<compile_context>
chip_gen: v6e
topology: v6e:2x2x1
jax: 0.10.0
libtpu: 0.0.40
codegen_flags: <defaults>
</compile_context>

<pallas_src>
import functools

import jax
import jax.numpy as jnp
from jax.experimental import pallas as pl
from jax.experimental.pallas import tpu as pltpu

_LANE = 128


def _round_up(x, m):
    return (x + m - 1) // m * m


def _double_conv_kernel(x_ref, w1_ref, b1_ref, w2_ref, b2_ref, o_ref,
                        xpad_ref, mid_ref, col_ref):
    """One grid step = one batch element.

    x_ref:    (1, H, W, Cin)         bf16 input tile
    w1_ref:   (9*Cin, Cmid_p)        bf16 conv1 weights, BN1 scale folded in,
                                     rows ordered (dx, dy, cin)
    b1_ref:   (1, Cmid_p)            f32 folded BN1 bias
    w2_ref:   (3, 3*Cmid_p, Cout_p)  bf16 conv2 weights, BN2 scale folded in,
                                     axis0 = dx, rows within = (dy, cmid)
    b2_ref:   (1, Cout_p)            f32 folded BN2 bias
    o_ref:    (1, H, W, Cout_p)      bf16 output (lane-dense)
    xpad_ref: (H+2, W+2, Cin)        bf16 scratch: halo-padded input
    mid_ref:  (H+2, W+2, Cmid_p)     bf16 scratch: halo-padded conv1 act.
    col_ref:  (TH*W, 9*Cin)          bf16 scratch: conv1 im2col slab (per tile)
    """
    H, W, Cin = x_ref.shape[1], x_ref.shape[2], x_ref.shape[3]
    Cmid_p = mid_ref.shape[2]
    Cout_p = o_ref.shape[3]
    THW = col_ref.shape[0]
    TH = THW // W
    n_tiles = H // TH

    # ---- halo-only zeroing (interiors are fully overwritten below) --------
    def zero_halo(ref):
        c = ref.shape[2]
        ref[0:1, :, :] = jnp.zeros((1, W + 2, c), ref.dtype)
        ref[H + 1:H + 2, :, :] = jnp.zeros((1, W + 2, c), ref.dtype)
        ref[:, 0:1, :] = jnp.zeros((H + 2, 1, c), ref.dtype)
        ref[:, W + 1:W + 2, :] = jnp.zeros((H + 2, 1, c), ref.dtype)

    zero_halo(xpad_ref)
    zero_halo(mid_ref)

    # Stage the input tile inside its zero halo.
    xpad_ref[1:H + 1, 1:W + 1, :] = x_ref[0]

    def dx_slab(src_ref, r0, dx, c):
        # (TH+2, W, c) column-shifted slab for one dx, flattened to rows.
        return src_ref[r0:r0 + TH + 2, dx:dx + W, :].reshape((TH + 2) * W, c)

    # ---- pass 1: conv1 (+folded BN1) -> ReLU -> mid (bf16, VMEM resident) --
    for t in range(n_tiles):
        r0 = t * TH
        # Build the im2col slab (TH*W, 9*Cin) for this row tile.
        for dx in range(3):
            slab = dx_slab(xpad_ref, r0, dx, Cin)
            for dy in range(3):
                c0 = (dx * 3 + dy) * Cin
                col_ref[:, c0:c0 + Cin] = slab[dy * W:dy * W + THW, :]
        a1 = jnp.dot(col_ref[...], w1_ref[...],
                     preferred_element_type=jnp.float32)
        a1 = jnp.maximum(a1 + b1_ref[...], 0.0)
        mid_ref[1 + r0:1 + r0 + TH, 1:W + 1, :] = (
            a1.reshape(TH, W, Cmid_p).astype(mid_ref.dtype))

    # ---- pass 2: conv2 (+folded BN2) -> ReLU -> output (bf16, lane-dense) --
    for t in range(n_tiles):
        r0 = t * TH
        acc = None
        for dx in range(3):
            slab = dx_slab(mid_ref, r0, dx, Cmid_p)
            # Fuse the 3 dy taps into one K = 3*Cmid_p operand.
            taps = jnp.concatenate(
                [slab[dy * W:dy * W + THW, :] for dy in range(3)], axis=-1)
            d = jnp.dot(taps, w2_ref[dx], preferred_element_type=jnp.float32)
            acc = d if acc is None else acc + d
        a2 = jnp.maximum(acc + b2_ref[...], 0.0)
        o_ref[0:1, r0:r0 + TH, :, :] = (
            a2.reshape(1, TH, W, Cout_p).astype(o_ref.dtype))


def _fold_bn(conv_bias, gamma, beta, running_mean, running_var, eps=1e-5):
    """Fold eval-mode BatchNorm2d (+ conv bias) into per-channel scale/bias."""
    scale = gamma / jnp.sqrt(running_var + eps)
    bias = beta + (conv_bias - running_mean) * scale
    return scale, bias


def _pad_last(a, target):
    pad = target - a.shape[-1]
    if pad == 0:
        return a
    return jnp.pad(a, [(0, 0)] * (a.ndim - 1) + [(0, pad)])


def double_conv(x_nchw, params):
    """DoubleConv forward. x_nchw: (N, C_in, H, W) -> (N, C_out, H, W)."""
    N, Cin, H, W = x_nchw.shape
    Cmid = params["w1"].shape[3]
    Cout = params["w2"].shape[3]
    Cmid_p = _round_up(Cmid, _LANE)
    Cout_p = _round_up(Cout, _LANE)

    # Layout assumptions (aligned row slices, bf16 output block).
    assert W % 8 == 0, "W must be a multiple of 8"

    # Row tile over the flattened HW axis: ~512 rows per tile, dividing H.
    TH = max(1, min(H, 512 // max(W, 1)))
    while H % TH:
        TH -= 1

    # NCHW -> NHWC (channels on the lane axis), bf16 activations.
    x = jnp.transpose(x_nchw, (0, 2, 3, 1)).astype(jnp.bfloat16)

    s1, b1 = _fold_bn(params["b1_conv"], params["gamma1"], params["beta1"],
                      params["mean1"], params["var1"])
    s2, b2 = _fold_bn(params["b2_conv"], params["gamma2"], params["beta2"],
                      params["mean2"], params["var2"])

    # BN scale folded into conv weights (out-channel columns), lane-padded.
    # w1: HWIO (3,3,Cin,Cmid) -> (kw,kh,cin,cmid_p) -> (9*Cin, Cmid_p).
    w1 = params["w1"] * s1[None, None, None, :]
    w1 = jnp.transpose(_pad_last(w1, Cmid_p), (1, 0, 2, 3))
    w1 = w1.reshape(9 * Cin, Cmid_p).astype(jnp.bfloat16)
    # w2: HWIO (3,3,Cmid,Cout) -> (kw,kh,cmid_p,cout_p) -> (3, 3*Cmid_p, Cout_p).
    w2 = params["w2"] * s2[None, None, None, :]
    w2 = jnp.pad(w2, ((0, 0), (0, 0), (0, Cmid_p - Cmid), (0, Cout_p - Cout)))
    w2 = jnp.transpose(w2, (1, 0, 2, 3))
    w2 = w2.reshape(3, 3 * Cmid_p, Cout_p).astype(jnp.bfloat16)

    b1p = _pad_last(b1, Cmid_p).reshape(1, Cmid_p).astype(jnp.float32)
    b2p = _pad_last(b2, Cout_p).reshape(1, Cout_p).astype(jnp.float32)

    flops = 2 * N * H * W * 9 * (Cin * Cmid_p + Cmid_p * Cout_p)
    bytes_accessed = (N * H * W * Cin * 2            # bf16 input
                      + N * H * W * Cout_p * 2       # bf16 output
                      + 9 * Cin * Cmid_p * 2
                      + 9 * Cmid_p * Cout_p * 2
                      + (Cmid_p + Cout_p) * 4)

    out = pl.pallas_call(
        _double_conv_kernel,
        out_shape=jax.ShapeDtypeStruct((N, H, W, Cout_p), jnp.bfloat16),
        grid_spec=pltpu.PrefetchScalarGridSpec(
            num_scalar_prefetch=0,
            grid=(N,),
            in_specs=[
                pl.BlockSpec((1, H, W, Cin), lambda n: (n, 0, 0, 0)),
                pl.BlockSpec((9 * Cin, Cmid_p), lambda n: (0, 0)),
                pl.BlockSpec((1, Cmid_p), lambda n: (0, 0)),
                pl.BlockSpec((3, 3 * Cmid_p, Cout_p), lambda n: (0, 0, 0)),
                pl.BlockSpec((1, Cout_p), lambda n: (0, 0)),
            ],
            out_specs=pl.BlockSpec((1, H, W, Cout_p), lambda n: (n, 0, 0, 0)),
            scratch_shapes=[
                pltpu.VMEM((H + 2, W + 2, Cin), jnp.bfloat16),
                pltpu.VMEM((H + 2, W + 2, Cmid_p), jnp.bfloat16),
                pltpu.VMEM((TH * W, 9 * Cin), jnp.bfloat16),
            ],
        ),
        compiler_params=pltpu.CompilerParams(
            dimension_semantics=("parallel",),
            vmem_limit_bytes=48 * 1024 * 1024),
        cost_estimate=pl.CostEstimate(
            flops=flops, transcendentals=0, bytes_accessed=bytes_accessed),
    )(x, w1, b1p, w2, b2p)

    out = out[..., :Cout].astype(jnp.float32)      # drop lane-pad channels
    # TODO(synk): keep NHWC (skip this transpose) if the downstream layer can
    # consume NHWC; kept to match the PyTorch module's NCHW contract.
    return jnp.transpose(out, (0, 3, 1, 2))


def _reference_double_conv(x_nchw, params):
    """Pure-JAX f32 reference (lax.conv) for correctness checking."""
    def step(x, w_hwio, cb, g, b, m, v):
        y = jax.lax.conv_general_dilated(
            x, w_hwio, window_strides=(1, 1), padding="SAME",
            dimension_numbers=("NCHW", "HWIO", "NCHW"))
        y = y + cb[None, :, None, None]
        s = g / jnp.sqrt(v + 1e-5)
        y = (y - m[None, :, None, None]) * s[None, :, None, None] \
            + b[None, :, None, None]
        return jnp.maximum(y, 0.0)

    y = step(x_nchw, params["w1"], params["b1_conv"], params["gamma1"],
             params["beta1"], params["mean1"], params["var1"])
    y = step(y, params["w2"], params["b2_conv"], params["gamma2"],
             params["beta2"], params["mean2"], params["var2"])
    return y


def init_params(key, in_channels, out_channels, mid_channels=None):
    if not mid_channels:
        mid_channels = out_channels
    ks = jax.random.split(key, 12)
    p = {
        # conv weights stored HWIO (3,3,Cin,Cout) — the kernel's layout.
        "w1": 0.1 * jax.random.normal(ks[0], (3, 3, in_channels, mid_channels),
                                      jnp.float32),
        "b1_conv": 0.1 * jax.random.normal(ks[1], (mid_channels,), jnp.float32),
        "gamma1": 1.0 + 0.1 * jax.random.normal(ks[2], (mid_channels,),
                                                jnp.float32),
        "beta1": 0.1 * jax.random.normal(ks[3], (mid_channels,), jnp.float32),
        "mean1": 0.1 * jax.random.normal(ks[4], (mid_channels,), jnp.float32),
        "var1": 1.0 + 0.5 * jax.random.uniform(ks[5], (mid_channels,),
                                               jnp.float32),
        "w2": 0.1 * jax.random.normal(ks[6], (3, 3, mid_channels, out_channels),
                                      jnp.float32),
        "b2_conv": 0.1 * jax.random.normal(ks[7], (out_channels,), jnp.float32),
        "gamma2": 1.0 + 0.1 * jax.random.normal(ks[8], (out_channels,),
                                                jnp.float32),
        "beta2": 0.1 * jax.random.normal(ks[9], (out_channels,), jnp.float32),
        "mean2": 0.1 * jax.random.normal(ks[10], (out_channels,), jnp.float32),
        "var2": 1.0 + 0.5 * jax.random.uniform(ks[11], (out_channels,),
                                               jnp.float32),
    }
    return p


if __name__ == "__main__":
    N, C_IN, C_OUT, H, W = 2, 4, 8, 16, 16

    key = jax.random.PRNGKey(0)
    k_x, k_p = jax.random.split(key)
    x = jax.random.normal(k_x, (N, C_IN, H, W), jnp.float32)
    params = init_params(k_p, C_IN, C_OUT)

    out = jax.jit(functools.partial(double_conv, params=params))(x)
    out = jax.block_until_ready(out)

    ref = _reference_double_conv(x, params)
    assert out.shape == (N, C_OUT, H, W)
    # bf16 activations/weights/output (f32 accumulation) => relaxed tolerance
    # vs the f32 reference.
    err = jnp.max(jnp.abs(out - ref))
    assert jnp.allclose(out, ref, rtol=2e-2, atol=2e-2), (
        f"max abs err = {err}")

    print("KERNEL_OK")
</pallas_src>

<mosaic_0001>
module attributes {stable_mosaic.version = 11 : i64} {
  func.func @_double_conv_kernel(%arg0: i32, %arg1: memref<1x16x16x4xbf16, #tpu.memory_space<vmem>>, %arg2: memref<36x128xbf16, #tpu.memory_space<vmem>>, %arg3: memref<1x128xf32, #tpu.memory_space<vmem>>, %arg4: memref<3x384x128xbf16, #tpu.memory_space<vmem>>, %arg5: memref<1x128xf32, #tpu.memory_space<vmem>>, %arg6: memref<1x16x16x128xbf16, #tpu.memory_space<vmem>>, %arg7: memref<18x18x4xbf16, #tpu.memory_space<vmem>>, %arg8: memref<18x18x128xbf16, #tpu.memory_space<vmem>>, %arg9: memref<256x36xbf16, #tpu.memory_space<vmem>>) attributes {dimension_semantics = [#tpu.dimension_semantics<parallel>], iteration_bounds = array<i64: 2>, scalar_prefetch = 0 : i64, scratch_operands = 3 : i64, tpu.core_type = #tpu.core_type<tc>, window_params = [{transform_indices = @transform_0, window_bounds = array<i64: 1, 16, 16, 4>}, {pipeline_mode = #tpu.pipeline_mode<synchronous>, transform_indices = @transform_1, window_bounds = array<i64: 36, 128>}, {pipeline_mode = #tpu.pipeline_mode<synchronous>, transform_indices = @transform_2, window_bounds = array<i64: 1, 128>}, {pipeline_mode = #tpu.pipeline_mode<synchronous>, transform_indices = @transform_3, window_bounds = array<i64: 3, 384, 128>}, {pipeline_mode = #tpu.pipeline_mode<synchronous>, transform_indices = @transform_4, window_bounds = array<i64: 1, 128>}, {transform_indices = @transform_5, window_bounds = array<i64: 1, 16, 16, 128>}]} {
    %cst = arith.constant 0.000000e+00 : bf16
    %0 = vector.broadcast %cst : bf16 to vector<1x18x4xbf16>
    %c0 = arith.constant 0 : index
    %c0_0 = arith.constant 0 : index
    %c0_1 = arith.constant 0 : index
    %1 = vector.load %arg7[%c0, %c0_0, %c0_1] : memref<18x18x4xbf16, #tpu.memory_space<vmem>>, vector<1x18x4xbf16>
    tpu.vector_store %arg7[%c0, %c0_0, %c0_1], %0 {strides = array<i32>} : memref<18x18x4xbf16, #tpu.memory_space<vmem>>, vector<1x18x4xbf16>,
    %cst_2 = arith.constant 0.000000e+00 : bf16
    %2 = vector.broadcast %cst_2 : bf16 to vector<1x18x4xbf16>
    %c17 = arith.constant 17 : index
    %c0_3 = arith.constant 0 : index
    %c0_4 = arith.constant 0 : index
    %3 = vector.load %arg7[%c17, %c0_3, %c0_4] : memref<18x18x4xbf16, #tpu.memory_space<vmem>>, vector<1x18x4xbf16>
    tpu.vector_store %arg7[%c17, %c0_3, %c0_4], %2 {strides = array<i32>} : memref<18x18x4xbf16, #tpu.memory_space<vmem>>, vector<1x18x4xbf16>,
    %cst_5 = arith.constant 0.000000e+00 : bf16
    %4 = vector.broadcast %cst_5 : bf16 to vector<18x1x4xbf16>
    %c0_6 = arith.constant 0 : index
    %c0_7 = arith.constant 0 : index
    %c0_8 = arith.constant 0 : index
    %5 = vector.load %arg7[%c0_6, %c0_7, %c0_8] : memref<18x18x4xbf16, #tpu.memory_space<vmem>>, vector<18x1x4xbf16>
    tpu.vector_store %arg7[%c0_6, %c0_7, %c0_8], %4 {strides = array<i32>} : memref<18x18x4xbf16, #tpu.memory_space<vmem>>, vector<18x1x4xbf16>,
    %cst_9 = arith.constant 0.000000e+00 : bf16
    %6 = vector.broadcast %cst_9 : bf16 to vector<18x1x4xbf16>
    %c0_10 = arith.constant 0 : index
    %c17_11 = arith.constant 17 : index
    %c0_12 = arith.constant 0 : index
    %7 = vector.load %arg7[%c0_10, %c17_11, %c0_12] : memref<18x18x4xbf16, #tpu.memory_space<vmem>>, vector<18x1x4xbf16>
    tpu.vector_store %arg7[%c0_10, %c17_11, %c0_12], %6 {strides = array<i32>} : memref<18x18x4xbf16, #tpu.memory_space<vmem>>, vector<18x1x4xbf16>,
    %cst_13 = arith.constant 0.000000e+00 : bf16
    %8 = vector.broadcast %cst_13 : bf16 to vector<1x18x128xbf16>
    %c0_14 = arith.constant 0 : index
    %c0_15 = arith.constant 0 : index
    %c0_16 = arith.constant 0 : index
    %9 = vector.load %arg8[%c0_14, %c0_15, %c0_16] : memref<18x18x128xbf16, #tpu.memory_space<vmem>>, vector<1x18x128xbf16>
    tpu.vector_store %arg8[%c0_14, %c0_15, %c0_16], %8 {strides = array<i32>} : memref<18x18x128xbf16, #tpu.memory_space<vmem>>, vector<1x18x128xbf16>,
    %cst_17 = arith.constant 0.000000e+00 : bf16
    %10 = vector.broadcast %cst_17 : bf16 to vector<1x18x128xbf16>
    %c17_18 = arith.constant 17 : index
    %c0_19 = arith.constant 0 : index
    %c0_20 = arith.constant 0 : index
    %11 = vector.load %arg8[%c17_18, %c0_19, %c0_20] : memref<18x18x128xbf16, #tpu.memory_space<vmem>>, vector<1x18x128xbf16>
    tpu.vector_store %arg8[%c17_18, %c0_19, %c0_20], %10 {strides = array<i32>} : memref<18x18x128xbf16, #tpu.memory_space<vmem>>, vector<1x18x128xbf16>,
    %cst_21 = arith.constant 0.000000e+00 : bf16
    %12 = vector.broadcast %cst_21 : bf16 to vector<18x1x128xbf16>
    %c0_22 = arith.constant 0 : index
    %c0_23 = arith.constant 0 : index
    %c0_24 = arith.constant 0 : index
    %13 = vector.load %arg8[%c0_22, %c0_23, %c0_24] : memref<18x18x128xbf16, #tpu.memory_space<vmem>>, vector<18x1x128xbf16>
    tpu.vector_store %arg8[%c0_22, %c0_23, %c0_24], %12 {strides = array<i32>} : memref<18x18x128xbf16, #tpu.memory_space<vmem>>, vector<18x1x128xbf16>,
    %cst_25 = arith.constant 0.000000e+00 : bf16
    %14 = vector.broadcast %cst_25 : bf16 to vector<18x1x128xbf16>
    %c0_26 = arith.constant 0 : index
    %c17_27 = arith.constant 17 : index
    %c0_28 = arith.constant 0 : index
    %15 = vector.load %arg8[%c0_26, %c17_27, %c0_28] : memref<18x18x128xbf16, #tpu.memory_space<vmem>>, vector<18x1x128xbf16>
    tpu.vector_store %arg8[%c0_26, %c17_27, %c0_28], %14 {strides = array<i32>} : memref<18x18x128xbf16, #tpu.memory_space<vmem>>, vector<18x1x128xbf16>,
    %c0_29 = arith.constant 0 : index
    %c0_30 = arith.constant 0 : index
    %c0_31 = arith.constant 0 : index
    %c0_32 = arith.constant 0 : index
    %16 = vector.load %arg1[%c0_29, %c0_30, %c0_31, %c0_32] : memref<1x16x16x4xbf16, #tpu.memory_space<vmem>>, vector<1x16x16x4xbf16>
    %17 = vector.shape_cast %16 : vector<1x16x16x4xbf16> to vector<16x16x4xbf16>
    %c1 = arith.constant 1 : index
    %c1_33 = arith.constant 1 : index
    %c0_34 = arith.constant 0 : index
    %18 = vector.load %arg7[%c1, %c1_33, %c0_34] : memref<18x18x4xbf16, #tpu.memory_space<vmem>>, vector<16x16x4xbf16>
    tpu.vector_store %arg7[%c1, %c1_33, %c0_34], %17 {strides = array<i32>} : memref<18x18x4xbf16, #tpu.memory_space<vmem>>, vector<16x16x4xbf16>,
    %c0_35 = arith.constant 0 : index
    %c0_36 = arith.constant 0 : index
    %c0_37 = arith.constant 0 : index
    %19 = vector.load %arg7[%c0_35, %c0_36, %c0_37] : memref<18x18x4xbf16, #tpu.memory_space<vmem>>, vector<18x16x4xbf16>
    %20 = vector.shape_cast %19 : vector<18x16x4xbf16> to vector<288x4xbf16>
    %21 = vector.extract_strided_slice %20 {offsets = [0, 0], sizes = [256, 4], strides = [1, 1]} : vector<288x4xbf16> to vector<256x4xbf16>
    %c0_38 = arith.constant 0 : index
    %c0_39 = arith.constant 0 : index
    %22 = vector.load %arg9[%c0_38, %c0_39] : memref<256x36xbf16, #tpu.memory_space<vmem>>, vector<256x4xbf16>
    tpu.vector_store %arg9[%c0_38, %c0_39], %21 {strides = array<i32>} : memref<256x36xbf16, #tpu.memory_space<vmem>>, vector<256x4xbf16>,
    %23 = vector.extract_strided_slice %20 {offsets = [16, 0], sizes = [256, 4], strides = [1, 1]} : vector<288x4xbf16> to vector<256x4xbf16>
    %c0_40 = arith.constant 0 : index
    %c4 = arith.constant 4 : index
    %24 = vector.load %arg9[%c0_40, %c4] : memref<256x36xbf16, #tpu.memory_space<vmem>>, vector<256x4xbf16>
    tpu.vector_store %arg9[%c0_40, %c4], %23 {strides = array<i32>} : memref<256x36xbf16, #tpu.memory_space<vmem>>, vector<256x4xbf16>,
    %25 = vector.extract_strided_slice %20 {offsets = [32, 0], sizes = [256, 4], strides = [1, 1]} : vector<288x4xbf16> to vector<256x4xbf16>
    %c0_41 = arith.constant 0 : index
    %c8 = arith.constant 8 : index
    %26 = vector.load %arg9[%c0_41, %c8] : memref<256x36xbf16, #tpu.memory_space<vmem>>, vector<256x4xbf16>
    tpu.vector_store %arg9[%c0_41, %c8], %25 {strides = array<i32>} : memref<256x36xbf16, #tpu.memory_space<vmem>>, vector<256x4xbf16>,
    %c0_42 = arith.constant 0 : index
    %c1_43 = arith.constant 1 : index
    %c0_44 = arith.constant 0 : index
    %27 = vector.load %arg7[%c0_42, %c1_43, %c0_44] : memref<18x18x4xbf16, #tpu.memory_space<vmem>>, vector<18x16x4xbf16>
    %28 = vector.shape_cast %27 : vector<18x16x4xbf16> to vector<288x4xbf16>
    %29 = vector.extract_strided_slice %28 {offsets = [0, 0], sizes = [256, 4], strides = [1, 1]} : vector<288x4xbf16> to vector<256x4xbf16>
    %c0_45 = arith.constant 0 : index
    %c12 = arith.constant 12 : index
    %30 = vector.load %arg9[%c0_45, %c12] : memref<256x36xbf16, #tpu.memory_space<vmem>>, vector<256x4xbf16>
    tpu.vector_store %arg9[%c0_45, %c12], %29 {strides = array<i32>} : memref<256x36xbf16, #tpu.memory_space<vmem>>, vector<256x4xbf16>,
    %31 = vector.extract_strided_slice %28 {offsets = [16, 0], sizes = [256, 4], strides = [1, 1]} : vector<288x4xbf16> to vector<256x4xbf16>
    %c0_46 = arith.constant 0 : index
    %c16 = arith.constant 16 : index
    %32 = vector.load %arg9[%c0_46, %c16] : memref<256x36xbf16, #tpu.memory_space<vmem>>, vector<256x4xbf16>
    tpu.vector_store %arg9[%c0_46, %c16], %31 {strides = array<i32>} : memref<256x36xbf16, #tpu.memory_space<vmem>>, vector<256x4xbf16>,
    %33 = vector.extract_strided_slice %28 {offsets = [32, 0], sizes = [256, 4], strides = [1, 1]} : vector<288x4xbf16> to vector<256x4xbf16>
    %c0_47 = arith.constant 0 : index
    %c20 = arith.constant 20 : index
    %34 = vector.load %arg9[%c0_47, %c20] : memref<256x36xbf16, #tpu.memory_space<vmem>>, vector<256x4xbf16>
    tpu.vector_store %arg9[%c0_47, %c20], %33 {strides = array<i32>} : memref<256x36xbf16, #tpu.memory_space<vmem>>, vector<256x4xbf16>,
    %c0_48 = arith.constant 0 : index
    %c2 = arith.constant 2 : index
    %c0_49 = arith.constant 0 : index
    %35 = vector.load %arg7[%c0_48, %c2, %c0_49] : memref<18x18x4xbf16, #tpu.memory_space<vmem>>, vector<18x16x4xbf16>
    %36 = vector.shape_cast %35 : vector<18x16x4xbf16> to vector<288x4xbf16>
    %37 = vector.extract_strided_slice %36 {offsets = [0, 0], sizes = [256, 4], strides = [1, 1]} : vector<288x4xbf16> to vector<256x4xbf16>
    %c0_50 = arith.constant 0 : index
    %c24 = arith.constant 24 : index
    %38 = vector.load %arg9[%c0_50, %c24] : memref<256x36xbf16, #tpu.memory_space<vmem>>, vector<256x4xbf16>
    tpu.vector_store %arg9[%c0_50, %c24], %37 {strides = array<i32>} : memref<256x36xbf16, #tpu.memory_space<vmem>>, vector<256x4xbf16>,
    %39 = vector.extract_strided_slice %36 {offsets = [16, 0], sizes = [256, 4], strides = [1, 1]} : vector<288x4xbf16> to vector<256x4xbf16>
    %c0_51 = arith.constant 0 : index
    %c28 = arith.constant 28 : index
    %40 = vector.load %arg9[%c0_51, %c28] : memref<256x36xbf16, #tpu.memory_space<vmem>>, vector<256x4xbf16>
    tpu.vector_store %arg9[%c0_51, %c28], %39 {strides = array<i32>} : memref<256x36xbf16, #tpu.memory_space<vmem>>, vector<256x4xbf16>,
    %41 = vector.extract_strided_slice %36 {offsets = [32, 0], sizes = [256, 4], strides = [1, 1]} : vector<288x4xbf16> to vector<256x4xbf16>
    %c0_52 = arith.constant 0 : index
    %c32 = arith.constant 32 : index
    %42 = vector.load %arg9[%c0_52, %c32] : memref<256x36xbf16, #tpu.memory_space<vmem>>, vector<256x4xbf16>
    tpu.vector_store %arg9[%c0_52, %c32], %41 {strides = array<i32>} : memref<256x36xbf16, #tpu.memory_space<vmem>>, vector<256x4xbf16>,
    %c0_53 = arith.constant 0 : index
    %c0_54 = arith.constant 0 : index
    %43 = vector.load %arg9[%c0_53, %c0_54] : memref<256x36xbf16, #tpu.memory_space<vmem>>, vector<256x36xbf16>
    %c0_55 = arith.constant 0 : index
    %c0_56 = arith.constant 0 : index
    %44 = vector.load %arg2[%c0_55, %c0_56] : memref<36x128xbf16, #tpu.memory_space<vmem>>, vector<36x128xbf16>
    %cst_57 = arith.constant dense<0.000000e+00> : vector<256x128xf32>
    %45 = tpu.matmul %43, %44, %cst_57 {dimension_numbers = #tpu.dot_dimension_numbers<[1], [0], [0], [1], [0, 0, 1, 1], [], []>} : vector<256x36xbf16>, vector<36x128xbf16>, vector<256x128xf32> -> vector<256x128xf32>
    %c0_58 = arith.constant 0 : index
    %c0_59 = arith.constant 0 : index
    %46 = vector.load %arg3[%c0_58, %c0_59] : memref<1x128xf32, #tpu.memory_space<vmem>>, vector<1x128xf32>
    %47 = vector.broadcast %46 : vector<1x128xf32> to vector<256x128xf32>
    %48 = arith.addf %45, %47 : vector<256x128xf32>
    %cst_60 = arith.constant 0.000000e+00 : f32
    %49 = vector.broadcast %cst_60 : f32 to vector<256x128xf32>
    %50 = arith.maximumf %48, %49 : vector<256x128xf32>
    %51 = vector.shape_cast %50 : vector<256x128xf32> to vector<16x16x128xf32>
    %52 = arith.truncf %51 : vector<16x16x128xf32> to vector<16x16x128xbf16>
    %c1_61 = arith.constant 1 : index
    %c1_62 = arith.constant 1 : index
    %c0_63 = arith.constant 0 : index
    %53 = vector.load %arg8[%c1_61, %c1_62, %c0_63] : memref<18x18x128xbf16, #tpu.memory_space<vmem>>, vector<16x16x128xbf16>
    tpu.vector_store %arg8[%c1_61, %c1_62, %c0_63], %52 {strides = array<i32>} : memref<18x18x128xbf16, #tpu.memory_space<vmem>>, vector<16x16x128xbf16>,
    %c0_64 = arith.constant 0 : index
    %c0_65 = arith.constant 0 : index
    %c0_66 = arith.constant 0 : index
    %54 = vector.load %arg8[%c0_64, %c0_65, %c0_66] : memref<18x18x128xbf16, #tpu.memory_space<vmem>>, vector<18x16x128xbf16>
    %55 = vector.shape_cast %54 : vector<18x16x128xbf16> to vector<288x128xbf16>
    %56 = vector.extract_strided_slice %55 {offsets = [0, 0], sizes = [256, 128], strides = [1, 1]} : vector<288x128xbf16> to vector<256x128xbf16>
    %57 = vector.extract_strided_slice %55 {offsets = [16, 0], sizes = [256, 128], strides = [1, 1]} : vector<288x128xbf16> to vector<256x128xbf16>
    %58 = vector.extract_strided_slice %55 {offsets = [32, 0], sizes = [256, 128], strides = [1, 1]} : vector<288x128xbf16> to vector<256x128xbf16>
    %59 = tpu.concatenate %56, %57, %58 in 1 : vector<256x128xbf16>, vector<256x128xbf16>, vector<256x128xbf16> -> vector<256x384xbf16>
    %c0_67 = arith.constant 0 : index
    %c0_68 = arith.constant 0 : index
    %c0_69 = arith.constant 0 : index
    %60 = vector.load %arg4[%c0_67, %c0_68, %c0_69] : memref<3x384x128xbf16, #tpu.memory_space<vmem>>, vector<1x384x128xbf16>
    %61 = vector.shape_cast %60 : vector<1x384x128xbf16> to vector<384x128xbf16>
    %cst_70 = arith.constant dense<0.000000e+00> : vector<256x128xf32>
    %62 = tpu.matmul %59, %61, %cst_70 {dimension_numbers = #tpu.dot_dimension_numbers<[1], [0], [0], [1], [0, 0, 1, 1], [], []>} : vector<256x384xbf16>, vector<384x128xbf16>, vector<256x128xf32> -> vector<256x128xf32>
    %c0_71 = arith.constant 0 : index
    %c1_72 = arith.constant 1 : index
    %c0_73 = arith.constant 0 : index
    %63 = vector.load %arg8[%c0_71, %c1_72, %c0_73] : memref<18x18x128xbf16, #tpu.memory_space<vmem>>, vector<18x16x128xbf16>
    %64 = vector.shape_cast %63 : vector<18x16x128xbf16> to vector<288x128xbf16>
    %65 = vector.extract_strided_slice %64 {offsets = [0, 0], sizes = [256, 128], strides = [1, 1]} : vector<288x128xbf16> to vector<256x128xbf16>
    %66 = vector.extract_strided_slice %64 {offsets = [16, 0], sizes = [256, 128], strides = [1, 1]} : vector<288x128xbf16> to vector<256x128xbf16>
    %67 = vector.extract_strided_slice %64 {offsets = [32, 0], sizes = [256, 128], strides = [1, 1]} : vector<288x128xbf16> to vector<256x128xbf16>
    %68 = tpu.concatenate %65, %66, %67 in 1 : vector<256x128xbf16>, vector<256x128xbf16>, vector<256x128xbf16> -> vector<256x384xbf16>
    %c1_74 = arith.constant 1 : index
    %c0_75 = arith.constant 0 : index
    %c0_76 = arith.constant 0 : index
    %69 = vector.load %arg4[%c1_74, %c0_75, %c0_76] : memref<3x384x128xbf16, #tpu.memory_space<vmem>>, vector<1x384x128xbf16>
    %70 = vector.shape_cast %69 : vector<1x384x128xbf16> to vector<384x128xbf16>
    %cst_77 = arith.constant dense<0.000000e+00> : vector<256x128xf32>
    %71 = tpu.matmul %68, %70, %cst_77 {dimension_numbers = #tpu.dot_dimension_numbers<[1], [0], [0], [1], [0, 0, 1, 1], [], []>} : vector<256x384xbf16>, vector<384x128xbf16>, vector<256x128xf32> -> vector<256x128xf32>
    %72 = arith.addf %62, %71 : vector<256x128xf32>
    %c0_78 = arith.constant 0 : index
    %c2_79 = arith.constant 2 : index
    %c0_80 = arith.constant 0 : index
    %73 = vector.load %arg8[%c0_78, %c2_79, %c0_80] : memref<18x18x128xbf16, #tpu.memory_space<vmem>>, vector<18x16x128xbf16>
    %74 = vector.shape_cast %73 : vector<18x16x128xbf16> to vector<288x128xbf16>
    %75 = vector.extract_strided_slice %74 {offsets = [0, 0], sizes = [256, 128], strides = [1, 1]} : vector<288x128xbf16> to vector<256x128xbf16>
    %76 = vector.extract_strided_slice %74 {offsets = [16, 0], sizes = [256, 128], strides = [1, 1]} : vector<288x128xbf16> to vector<256x128xbf16>
    %77 = vector.extract_strided_slice %74 {offsets = [32, 0], sizes = [256, 128], strides = [1, 1]} : vector<288x128xbf16> to vector<256x128xbf16>
    %78 = tpu.concatenate %75, %76, %77 in 1 : vector<256x128xbf16>, vector<256x128xbf16>, vector<256x128xbf16> -> vector<256x384xbf16>
    %c2_81 = arith.constant 2 : index
    %c0_82 = arith.constant 0 : index
    %c0_83 = arith.constant 0 : index
    %79 = vector.load %arg4[%c2_81, %c0_82, %c0_83] : memref<3x384x128xbf16, #tpu.memory_space<vmem>>, vector<1x384x128xbf16>
    %80 = vector.shape_cast %79 : vector<1x384x128xbf16> to vector<384x128xbf16>
    %cst_84 = arith.constant dense<0.000000e+00> : vector<256x128xf32>
    %81 = tpu.matmul %78, %80, %cst_84 {dimension_numbers = #tpu.dot_dimension_numbers<[1], [0], [0], [1], [0, 0, 1, 1], [], []>} : vector<256x384xbf16>, vector<384x128xbf16>, vector<256x128xf32> -> vector<256x128xf32>
    %82 = arith.addf %72, %81 : vector<256x128xf32>
    %c0_85 = arith.constant 0 : index
    %c0_86 = arith.constant 0 : index
    %83 = vector.load %arg5[%c0_85, %c0_86] : memref<1x128xf32, #tpu.memory_space<vmem>>, vector<1x128xf32>
    %84 = vector.broadcast %83 : vector<1x128xf32> to vector<256x128xf32>
    %85 = arith.addf %82, %84 : vector<256x128xf32>
    %cst_87 = arith.constant 0.000000e+00 : f32
    %86 = vector.broadcast %cst_87 : f32 to vector<256x128xf32>
    %87 = arith.maximumf %85, %86 : vector<256x128xf32>
    %88 = vector.shape_cast %87 : vector<256x128xf32> to vector<1x16x16x128xf32>
    %89 = arith.truncf %88 : vector<1x16x16x128xf32> to vector<1x16x16x128xbf16>
    %c0_88 = arith.constant 0 : index
    %c0_89 = arith.constant 0 : index
    %c0_90 = arith.constant 0 : index
    %c0_91 = arith.constant 0 : index
    %90 = vector.load %arg6[%c0_88, %c0_89, %c0_90, %c0_91] : memref<1x16x16x128xbf16, #tpu.memory_space<vmem>>, vector<1x16x16x128xbf16>
    tpu.vector_store %arg6[%c0_88, %c0_89, %c0_90, %c0_91], %89 {strides = array<i32>} : memref<1x16x16x128xbf16, #tpu.memory_space<vmem>>, vector<1x16x16x128xbf16>,
    return
  }
  func.func @transform_0(%arg0: i32) -> (i32, i32, i32, i32) {
    %c0_i32 = arith.constant 0 : i32
    %c0_i32_0 = arith.constant 0 : i32
    %c0_i32_1 = arith.constant 0 : i32
    %c0_i32_2 = arith.constant 0 : i32
    return %arg0, %c0_i32, %c0_i32_0, %c0_i32_1 : i32, i32, i32, i32
  }
  func.func @transform_1(%arg0: i32) -> (i32, i32) {
    %c0_i32 = arith.constant 0 : i32
    %c0_i32_0 = arith.constant 0 : i32
    %c0_i32_1 = arith.constant 0 : i32
    return %c0_i32, %c0_i32_0 : i32, i32
  }
  func.func @transform_2(%arg0: i32) -> (i32, i32) {
    %c0_i32 = arith.constant 0 : i32
    %c0_i32_0 = arith.constant 0 : i32
    %c0_i32_1 = arith.constant 0 : i32
    return %c0_i32, %c0_i32_0 : i32, i32
  }
  func.func @transform_3(%arg0: i32) -> (i32, i32, i32) {
    %c0_i32 = arith.constant 0 : i32
    %c0_i32_0 = arith.constant 0 : i32
    %c0_i32_1 = arith.constant 0 : i32
    %c0_i32_2 = arith.constant 0 : i32
    return %c0_i32, %c0_i32_0, %c0_i32_1 : i32, i32, i32
  }
  func.func @transform_4(%arg0: i32) -> (i32, i32) {
    %c0_i32 = arith.constant 0 : i32
    %c0_i32_0 = arith.constant 0 : i32
    %c0_i32_1 = arith.constant 0 : i32
    return %c0_i32, %c0_i32_0 : i32, i32
  }
  func.func @transform_5(%arg0: i32) -> (i32, i32, i32, i32) {
    %c0_i32 = arith.constant 0 : i32
    %c0_i32_0 = arith.constant 0 : i32
    %c0_i32_1 = arith.constant 0 : i32
    %c0_i32_2 = arith.constant 0 : i32
    return %arg0, %c0_i32, %c0_i32_0, %c0_i32_1 : i32, i32, i32, i32
  }
}

</mosaic_0001>

<bundles_post_ra>
// kernel: double_conv.1
= control target key start
LH: loop header
LB: loop body
LE: loop exit
PB: predicated region body
PF: predicated region fallthrough
CT: control target
= control target key end

     0   :  { %10 = vsyncpa [#allocation6], 0  ;;  %s7780_s18 = smov 0   ;;  %s10555_s0 = inlined_call_operand.vmem [shape: bf16[2,16,16,4], index: 0, kind: input, shape index: {}]   ;;  %s10556_s1 = inlined_call_operand.vmem [shape: bf16[36,128], index: 1, kind: input, shape index: {}]   ;;  %s10557_s2 = inlined_call_operand.vmem [shape: f32[1,128], index: 2, kind: input, shape index: {}]   ;;  %s10558_s3 = inlined_call_operand.hbm [shape: bf16[3,384,128], index: 3, kind: input, shape index: {}]   ;;  %s10559_s4 = inlined_call_operand.vmem [shape: f32[1,128], index: 4, kind: input, shape index: {}]   ;;  %s10560_s5 = inlined_call_operand.vmem [shape: bf16[2,16,16,128], index: 5, kind: output, shape index: {}]  }
   0x1 LB: > { %s6518_s19 = sadd.s32 4294967295, %s7736_s18   ;;  %p6520_p0 = scmp.ge.s32.totalorder %s7736_s18, 1  ;;  %s7736_s18 = sphi %s7780_s18, %s16_s18  }
   0x2   : > { %p157_p1 = scmp.lt.s32.totalorder %s7736_s18, 3  ;;  %s7738_s20 = smov [#allocation5]  }
   0x3   : > { %s175_s21 = sshll.u32 %s7738_s20, 4  ;;  %p7573_p3 = scmp.eq.s32.totalorder %s6518_s19, 0  ;;  %s176_s21 = int_to_ptr.vmem [resolvable:$true] %s175_s21 }
   0x4   : > { %p7788_p2 = pnand %p6520_p0, %p157_p1  ;;  %s7711_s23 = scalar_lea.vmem %s176_s21, 9216 }
   0x5   : > { %p7712_p7 = scmp.ne.s32.totalorder %s176_s21, %s7711_s23  ;;  %p7719_p10 = scmp.lt.s32.totalorder %s176_s21, %s176_s21 }
   0x6   : > { %p7569_p4 = pneg %p7788_p2  ;;  %p7720_p11 = scmp.lt.s32.totalorder %s7711_s23, %s7711_s23 }
   0x8   : > { %p7570_p5 = pnand %p7573_p3, %p7569_p4  ;;  %p7721_p12 = por %p7720_p11, %p7719_p10 }
   0xa   : > { %p7702_p6 = pneg %p7570_p5 }
   0xc   : > { %p7714_p8 = pnand %p7712_p7, %p7702_p6 }
   0xe   : > { %p7715_p9 = pneg %p7714_p8 }
  0x10   : > { %p7722_p13 = pnand %p7721_p12, %p7715_p9 }
  0x12   : > { %7725 = shalt.err (!%p7722_p13)
}
  0x13   : > { %s7739_s24 = smov 64   ;;  %s7740_s25 = smov 4  }
  0x14   : > { %7572 = dma.hbm_to_vmem [thread:$0]  (!%p7570_p5), %s10558_s3, 9216, %s176_s21, [#allocation6], %s7739_s24, %s7739_s24, %s7740_s25  }
  0x15   : > { %202 = sbr.rel (%p7788_p2) target bundleno = 1328 (0x530), region = 40 }
  0x1a   : > { %7731 = dma.done.wait (%p7573_p3), [#allocation6], 9216  }
  0x1b   : > { %7733 = vsyncadd (%p7573_p3), [#allocation6], 4294958080  ;;  %p230_p0 = scmp.lt.s32.totalorder %s6518_s19, 1  ;;  %vm241_vm0 = vcmask 27648   ;;  %vm244_vm1 = vcmask 24576   ;;  %v7741_v0 = vmov 0  }
  0x1c   : > { %243 = vst.msk [vmem:[#allocation2 + $0x4] sm:$0xf] %vm241_vm0, %v7741_v0  ;;  %242 = vst.msk [vmem:[#allocation2] sm:$0xf] %vm241_vm0, %v7741_v0  ;;  %vm10562_vm2 = vsmask.f32 256 }
  0x1d   : > { %s10793_s19 = smov (!%p230_p0, %s6518_s19), 1  ;;  %245 = vst.msk [vmem:[#allocation2 + $0x8] sm:$0x1] %vm244_vm1, %v7741_v0  ;;  %249 = vst.msk [vmem:[#allocation2 + $0xd4] sm:$0x1] %vm244_vm1, %v7741_v0  ;;  %s7742_s7 = smov 4  }
  0x1e   : > { %247 = vst.msk [vmem:[#allocation2 + $0xcc] sm:$0xf] %vm241_vm0, %v7741_v0  ;;  %248 = vst.msk [vmem:[#allocation2 + $0xd0] sm:$0xf] %vm241_vm0, %v7741_v0  ;;  %s6794_s28 = sshll.u32 %s10793_s19, 7  ;;  %s7743_s8 = smov 8  }
  0x1f   : > { %363 = vst [vmem:[#allocation3] sm:$0xf] %v7741_v0  ;;  %364 = vst [vmem:[#allocation3 + $0x4] sm:$0xf] %v7741_v0  ;;  %s7816_s6 = scalar_lea.vmem %s10555_s0, %s6794_s28  ;;  %vm513_vm3 = vsmask.f32 4368 }
  0x20   : > { %365 = vst [vmem:[#allocation3 + $0x8] sm:$0x1] %v7741_v0  ;;  %367 = vst [vmem:[#allocation3 + $0xcc] sm:$0xf] %v7741_v0  ;;  %v7825_v2 = vld [vmem:[%s7816_s6 + $0x8] sm:$0xf] }
  0x21   : > { %368 = vst [vmem:[#allocation3 + $0xd0] sm:$0xf] %v7741_v0  ;;  %369 = vst [vmem:[#allocation3 + $0xd4] sm:$0x1] %v7741_v0  ;;  %v484_v3 = vld [vmem:[%s7816_s6 + $0xc] sm:$0xf] }
  0x22   : > { %vm7820_vm4 = vmand %vm244_vm1, %vm10562_vm2  ;;  %v481_v4 = vld [vmem:[%s7816_s6] sm:$0xf]  ;;  %v533_v5 = vshrl.u32 %v7825_v2, 16  ;;  %v541_v6 = vshrl.u32 %v484_v3, 16  ;;  %v544_v7 = vshll.u32 %v484_v3, 16  ;;  %v536_v27 = vshll.u32 %v7825_v2, 16 }
  0x23   : > { %v482_v8 = vld [vmem:[%s7816_s6 + $0x4] sm:$0xf]  ;;  %v516_v9 = vshrl.u32 %v481_v4, 16  ;;  %v256_v12 = vld [vmem:[#allocation2 + $0xc] sm:$0x1]  ;;  %vm7838_vm5 = vmor %vm10562_vm2, %vm513_vm3  ;;  %v519_v19 = vshll.u32 %v481_v4, 16 }
  0x24   : > { %v524_v10 = vshrl.u32 %v482_v8, 16  ;;  %v527_v11 = vshll.u32 %v482_v8, 16  ;;  %v535_v13 = vrot.slane %v533_v5, 7  ;;  %v7831_v14 = vrot.slane %v541_v6, 7  ;;  %v485_v16 = vld [vmem:[%s7816_s6 + $0x10] sm:$0xf] }
  0x25   : > { %v257_v15 = vsel %vm7820_vm4, 0, %v256_v12  ;;  %v518_v18 = vrot.slane %v516_v9, 7  ;;  %v486_v21 = vld [vmem:[%s7816_s6 + $0x14] sm:$0xf]  ;;  %v550_v22 = vshrl.u32 %v485_v16, 16  ;;  %v553_v45 = vshll.u32 %v485_v16, 16 }
  0x26   : > { %v7842_v20 = vrot.slane %v524_v10, 7  ;;  %258 = vst [vmem:[#allocation2 + $0xc] sm:$0x1] %v257_v15  ;;  %v539_v23 = vrot.slane %v535_v13, 4  ;;  %v546_v24 = vor.u32 %v544_v7, %v7831_v14  ;;  %vm10561_vm6 = vsmask.f32 7938 }
  0x27   : > { %v558_v25 = vshrl.u32 %v486_v21, 16  ;;  %v259_v26 = vld [vmem:[#allocation2 + $0x18] sm:$0x1]  ;;  %v522_v28 = vrot.slane %v518_v18, 4  ;;  %v262_v30 = vld [vmem:[#allocation2 + $0x24] sm:$0x1]  ;;  %vm7852_vm7 = vmand %vm244_vm1, %vm10561_vm6  ;;  %v521_v39 = vor.u32 %v519_v19, %v518_v18  ;;  %v538_v62 = vor.u32 %v536_v27, %v535_v13 }
  0x28   : > { %v529_v29 = vor.u32 %v527_v11, %v7842_v20  ;;  %v309_v31 = vld [vmem:[#allocation2 + $0x8] sm:$0x1]  ;;  %v547_v32 = vsel %vm7838_vm5, %v539_v23, %v546_v24  ;;  %v552_v34 = vrot.slane %v550_v22, 7  ;;  %v561_v36 = vshll.u32 %v486_v21, 16  ;;  %v1311_v37 = vld [vmem:[#allocation2 + $0x4] sm:$0xf]  ;;  %vm7868_vm8 = vmand %vm241_vm0, %vm10561_vm6 }
  0x29   : > { %v7856_v35 = vrot.slane %v558_v25, 7  ;;  %848 = vst.msk [vmem:[#allocation2 + $0x1c] sm:$0xf] %vm241_vm0, %v547_v32  ;;  %v260_v40 = vsel %vm7820_vm4, 0, %v259_v26  ;;  %v263_v41 = vsel %vm7820_vm4, 0, %v262_v30  ;;  %v310_v50 = vsel %vm7852_vm7, 0, %v309_v31 }
  0x2a   : > { %v530_v38 = vsel %vm7838_vm5, %v522_v28, %v529_v29  ;;  %v253_v42 = vld [vmem:[#allocation2] sm:$0x1]  ;;  %v312_v43 = vld [vmem:[#allocation2 + $0x14] sm:$0x1]  ;;  %v556_v46 = vrot.slane %v552_v34, 4  ;;  %v1377_v51 = vshll.u32 %v1311_v37, 16  ;;  %v555_v63 = vor.u32 %v553_v45, %v552_v34 }
  0x2b   : > { %841 = vst.msk [vmem:[#allocation2 + $0x10] sm:$0xf] %vm241_vm0, %v530_v38  ;;  %v563_v47 = vor.u32 %v561_v36, %v7856_v35  ;;  %261 = vst [vmem:[#allocation2 + $0x18] sm:$0x1] %v260_v40  ;;  %v315_v48 = vld [vmem:[#allocation2 + $0x20] sm:$0x1] }
  0x2c   : > { %264 = vst [vmem:[#allocation2 + $0x24] sm:$0x1] %v263_v41  ;;  %v318_v49 = vld [vmem:[#allocation2 + $0x2c] sm:$0x1]  ;;  %v1381_v52 = vshrl.u32 %v1311_v37, 16  ;;  %v254_v53 = vsel %vm7820_vm4, 0, %v253_v42 }
  0x2d   : > { %v838_v54 = vld [vmem:[#allocation2 + $0xc] sm:$0xf]  ;;  %v564_v55 = vsel %vm7838_vm5, %v556_v46, %v563_v47  ;;  %311 = vst [vmem:[#allocation2 + $0x8] sm:$0x1] %v310_v50  ;;  %255 = vst [vmem:[#allocation2] sm:$0x1] %v254_v53 }
  0x2e   : > { %v313_v56 = vsel %vm7852_vm7, 0, %v312_v43  ;;  %v316_v57 = vsel %vm7852_vm7, 0, %v315_v48  ;;  %v319_v58 = vsel %vm7852_vm7, 0, %v318_v49  ;;  %v839_v59 = vsel %vm7868_vm8, %v521_v39, %v838_v54  ;;  %855 = vst.msk [vmem:[#allocation2 + $0x28] sm:$0xf] %vm241_vm0, %v564_v55  ;;  %s7744_s9 = smov 12  }
  0x2f   : > { %v7888_v60 = vrot.slane %v1377_v51, 5  ;;  %v1383_v61 = vrot.slane %v1381_v52, 4  ;;  %314 = vst [vmem:[#allocation2 + $0x14] sm:$0x1] %v313_v56  ;;  %317 = vst [vmem:[#allocation2 + $0x20] sm:$0x1] %v316_v57 }
  0x30   : > { %320 = vst [vmem:[#allocation2 + $0x2c] sm:$0x1] %v319_v58  ;;  %840 = vst [vmem:[#allocation2 + $0xc] sm:$0xf] %v839_v59  ;;  %v955_v0 = vld [vmem:[#allocation2 + $0x1c] sm:$0xf] }
  0x31   : > { %vm1364_vm9 = vsmask.f32 3328  ;;  %1056 = vrot.lane.b32.xlu1 %v955_v0, %s7742_s7  ;;  %991 = vst.msk [vmem:[#allocation4 + $0x14] sm:$0xf] %vm241_vm0, %v955_v0  ;;  %v1384_v5 = vor.u32 %v1383_v61, %v7888_v60  ;;  %v531_v6 = vrot.slane %v7842_v20, 4  ;;  %v548_v15 = vrot.slane %v7831_v14, 4 }
  0x32   : > { %v953_v2 = vld [vmem:[#allocation2 + $0x10] sm:$0xf]  ;;  %v845_v3 = vld [vmem:[#allocation2 + $0x18] sm:$0xf]  ;;  %vm1365_vm10 = vsmask.f32 7440 }
  0x33   : > { %v852_v4 = vld [vmem:[#allocation2 + $0x24] sm:$0xf]  ;;  %1052 = vrot.lane.b32.xlu0 %v953_v2, %s7742_s7  ;;  %989 = vst.msk [vmem:[#allocation4 + $0xc] sm:$0xf] %vm241_vm0, %v953_v2  ;;  %v846_v7 = vsel %vm7868_vm8, %v538_v62, %v845_v3  ;;  %v1314_v9 = vld [vmem:[#allocation2 + $0x10] sm:$0xf]  ;;  %vm7913_vm11 = vmor %vm1364_vm9, %vm1365_vm10 }
  0x34   : > { %v853_v8 = vsel %vm7868_vm8, %v555_v63, %v852_v4  ;;  %847 = vst [vmem:[#allocation2 + $0x18] sm:$0xf] %v846_v7  ;;  %v1312_v10 = vld [vmem:[#allocation2 + $0x8] sm:$0x1]  ;;  %v1310_v11 = vld [vmem:[#allocation2] sm:$0xf] }
  0x35   : > { %854 = vst [vmem:[#allocation2 + $0x24] sm:$0xf] %v853_v8  ;;  %v1401_v12 = vshll.u32 %v1314_v9, 16  ;;  %v1405_v13 = vshrl.u32 %v1314_v9, 16  ;;  %v7901_v16 = vld [vmem:[#allocation2 + $0x28] sm:$0xf]  ;;  %1183 = vrot.lane.b32.xlu1 %v955_v0, %s7743_s8 }
  0x36   : > { %v1387_v18 = vshll.u32 %v1312_v10, 16  ;;  %v1368_v19 = vshrl.u32 %v1310_v11, 16  ;;  %v1371_v20 = vshll.u32 %v1310_v11, 16  ;;  %v1317_v21 = vld [vmem:[#allocation2 + $0x1c] sm:$0xf]  ;;  %v565_v23 = vrot.slane %v7856_v35, 4 }
  0x37   : > { %v952_v22 = vld [vmem:[#allocation2 + $0xc] sm:$0xf]  ;;  %993 = vst.msk [vmem:[#allocation4 + $0x1c] sm:$0xf] %vm241_vm0, %v7901_v16  ;;  %v1385_v24 = vrot.slane %v1384_v5, 4  ;;  %v7917_v31 = vrot.slane %v1401_v12, 5 }
  0x38   : > { %v842_v25 = vld [vmem:[#allocation2 + $0x14] sm:$0x1]  ;;  %1050 = vrot.lane.b32.xlu0 %v952_v22, %s7742_s7  ;;  %988 = vst.msk [vmem:[#allocation4 + $0x8] sm:$0xf] %vm241_vm0, %v952_v22  ;;  %v1389_v14 = vrot.slane %v1387_v18, 5  ;;  %v1370_v26 = vrot.slane %v1368_v19, 4 }
  0x39   : > { %v1373_v27 = vrot.slane %v1371_v20, 5  ;;  %v843_v28 = vsel %vm7820_vm4, %v531_v6, %v842_v25  ;;  %v1313_v29 = vld [vmem:[#allocation2 + $0xc] sm:$0xf]  ;;  %v1407_v32 = vrot.slane %v1405_v13, 4  ;;  %v849_v36 = vld [vmem:[#allocation2 + $0x20] sm:$0x1]  ;;  %1187 = vrot.lane.b32.xlu1 %v7901_v16, %s7743_s8 }
  0x3a   : > { %844 = vst [vmem:[#allocation2 + $0x14] sm:$0x1] %v843_v28  ;;  %v1392_v34 = vshrl.u32 %v1313_v29, 16  ;;  %v1395_v35 = vshll.u32 %v1313_v29, 16  ;;  %v850_v38 = vsel %vm7820_vm4, %v548_v15, %v849_v36  ;;  %v856_v39 = vld [vmem:[#allocation2 + $0x2c] sm:$0x1]  ;;  %v1390_v48 = vsel %vm7913_vm11, %v1385_v24, %v1389_v14 }
  0x3b   : > { %v1374_v37 = vor.u32 %v1373_v27, %v1370_v26  ;;  %v1320_v40 = vld [vmem:[#allocation2 + $0x28] sm:$0xf]  ;;  %851 = vst [vmem:[#allocation2 + $0x20] sm:$0x1] %v850_v38  ;;  %v1425_v43 = vshll.u32 %v1317_v21, 16  ;;  %v1429_v45 = vshrl.u32 %v1317_v21, 16  ;;  %v857_v49 = vsel %vm7820_vm4, %v565_v23, %v856_v39 }
  0x3c   : > { %v1394_v41 = vrot.slane %v1392_v34, 4  ;;  %v1397_v42 = vrot.slane %v1395_v35, 5  ;;  %v954_v46 = vld [vmem:[#allocation2 + $0x18] sm:$0xf]  ;;  %v7923_v47 = vld [vmem:[#allocation2 + $0x24] sm:$0xf]  ;;  %v1408_v50 = vor.u32 %v1407_v32, %v7917_v31 }
  0x3d   : > { %990 = vst.msk [vmem:[#allocation4 + $0x10] sm:$0xf] %vm241_vm0, %v954_v46  ;;  %1181 = vrot.lane.b32.xlu0 %v954_v46, %s7743_s8  ;;  %992 = vst.msk [vmem:[#allocation4 + $0x18] sm:$0xf] %vm241_vm0, %v7923_v47  ;;  %v1316_v51 = vld [vmem:[#allocation2 + $0x18] sm:$0xf]  ;;  %1801 = vrot.lane.b32.xlu1 %v1390_v48, %s7744_s9 }
  0x3e   : > { %858 = vst [vmem:[#allocation2 + $0x2c] sm:$0x1] %v857_v49  ;;  %v1449_v52 = vshll.u32 %v1320_v40, 16  ;;  %v1453_v53 = vshrl.u32 %v1320_v40, 16  ;;  %v7934_v54 = vld [vmem:[#allocation2 + $0x4] sm:$0xf]  ;;  %v1398_v56 = vor.u32 %v1397_v42, %v1394_v41 }
  0x3f   : > { %v1375_v55 = vrot.slane %v1374_v37, 4  ;;  %v1416_v57 = vshrl.u32 %v1316_v51, 16  ;;  %v1419_v58 = vshll.u32 %v1316_v51, 16  ;;  %v7937_v59 = vrot.slane %v1425_v43, 5  ;;  %v1319_v62 = vld [vmem:[#allocation2 + $0x24] sm:$0xf] }
  0x40   : > { %v1431_v61 = vrot.slane %v1429_v45, 4  ;;  %v2299_v3 = vrot.slane %v7934_v54, 5  ;;  %v1409_v4 = vrot.slane %v1408_v50, 4  ;;  %v7942_v6 = vrot.slane %v1449_v52, 5  ;;  %v7945_v8 = vld [vmem:[%s7816_s6 + $0x18] sm:$0xf] }
  0x41   : > { %v1315_v63 = vld [vmem:[#allocation2 + $0x14] sm:$0x1]  ;;  %v1418_v0 = vrot.slane %v1416_v57, 4  ;;  %v1421_v2 = vrot.slane %v1419_v58, 5  ;;  %1185 = vrot.lane.b32.xlu0 %v7923_v47, %s7743_s8  ;;  %v1455_v7 = vrot.slane %v1453_v53, 4  ;;  %v1380_v9 = vsel %vm7913_vm11, %v1375_v55, %v7888_v60  ;;  %1054 = vrot.lane.b32.xlu1 %v954_v46, %s7742_s7  ;;  %s7745_s10 = smov 16  }
  0x42   : > { %v1411_v5 = vshll.u32 %v1315_v63, 16  ;;  %v1399_v10 = vrot.slane %v1398_v56, 4  ;;  %v1318_v11 = vld [vmem:[#allocation2 + $0x20] sm:$0x1]  ;;  %v1440_v12 = vshrl.u32 %v1319_v62, 16  ;;  %v1443_v13 = vshll.u32 %v1319_v62, 16 }
  0x43   : > { %v1432_v18 = vor.u32 %v1431_v61, %v7937_v59  ;;  %v1422_v19 = vor.u32 %v1421_v2, %v1418_v0  ;;  %v1435_v20 = vshll.u32 %v1318_v11, 16  ;;  %v7952_v22 = vld [vmem:[#allocation2 + $0x8] sm:$0x1]  ;;  %v1456_v23 = vor.u32 %v1455_v7, %v7942_v6  ;;  %v7962_v25 = vld [vmem:[#allocation2 + $0x10] sm:$0xf]  ;;  %s7746_s11 = smov 20  }
  0x44   : > { %v1413_v15 = vrot.slane %v1411_v5, 5  ;;  %v7960_v24 = vrot.slane %v2299_v3, 4  ;;  %v567_v14 = vshrl.u32 %v7945_v8, 16  ;;  %v1404_v26 = vsel %vm7913_vm11, %v1399_v10, %v7917_v31  ;;  %v488_v29 = vld [vmem:[%s7816_s6 + $0x1c] sm:$0xf]  ;;  %s7747_s12 = smov 24  }
  0x45   : > { %v1321_v21 = vld [vmem:[#allocation2 + $0x2c] sm:$0x1]  ;;  %1799 = vrot.lane.b32.xlu0 %v1380_v9, %s7744_s9  ;;  %v1442_v27 = vrot.slane %v1440_v12, 4  ;;  %v1445_v28 = vrot.slane %v1443_v13, 5  ;;  %v570_v32 = vshll.u32 %v7945_v8, 16  ;;  %v1433_v34 = vrot.slane %v1432_v18, 4 }
  0x46   : > { %v1414_v60 = vsel %vm7913_vm11, %v1409_v4, %v1413_v15  ;;  %v1423_v35 = vrot.slane %v1422_v19, 4  ;;  %v1459_v36 = vshll.u32 %v1321_v21, 16  ;;  %v2302_v37 = vrot.slane %v7952_v22, 5  ;;  %v265_v38 = vld [vmem:[#allocation2 + $0x30] sm:$0x1]  ;;  %s7748_s13 = smov 28  }
  0x47   : > { %1805 = vrot.lane.b32.xlu1 %v1414_v60, %s7744_s9  ;;  %v1437_v39 = vrot.slane %v1435_v20, 5  ;;  %v2306_v40 = vrot.slane %v7962_v25, 5  ;;  %v7974_v41 = vld [vmem:[%s7816_s6 + $0x20] sm:$0xf]  ;;  %v490_v42 = vld [vmem:[%s7816_s6 + $0x24] sm:$0xf]  ;;  %v1446_v48 = vor.u32 %v1445_v28, %v1442_v27 }
  0x48   : > { %v1457_v31 = vrot.slane %v1456_v23, 4  ;;  %v569_v43 = vrot.slane %v567_v14, 7  ;;  %v951_v45 = vld [vmem:[#allocation2 + $0x4] sm:$0xf]  ;;  %v950_v46 = vld [vmem:[#allocation2] sm:$0xf]  ;;  %v7984_v53 = vsel %vm7913_vm11, %v1423_v35, %v7937_v59 }
  0x49   : > { %1803 = vrot.lane.b32.xlu0 %v1404_v26, %s7744_s9  ;;  %vm2294_vm12 = vcmask 1042432   ;;  %vm2295_vm13 = vcmask 1046532   ;;  %v575_v49 = vshrl.u32 %v488_v29, 16  ;;  %v578_v50 = vshll.u32 %v488_v29, 16  ;;  %v268_v51 = vld [vmem:[#allocation2 + $0x3c] sm:$0x1] }
  0x4a   : > { %v321_v52 = vld [vmem:[#allocation2 + $0x38] sm:$0x1]  ;;  %987 = vst.msk [vmem:[#allocation4 + $0x4] sm:$0xf] %vm241_vm0, %v951_v45  ;;  %986 = vst.msk [vmem:[#allocation4] sm:$0xf] %vm241_vm0, %v950_v46  ;;  %v7991_v61 = vsel %vm7913_vm11, %v1433_v34, %v1437_v39  ;;  %v572_v14 = vor.u32 %v570_v32, %v569_v43 }
  0x4b   : > { %1930 = vrot.lane.b32.xlu1 %v1414_v60, %s7745_s10  ;;  %v1461_v55 = vrot.slane %v1459_v36, 5  ;;  %v266_v56 = vsel %vm7820_vm4, 0, %v265_v38  ;;  %v584_v57 = vshrl.u32 %v7974_v41, 16  ;;  %v324_v58 = vld [vmem:[#allocation2 + $0x44] sm:$0x1]  ;;  %v573_v62 = vrot.slane %v569_v43, 4  ;;  %vm8053_vm14 = vmor %vm2294_vm12, %vm2295_vm13 }
  0x4c   : > { %v7993_v63 = vrot.slane %v575_v49, 7  ;;  %267 = vst [vmem:[#allocation2 + $0x30] sm:$0x1] %v266_v56  ;;  %v592_v0 = vshrl.u32 %v490_v42, 16  ;;  %v7996_v2 = vld [vmem:[%s7816_s6 + $0x28] sm:$0xf] }
  0x4d   : > { %1928 = vrot.lane.b32.xlu0 %v1404_v26, %s7745_s10  ;;  %v586_v59 = vrot.slane %v584_v57, 7  ;;  %v595_v4 = vshll.u32 %v490_v42, 16  ;;  %v269_v5 = vsel %vm7820_vm4, 0, %v268_v51  ;;  %v322_v7 = vsel %vm7852_vm7, 0, %v321_v52  ;;  %v492_v8 = vld [vmem:[%s7816_s6 + $0x2c] sm:$0xf] }
  0x4e   : > { %v580_v9 = vor.u32 %v578_v50, %v7993_v63  ;;  %v587_v10 = vshll.u32 %v7974_v41, 16  ;;  %v8006_v11 = vrot.slane %v592_v0, 7  ;;  %270 = vst [vmem:[#allocation2 + $0x3c] sm:$0x1] %v269_v5  ;;  %323 = vst [vmem:[#allocation2 + $0x38] sm:$0x1] %v322_v7  ;;  %v8014_v15 = vsel %vm7913_vm11, %v1457_v31, %v1461_v55 }
  0x4f   : > { %v325_v12 = vsel %vm7852_vm7, 0, %v324_v58  ;;  %v271_v13 = vld [vmem:[#allocation2 + $0x48] sm:$0x1]  ;;  %1934 = vrot.lane.b32.xlu1 %v7991_v61, %s7745_s10  ;;  %v1447_v18 = vrot.slane %v1446_v48, 4  ;;  %v590_v19 = vrot.slane %v586_v59, 4  ;;  %v601_v20 = vshrl.u32 %v7996_v2, 16 }
  0x50   : > { %326 = vst [vmem:[#allocation2 + $0x44] sm:$0x1] %v325_v12  ;;  %v8018_v21 = vld [vmem:[%s7816_s6 + $0x30] sm:$0xf]  ;;  %v581_v60 = vsel %vm7838_vm5, %v573_v62, %v580_v9  ;;  %v582_v23 = vrot.slane %v7993_v63, 4  ;;  %v597_v26 = vor.u32 %v595_v4, %v8006_v11  ;;  %v609_v34 = vshrl.u32 %v492_v8, 16 }
  0x51   : > { %v494_v27 = vld [vmem:[%s7816_s6 + $0x34] sm:$0xf]  ;;  %1932 = vrot.lane.b32.xlu0 %v7984_v53, %s7745_s10  ;;  %862 = vst.msk [vmem:[#allocation2 + $0x34] sm:$0xf] %vm241_vm0, %v581_v60  ;;  %v603_v29 = vrot.slane %v601_v20, 7  ;;  %v612_v35 = vshll.u32 %v492_v8, 16  ;;  %v589_v32 = vor.u32 %v587_v10, %v586_v59  ;;  %v8049_v56 = vsel %vm7913_vm11, %v1447_v18, %v7942_v6 }
  0x52   : > { %v274_v28 = vld [vmem:[#allocation2 + $0x54] sm:$0x1]  ;;  %v272_v36 = vsel %vm7820_vm4, 0, %v271_v13  ;;  %v2186_v38 = vld [vmem:[#allocation2] sm:$0xe]  ;;  %v598_v39 = vsel %vm7838_vm5, %v590_v19, %v597_v26  ;;  %v604_v41 = vshll.u32 %v7996_v2, 16  ;;  %v2303_v12 = vsel %vm8053_vm14, %v7960_v24, %v2302_v37 }
  0x53   : > { %273 = vst [vmem:[#allocation2 + $0x48] sm:$0x1] %v272_v36  ;;  %v618_v42 = vshrl.u32 %v8018_v21, 16  ;;  %2059 = vrot.lane.b32.xlu1 %v7991_v61, %s7746_s11  ;;  %v2191_v31 = vld [vmem:[#allocation2 + $0x14] sm:$0x1]  ;;  %v599_v45 = vrot.slane %v8006_v11, 4 }
  0x54   : > { %v859_v43 = vld [vmem:[#allocation2 + $0x30] sm:$0xf]  ;;  %869 = vst.msk [vmem:[#allocation2 + $0x40] sm:$0xf] %vm241_vm0, %v598_v39  ;;  %v607_v46 = vrot.slane %v603_v29, 4  ;;  %v8038_v48 = vrot.slane %v609_v34, 7  ;;  %v606_v5 = vor.u32 %v604_v41, %v603_v29 }
  0x55   : > { %v626_v49 = vshrl.u32 %v494_v27, 16  ;;  %v860_v50 = vsel %vm7868_vm8, %v572_v14, %v859_v43  ;;  %v620_v51 = vrot.slane %v618_v42, 7  ;;  %v629_v52 = vshll.u32 %v494_v27, 16  ;;  %2057 = vrot.lane.b32.xlu0 %v7984_v53, %s7746_s11  ;;  %v866_v62 = vld [vmem:[#allocation2 + $0x3c] sm:$0xf]  ;;  %s7749_s20 = smov 32  }
  0x56   : > { %v275_v55 = vsel %vm7820_vm4, 0, %v274_v28  ;;  %v6529_v58 = vrot.slane %v2186_v38, 9  ;;  %861 = vst [vmem:[#allocation2 + $0x30] sm:$0xf] %v860_v50  ;;  %v863_v63 = vld [vmem:[#allocation2 + $0x38] sm:$0x1]  ;;  %v614_v0 = vor.u32 %v612_v35, %v8038_v48  ;;  %v867_v59 = vsel %vm7868_vm8, %v589_v32, %v866_v62 }
  0x57   : > { %v8058_v2 = vrot.slane %v626_v49, 7  ;;  %276 = vst [vmem:[#allocation2 + $0x54] sm:$0x1] %v275_v55  ;;  %v864_v6 = vsel %vm7820_vm4, %v582_v23, %v863_v63  ;;  %v870_v4 = vld [vmem:[#allocation2 + $0x44] sm:$0x1]  ;;  %v624_v7 = vrot.slane %v620_v51, 4  ;;  %2063 = vrot.lane.b32.xlu1 %v8014_v15, %s7746_s11 }
  0x58   : > { %v2189_v8 = vld [vmem:[#allocation2 + $0xc] sm:$0xe]  ;;  %868 = vst [vmem:[#allocation2 + $0x3c] sm:$0xf] %v867_v59  ;;  %865 = vst [vmem:[#allocation2 + $0x38] sm:$0x1] %v864_v6  ;;  %v871_v9 = vsel %vm7820_vm4, %v599_v45, %v870_v4  ;;  %v615_v10 = vsel %vm7838_vm5, %v607_v46, %v614_v0  ;;  %v2300_v37 = vsel %vm8053_vm14, %v6529_v58, %v2299_v3 }
  0x59   : > { %v631_v11 = vor.u32 %v629_v52, %v8058_v2  ;;  %v2308_v13 = vrot.slane %v2306_v40, 4  ;;  %v2309_v18 = vrot.slane %v2191_v31, 5  ;;  %v8078_v19 = vld [vmem:[#allocation2 + $0x34] sm:$0xf]  ;;  %872 = vst [vmem:[#allocation2 + $0x44] sm:$0x1] %v871_v9  ;;  %2061 = vrot.lane.b32.xlu0 %v8049_v56, %s7746_s11 }
  0x5a   : > { %876 = vst.msk [vmem:[#allocation2 + $0x4c] sm:$0xf] %vm241_vm0, %v615_v10  ;;  %v2193_v20 = vld [vmem:[#allocation2 + $0x1c] sm:$0xf]  ;;  %995 = vst.msk [vmem:[#allocation4 + $0x24] sm:$0xf] %vm241_vm0, %v8078_v19 }
  0x5b   : > { %v873_v22 = vld [vmem:[#allocation2 + $0x48] sm:$0xf]  ;;  %v632_v24 = vsel %vm7838_vm5, %v624_v7, %v631_v11  ;;  %v6530_v60 = vrot.slane %v2189_v8, 9  ;;  %v8091_v23 = vld [vmem:[#allocation2 + $0x40] sm:$0xf]  ;;  %2425 = vrot.lane.b32.xlu1 %v2303_v12, %s7747_s12  ;;  %v2310_v54 = vsel %vm8053_vm14, %v2308_v13, %v2309_v18  ;;  %v2313_v26 = vrot.slane %v2193_v20, 5 }
  0x5c   : > { %v874_v14 = vsel %vm7868_vm8, %v606_v5, %v873_v22  ;;  %883 = vst.msk [vmem:[#allocation2 + $0x58] sm:$0xf] %vm241_vm0, %v632_v24  ;;  %997 = vst.msk [vmem:[#allocation4 + $0x2c] sm:$0xf] %vm241_vm0, %v8091_v23  ;;  %v2194_v27 = vld [vmem:[#allocation2 + $0x20] sm:$0x1] }
  0x5d   : > { %875 = vst [vmem:[#allocation2 + $0x48] sm:$0xf] %v874_v14  ;;  %v8101_v3 = vld [vmem:[#allocation2 + $0x30] sm:$0xf]  ;;  %2423 = vrot.lane.b32.xlu0 %v2300_v37, %s7747_s12  ;;  %v2307_v28 = vsel %vm8053_vm14, %v6530_v60, %v2306_v40  ;;  %v621_v34 = vshll.u32 %v8018_v21, 16  ;;  %v2315_v36 = vrot.slane %v2313_v26, 4 }
  0x5e   : > { %994 = vst.msk [vmem:[#allocation4 + $0x20] sm:$0xf] %vm241_vm0, %v8101_v3  ;;  %v2192_v35 = vld [vmem:[#allocation2 + $0x18] sm:$0xe]  ;;  %v2316_v38 = vrot.slane %v2194_v27, 5  ;;  %v7596_v59 = vld [vmem:[%s10556_s1 + $0x8] sm:$0xff]  }
  0x5f   : > { %v8110_v29 = vld [vmem:[#allocation2 + $0x3c] sm:$0xf]  ;;  %2429 = vrot.lane.b32.xlu1 %v2310_v54, %s7747_s12  ;;  %v2196_v39 = vld [vmem:[#allocation2 + $0x28] sm:$0xf]  ;;  %v6531_v32 = vrot.slane %v2192_v35, 9  ;;  %v623_v25 = vor.u32 %v621_v34, %v620_v51  ;;  %vm2998_vm15 = vcmask 1041408  }
  0x60   : > { %996 = vst.msk [vmem:[#allocation4 + $0x28] sm:$0xf] %vm241_vm0, %v8110_v29  ;;  %v327_v41 = vld [vmem:[#allocation2 + $0x50] sm:$0x1]  ;;  %v8122_v21 = vsel %vm8053_vm14, %v2315_v36, %v2316_v38  ;;  %v2320_v42 = vrot.slane %v2196_v39, 5  ;;  %v616_v4 = vrot.slane %v8038_v48, 4 }
  0x61   : > { %2427 = vrot.lane.b32.xlu0 %v2307_v28, %s7747_s12  ;;  %v8118_v40 = vld [vmem:[#allocation2 + $0x4c] sm:$0xf]  ;;  %v880_v46 = vld [vmem:[#allocation2 + $0x54] sm:$0xf]  ;;  %v330_v49 = vld [vmem:[#allocation2 + $0x5c] sm:$0x1]  ;;  %v8137_v50 = vsel %vm8053_vm14, %v6531_v32, %v2313_v26 }
  0x62   : > { %999 = vst.msk [vmem:[#allocation4 + $0x34] sm:$0xf] %vm241_vm0, %v8118_v40  ;;  %v2197_v45 = vld [vmem:[#allocation2 + $0x2c] sm:$0x1]  ;;  %v881_v51 = vsel %vm7868_vm8, %v623_v25, %v880_v46  ;;  %v328_v52 = vsel %vm7852_vm7, 0, %v327_v41  ;;  %v2322_v58 = vrot.slane %v2320_v42, 4 }
  0x63   : > { %2554 = vrot.lane.b32.xlu1 %v2310_v54, %s7748_s13  ;;  %v8128_v43 = vld [vmem:[#allocation2 + $0x58] sm:$0xf]  ;;  %v2195_v55 = vld [vmem:[#allocation2 + $0x24] sm:$0xe]  ;;  %882 = vst [vmem:[#allocation2 + $0x54] sm:$0xf] %v881_v51 }
  0x64   : > { %v8126_v31 = vld [vmem:[#allocation2 + $0x48] sm:$0xf]  ;;  %1001 = vst.msk [vmem:[#allocation4 + $0x3c] sm:$0xf] %vm241_vm0, %v8128_v43  ;;  %329 = vst [vmem:[#allocation2 + $0x50] sm:$0x1] %v328_v52 }
  0x65   : > { %2552 = vrot.lane.b32.xlu0 %v2307_v28, %s7748_s13  ;;  %998 = vst.msk [vmem:[#allocation4 + $0x30] sm:$0xf] %vm241_vm0, %v8126_v31  ;;  %v2323_v62 = vrot.slane %v2197_v45, 5  ;;  %v331_v63 = vsel %vm7852_vm7, 0, %v330_v49  ;;  %v6532_v6 = vrot.slane %v2195_v55, 9  ;;  %v633_v9 = vrot.slane %v8058_v2, 4 }
  0x66   : > { %332 = vst [vmem:[#allocation2 + $0x5c] sm:$0x1] %v331_v63  ;;  %v7595_v0 = vld [vmem:[%s10556_s1 + $0x10] ss:$0 sps:$4 sm:$0x33]   ;;  %v7597_v10 = vld [vmem:[%s10556_s1] sm:$0xff]  }
  0x67   : > { %2558 = vrot.lane.b32.xlu1 %v8122_v21, %s7748_s13  ;;  %7564 = vmatprep.subr.msk.bf16.mxu0 %vm2998_vm15, %v7595_v0  ;;  %v3000_v5 = vsel %vm2998_vm15, %v7595_v0, 0  ;;  %v495_v7 = vld [vmem:[%s7816_s6 + $0x38] sm:$0xf]  ;;  %v8161_v8 = vsel %vm8053_vm14, %v2322_v58, %v2323_v62  ;;  %v8171_v11 = vsel %vm8053_vm14, %v6532_v6, %v2320_v42  ;;  %v1323_v12 = vld [vmem:[#allocation2 + $0x34] sm:$0xf]  ;;  %vm10564_vm1 = vcmask 60448  }
  0x68   : > { %7383 = vmatpush3.bf16.msra.mxu0 %v3000_v5  ;;  %v635_v48 = vshrl.u32 %v495_v7, 16  ;;  %v496_v20 = vld [vmem:[%s7816_s6 + $0x3c] sm:$0xf]  ;;  %v277_v37 = vld [vmem:[#allocation2 + $0x60] sm:$0x1]  ;;  %v1473_v60 = vshll.u32 %v1323_v12, 16 }
  0x69   : > { %2556 = vrot.lane.b32.xlu0 %v8137_v50, %s7748_s13  ;;  %7384 = vmatprep.subr.bf16.mxu0 %v7596_v59  ;;  %v1477_v14 = vshrl.u32 %v1323_v12, 16  ;;  %v1322_v54 = vld [vmem:[#allocation2 + $0x30] sm:$0xf]  ;;  %v497_v27 = vld [vmem:[%s7816_s6 + $0x40] sm:$0xf]  ;;  %v643_v28 = vshrl.u32 %v496_v20, 16 }
  0x6a   : > { %v8173_v13 = vld [vmem:[#allocation2 + $0x54] sm:$0xf]  ;;  %v637_v24 = vrot.slane %v635_v48, 7  ;;  %v646_v34 = vshll.u32 %v496_v20, 16  ;;  %v498_v35 = vld [vmem:[%s7816_s6 + $0x44] sm:$0xf] }
  0x6b   : > { %2683 = vrot.lane.b32.xlu1 %v8122_v21, %s7749_s20  ;;  %v877_v18 = vld [vmem:[#allocation2 + $0x50] sm:$0x1]  ;;  %1000 = vst.msk [vmem:[#allocation4 + $0x38] sm:$0xf] %vm241_vm0, %v8173_v13  ;;  %v280_v36 = vld [vmem:[#allocation2 + $0x6c] sm:$0x1] }
  0x6c   : > { %v878_v2 = vsel %vm7820_vm4, %v616_v4, %v877_v18  ;;  %7385 = vmatpush3.bf16.msra.mxu0 %v7596_v59  ;;  %v278_v38 = vsel %vm7820_vm4, 0, %v277_v37  ;;  %v652_v39 = vshrl.u32 %v497_v27, 16  ;;  %v8192_v32 = vld [vmem:[#allocation2 + $0x40] sm:$0xf]  ;;  %v638_v25 = vshll.u32 %v495_v7, 16 }
  0x6d   : > { %2681 = vrot.lane.b32.xlu0 %v8137_v50, %s7749_s20  ;;  %879 = vst [vmem:[#allocation2 + $0x50] sm:$0x1] %v878_v2  ;;  %v884_v22 = vld [vmem:[#allocation2 + $0x5c] sm:$0x1]  ;;  %7386 = vmatprep.subr.bf16.mxu0 %v7597_v10  ;;  %v641_v41 = vrot.slane %v637_v24, 4  ;;  %v645_v42 = vrot.slane %v643_v28, 7 }
  0x6e   : > { %v885_v26 = vsel %vm7820_vm4, %v633_v9, %v884_v22  ;;  %279 = vst [vmem:[#allocation2 + $0x60] sm:$0x1] %v278_v38  ;;  %v660_v45 = vshrl.u32 %v498_v35, 16  ;;  %v1464_v46 = vshrl.u32 %v1322_v54, 16  ;;  %v654_v49 = vrot.slane %v652_v39, 7 }
  0x6f   : > { %2687 = vrot.lane.b32.xlu1 %v8161_v8, %s7749_s20  ;;  %886 = vst [vmem:[#allocation2 + $0x5c] sm:$0x1] %v885_v26  ;;  %v663_v51 = vshll.u32 %v498_v35, 16  ;;  %v648_v52 = vor.u32 %v646_v34, %v645_v42  ;;  %v655_v55 = vshll.u32 %v497_v27, 16  ;;  %v1324_v62 = vld [vmem:[#allocation2 + $0x38] sm:$0x1]  ;;  %v640_v59 = vor.u32 %v638_v25, %v637_v24 }
  0x70   : > { %7387 = vmatpush3.bf16.msra.mxu0 %v7597_v10  ;;  %v8198_v58 = vrot.slane %v660_v45, 7  ;;  %v1467_v63 = vshll.u32 %v1322_v54, 16  ;;  %v658_v0 = vrot.slane %v654_v49, 4  ;;  %v8206_v6 = vrot.slane %v1473_v60, 5  ;;  %v333_v9 = vld [vmem:[#allocation2 + $0x68] sm:$0x1] }
  0x71   : > { %2685 = vrot.lane.b32.xlu0 %v8171_v11, %s7749_s20  ;;  %v1479_v4 = vrot.slane %v1477_v14, 4  ;;  %v1497_v5 = vshll.u32 %v8192_v32, 16  ;;  %v1483_v10 = vshll.u32 %v1324_v62, 16  ;;  %v1466_v48 = vrot.slane %v1464_v46, 4  ;;  %v1325_v37 = vld [vmem:[#allocation2 + $0x3c] sm:$0xf] }
  0x72   : > { %v665_v7 = vor.u32 %v663_v51, %v8198_v58  ;;  %v1501_v12 = vshrl.u32 %v8192_v32, 16  ;;  %v657_v18 = vor.u32 %v655_v55, %v654_v49  ;;  %v1469_v2 = vrot.slane %v1467_v63, 5 }
  0x73   : > { %1060 = vrot.lane.b32.xlu1 %v7901_v16, %s7742_s7  ;;  %v281_v16 = vsel %vm7820_vm4, 0, %v280_v36  ;;  %v334_v24 = vsel %vm7852_vm7, 0, %v333_v9  ;;  %v1488_v54 = vshrl.u32 %v1325_v37, 16  ;;  %v650_v26 = vrot.slane %v645_v42, 4 }
  0x74   : > { %282 = vst [vmem:[#allocation2 + $0x6c] sm:$0x1] %v281_v16  ;;  %v666_v22 = vsel %vm7838_vm5, %v658_v0, %v665_v7  ;;  %335 = vst [vmem:[#allocation2 + $0x68] sm:$0x1] %v334_v24  ;;  %v1491_v28 = vshll.u32 %v1325_v37, 16  ;;  %v1480_v38 = vor.u32 %v1479_v4, %v8206_v6  ;;  %v1503_v42 = vrot.slane %v1501_v12, 4 }
  0x75   : > { %1058 = vrot.lane.b32.xlu0 %v7923_v47, %s7742_s7  ;;  %v649_v47 = vsel %vm7838_vm5, %v641_v41, %v648_v52  ;;  %v887_v20 = vld [vmem:[#allocation2 + $0x60] sm:$0xf]  ;;  %897 = vst.msk [vmem:[#allocation2 + $0x70] sm:$0xf] %vm241_vm0, %v666_v22  ;;  %v1499_v41 = vrot.slane %v1497_v5, 5  ;;  %v667_v45 = vrot.slane %v8198_v58, 4 }
  0x76   : > { %890 = vst.msk [vmem:[#allocation2 + $0x64] sm:$0xf] %vm241_vm0, %v649_v47  ;;  %v888_v60 = vsel %vm7868_vm8, %v640_v59, %v887_v20  ;;  %v1481_v46 = vrot.slane %v1480_v38, 4  ;;  %v1485_v49 = vrot.slane %v1483_v10, 5  ;;  %v1490_v16 = vrot.slane %v1488_v54, 4 }
  0x77   : > { %1064 = vrot.lane.b32.xlu1 %v8078_v19, %s7742_s7  ;;  %889 = vst [vmem:[#allocation2 + $0x60] sm:$0xf] %v888_v60  ;;  %v1493_v52 = vrot.slane %v1491_v28, 5  ;;  %v1504_v63 = vor.u32 %v1503_v42, %v1499_v41  ;;  %v2202_v10 = vld [vmem:[#allocation2 + $0x40] sm:$0xf]  ;;  %vm1277_vm3 = vcmask 93248  }
  0x78   : > { %v8265_v58 = vsel %vm7913_vm11, %v1481_v46, %v1485_v49  ;;  %v2203_v24 = vld [vmem:[#allocation2 + $0x44] sm:$0x1]  ;;  %v2201_v60 = vld [vmem:[#allocation2 + $0x3c] sm:$0xe]  ;;  %v283_v54 = vld [vmem:[#allocation2 + $0x78] sm:$0x1] }
  0x79   : > { %1062 = vrot.lane.b32.xlu0 %v8101_v3, %s7742_s7  ;;  %v1494_v59 = vor.u32 %v1493_v52, %v1490_v16  ;;  %v1505_v4 = vrot.slane %v1504_v63, 4  ;;  %v499_v28 = vld [vmem:[%s7816_s6 + $0x48] sm:$0xf]  ;;  %v286_v16 = vld [vmem:[#allocation2 + $0x84] sm:$0x1]  ;;  %vm1895_vm9 = vcmask 126048  }
  0x7a   : > { %v669_v38 = vshrl.u32 %v499_v28, 16  ;;  %v672_v42 = vshll.u32 %v499_v28, 16  ;;  %vm2024_vm10 = vcmask 158848   ;;  %vm10568_vm12 = vcmask 191648  }
  0x7b   : > { %1191 = vrot.lane.b32.xlu1 %v8078_v19, %s7743_s8  ;;  %v894_v19 = vld [vmem:[#allocation2 + $0x6c] sm:$0xf]  ;;  %v891_v36 = vld [vmem:[#allocation2 + $0x68] sm:$0x1]  ;;  %v1495_v7 = vrot.slane %v1494_v59, 4  ;;  %vm10567_vm13 = vcmask 224448  }
  0x7c   : > { %v895_v14 = vsel %vm7868_vm8, %v657_v18, %v894_v19  ;;  %v8237_v35 = vld [vmem:[#allocation2 + $0x70] sm:$0xf]  ;;  %v892_v32 = vsel %vm7820_vm4, %v650_v26, %v891_v36  ;;  %v284_v26 = vsel %vm7820_vm4, 0, %v283_v54  ;;  %vm10565_vm15 = vcmask 257248  }
  0x7d   : > { %1189 = vrot.lane.b32.xlu0 %v8101_v3, %s7743_s8  ;;  %896 = vst [vmem:[#allocation2 + $0x6c] sm:$0xf] %v895_v14  ;;  %v8227_v27 = vld [vmem:[#allocation2 + $0x64] sm:$0xf]  ;;  %v336_v3 = vld [vmem:[#allocation2 + $0x74] sm:$0x1]  ;;  %v8288_v12 = vsel %vm7913_vm11, %v1495_v7, %v1499_v41 }
  0x7e   : > { %1003 = vst.msk [vmem:[#allocation4 + $0x44] sm:$0xf] %vm241_vm0, %v8227_v27  ;;  %v337_v34 = vsel %vm7852_vm7, 0, %v336_v3  ;;  %v8240_v39 = vld [vmem:[#allocation2 + $0x60] sm:$0xf]  ;;  %v2337_v14 = vrot.slane %v2203_v24, 5 }
  0x7f   : > { %1195 = vrot.lane.b32.xlu1 %v8091_v23, %s7743_s8  ;;  %338 = vst [vmem:[#allocation2 + $0x74] sm:$0x1] %v337_v34  ;;  %1005 = vst.msk [vmem:[#allocation4 + $0x4c] sm:$0xf] %vm241_vm0, %v8237_v35  ;;  %v500_v34 = vld [vmem:[%s7816_s6 + $0x4c] sm:$0xf] }
  0x80   : > { %1002 = vst.msk [vmem:[#allocation4 + $0x40] sm:$0xf] %vm241_vm0, %v8240_v39  ;;  %893 = vst [vmem:[#allocation2 + $0x68] sm:$0x1] %v892_v32  ;;  %v677_v32 = vshrl.u32 %v500_v34, 16  ;;  %v671_v41 = vrot.slane %v669_v38, 7 }
  0x81   : > { %1193 = vrot.lane.b32.xlu0 %v8110_v29, %s7743_s8  ;;  %285 = vst [vmem:[#allocation2 + $0x78] sm:$0x1] %v284_v26  ;;  %v680_v49 = vshll.u32 %v500_v34, 16  ;;  %v502_v7 = vld [vmem:[%s7816_s6 + $0x54] sm:$0xf]  ;;  %vm10563_vm6 = vcmask 290048  }
  0x82   : > { %v1328_v26 = vld [vmem:[#allocation2 + $0x48] sm:$0xf]  ;;  %v339_v34 = vld [vmem:[#allocation2 + $0x80] sm:$0x1]  ;;  %vm10566_vm2 = vcmask 293888  }
  0x83   : > { %1809 = vrot.lane.b32.xlu1 %v7991_v61, %s7744_s9  ;;  %v1470_v61 = vor.u32 %v1469_v2, %v1466_v48  ;;  %v2200_v48 = vld [vmem:[#allocation2 + $0x38] sm:$0x1]  ;;  %v2334_v2 = vrot.slane %v2202_v10, 5  ;;  %v340_v38 = vsel %vm7852_vm7, 0, %v339_v34 }
  0x84   : > { %v8250_v25 = vld [vmem:[#allocation2 + $0x6c] sm:$0xf]  ;;  %v2330_v20 = vrot.slane %v2200_v48, 5  ;;  %341 = vst [vmem:[#allocation2 + $0x80] sm:$0x1] %v340_v38 }
  0x85   : > { %1807 = vrot.lane.b32.xlu0 %v7984_v53, %s7744_s9  ;;  %1004 = vst.msk [vmem:[#allocation4 + $0x48] sm:$0xf] %vm241_vm0, %v8250_v25  ;;  %v1327_v53 = vld [vmem:[#allocation2 + $0x44] sm:$0x1]  ;;  %v1471_v51 = vrot.slane %v1470_v61, 4 }
  0x86   : > { %v898_v55 = vld [vmem:[#allocation2 + $0x74] sm:$0x1]  ;;  %v1507_v0 = vshll.u32 %v1327_v53, 16  ;;  %v1329_v48 = vld [vmem:[#allocation2 + $0x4c] sm:$0xf] }
  0x87   : > { %1813 = vrot.lane.b32.xlu1 %v8014_v15, %s7744_s9  ;;  %v899_v62 = vsel %vm7820_vm4, %v667_v45, %v898_v55  ;;  %v8272_v47 = vsel %vm7913_vm11, %v1471_v51, %v8206_v6  ;;  %v8332_v45 = vrot.slane %v677_v32, 7  ;;  %v675_v51 = vrot.slane %v671_v41, 4 }
  0x88   : > { %900 = vst [vmem:[#allocation2 + $0x74] sm:$0x1] %v899_v62  ;;  %v1509_v5 = vrot.slane %v1507_v0, 5  ;;  %v674_v62 = vor.u32 %v672_v42, %v671_v41  ;;  %v901_v63 = vld [vmem:[#allocation2 + $0x78] sm:$0xf]  ;;  %v287_v0 = vsel %vm7820_vm4, 0, %v286_v16 }
  0x89   : > { %1811 = vrot.lane.b32.xlu0 %v8049_v56, %s7744_s9  ;;  %v682_v55 = vor.u32 %v680_v49, %v8332_v45  ;;  %288 = vst [vmem:[#allocation2 + $0x84] sm:$0x1] %v287_v0  ;;  %v1512_v42 = vshrl.u32 %v1328_v26, 16 }
  0x8a   : > { %v8282_v6 = vsel %vm7913_vm11, %v1505_v4, %v1509_v5  ;;  %v902_v4 = vsel %vm7868_vm8, %v674_v62, %v901_v63  ;;  %v501_v5 = vld [vmem:[%s7816_s6 + $0x50] sm:$0xf]  ;;  %v1332_v63 = vld [vmem:[#allocation2 + $0x58] sm:$0xf] }
  0x8b   : > { %1938 = vrot.lane.b32.xlu1 %v8014_v15, %s7745_s10  ;;  %v2199_v15 = vld [vmem:[#allocation2 + $0x34] sm:$0xf]  ;;  %903 = vst [vmem:[#allocation2 + $0x78] sm:$0xf] %v902_v4  ;;  %v1330_v62 = vld [vmem:[#allocation2 + $0x50] sm:$0x1] }
  0x8c   : > { %v2327_v9 = vrot.slane %v2199_v15, 5  ;;  %v683_v15 = vsel %vm7838_vm5, %v675_v51, %v682_v55  ;;  %v684_v51 = vrot.slane %v8332_v45, 4  ;;  %v342_v45 = vld [vmem:[#allocation2 + $0x8c] sm:$0x1]  ;;  %v1514_v0 = vrot.slane %v1512_v42, 4 }
  0x8d   : > { %1936 = vrot.lane.b32.xlu0 %v8049_v56, %s7745_s10  ;;  %v2198_v56 = vld [vmem:[#allocation2 + $0x30] sm:$0xe]  ;;  %904 = vst.msk [vmem:[#allocation2 + $0x7c] sm:$0xf] %vm241_vm0, %v683_v15  ;;  %v905_v15 = vld [vmem:[#allocation2 + $0x80] sm:$0x1] }
  0x8e   : > { %v2329_v18 = vrot.slane %v2327_v9, 4  ;;  %v6533_v22 = vrot.slane %v2198_v56, 9  ;;  %v694_v56 = vshrl.u32 %v502_v7, 16  ;;  %v343_v4 = vsel %vm7852_vm7, 0, %v342_v45 }
  0x8f   : > { %1942 = vrot.lane.b32.xlu1 %v8265_v58, %s7745_s10  ;;  %344 = vst [vmem:[#allocation2 + $0x8c] sm:$0x1] %v343_v4 }
  0x90   : > { %v8306_v37 = vsel %vm8053_vm14, %v2329_v18, %v2330_v20  ;;  %v8313_v19 = vsel %vm8053_vm14, %v6533_v22, %v2327_v9  ;;  %v686_v9 = vshrl.u32 %v501_v5, 16  ;;  %v8359_v20 = vrot.slane %v694_v56, 7 }
  0x91   : > { %1940 = vrot.lane.b32.xlu0 %v8272_v47, %s7745_s10  ;;  %v697_v22 = vshll.u32 %v502_v7, 16  ;;  %v1331_v7 = vld [vmem:[#allocation2 + $0x54] sm:$0xf] }
  0x92   : > { %v688_v18 = vrot.slane %v686_v9, 7  ;;  %v8377_v28 = vld [vmem:[#allocation2 + $0x78] sm:$0xf]  ;;  %v906_v9 = vsel %vm7820_vm4, %v684_v51, %v905_v15  ;;  %v2205_v15 = vld [vmem:[#allocation2 + $0x4c] sm:$0xf] }
  0x93   : > { %2067 = vrot.lane.b32.xlu1 %v8265_v58, %s7746_s11  ;;  %1006 = vst.msk [vmem:[#allocation4 + $0x50] sm:$0xf] %vm241_vm0, %v8377_v28  ;;  %907 = vst [vmem:[#allocation2 + $0x80] sm:$0x1] %v906_v9  ;;  %v2206_v9 = vld [vmem:[#allocation2 + $0x50] sm:$0x1] }
  0x95   : > { %2065 = vrot.lane.b32.xlu0 %v8272_v47, %s7746_s11 }
  0x96   : > { %v912_v34 = vld [vmem:[#allocation2 + $0x8c] sm:$0x1] }
  0x97   : > { %2071 = vrot.lane.b32.xlu1 %v8282_v6, %s7746_s11 }
  0x99   : > { %2069 = vrot.lane.b32.xlu0 %v8288_v12, %s7746_s11 }
  0x9b   : > { %2433 = vrot.lane.b32.xlu1 %v8122_v21, %s7747_s12 }
  0x9d   : > { %2431 = vrot.lane.b32.xlu0 %v8137_v50, %s7747_s12 }
  0x9f   : > { %2437 = vrot.lane.b32.xlu1 %v8161_v8, %s7747_s12 }
  0xa1   : > { %2435 = vrot.lane.b32.xlu0 %v8171_v11, %s7747_s12 }
  0xa3   : > { %2562 = vrot.lane.b32.xlu1 %v8161_v8, %s7748_s13  ;;  %v1057_v21 = vpop.permute.xlu1 %1056  ;;  %v2336_v8 = vrot.slane %v2334_v2, 4 }
  0xa4   : > { %1150 = vst.msk [vmem:[#allocation4 + $0xc] sm:$0xf] %vm10564_vm1, %v1057_v21  ;;  %v699_v21 = vor.u32 %v697_v22, %v8359_v20  ;;  %v1536_v22 = vshrl.u32 %v1331_v7, 16 }
  0xa5   : > { %2560 = vrot.lane.b32.xlu0 %v8171_v11, %s7748_s13  ;;  %v1053_v50 = vpop.permute.xlu0 %1052  ;;  %v6534_v11 = vrot.slane %v2201_v60, 9  ;;  %v8330_v61 = vsel %vm8053_vm14, %v2336_v8, %v2337_v14  ;;  %v692_v60 = vrot.slane %v688_v18, 4  ;;  %v1521_v14 = vshll.u32 %v1329_v48, 16 }
  0xa6   : > { %1148 = vst.msk [vmem:[#allocation4 + $0x4] sm:$0xf] %vm10564_vm1, %v1053_v50 }
  0xa7   : > { %2566 = vrot.lane.b32.xlu1 %v8306_v37, %s7748_s13  ;;  %v1184_v3 = vpop.permute.xlu1 %1183  ;;  %v8339_v53 = vsel %vm8053_vm14, %v6534_v11, %v2334_v2  ;;  %v689_v2 = vshll.u32 %v501_v5, 16 }
  0xa8   : > { %1279 = vst.msk [vmem:[#allocation4 + $0x4] sm:$0xf] %vm1277_vm3, %v1184_v3  ;;  %v8375_v3 = vld [vmem:[#allocation2 + $0x7c] sm:$0xf] }
  0xa9   : > { %2564 = vrot.lane.b32.xlu0 %v8313_v19, %s7748_s13  ;;  %v691_v50 = vor.u32 %v689_v2, %v688_v18  ;;  %1007 = vst.msk [vmem:[#allocation4 + $0x54] sm:$0xf] %vm241_vm0, %v8375_v3  ;;  %v1549_v18 = vshrl.u32 %v1332_v63, 16 }
  0xaa   : > { %v1051_v36 = vpop.permute.xlu0 %1050 }
  0xab   : > { %1147 = vst.msk [vmem:[#allocation4] sm:$0xf] %vm10564_vm1, %v1051_v36  ;;  %2691 = vrot.lane.b32.xlu1 %v8306_v37, %s7749_s20  ;;  %v1188_v46 = vpop.permute.xlu1 %1187  ;;  %v1525_v36 = vshrl.u32 %v1329_v48, 16  ;;  %v1545_v48 = vshll.u32 %v1332_v63, 16 }
  0xac   : > { %1281 = vst.msk [vmem:[#allocation4 + $0xc] sm:$0xf] %vm1277_vm3, %v1188_v46  ;;  %v1515_v46 = vshll.u32 %v1328_v26, 16 }
  0xad   : > { %2689 = vrot.lane.b32.xlu0 %v8313_v19, %s7749_s20  ;;  %v1527_v16 = vrot.slane %v1525_v36, 4 }
  0xaf   : > { %v1182_v52 = vpop.permute.xlu0 %1181  ;;  %2695 = vrot.lane.b32.xlu1 %v8330_v61, %s7749_s20  ;;  %v1802_v59 = vpop.permute.xlu1 %1801 }
  0xb0   : > { %1278 = vst.msk [vmem:[#allocation4] sm:$0xf] %vm1277_vm3, %v1182_v52 }
  0xb1   : > { %2693 = vrot.lane.b32.xlu0 %v8339_v53, %s7749_s20  ;;  %1897 = vst.msk [vmem:[#allocation4 + $0x4] sm:$0xf] %vm1895_vm9, %v1802_v59  ;;  %v1517_v59 = vrot.slane %v1515_v46, 5 }
  0xb3   : > { %v1186_v10 = vpop.permute.xlu0 %1185  ;;  %1068 = vrot.lane.b32.xlu1 %v8091_v23, %s7742_s7  ;;  %v1055_v24 = vpop.permute.xlu1 %1054  ;;  %v908_v23 = vld [vmem:[#allocation2 + $0x84] sm:$0xf] }
  0xb4   : > { %1149 = vst.msk [vmem:[#allocation4 + $0x8] sm:$0xf] %vm10564_vm1, %v1055_v24  ;;  %v909_v54 = vsel %vm7868_vm8, %v691_v50, %v908_v23  ;;  %v1539_v24 = vshll.u32 %v1331_v7, 16  ;;  %v1547_v23 = vrot.slane %v1545_v48, 5 }
  0xb5   : > { %1066 = vrot.lane.b32.xlu0 %v8110_v29, %s7742_s7  ;;  %1280 = vst.msk [vmem:[#allocation4 + $0x8] sm:$0xf] %vm1277_vm3, %v1186_v10  ;;  %v700_v29 = vsel %vm7838_vm5, %v692_v60, %v699_v21  ;;  %910 = vst [vmem:[#allocation2 + $0x84] sm:$0xf] %v909_v54  ;;  %v1531_v10 = vshll.u32 %v1330_v62, 16  ;;  %v701_v21 = vrot.slane %v8359_v20, 4 }
  0xb6   : > { %911 = vst.msk [vmem:[#allocation2 + $0x88] sm:$0xf] %vm241_vm0, %v700_v29  ;;  %v1333_v29 = vld [vmem:[#allocation2 + $0x5c] sm:$0x1]  ;;  %v1541_v26 = vrot.slane %v1539_v24, 5 }
  0xb7   : > { %v1800_v8 = vpop.permute.xlu0 %1799  ;;  %1072 = vrot.lane.b32.xlu1 %v8118_v40, %s7742_s7  ;;  %v913_v20 = vsel %vm7820_vm4, %v701_v21, %v912_v34  ;;  %v2209_v21 = vld [vmem:[#allocation2 + $0x5c] sm:$0x1] }
  0xb8   : > { %1896 = vst.msk [vmem:[#allocation4] sm:$0xf] %vm1895_vm9, %v1800_v8  ;;  %v1533_v8 = vrot.slane %v1531_v10, 5  ;;  %914 = vst [vmem:[#allocation2 + $0x8c] sm:$0x1] %v913_v20 }
  0xb9   : > { %1070 = vrot.lane.b32.xlu0 %v8126_v31, %s7742_s7  ;;  %v1806_v11 = vpop.permute.xlu1 %1805  ;;  %v2204_v10 = vld [vmem:[#allocation2 + $0x48] sm:$0xe] }
  0xba   : > { %1899 = vst.msk [vmem:[#allocation4 + $0xc] sm:$0xf] %vm1895_vm9, %v1806_v11  ;;  %v1538_v11 = vrot.slane %v1536_v22, 4 }
  0xbb   : > { %v1804_v32 = vpop.permute.xlu0 %1803  ;;  %1199 = vrot.lane.b32.xlu1 %v8118_v40, %s7743_s8  ;;  %v8397_v40 = vrot.slane %v1521_v14, 5  ;;  %v1551_v14 = vrot.slane %v1549_v18, 4 }
  0xbc   : > { %1898 = vst.msk [vmem:[#allocation4 + $0x8] sm:$0xf] %vm1895_vm9, %v1804_v32  ;;  %v8401_v55 = vld [vmem:[#allocation2 + $0x84] sm:$0xf]  ;;  %v1542_v46 = vor.u32 %v1541_v26, %v1538_v11  ;;  %v503_v11 = vld [vmem:[%s7816_s6 + $0x58] sm:$0xf] }
  0xbd   : > { %1197 = vrot.lane.b32.xlu0 %v8126_v31, %s7743_s8  ;;  %v1931_v41 = vpop.permute.xlu1 %1930  ;;  %v8399_v52 = vld [vmem:[#allocation2 + $0x88] sm:$0xf]  ;;  %1008 = vst.msk [vmem:[#allocation4 + $0x58] sm:$0xf] %vm241_vm0, %v8401_v55  ;;  %v1528_v56 = vor.u32 %v1527_v16, %v8397_v40  ;;  %v1552_v32 = vor.u32 %v1551_v14, %v1547_v23  ;;  %v2207_v14 = vld [vmem:[#allocation2 + $0x54] sm:$0xe] }
  0xbe   : > { %2026 = vst.msk [vmem:[#allocation4 + $0x4] sm:$0xf] %vm2024_vm10, %v1931_v41  ;;  %v1555_v41 = vshll.u32 %v1333_v29, 16  ;;  %v2351_v29 = vrot.slane %v2209_v21, 5  ;;  %v504_v26 = vld [vmem:[%s7816_s6 + $0x5c] sm:$0xf] }
  0xbf   : > { %v1929_v49 = vpop.permute.xlu0 %1928  ;;  %1203 = vrot.lane.b32.xlu1 %v8128_v43, %s7743_s8  ;;  %1009 = vst.msk [vmem:[#allocation4 + $0x5c] sm:$0xf] %vm241_vm0, %v8399_v52  ;;  %v1529_v50 = vrot.slane %v1528_v56, 4  ;;  %v1553_v51 = vrot.slane %v1552_v32, 4  ;;  %v6536_v34 = vrot.slane %v2207_v14, 9  ;;  %v711_v20 = vshrl.u32 %v504_v26, 16 }
  0xc0   : > { %2025 = vst.msk [vmem:[#allocation4] sm:$0xf] %vm2024_vm10, %v1929_v49  ;;  %v1557_v16 = vrot.slane %v1555_v41, 5 }
  0xc1   : > { %1201 = vrot.lane.b32.xlu0 %v8173_v13, %s7743_s8  ;;  %v1935_v31 = vpop.permute.xlu1 %1934  ;;  %v8435_v38 = vsel %vm7913_vm11, %v1529_v50, %v1533_v8 }
  0xc2   : > { %2028 = vst.msk [vmem:[#allocation4 + $0xc] sm:$0xf] %vm2024_vm10, %v1935_v31  ;;  %v1543_v31 = vrot.slane %v1542_v46, 4 }
  0xc3   : > { %v1933_v5 = vpop.permute.xlu0 %1932  ;;  %1817 = vrot.lane.b32.xlu1 %v8265_v58, %s7744_s9  ;;  %v1518_v58 = vor.u32 %v1517_v59, %v1514_v0 }
  0xc4   : > { %2027 = vst.msk [vmem:[#allocation4 + $0x8] sm:$0xf] %vm2024_vm10, %v1933_v5  ;;  %v8463_v45 = vsel %vm7913_vm11, %v1543_v31, %v1547_v23  ;;  %v2341_v5 = vrot.slane %v2205_v15, 5 }
  0xc5   : > { %1815 = vrot.lane.b32.xlu0 %v8272_v47, %s7744_s9  ;;  %v2060_v2 = vpop.permute.xlu1 %2059  ;;  %v1519_v54 = vrot.slane %v1518_v58, 4 }
  0xc6   : > { %2155 = vst.msk [vmem:[#allocation4 + $0x4] sm:$0xf] %vm10568_vm12, %v2060_v2  ;;  %v2343_v48 = vrot.slane %v2341_v5, 4  ;;  %v2208_v2 = vld [vmem:[#allocation2 + $0x58] sm:$0xf] }
  0xc7   : > { %v2058_v60 = vpop.permute.xlu0 %2057  ;;  %1821 = vrot.lane.b32.xlu1 %v8282_v6, %s7744_s9  ;;  %v2348_v24 = vrot.slane %v2208_v2, 5 }
  0xc8   : > { %2154 = vst.msk [vmem:[#allocation4] sm:$0xf] %vm10568_vm12, %v2058_v60 }
  0xc9   : > { %1819 = vrot.lane.b32.xlu0 %v8288_v12, %s7744_s9  ;;  %v2064_v47 = vpop.permute.xlu1 %2063  ;;  %v8523_v31 = vsel %vm8053_vm14, %v6536_v34, %v2348_v24 }
  0xca   : > { %2157 = vst.msk [vmem:[#allocation4 + $0xc] sm:$0xf] %vm10568_vm12, %v2064_v47  ;;  %v2350_v47 = vrot.slane %v2348_v24, 4 }
  0xcb   : > { %v2062_v36 = vpop.permute.xlu0 %2061  ;;  %1946 = vrot.lane.b32.xlu1 %v8282_v6, %s7745_s10  ;;  %v8443_v6 = vsel %vm7913_vm11, %v1519_v54, %v8397_v40  ;;  %v8456_v40 = vsel %vm7913_vm11, %v1553_v51, %v1557_v16  ;;  %v8515_v51 = vrot.slane %v711_v20, 7  ;;  %v1334_v20 = vld [vmem:[#allocation2 + $0x60] sm:$0xf] }
  0xcc   : > { %2156 = vst.msk [vmem:[#allocation4 + $0x8] sm:$0xf] %vm10568_vm12, %v2062_v36  ;;  %v703_v36 = vshrl.u32 %v503_v11, 16 }
  0xcd   : > { %1944 = vrot.lane.b32.xlu0 %v8288_v12, %s7745_s10  ;;  %v2426_v42 = vpop.permute.xlu1 %2425 }
  0xce   : > { %2521 = vst.msk [vmem:[#allocation4 + $0x4] sm:$0xf] %vm10567_vm13, %v2426_v42  ;;  %v8513_v42 = vsel %vm8053_vm14, %v2350_v47, %v2351_v29  ;;  %v705_v46 = vrot.slane %v703_v36, 7 }
  0xcf   : > { %v2424_v49 = vpop.permute.xlu0 %2423  ;;  %1950 = vrot.lane.b32.xlu1 %v8435_v38, %s7745_s10 }
  0xd0   : > { %2520 = vst.msk [vmem:[#allocation4] sm:$0xf] %vm10567_vm13, %v2424_v49  ;;  %v706_v49 = vshll.u32 %v503_v11, 16 }
  0xd1   : > { %1948 = vrot.lane.b32.xlu0 %v8443_v6, %s7745_s10  ;;  %v2430_v12 = vpop.permute.xlu1 %2429 }
  0xd2   : > { %2523 = vst.msk [vmem:[#allocation4 + $0xc] sm:$0xf] %vm10567_vm13, %v2430_v12  ;;  %v714_v12 = vshll.u32 %v504_v26, 16  ;;  %v708_v15 = vor.u32 %v706_v49, %v705_v46  ;;  %v345_v26 = vld [vmem:[#allocation2 + $0x98] sm:$0x1]  ;;  %v1560_v49 = vshrl.u32 %v1334_v20, 16 }
  0xd3   : > { %v2428_v62 = vpop.permute.xlu0 %2427  ;;  %2075 = vrot.lane.b32.xlu1 %v8435_v38, %s7746_s11  ;;  %v346_v34 = vsel %vm7852_vm7, 0, %v345_v26 }
  0xd4   : > { %2522 = vst.msk [vmem:[#allocation4 + $0x8] sm:$0xf] %vm10567_vm13, %v2428_v62  ;;  %v709_v62 = vrot.slane %v705_v46, 4  ;;  %347 = vst [vmem:[#allocation2 + $0x98] sm:$0x1] %v346_v34 }
  0xd5   : > { %2073 = vrot.lane.b32.xlu0 %v8443_v6, %s7746_s11  ;;  %v2555_v63 = vpop.permute.xlu1 %2554 }
  0xd6   : > { %2650 = vst.msk [vmem:[#allocation4 + $0x4] sm:$0xf] %vm10565_vm15, %v2555_v63  ;;  %v292_v63 = vld [vmem:[#allocation2 + $0x9c] sm:$0x1] }
  0xd7   : > { %v2553_v0 = vpop.permute.xlu0 %2552  ;;  %2079 = vrot.lane.b32.xlu1 %v8456_v40, %s7746_s11 }
  0xd8   : > { %2649 = vst.msk [vmem:[#allocation4] sm:$0xf] %vm10565_vm15, %v2553_v0 }
  0xd9   : > { %2077 = vrot.lane.b32.xlu0 %v8463_v45, %s7746_s11  ;;  %v2559_v59 = vpop.permute.xlu1 %2558 }
  0xda   : > { %2652 = vst.msk [vmem:[#allocation4 + $0xc] sm:$0xf] %vm10565_vm15, %v2559_v59  ;;  %v716_v59 = vor.u32 %v714_v12, %v8515_v51 }
  0xdb   : > { %v2557_v4 = vpop.permute.xlu0 %2556  ;;  %2441 = vrot.lane.b32.xlu1 %v8306_v37, %s7747_s12  ;;  %v2344_v37 = vrot.slane %v2206_v9, 5 }
  0xdc   : > { %2651 = vst.msk [vmem:[#allocation4 + $0x8] sm:$0xf] %vm10565_vm15, %v2557_v4  ;;  %v717_v9 = vsel %vm7838_vm5, %v709_v62, %v716_v59 }
  0xdd   : > { %2439 = vrot.lane.b32.xlu0 %v8313_v19, %s7747_s12  ;;  %v2684_v7 = vpop.permute.xlu1 %2683  ;;  %v6535_v19 = vrot.slane %v2204_v10, 9  ;;  %v8488_v22 = vsel %vm8053_vm14, %v2343_v48, %v2344_v37  ;;  %v505_v10 = vld [vmem:[%s7816_s6 + $0x60] sm:$0xf]  ;;  %v506_v48 = vld [vmem:[%s7816_s6 + $0x64] sm:$0xf] }
  0xde   : > { %2779 = vst.msk [vmem:[#allocation4 + $0x4] sm:$0xf] %vm10563_vm6, %v2684_v7  ;;  %v720_v37 = vshrl.u32 %v505_v10, 16 }
  0xdf   : > { %v2682_v56 = vpop.permute.xlu0 %2681  ;;  %2445 = vrot.lane.b32.xlu1 %v8330_v61, %s7747_s12  ;;  %v8495_v50 = vsel %vm8053_vm14, %v6535_v19, %v2341_v5  ;;  %v293_v5 = vsel %vm7820_vm4, 0, %v292_v63  ;;  %918 = vst.msk [vmem:[#allocation2 + $0x94] sm:$0xf] %vm241_vm0, %v717_v9  ;;  %v919_v9 = vld [vmem:[#allocation2 + $0x98] sm:$0x1] }
  0xe0   : > { %2778 = vst.msk [vmem:[#allocation4] sm:$0xf] %vm10563_vm6, %v2682_v56  ;;  %294 = vst [vmem:[#allocation2 + $0x9c] sm:$0x1] %v293_v5  ;;  %v722_v19 = vrot.slane %v720_v37, 7  ;;  %v1562_v5 = vrot.slane %v1560_v49, 4 }
  0xe1   : > { %2443 = vrot.lane.b32.xlu0 %v8339_v53, %s7747_s12  ;;  %v2688_v18 = vpop.permute.xlu1 %2687 }
  0xe2   : > { %2781 = vst.msk [vmem:[#allocation4 + $0xc] sm:$0xf] %vm10563_vm6, %v2688_v18  ;;  %v728_v18 = vshrl.u32 %v506_v48, 16 }
  0xe3   : > { %v2686_v58 = vpop.permute.xlu0 %2685  ;;  %2570 = vrot.lane.b32.xlu1 %v8330_v61, %s7748_s13  ;;  %v289_v61 = vld [vmem:[#allocation2 + $0x90] sm:$0x1] }
  0xe4   : > { %2780 = vst.msk [vmem:[#allocation4 + $0x8] sm:$0xf] %vm10563_vm6, %v2686_v58  ;;  %v723_v58 = vshll.u32 %v505_v10, 16  ;;  %v8544_v24 = vrot.slane %v728_v18, 7 }
  0xe5   : > { %2568 = vrot.lane.b32.xlu0 %v8339_v53, %s7748_s13  ;;  %v1061_v60 = vpop.permute.xlu1 %1060  ;;  %v290_v53 = vsel %vm7820_vm4, 0, %v289_v61  ;;  %v726_v61 = vrot.slane %v722_v19, 4 }
  0xe6   : > { %1152 = vst.msk [vmem:[#allocation4 + $0x14] sm:$0xf] %vm10564_vm1, %v1061_v60  ;;  %291 = vst [vmem:[#allocation2 + $0x90] sm:$0x1] %v290_v53  ;;  %v731_v60 = vshll.u32 %v506_v48, 16 }
  0xe7   : > { %v1059_v8 = vpop.permute.xlu0 %1058  ;;  %2574 = vrot.lane.b32.xlu1 %v8488_v22, %s7748_s13  ;;  %v7598_v23 = vld [vmem:[#allocation4] sm:$0xff]   ;;  %v1335_v53 = vld [vmem:[#allocation2 + $0x64] sm:$0xf]  ;;  %v1337_v48 = vld [vmem:[#allocation2 + $0x6c] sm:$0xf] }
  0xe8   : > { %1151 = vst.msk [vmem:[#allocation4 + $0x10] sm:$0xf] %vm10564_vm1, %v1059_v8  ;;  %7388 = vmatprep.mubr.msk.bf16.mxu0 %vm10566_vm2, %v7598_v23  ;;  %v733_v8 = vor.u32 %v731_v60, %v8544_v24  ;;  %v725_v23 = vor.u32 %v723_v58, %v722_v19 }
  0xe9   : > { %2572 = vrot.lane.b32.xlu0 %v8495_v50, %s7748_s13  ;;  %v1065_v54 = vpop.permute.xlu1 %1064 }
  0xea   : > { %1154 = vst.msk [vmem:[#allocation4 + $0x1c] sm:$0xf] %vm10564_vm1, %v1065_v54  ;;  %v734_v47 = vsel %vm7838_vm5, %v726_v61, %v733_v8  ;;  %v8559_v54 = vld [vmem:[#allocation2 + $0x94] sm:$0xf]  ;;  %v1587_v61 = vshll.u32 %v1337_v48, 16 }
  0xeb   : > { %v1063_v32 = vpop.permute.xlu0 %1062  ;;  %2699 = vrot.lane.b32.xlu1 %v8488_v22, %s7749_s20  ;;  %v7599_v41 = vld [vmem:[#allocation4 + $0x8] sm:$0xff]   ;;  %925 = vst.msk [vmem:[#allocation2 + $0xa0] sm:$0xf] %vm241_vm0, %v734_v47  ;;  %1011 = vst.msk [vmem:[#allocation4 + $0x64] sm:$0xf] %vm241_vm0, %v8559_v54 }
  0xec   : > { %1153 = vst.msk [vmem:[#allocation4 + $0x18] sm:$0xf] %vm10564_vm1, %v1063_v32  ;;  %7389 = vmatmul.mubr.msk.bf16.vlgmr.msra.gmra.mxu0 %vm10566_vm2, %v7599_v41  ;;  %v1569_v32 = vshll.u32 %v1335_v53, 16  ;;  %v1573_v41 = vshrl.u32 %v1335_v53, 16  ;;  %v1589_v34 = vrot.slane %v1587_v61, 5 }
  0xed   : > { %2697 = vrot.lane.b32.xlu0 %v8495_v50, %s7749_s20  ;;  %v1192_v16 = vpop.permute.xlu1 %1191  ;;  %v915_v4 = vld [vmem:[#allocation2 + $0x90] sm:$0xf] }
  0xee   : > { %1283 = vst.msk [vmem:[#allocation4 + $0x14] sm:$0xf] %vm1277_vm3, %v1192_v16  ;;  %v916_v56 = vsel %vm7868_vm8, %v708_v15, %v915_v4  ;;  %v1563_v16 = vshll.u32 %v1334_v20, 16  ;;  %v1571_v62 = vrot.slane %v1569_v32, 5  ;;  %v1575_v63 = vrot.slane %v1573_v41, 4 }
  0xef   : > { %v1190_v0 = vpop.permute.xlu0 %1189  ;;  %2703 = vrot.lane.b32.xlu1 %v8513_v42, %s7749_s20  ;;  %917 = vst [vmem:[#allocation2 + $0x90] sm:$0xf] %v916_v56  ;;  %v1336_v15 = vld [vmem:[#allocation2 + $0x68] sm:$0x1]  ;;  %v1338_v4 = vld [vmem:[#allocation2 + $0x70] sm:$0xf] }
  0xf0   : > { %1282 = vst.msk [vmem:[#allocation4 + $0x10] sm:$0xf] %vm1277_vm3, %v1190_v0  ;;  %v1576_v18 = vor.u32 %v1575_v63, %v1571_v62  ;;  %v1593_v19 = vshll.u32 %v1338_v4, 16  ;;  %v1597_v58 = vshrl.u32 %v1338_v4, 16 }
  0xf1   : > { %2701 = vrot.lane.b32.xlu0 %v8523_v31, %s7749_s20  ;;  %v1196_v7 = vpop.permute.xlu1 %1195 }
  0xf2   : > { %1285 = vst.msk [vmem:[#allocation4 + $0x1c] sm:$0xf] %vm1277_vm3, %v1196_v7  ;;  %v8581_v0 = vld [vmem:[#allocation2 + $0xa0] sm:$0xf]  ;;  %v1565_v7 = vrot.slane %v1563_v16, 5  ;;  %v1595_v53 = vrot.slane %v1593_v19, 5 }
  0xf3   : > { %v1194_v2 = vpop.permute.xlu0 %1193  ;;  %1076 = vrot.lane.b32.xlu1 %v8128_v43, %s7742_s7  ;;  %v922_v43 = vld [vmem:[#allocation2 + $0x9c] sm:$0xf]  ;;  %1013 = vst.msk [vmem:[#allocation4 + $0x6c] sm:$0xf] %vm241_vm0, %v8581_v0  ;;  %v1599_v47 = vrot.slane %v1597_v58, 4 }
  0xf4   : > { %1284 = vst.msk [vmem:[#allocation4 + $0x18] sm:$0xf] %vm1277_vm3, %v1194_v2  ;;  %v1579_v2 = vshll.u32 %v1336_v15, 16 }
  0xf5   : > { %1074 = vrot.lane.b32.xlu0 %v8173_v13, %s7742_s7  ;;  %v1810_v21 = vpop.permute.xlu1 %1809  ;;  %v923_v13 = vsel %vm7868_vm8, %v725_v23, %v922_v43  ;;  %v735_v23 = vrot.slane %v8544_v24, 4  ;;  %v1600_v41 = vor.u32 %v1599_v47, %v1595_v53  ;;  %v295_v47 = vld [vmem:[#allocation2 + $0xa8] sm:$0x1] }
  0xf6   : > { %1901 = vst.msk [vmem:[#allocation4 + $0x14] sm:$0xf] %vm1895_vm9, %v1810_v21  ;;  %v8561_v11 = vld [vmem:[#allocation2 + $0x90] sm:$0xf]  ;;  %924 = vst [vmem:[#allocation2 + $0x9c] sm:$0xf] %v923_v13  ;;  %v1566_v21 = vor.u32 %v1565_v7, %v1562_v5 }
  0xf7   : > { %v1808_v14 = vpop.permute.xlu0 %1807  ;;  %1080 = vrot.lane.b32.xlu1 %v8227_v27, %s7742_s7  ;;  %1010 = vst.msk [vmem:[#allocation4 + $0x60] sm:$0xf] %vm241_vm0, %v8561_v11  ;;  %v1581_v43 = vrot.slane %v1579_v2, 5  ;;  %v1339_v13 = vld [vmem:[#allocation2 + $0x74] sm:$0x1] }
  0xf8   : > { %1900 = vst.msk [vmem:[#allocation4 + $0x10] sm:$0xf] %vm1895_vm9, %v1808_v14  ;;  %v1577_v14 = vrot.slane %v1576_v18, 4  ;;  %v2210_v2 = vld [vmem:[#allocation2 + $0x60] sm:$0xe] }
  0xf9   : > { %1078 = vrot.lane.b32.xlu0 %v8240_v39, %s7742_s7  ;;  %v1814_v29 = vpop.permute.xlu1 %1813 }
  0xfa   : > { %1903 = vst.msk [vmem:[#allocation4 + $0x1c] sm:$0xf] %vm1895_vm9, %v1814_v29  ;;  %v1567_v29 = vrot.slane %v1566_v21, 4  ;;  %v8616_v32 = vsel %vm7913_vm11, %v1577_v14, %v1581_v43 }
  0xfb   : > { %v1812_v36 = vpop.permute.xlu0 %1811  ;;  %1207 = vrot.lane.b32.xlu1 %v8227_v27, %s7743_s8  ;;  %v718_v27 = vrot.slane %v8515_v51, 4  ;;  %v348_v51 = vld [vmem:[#allocation2 + $0xa4] sm:$0x1] }
  0xfc   : > { %1902 = vst.msk [vmem:[#allocation4 + $0x18] sm:$0xf] %vm1895_vm9, %v1812_v36  ;;  %v349_v56 = vsel %vm7852_vm7, 0, %v348_v51 }
  0xfd   : > { %1205 = vrot.lane.b32.xlu0 %v8240_v39, %s7743_s8  ;;  %v1939_v46 = vpop.permute.xlu1 %1938  ;;  %v8583_v59 = vld [vmem:[#allocation2 + $0x9c] sm:$0xf]  ;;  %v920_v37 = vsel %vm7820_vm4, %v718_v27, %v919_v9  ;;  %350 = vst [vmem:[#allocation2 + $0xa4] sm:$0x1] %v349_v56  ;;  %v1601_v27 = vrot.slane %v1600_v41, 4 }
  0xfe   : > { %2030 = vst.msk [vmem:[#allocation4 + $0x14] sm:$0xf] %vm2024_vm10, %v1939_v46  ;;  %921 = vst [vmem:[#allocation2 + $0x98] sm:$0x1] %v920_v37  ;;  %v1603_v46 = vshll.u32 %v1339_v13, 16  ;;  %v296_v13 = vsel %vm7820_vm4, 0, %v295_v47 }
  0xff   : > { %v1937_v12 = vpop.permute.xlu0 %1936  ;;  %1211 = vrot.lane.b32.xlu1 %v8237_v35, %s7743_s8  ;;  %1012 = vst.msk [vmem:[#allocation4 + $0x68] sm:$0xf] %vm241_vm0, %v8583_v59  ;;  %v2211_v9 = vld [vmem:[#allocation2 + $0x64] sm:$0xf]  ;;  %v2212_v37 = vld [vmem:[#allocation2 + $0x68] sm:$0x1] }
 0x100   : > { %2029 = vst.msk [vmem:[#allocation4 + $0x10] sm:$0xf] %vm2024_vm10, %v1937_v12  ;;  %v1605_v63 = vrot.slane %v1603_v46, 5  ;;  %v2358_v58 = vrot.slane %v2212_v37, 5  ;;  %297 = vst [vmem:[#allocation2 + $0xa8] sm:$0x1] %v296_v13 }
 0x101   : > { %1209 = vrot.lane.b32.xlu0 %v8250_v25, %s7743_s8  ;;  %v1943_v39 = vpop.permute.xlu1 %1942 }
 0x102   : > { %2032 = vst.msk [vmem:[#allocation4 + $0x1c] sm:$0xf] %vm2024_vm10, %v1943_v39 }
 0x103   : > { %v1941_v10 = vpop.permute.xlu0 %1940  ;;  %1825 = vrot.lane.b32.xlu1 %v8435_v38, %s7744_s9  ;;  %v1584_v38 = vshrl.u32 %v1337_v48, 16 }
 0x104   : > { %2031 = vst.msk [vmem:[#allocation4 + $0x18] sm:$0xf] %vm2024_vm10, %v1941_v10  ;;  %v926_v36 = vld [vmem:[#allocation2 + $0xa4] sm:$0x1]  ;;  %v2355_v10 = vrot.slane %v2211_v9, 5 }
 0x105   : > { %1823 = vrot.lane.b32.xlu0 %v8443_v6, %s7744_s9  ;;  %v2068_v60 = vpop.permute.xlu1 %2067  ;;  %v1586_v26 = vrot.slane %v1584_v38, 4  ;;  %v927_v24 = vsel %vm7820_vm4, %v735_v23, %v926_v36  ;;  %v2215_v23 = vld [vmem:[#allocation2 + $0x74] sm:$0x1]  ;;  %v508_v36 = vld [vmem:[%s7816_s6 + $0x6c] sm:$0xf] }
 0x106   : > { %2159 = vst.msk [vmem:[#allocation4 + $0x14] sm:$0xf] %vm10568_vm12, %v2068_v60  ;;  %928 = vst [vmem:[#allocation2 + $0xa4] sm:$0x1] %v927_v24  ;;  %v2357_v19 = vrot.slane %v2355_v10, 4 }
 0x107   : > { %v2066_v8 = vpop.permute.xlu0 %2065  ;;  %1829 = vrot.lane.b32.xlu1 %v8456_v40, %s7744_s9  ;;  %v1590_v16 = vor.u32 %v1589_v34, %v1586_v26  ;;  %v2214_v60 = vld [vmem:[#allocation2 + $0x70] sm:$0xf]  ;;  %v507_v34 = vld [vmem:[%s7816_s6 + $0x68] sm:$0xf] }
 0x108   : > { %2158 = vst.msk [vmem:[#allocation4 + $0x10] sm:$0xf] %vm10568_vm12, %v2066_v8  ;;  %v8668_v38 = vsel %vm8053_vm14, %v2357_v19, %v2358_v58  ;;  %v2362_v61 = vrot.slane %v2214_v60, 5  ;;  %v737_v41 = vshrl.u32 %v507_v34, 16  ;;  %v510_v60 = vld [vmem:[%s7816_s6 + $0x74] sm:$0xf] }
 0x109   : > { %1827 = vrot.lane.b32.xlu0 %v8463_v45, %s7744_s9  ;;  %v2072_v6 = vpop.permute.xlu1 %2071  ;;  %v1591_v39 = vrot.slane %v1590_v16, 4 }
 0x10a   : > { %2161 = vst.msk [vmem:[#allocation4 + $0x1c] sm:$0xf] %vm10568_vm12, %v2072_v6  ;;  %v2365_v6 = vrot.slane %v2215_v23, 5 }
 0x10b   : > { %v2070_v20 = vpop.permute.xlu0 %2069  ;;  %1954 = vrot.lane.b32.xlu1 %v8456_v40, %s7745_s10  ;;  %v8623_v40 = vsel %vm7913_vm11, %v1567_v29, %v1571_v62  ;;  %v8636_v62 = vsel %vm7913_vm11, %v1601_v27, %v1605_v63  ;;  %v8643_v51 = vsel %vm7913_vm11, %v1591_v39, %v1595_v53  ;;  %v739_v27 = vrot.slane %v737_v41, 7 }
 0x10c   : > { %2160 = vst.msk [vmem:[#allocation4 + $0x18] sm:$0xf] %vm10568_vm12, %v2070_v20  ;;  %v740_v39 = vshll.u32 %v507_v34, 16 }
 0x10d   : > { %1952 = vrot.lane.b32.xlu0 %v8463_v45, %s7745_s10  ;;  %v2434_v49 = vpop.permute.xlu1 %2433 }
 0x10e   : > { %2525 = vst.msk [vmem:[#allocation4 + $0x14] sm:$0xf] %vm10567_vm13, %v2434_v49  ;;  %v745_v49 = vshrl.u32 %v508_v36, 16 }
 0x10f   : > { %v2432_v12 = vpop.permute.xlu0 %2431  ;;  %1958 = vrot.lane.b32.xlu1 %v8616_v32, %s7745_s10 }
 0x110   : > { %2524 = vst.msk [vmem:[#allocation4 + $0x10] sm:$0xf] %vm10567_vm13, %v2432_v12  ;;  %v378_v12 = vld [vmem:[#allocation3 + $0x18] sm:$0x1]  ;;  %v8714_v9 = vrot.slane %v745_v49, 7  ;;  %v7608_v49 = vld [vmem:[#allocation5 + $0x130] sm:$0xff]  }
 0x111   : > { %1956 = vrot.lane.b32.xlu0 %v8623_v40, %s7745_s10  ;;  %v2438_v45 = vpop.permute.xlu1 %2437 }
 0x112   : > { %2527 = vst.msk [vmem:[#allocation4 + $0x1c] sm:$0xf] %vm10567_vm13, %v2438_v45 }
 0x113   : > { %v2436_v15 = vpop.permute.xlu0 %2435  ;;  %2083 = vrot.lane.b32.xlu1 %v8616_v32, %s7746_s11 }
 0x114   : > { %2526 = vst.msk [vmem:[#allocation4 + $0x18] sm:$0xf] %vm10567_vm13, %v2436_v15 }
 0x115   : > { %2081 = vrot.lane.b32.xlu0 %v8623_v40, %s7746_s11  ;;  %v2563_v4 = vpop.permute.xlu1 %2562 }
 0x116   : > { %2654 = vst.msk [vmem:[#allocation4 + $0x14] sm:$0xf] %vm10565_vm15, %v2563_v4 }
 0x117   : > { %v2561_v5 = vpop.permute.xlu0 %2560  ;;  %2087 = vrot.lane.b32.xlu1 %v8636_v62, %s7746_s11 }
 0x118   : > { %2653 = vst.msk [vmem:[#allocation4 + $0x10] sm:$0xf] %vm10565_vm15, %v2561_v5  ;;  %v743_v5 = vrot.slane %v739_v27, 4 }
 0x119   : > { %2085 = vrot.lane.b32.xlu0 %v8643_v51, %s7746_s11  ;;  %v2567_v7 = vpop.permute.xlu1 %2566 }
 0x11a   : > { %2656 = vst.msk [vmem:[#allocation4 + $0x1c] sm:$0xf] %vm10565_vm15, %v2567_v7  ;;  %v298_v7 = vld [vmem:[#allocation2 + $0xb4] sm:$0x1] }
 0x11b   : > { %v2565_v56 = vpop.permute.xlu0 %2564  ;;  %2449 = vrot.lane.b32.xlu1 %v8488_v22, %s7747_s12  ;;  %v299_v37 = vsel %vm7820_vm4, 0, %v298_v7 }
 0x11c   : > { %2655 = vst.msk [vmem:[#allocation4 + $0x18] sm:$0xf] %vm10565_vm15, %v2565_v56  ;;  %v748_v56 = vshll.u32 %v508_v36, 16  ;;  %300 = vst [vmem:[#allocation2 + $0xb4] sm:$0x1] %v299_v37 }
 0x11d   : > { %2447 = vrot.lane.b32.xlu0 %v8495_v50, %s7747_s12  ;;  %v2692_v48 = vpop.permute.xlu1 %2691  ;;  %v6537_v50 = vrot.slane %v2210_v2, 9  ;;  %v375_v2 = vld [vmem:[#allocation3 + $0xc] sm:$0x1] }
 0x11e   : > { %2783 = vst.msk [vmem:[#allocation4 + $0x14] sm:$0xf] %vm10563_vm6, %v2692_v48  ;;  %v929_v48 = vld [vmem:[#allocation2 + $0xa8] sm:$0xf]  ;;  %v750_v19 = vor.u32 %v748_v56, %v8714_v9  ;;  %v351_v56 = vld [vmem:[#allocation2 + $0xb0] sm:$0x1] }
 0x11f   : > { %v2690_v18 = vpop.permute.xlu0 %2689  ;;  %2453 = vrot.lane.b32.xlu1 %v8513_v42, %s7747_s12  ;;  %v8675_v14 = vsel %vm8053_vm14, %v6537_v50, %v2355_v10  ;;  %v742_v10 = vor.u32 %v740_v39, %v739_v27  ;;  %v7609_v27 = vld [vmem:[#allocation5 + $0xf0] sm:$0xff]  }
 0x120   : > { %2782 = vst.msk [vmem:[#allocation4 + $0x10] sm:$0xf] %vm10563_vm6, %v2690_v18 }
 0x121   : > { %2451 = vrot.lane.b32.xlu0 %v8523_v31, %s7747_s12  ;;  %v2696_v22 = vpop.permute.xlu1 %2695  ;;  %v930_v58 = vsel %vm7868_vm8, %v742_v10, %v929_v48 }
 0x122   : > { %2785 = vst.msk [vmem:[#allocation4 + $0x1c] sm:$0xf] %vm10563_vm6, %v2696_v22  ;;  %v509_v22 = vld [vmem:[%s7816_s6 + $0x70] sm:$0xf]  ;;  %931 = vst [vmem:[#allocation2 + $0xa8] sm:$0xf] %v930_v58 }
 0x123   : > { %v2694_v21 = vpop.permute.xlu0 %2693  ;;  %2578 = vrot.lane.b32.xlu1 %v8513_v42, %s7748_s13  ;;  %v2213_v42 = vld [vmem:[#allocation2 + $0x6c] sm:$0xe]  ;;  %v757_v13 = vshll.u32 %v509_v22, 16  ;;  %v936_v39 = vld [vmem:[#allocation2 + $0xb4] sm:$0xf] }
 0x124   : > { %2784 = vst.msk [vmem:[#allocation4 + $0x18] sm:$0xf] %vm10563_vm6, %v2694_v21  ;;  %v6538_v26 = vrot.slane %v2213_v42, 9  ;;  %vm370_vm6 = vcmask 1040384   ;;  %v433_v42 = vld [vmem:[#allocation3 + $0x20] sm:$0x1] }
 0x125   : > { %2576 = vrot.lane.b32.xlu0 %v8523_v31, %s7748_s13  ;;  %v1069_v8 = vpop.permute.xlu1 %1068  ;;  %v2364_v31 = vrot.slane %v2362_v61, 4 }
 0x126   : > { %1156 = vst.msk [vmem:[#allocation4 + $0x24] sm:$0xf] %vm10564_vm1, %v1069_v8  ;;  %v8701_v63 = vsel %vm8053_vm14, %v6538_v26, %v2362_v61  ;;  %v754_v61 = vshrl.u32 %v509_v22, 16  ;;  %v762_v8 = vshrl.u32 %v510_v60, 16  ;;  %v765_v26 = vshll.u32 %v510_v60, 16  ;;  %v7611_v22 = vld [vmem:[#allocation5 + $0xe8] sm:$0xff]  }
 0x127   : > { %v1067_v43 = vpop.permute.xlu0 %1066  ;;  %2582 = vrot.lane.b32.xlu1 %v8668_v38, %s7748_s13  ;;  %v7600_v53 = vld [vmem:[#allocation4 + $0x10] sm:$0xff]   ;;  %v8693_v46 = vsel %vm8053_vm14, %v2364_v31, %v2365_v6  ;;  %v7607_v31 = vld [vmem:[#allocation5 + $0xf8] sm:$0xff]  }
 0x128   : > { %1155 = vst.msk [vmem:[#allocation4 + $0x20] sm:$0xf] %vm10564_vm1, %v1067_v43  ;;  %7392 = vmatprep.mubr.msk.bf16.mxu0 %vm10566_vm2, %v7600_v53  ;;  %v7606_v43 = vld [vmem:[#allocation5 + $0x138] sm:$0xff]   ;;  %v756_v6 = vrot.slane %v754_v61, 7 }
 0x129   : > { %2580 = vrot.lane.b32.xlu0 %v8675_v14, %s7748_s13  ;;  %v1073_v29 = vpop.permute.xlu1 %1072  ;;  %6974 = vmatprep.subr.bf16.mxu1 %v7606_v43 }
 0x12a   : > { %1158 = vst.msk [vmem:[#allocation4 + $0x2c] sm:$0xf] %vm10564_vm1, %v1073_v29  ;;  %v8744_v29 = vrot.slane %v762_v8, 7  ;;  %6975 = vmatpush3.bf16.msra.mxu1 %v7607_v31  ;;  %v760_v36 = vrot.slane %v756_v6, 4  ;;  %v1344_v8 = vld [vmem:[#allocation2 + $0x88] sm:$0xf] }
 0x12b   : > { %v1071_v20 = vpop.permute.xlu0 %1070  ;;  %2707 = vrot.lane.b32.xlu1 %v8668_v38, %s7749_s20  ;;  %v7601_v24 = vld [vmem:[#allocation4 + $0x18] sm:$0xff]   ;;  %6976 = vmatprep.subr.bf16.mxu1 %v7608_v49  ;;  %v372_v31 = vld [vmem:[#allocation3] sm:$0x1]  ;;  %v1641_v49 = vshll.u32 %v1344_v8, 16 }
 0x12c   : > { %1157 = vst.msk [vmem:[#allocation4 + $0x28] sm:$0xf] %vm10564_vm1, %v1071_v20  ;;  %7393 = vmatmul.mubr.msk.bf16.gmra.mxu0 %vm10566_vm2, %v7601_v24  ;;  %vm10594_vm1 = vsmask.f32 256  ;;  %v759_v20 = vor.u32 %v757_v13, %v756_v6  ;;  %v1341_v24 = vld [vmem:[#allocation2 + $0x7c] sm:$0xf] }
 0x12d   : > { %2705 = vrot.lane.b32.xlu0 %v8675_v14, %s7749_s20  ;;  %v1200_v16 = vpop.permute.xlu1 %1199  ;;  %vm8705_vm15 = vmand %vm370_vm6, %vm10594_vm1  ;;  %vm10597_vm1 = vsmask.f32 7938  ;;  %v1617_v48 = vshll.u32 %v1341_v24, 16  ;;  %v1621_v37 = vshrl.u32 %v1341_v24, 16  ;;  %v752_v13 = vrot.slane %v8714_v9, 4 }
 0x12e   : > { %1287 = vst.msk [vmem:[#allocation4 + $0x24] sm:$0xf] %vm1277_vm3, %v1200_v16  ;;  %v379_v4 = vsel %vm8705_vm15, 0, %v378_v12  ;;  %v376_v21 = vsel %vm8705_vm15, 0, %v375_v2  ;;  %vm8733_vm2 = vmand %vm370_vm6, %vm10597_vm1  ;;  %v767_v16 = vor.u32 %v765_v26, %v8744_v29  ;;  %v937_v7 = vsel %vm7868_vm8, %v759_v20, %v936_v39  ;;  %6977 = vmatpush3.bf16.msra.mxu1 %v7609_v27 }
 0x12f   : > { %v1198_v15 = vpop.permute.xlu0 %1197  ;;  %2711 = vrot.lane.b32.xlu1 %v8693_v46, %s7749_s20  ;;  %380 = vst [vmem:[#allocation3 + $0x18] sm:$0x1] %v379_v4  ;;  %377 = vst [vmem:[#allocation3 + $0xc] sm:$0x1] %v376_v21  ;;  %v434_v47 = vsel %vm8733_vm2, 0, %v433_v42  ;;  %v8779_v21 = vrot.slane %v1617_v48, 5 }
 0x130   : > { %1286 = vst.msk [vmem:[#allocation4 + $0x20] sm:$0xf] %vm1277_vm3, %v1198_v15  ;;  %435 = vst [vmem:[#allocation3 + $0x20] sm:$0x1] %v434_v47  ;;  %v1340_v15 = vld [vmem:[#allocation2 + $0x78] sm:$0xf] }
 0x131   : > { %2709 = vrot.lane.b32.xlu0 %v8701_v63, %s7749_s20  ;;  %v1204_v18 = vpop.permute.xlu1 %1203  ;;  %v8756_v4 = vld [vmem:[#allocation2 + $0xa8] sm:$0xf]  ;;  %938 = vst [vmem:[#allocation2 + $0xb4] sm:$0xf] %v937_v7  ;;  %v1608_v58 = vshrl.u32 %v1340_v15, 16  ;;  %v1611_v60 = vshll.u32 %v1340_v15, 16 }
 0x132   : > { %1289 = vst.msk [vmem:[#allocation4 + $0x2c] sm:$0xf] %vm1277_vm3, %v1204_v18  ;;  %v352_v18 = vsel %vm7852_vm7, 0, %v351_v56  ;;  %v1623_v61 = vrot.slane %v1621_v37, 4  ;;  %v7612_v42 = vld [vmem:[#allocation5 + $0x120] sm:$0xff]   ;;  %v373_v24 = vsel %vm8705_vm15, 0, %v372_v31 }
 0x133   : > { %v1202_v50 = vpop.permute.xlu0 %1201  ;;  %1084 = vrot.lane.b32.xlu1 %v8237_v35, %s7742_s7  ;;  %v751_v35 = vsel %vm7838_vm5, %v743_v5, %v750_v19  ;;  %v768_v5 = vsel %vm7838_vm5, %v760_v36, %v767_v16  ;;  %1014 = vst.msk [vmem:[#allocation4 + $0x70] sm:$0xf] %vm241_vm0, %v8756_v4  ;;  %v7610_v19 = vld [vmem:[#allocation5 + $0x128] sm:$0xff]   ;;  %353 = vst [vmem:[#allocation2 + $0xb0] sm:$0x1] %v352_v18  ;;  %v7613_v47 = vld [vmem:[#allocation5 + $0xe0] sm:$0xff]  }
 0x134   : > { %1288 = vst.msk [vmem:[#allocation4 + $0x28] sm:$0xf] %vm1277_vm3, %v1202_v50  ;;  %6978 = vmatprep.subr.bf16.mxu1 %v7610_v19  ;;  %v1613_v6 = vrot.slane %v1611_v60, 5  ;;  %v1624_v36 = vor.u32 %v1623_v61, %v8779_v21  ;;  %v1645_v16 = vshrl.u32 %v1344_v8, 16  ;;  %374 = vst [vmem:[#allocation3] sm:$0x1] %v373_v24 }
 0x135   : > { %1082 = vrot.lane.b32.xlu0 %v8250_v25, %s7742_s7  ;;  %v1818_v53 = vpop.permute.xlu1 %1817  ;;  %932 = vst.msk [vmem:[#allocation2 + $0xac] sm:$0xf] %vm241_vm0, %v751_v35  ;;  %v430_v25 = vld [vmem:[#allocation3 + $0x14] sm:$0x1]  ;;  %939 = vst.msk [vmem:[#allocation2 + $0xb8] sm:$0xf] %vm241_vm0, %v768_v5  ;;  %6979 = vmatpush3.bf16.msra.mxu1 %v7611_v22 }
 0x136   : > { %1905 = vst.msk [vmem:[#allocation4 + $0x24] sm:$0xf] %vm1895_vm9, %v1818_v53  ;;  %v431_v41 = vsel %vm8733_vm2, 0, %v430_v25  ;;  %v1610_v35 = vrot.slane %v1608_v58, 4  ;;  %v1343_v53 = vld [vmem:[#allocation2 + $0x84] sm:$0xf]  ;;  %6980 = vmatprep.subr.bf16.mxu1 %v7612_v42 }
 0x137   : > { %v1816_v34 = vpop.permute.xlu0 %1815  ;;  %1088 = vrot.lane.b32.xlu1 %v8375_v3, %s7742_s7  ;;  %432 = vst [vmem:[#allocation3 + $0x14] sm:$0x1] %v431_v41  ;;  %v354_v41 = vld [vmem:[#allocation2 + $0xbc] sm:$0x1]  ;;  %v7615_v15 = vld [vmem:[#allocation5 + $0xd8] sm:$0xff]   ;;  %v1632_v56 = vshrl.u32 %v1343_v53, 16 }
 0x138   : > { %1904 = vst.msk [vmem:[#allocation4 + $0x20] sm:$0xf] %vm1895_vm9, %v1816_v34  ;;  %v8788_v34 = vld [vmem:[#allocation2 + $0xb4] sm:$0xf]  ;;  %v355_v27 = vsel %vm7852_vm7, 0, %v354_v41  ;;  %v1614_v7 = vor.u32 %v1613_v6, %v1610_v35  ;;  %v1643_v19 = vrot.slane %v1641_v49, 5 }
 0x139   : > { %1086 = vrot.lane.b32.xlu0 %v8377_v28, %s7742_s7  ;;  %v1822_v12 = vpop.permute.xlu1 %1821  ;;  %1016 = vst.msk [vmem:[#allocation4 + $0x78] sm:$0xf] %vm241_vm0, %v8788_v34  ;;  %6981 = vmatpush3.bf16.msra.mxu1 %v7613_v47  ;;  %v427_v5 = vld [vmem:[#allocation3 + $0x8] sm:$0x1]  ;;  %356 = vst [vmem:[#allocation2 + $0xbc] sm:$0x1] %v355_v27 }
 0x13a   : > { %1907 = vst.msk [vmem:[#allocation4 + $0x2c] sm:$0xf] %vm1895_vm9, %v1822_v12  ;;  %v933_v9 = vld [vmem:[#allocation2 + $0xb0] sm:$0x1]  ;;  %v428_v48 = vsel %vm8733_vm2, 0, %v427_v5  ;;  %v7616_v58 = vld [vmem:[#allocation5 + $0x110] sm:$0xff]  }
 0x13b   : > { %v1820_v10 = vpop.permute.xlu0 %1819  ;;  %1215 = vrot.lane.b32.xlu1 %v8375_v3, %s7743_s8  ;;  %v934_v12 = vsel %vm7820_vm4, %v752_v13, %v933_v9  ;;  %429 = vst [vmem:[#allocation3 + $0x8] sm:$0x1] %v428_v48  ;;  %v1345_v60 = vld [vmem:[#allocation2 + $0x8c] sm:$0x1]  ;;  %v1615_v61 = vrot.slane %v1614_v7, 4  ;;  %v769_v42 = vrot.slane %v8744_v29, 4 }
 0x13c   : > { %1906 = vst.msk [vmem:[#allocation4 + $0x28] sm:$0xf] %vm1895_vm9, %v1820_v10  ;;  %v8770_v2 = vld [vmem:[#allocation2 + $0xac] sm:$0xf]  ;;  %v8786_v26 = vld [vmem:[#allocation2 + $0xb8] sm:$0xf] }
 0x13d   : > { %1213 = vrot.lane.b32.xlu0 %v8377_v28, %s7743_s8  ;;  %v1947_v3 = vpop.permute.xlu1 %1946  ;;  %1015 = vst.msk [vmem:[#allocation4 + $0x74] sm:$0xf] %vm241_vm0, %v8770_v2  ;;  %v1342_v28 = vld [vmem:[#allocation2 + $0x80] sm:$0x1]  ;;  %1017 = vst.msk [vmem:[#allocation4 + $0x7c] sm:$0xf] %vm241_vm0, %v8786_v26 }
 0x13e   : > { %2034 = vst.msk [vmem:[#allocation4 + $0x24] sm:$0xf] %vm2024_vm10, %v1947_v3  ;;  %v1627_v20 = vshll.u32 %v1342_v28, 16  ;;  %935 = vst [vmem:[#allocation2 + $0xb0] sm:$0x1] %v934_v12  ;;  %v1635_v10 = vshll.u32 %v1343_v53, 16 }
 0x13f   : > { %v1945_v50 = vpop.permute.xlu0 %1944  ;;  %1219 = vrot.lane.b32.xlu1 %v8399_v52, %s7743_s8  ;;  %v1647_v3 = vrot.slane %v1645_v16, 4  ;;  %v1634_v28 = vrot.slane %v1632_v56, 4  ;;  %v1651_v47 = vshll.u32 %v1345_v60, 16  ;;  %v7618_v31 = vld [vmem:[#allocation5 + $0x108] sm:$0xff]   ;;  %v7620_v24 = vld [vmem:[#allocation5 + $0x100] sm:$0xff]   ;;  %vm10600_vm6 = vcmask 257248  }
 0x140   : > { %2033 = vst.msk [vmem:[#allocation4 + $0x20] sm:$0xf] %vm2024_vm10, %v1945_v50  ;;  %v1629_v18 = vrot.slane %v1627_v20, 5  ;;  %v7617_v50 = vld [vmem:[#allocation5 + $0xd0] sm:$0xff]   ;;  %v1637_v8 = vrot.slane %v1635_v10, 5  ;;  %v7619_v29 = vld [vmem:[#allocation5 + $0xc8] sm:$0xff]   ;;  %vm10601_vm1 = vmmov %vm10600_vm6 }
 0x141   : > { %1217 = vrot.lane.b32.xlu0 %v8401_v55, %s7743_s8  ;;  %v1951_v43 = vpop.permute.xlu1 %1950  ;;  %v1648_v53 = vor.u32 %v1647_v3, %v1643_v19  ;;  %v940_v13 = vld [vmem:[#allocation2 + $0xbc] sm:$0x1]  ;;  %v1653_v9 = vrot.slane %v1651_v47, 5  ;;  %v7621_v41 = vld [vmem:[#allocation5 + $0xc0] sm:$0xff]   ;;  %v2218_v48 = vld [vmem:[#allocation2 + $0x80] sm:$0x1] }
 0x142   : > { %2036 = vst.msk [vmem:[#allocation4 + $0x2c] sm:$0xf] %vm2024_vm10, %v1951_v43  ;;  %v2217_v5 = vld [vmem:[#allocation2 + $0x7c] sm:$0xf]  ;;  %v2220_v3 = vld [vmem:[#allocation2 + $0x88] sm:$0xf] }
 0x143   : > { %v1949_v25 = vpop.permute.xlu0 %1948  ;;  %1833 = vrot.lane.b32.xlu1 %v8616_v32, %s7744_s9  ;;  %v7614_v32 = vld [vmem:[#allocation5 + $0x118] sm:$0xff]   ;;  %v2369_v56 = vrot.slane %v2217_v5, 5  ;;  %v2376_v60 = vrot.slane %v2220_v3, 5 }
 0x144   : > { %2035 = vst.msk [vmem:[#allocation4 + $0x28] sm:$0xf] %vm2024_vm10, %v1949_v25  ;;  %6982 = vmatprep.subr.bf16.mxu1 %v7614_v32  ;;  %v1638_v25 = vor.u32 %v1637_v8, %v1634_v28 }
 0x145   : > { %1831 = vrot.lane.b32.xlu0 %v8623_v40, %s7744_s9  ;;  %v2076_v39 = vpop.permute.xlu1 %2075  ;;  %6983 = vmatpush3.bf16.msra.mxu1 %v7615_v15  ;;  %v1625_v40 = vrot.slane %v1624_v36, 4  ;;  %v941_v36 = vsel %vm7820_vm4, %v769_v42, %v940_v13  ;;  %v2219_v42 = vld [vmem:[#allocation2 + $0x84] sm:$0xe] }
 0x146   : > { %2163 = vst.msk [vmem:[#allocation4 + $0x24] sm:$0xf] %vm10568_vm12, %v2076_v39  ;;  %6984 = vmatprep.subr.bf16.mxu1 %v7616_v58  ;;  %942 = vst [vmem:[#allocation2 + $0xbc] sm:$0x1] %v941_v36  ;;  %v1639_v49 = vrot.slane %v1638_v25, 4 }
 0x147   : > { %v2074_v37 = vpop.permute.xlu0 %2073  ;;  %1837 = vrot.lane.b32.xlu1 %v8636_v62, %s7744_s9  ;;  %v8821_v35 = vsel %vm7913_vm11, %v1625_v40, %v1629_v18  ;;  %v2216_v40 = vld [vmem:[#allocation2 + $0x78] sm:$0xe]  ;;  %v2371_v18 = vrot.slane %v2369_v56, 4 }
 0x148   : > { %2162 = vst.msk [vmem:[#allocation4 + $0x20] sm:$0xf] %vm10568_vm12, %v2074_v37  ;;  %v8851_v27 = vsel %vm7913_vm11, %v1639_v49, %v1643_v19  ;;  %v2372_v19 = vrot.slane %v2218_v48, 5  ;;  %v511_v25 = vld [vmem:[%s7816_s6 + $0x78] sm:$0xf] }
 0x149   : > { %1835 = vrot.lane.b32.xlu0 %v8643_v51, %s7744_s9  ;;  %v2080_v22 = vpop.permute.xlu1 %2079  ;;  %6985 = vmatpush3.bf16.msra.mxu1 %v7617_v50 }
 0x14a   : > { %2165 = vst.msk [vmem:[#allocation4 + $0x2c] sm:$0xf] %vm10568_vm12, %v2080_v22  ;;  %6986 = vmatprep.subr.bf16.mxu1 %v7618_v31  ;;  %v8876_v22 = vsel %vm8053_vm14, %v2371_v18, %v2372_v19 }
 0x14b   : > { %v2078_v43 = vpop.permute.xlu0 %2077  ;;  %1962 = vrot.lane.b32.xlu1 %v8636_v62, %s7745_s10  ;;  %v8829_v62 = vsel %vm7913_vm11, %v1615_v61, %v8779_v21  ;;  %v2221_v61 = vld [vmem:[#allocation2 + $0x8c] sm:$0x1] }
 0x14c   : > { %2164 = vst.msk [vmem:[#allocation4 + $0x28] sm:$0xf] %vm10568_vm12, %v2078_v43  ;;  %v2378_v43 = vrot.slane %v2376_v60, 4 }
 0x14d   : > { %1960 = vrot.lane.b32.xlu0 %v8643_v51, %s7745_s10  ;;  %v2442_v6 = vpop.permute.xlu1 %2441  ;;  %6987 = vmatpush3.bf16.msra.mxu1 %v7619_v29  ;;  %v1649_v51 = vrot.slane %v1648_v53, 4  ;;  %v301_v53 = vld [vmem:[#allocation2 + $0xc0] sm:$0x1] }
 0x14e   : > { %2529 = vst.msk [vmem:[#allocation4 + $0x24] sm:$0xf] %vm10567_vm13, %v2442_v6  ;;  %6988 = vmatprep.subr.bf16.mxu1 %v7620_v24  ;;  %v302_v31 = vsel %vm7820_vm4, 0, %v301_v53  ;;  %v6540_v6 = vrot.slane %v2219_v42, 9  ;;  %v384_v24 = vld [vmem:[#allocation3 + $0x30] sm:$0x1] }
 0x14f   : > { %v2440_v20 = vpop.permute.xlu0 %2439  ;;  %1966 = vrot.lane.b32.xlu1 %v8821_v35, %s7745_s10  ;;  %v8844_v32 = vsel %vm7913_vm11, %v1649_v51, %v1653_v9  ;;  %303 = vst [vmem:[#allocation2 + $0xc0] sm:$0x1] %v302_v31  ;;  %v771_v51 = vshrl.u32 %v511_v25, 16  ;;  %v385_v49 = vsel %vm8705_vm15, 0, %v384_v24 }
 0x150   : > { %2528 = vst.msk [vmem:[#allocation4 + $0x20] sm:$0xf] %vm10567_vm13, %v2440_v20  ;;  %v512_v20 = vld [vmem:[%s7816_s6 + $0x7c] sm:$0xf]  ;;  %386 = vst [vmem:[#allocation3 + $0x30] sm:$0x1] %v385_v49 }
 0x151   : > { %1964 = vrot.lane.b32.xlu0 %v8829_v62, %s7745_s10  ;;  %v2446_v21 = vpop.permute.xlu1 %2445  ;;  %6989 = vmatpush3.bf16.msra.mxu1 %v7621_v41  ;;  %v8909_v41 = vsel %vm8053_vm14, %v6540_v6, %v2376_v60  ;;  %v782_v5 = vshll.u32 %v512_v20, 16  ;;  %v436_v60 = vld [vmem:[#allocation3 + $0x2c] sm:$0x1] }
 0x152   : > { %2531 = vst.msk [vmem:[#allocation4 + $0x2c] sm:$0xf] %vm10567_vm13, %v2446_v21  ;;  %v779_v21 = vshrl.u32 %v512_v20, 16 }
 0x153   : > { %v2444_v16 = vpop.permute.xlu0 %2443  ;;  %2091 = vrot.lane.b32.xlu1 %v8821_v35, %s7746_s11 }
 0x154   : > { %2530 = vst.msk [vmem:[#allocation4 + $0x28] sm:$0xf] %vm10567_vm13, %v2444_v16  ;;  %vm10602_vm13 = vmmov %vm10601_vm1  ;;  %v773_v16 = vrot.slane %v771_v51, 7 }
 0x155   : > { %2089 = vrot.lane.b32.xlu0 %v8829_v62, %s7746_s11  ;;  %v2571_v12 = vpop.permute.xlu1 %2570 }
 0x156   : > { %2658 = vst.msk [vmem:[#allocation4 + $0x24] sm:$0xf] %vm10600_vm6, %v2571_v12  ;;  %vm10603_vm6 = vmmov %vm10601_vm1  ;;  %v774_v12 = vshll.u32 %v511_v25, 16 }
 0x157   : > { %v2569_v39 = vpop.permute.xlu0 %2568  ;;  %2095 = vrot.lane.b32.xlu1 %v8844_v32, %s7746_s11 }
 0x158   : > { %2657 = vst.msk [vmem:[#allocation4 + $0x20] sm:$0xf] %vm10601_vm1, %v2569_v39  ;;  %vm10604_vm1 = vcmask 290048   ;;  %v776_v48 = vor.u32 %v774_v12, %v773_v16  ;;  %v1349_v12 = vld [vmem:[#allocation2 + $0x9c] sm:$0xf] }
 0x159   : > { %2093 = vrot.lane.b32.xlu0 %v8851_v27, %s7746_s11  ;;  %v2575_v15 = vpop.permute.xlu1 %2574 }
 0x15a   : > { %2660 = vst.msk [vmem:[#allocation4 + $0x2c] sm:$0xf] %vm10602_vm13, %v2575_v15  ;;  %vm10605_vm13 = vmmov %vm10604_vm1  ;;  %v8915_v15 = vrot.slane %v779_v21, 7 }
 0x15b   : > { %v2573_v7 = vpop.permute.xlu0 %2572  ;;  %2457 = vrot.lane.b32.xlu1 %v8668_v38, %s7747_s12 }
 0x15c   : > { %2659 = vst.msk [vmem:[#allocation4 + $0x28] sm:$0xf] %vm10603_vm6, %v2573_v7  ;;  %vm10606_vm6 = vmmov %vm10604_vm1  ;;  %v777_v7 = vrot.slane %v773_v16, 4  ;;  %v786_v49 = vrot.slane %v8915_v15, 4 }
 0x15d   : > { %2455 = vrot.lane.b32.xlu0 %v8675_v14, %s7747_s12  ;;  %v2700_v10 = vpop.permute.xlu1 %2699  ;;  %v6539_v14 = vrot.slane %v2216_v40, 9 }
 0x15e   : > { %2787 = vst.msk [vmem:[#allocation4 + $0x24] sm:$0xf] %vm10604_vm1, %v2700_v10  ;;  %v784_v10 = vor.u32 %v782_v5, %v8915_v15 }
 0x15f   : > { %v2698_v37 = vpop.permute.xlu0 %2697  ;;  %2461 = vrot.lane.b32.xlu1 %v8693_v46, %s7747_s12  ;;  %v8883_v28 = vsel %vm8053_vm14, %v6539_v14, %v2369_v56 }
 0x160   : > { %2786 = vst.msk [vmem:[#allocation4 + $0x20] sm:$0xf] %vm10605_vm13, %v2698_v37  ;;  %vm10607_vm13 = vcmask 60448   ;;  %v943_v37 = vld [vmem:[#allocation2 + $0xc0] sm:$0xf]  ;;  %v785_v18 = vsel %vm7838_vm5, %v777_v7, %v784_v10 }
 0x161   : > { %2459 = vrot.lane.b32.xlu0 %v8701_v63, %s7747_s12  ;;  %v2704_v38 = vpop.permute.xlu1 %2703  ;;  %v944_v19 = vsel %vm7868_vm8, %v776_v48, %v943_v37  ;;  %946 = vst.msk [vmem:[#allocation2 + $0xc4] sm:$0xf] %vm241_vm0, %v785_v18  ;;  %vm10611_vm0 = vcmask 224448  }
 0x162   : > { %2789 = vst.msk [vmem:[#allocation4 + $0x2c] sm:$0xf] %vm10606_vm6, %v2704_v38  ;;  %vm10608_vm6 = vmmov %vm10607_vm13  ;;  %v381_v38 = vld [vmem:[#allocation3 + $0x24] sm:$0x1] }
 0x163   : > { %v2702_v58 = vpop.permute.xlu0 %2701  ;;  %2586 = vrot.lane.b32.xlu1 %v8693_v46, %s7748_s13  ;;  %945 = vst [vmem:[#allocation2 + $0xc0] sm:$0xf] %v944_v19  ;;  %v382_v14 = vsel %vm8705_vm15, 0, %v381_v38  ;;  %vm10614_vm8 = vmmov %vm10611_vm0 }
 0x164   : > { %2788 = vst.msk [vmem:[#allocation4 + $0x28] sm:$0xf] %vm10604_vm1, %v2702_v58  ;;  %vm10609_vm1 = vcmask 293888   ;;  %383 = vst [vmem:[#allocation3 + $0x24] sm:$0x1] %v382_v14 }
 0x165   : > { %2584 = vrot.lane.b32.xlu0 %v8701_v63, %s7748_s13  ;;  %v1077_v50 = vpop.permute.xlu1 %1076  ;;  %v2379_v63 = vrot.slane %v2221_v61, 5  ;;  %v437_v61 = vsel %vm8733_vm2, 0, %v436_v60  ;;  %v1351_v14 = vld [vmem:[#allocation2 + $0xa4] sm:$0x1] }
 0x166   : > { %1160 = vst.msk [vmem:[#allocation4 + $0x34] sm:$0xf] %vm10607_vm13, %v1077_v50  ;;  %vm10610_vm13 = vmmov %vm10608_vm6  ;;  %v1347_v50 = vld [vmem:[#allocation2 + $0x94] sm:$0xf] }
 0x167   : > { %v1075_v8 = vpop.permute.xlu0 %1074  ;;  %2590 = vrot.lane.b32.xlu1 %v8876_v22, %s7748_s13  ;;  %v7602_v46 = vld [vmem:[#allocation4 + $0x20] sm:$0xff]   ;;  %v8900_v36 = vsel %vm8053_vm14, %v2378_v43, %v2379_v63  ;;  %438 = vst [vmem:[#allocation3 + $0x2c] sm:$0x1] %v437_v61  ;;  %v357_v63 = vld [vmem:[#allocation2 + $0xc8] sm:$0x1]  ;;  %v1665_v53 = vshll.u32 %v1347_v50, 16 }
 0x168   : > { %1159 = vst.msk [vmem:[#allocation4 + $0x30] sm:$0xf] %vm10608_vm6, %v1075_v8  ;;  %7396 = vmatprep.mubr.msk.bf16.mxu0 %vm10609_vm1, %v7602_v46  ;;  %v304_v8 = vld [vmem:[#allocation2 + $0xcc] sm:$0x1]  ;;  %v1346_v43 = vld [vmem:[#allocation2 + $0x90] sm:$0xf] }
 0x169   : > { %2588 = vrot.lane.b32.xlu0 %v8883_v28, %s7748_s13  ;;  %v1081_v47 = vpop.permute.xlu1 %1080  ;;  %v305_v46 = vsel %vm7820_vm4, 0, %v304_v8  ;;  %v358_v31 = vsel %vm7852_vm7, 0, %v357_v63  ;;  %v1667_v25 = vrot.slane %v1665_v53, 5  ;;  %v1699_v61 = vshll.u32 %v1351_v14, 16  ;;  %v360_v8 = vld [vmem:[#allocation2 + $0xd4] sm:$0x1] }
 0x16a   : > { %1162 = vst.msk [vmem:[#allocation4 + $0x3c] sm:$0xf] %vm10610_vm13, %v1081_v47  ;;  %306 = vst [vmem:[#allocation2 + $0xcc] sm:$0x1] %v305_v46  ;;  %v1669_v47 = vshrl.u32 %v1347_v50, 16  ;;  %vm10615_vm13 = vcmask 257248  }
 0x16b   : > { %v1079_v29 = vpop.permute.xlu0 %1078  ;;  %2715 = vrot.lane.b32.xlu1 %v8876_v22, %s7749_s20  ;;  %v7603_v13 = vld [vmem:[#allocation4 + $0x28] sm:$0xff]   ;;  %359 = vst [vmem:[#allocation2 + $0xc8] sm:$0x1] %v358_v31 }
 0x16c   : > { %1161 = vst.msk [vmem:[#allocation4 + $0x38] sm:$0xf] %vm10608_vm6, %v1079_v29  ;;  %7397 = vmatmul.mubr.msk.bf16.gmra.mxu0 %vm10609_vm1, %v7603_v13  ;;  %v1656_v29 = vshrl.u32 %v1346_v43, 16  ;;  %v1659_v13 = vshll.u32 %v1346_v43, 16  ;;  %v1671_v20 = vrot.slane %v1669_v47, 4  ;;  %vm10616_vm6 = vmmov %vm10615_vm13 }
 0x16d   : > { %2713 = vrot.lane.b32.xlu0 %v8883_v28, %s7749_s20  ;;  %v1208_v9 = vpop.permute.xlu1 %1207  ;;  %vm10617_vm1 = vmmov %vm10616_vm6 }
 0x16e   : > { %1291 = vst.msk [vmem:[#allocation4 + $0x34] sm:$0xf] %vm1277_vm3, %v1208_v9  ;;  %v1348_v9 = vld [vmem:[#allocation2 + $0x98] sm:$0x1]  ;;  %v1658_v24 = vrot.slane %v1656_v29, 4  ;;  %v1661_v21 = vrot.slane %v1659_v13, 5 }
 0x16f   : > { %v1206_v39 = vpop.permute.xlu0 %1205  ;;  %2719 = vrot.lane.b32.xlu1 %v8900_v36, %s7749_s20  ;;  %v1675_v5 = vshll.u32 %v1348_v9, 16 }
 0x170   : > { %1290 = vst.msk [vmem:[#allocation4 + $0x30] sm:$0xf] %vm1277_vm3, %v1206_v39  ;;  %v1672_v39 = vor.u32 %v1671_v20, %v1667_v25  ;;  %v1662_v15 = vor.u32 %v1661_v21, %v1658_v24  ;;  %v2223_v20 = vld [vmem:[#allocation2 + $0x94] sm:$0xf]  ;;  %v2224_v24 = vld [vmem:[#allocation2 + $0x98] sm:$0x1] }
 0x171   : > { %2717 = vrot.lane.b32.xlu0 %v8909_v41, %s7749_s20  ;;  %v1212_v56 = vpop.permute.xlu1 %1211  ;;  %v1677_v38 = vrot.slane %v1675_v5, 5  ;;  %v2383_v9 = vrot.slane %v2223_v20, 5 }
 0x172   : > { %1293 = vst.msk [vmem:[#allocation4 + $0x3c] sm:$0xf] %vm1277_vm3, %v1212_v56  ;;  %v947_v10 = vld [vmem:[#allocation2 + $0xc8] sm:$0x1]  ;;  %v1673_v19 = vrot.slane %v1672_v39, 4 }
 0x173   : > { %v1210_v40 = vpop.permute.xlu0 %1209  ;;  %1092 = vrot.lane.b32.xlu1 %v8399_v52, %s7742_s7  ;;  %v439_v52 = vld [vmem:[#allocation3 + $0x38] sm:$0x1]  ;;  %v948_v37 = vsel %vm7820_vm4, %v786_v49, %v947_v10  ;;  %vm10612_vm4 = vmmov %vm10611_vm0  ;;  %v2222_v49 = vld [vmem:[#allocation2 + $0x90] sm:$0xe] }
 0x174   : > { %1292 = vst.msk [vmem:[#allocation4 + $0x38] sm:$0xf] %vm1277_vm3, %v1210_v40  ;;  %v440_v44 = vsel %vm8733_vm2, 0, %v439_v52  ;;  %v1680_v40 = vshrl.u32 %v1349_v12, 16  ;;  %949 = vst [vmem:[#allocation2 + $0xc8] sm:$0x1] %v948_v37 }
 0x175   : > { %1090 = vrot.lane.b32.xlu0 %v8401_v55, %s7742_s7  ;;  %v1826_v3 = vpop.permute.xlu1 %1825  ;;  %441 = vst [vmem:[#allocation3 + $0x38] sm:$0x1] %v440_v44  ;;  %v1663_v52 = vrot.slane %v1662_v15, 4  ;;  %v2226_v39 = vld [vmem:[#allocation2 + $0xa0] sm:$0xf] }
 0x176   : > { %1909 = vst.msk [vmem:[#allocation4 + $0x34] sm:$0xf] %vm1895_vm9, %v1826_v3 }
 0x177   : > { %v1824_v58 = vpop.permute.xlu0 %1823  ;;  %1096 = vrot.lane.b32.xlu1 %v8559_v54, %s7742_s7 }
 0x178   : > { %1908 = vst.msk [vmem:[#allocation4 + $0x30] sm:$0xf] %vm1895_vm9, %v1824_v58  ;;  %v1682_v58 = vrot.slane %v1680_v40, 4  ;;  %v2225_v40 = vld [vmem:[#allocation2 + $0x9c] sm:$0xe] }
 0x179   : > { %1094 = vrot.lane.b32.xlu0 %v8561_v11, %s7742_s7  ;;  %v1830_v55 = vpop.permute.xlu1 %1829 }
 0x17a   : > { %1911 = vst.msk [vmem:[#allocation4 + $0x3c] sm:$0xf] %vm1895_vm9, %v1830_v55  ;;  %v8981_v55 = vsel %vm7913_vm11, %v1673_v19, %v1677_v38  ;;  %v6542_v19 = vrot.slane %v2225_v40, 9  ;;  %v1353_v38 = vld [vmem:[#allocation2 + $0xac] sm:$0xf] }
 0x17b   : > { %v1828_v42 = vpop.permute.xlu0 %1827  ;;  %1223 = vrot.lane.b32.xlu1 %v8559_v54, %s7743_s8 }
 0x17c   : > { %1910 = vst.msk [vmem:[#allocation4 + $0x38] sm:$0xf] %vm1895_vm9, %v1828_v42  ;;  %v361_v42 = vsel %vm7852_vm7, 0, %v360_v8  ;;  %vm10613_vm7 = vmmov %vm10611_vm0 }
 0x17d   : > { %1221 = vrot.lane.b32.xlu0 %v8561_v11, %s7743_s8  ;;  %v1955_v6 = vpop.permute.xlu1 %1954  ;;  %v1350_v11 = vld [vmem:[#allocation2 + $0xa0] sm:$0xf]  ;;  %362 = vst [vmem:[#allocation2 + $0xd4] sm:$0x1] %v361_v42 }
 0x17e   : > { %2038 = vst.msk [vmem:[#allocation4 + $0x34] sm:$0xf] %vm2024_vm10, %v1955_v6  ;;  %v1689_v7 = vshll.u32 %v1350_v11, 16  ;;  %v1693_v56 = vshrl.u32 %v1350_v11, 16 }
 0x17f   : > { %v1953_v54 = vpop.permute.xlu0 %1952  ;;  %1227 = vrot.lane.b32.xlu1 %v8581_v0, %s7743_s8 }
 0x180   : > { %2037 = vst.msk [vmem:[#allocation4 + $0x30] sm:$0xf] %vm2024_vm10, %v1953_v54  ;;  %v1691_v3 = vrot.slane %v1689_v7, 5 }
 0x181   : > { %1225 = vrot.lane.b32.xlu0 %v8583_v59, %s7743_s8  ;;  %v1959_v51 = vpop.permute.xlu1 %1958 }
 0x182   : > { %2040 = vst.msk [vmem:[#allocation4 + $0x3c] sm:$0xf] %vm2024_vm10, %v1959_v51 }
 0x183   : > { %v1957_v16 = vpop.permute.xlu0 %1956  ;;  %1841 = vrot.lane.b32.xlu1 %v8821_v35, %s7744_s9  ;;  %v1683_v35 = vshll.u32 %v1349_v12, 16  ;;  %v2386_v12 = vrot.slane %v2224_v24, 5 }
 0x184   : > { %2039 = vst.msk [vmem:[#allocation4 + $0x38] sm:$0xf] %vm2024_vm10, %v1957_v16  ;;  %v2385_v16 = vrot.slane %v2383_v9, 4 }
 0x185   : > { %1839 = vrot.lane.b32.xlu0 %v8829_v62, %s7744_s9  ;;  %v2084_v48 = vpop.permute.xlu1 %2083  ;;  %v1695_v62 = vrot.slane %v1693_v56, 4  ;;  %v1685_v44 = vrot.slane %v1683_v35, 5  ;;  %v2390_v56 = vrot.slane %v2226_v39, 5 }
 0x186   : > { %2167 = vst.msk [vmem:[#allocation4 + $0x34] sm:$0xf] %vm10568_vm12, %v2084_v48  ;;  %v9035_v7 = vsel %vm8053_vm14, %v2385_v16, %v2386_v12  ;;  %v2227_v48 = vld [vmem:[#allocation2 + $0xa4] sm:$0x1]  ;;  %v9088_v16 = vld [vmem:[#allocation2 + $0xb0] sm:$0x1] }
 0x187   : > { %v2082_v18 = vpop.permute.xlu0 %2081  ;;  %1845 = vrot.lane.b32.xlu1 %v8844_v32, %s7744_s9  ;;  %v1696_v50 = vor.u32 %v1695_v62, %v1691_v3  ;;  %v1686_v43 = vor.u32 %v1685_v44, %v1682_v58  ;;  %v2392_v35 = vrot.slane %v2390_v56, 4  ;;  %v9056_v62 = vld [vmem:[%s10557_s2] ss:$0 sm:$0xff] }
 0x188   : > { %2166 = vst.msk [vmem:[#allocation4 + $0x30] sm:$0xf] %vm10568_vm12, %v2082_v18  ;;  %v2393_v18 = vrot.slane %v2227_v48, 5 }
 0x189   : > { %1843 = vrot.lane.b32.xlu0 %v8851_v27, %s7744_s9  ;;  %v2088_v1 = vpop.permute.xlu1 %2087  ;;  %v1697_v53 = vrot.slane %v1696_v50, 4  ;;  %v1687_v47 = vrot.slane %v1686_v43, 4  ;;  %v1717_v50 = vshrl.u32 %v1353_v38, 16 }
 0x18a   : > { %2169 = vst.msk [vmem:[#allocation4 + $0x3c] sm:$0xf] %vm10568_vm12, %v2088_v1  ;;  %v9061_v14 = vsel %vm8053_vm14, %v2392_v35, %v2393_v18 }
 0x18b   : > { %v2086_v60 = vpop.permute.xlu0 %2085  ;;  %1970 = vrot.lane.b32.xlu1 %v8844_v32, %s7745_s10  ;;  %v8990_v32 = vsel %vm7913_vm11, %v1663_v52, %v1667_v25  ;;  %v9010_v13 = vsel %vm7913_vm11, %v1687_v47, %v1691_v3  ;;  %v1352_v52 = vld [vmem:[#allocation2 + $0xa8] sm:$0xf]  ;;  %v9082_v20 = vrot.slane %v1717_v50, 4  ;;  %v1723_v50 = vshll.u32 %v9088_v16, 16 }
 0x18c   : > { %2168 = vst.msk [vmem:[#allocation4 + $0x38] sm:$0xf] %vm10568_vm12, %v2086_v60  ;;  %v1713_v60 = vshll.u32 %v1353_v38, 16 }
 0x18d   : > { %1968 = vrot.lane.b32.xlu0 %v8851_v27, %s7745_s10  ;;  %v2450_v46 = vpop.permute.xlu1 %2449  ;;  %v1701_v27 = vrot.slane %v1699_v61, 5  ;;  %v390_v61 = vld [vmem:[#allocation3 + $0x48] sm:$0x1] }
 0x18e   : > { %2533 = vst.msk [vmem:[#allocation4 + $0x34] sm:$0xf] %vm10611_vm0, %v2450_v46  ;;  %vm10618_vm0 = vmmov %vm10617_vm1  ;;  %v9070_v46 = vsel %vm8053_vm14, %v6542_v19, %v2390_v56  ;;  %v391_v42 = vsel %vm8705_vm15, 0, %v390_v61 }
 0x18f   : > { %v2448_v63 = vpop.permute.xlu0 %2447  ;;  %1974 = vrot.lane.b32.xlu1 %v8981_v55, %s7745_s10  ;;  %v9003_v6 = vsel %vm7913_vm11, %v1697_v53, %v1701_v27  ;;  %v1704_v53 = vshrl.u32 %v1352_v52, 16  ;;  %v1707_v27 = vshll.u32 %v1352_v52, 16  ;;  %392 = vst [vmem:[#allocation3 + $0x48] sm:$0x1] %v391_v42  ;;  %v445_v52 = vld [vmem:[#allocation3 + $0x50] sm:$0x1] }
 0x190   : > { %2532 = vst.msk [vmem:[#allocation4 + $0x30] sm:$0xf] %vm10612_vm4, %v2448_v63  ;;  %vm10619_vm4 = vcmask 290048  }
 0x191   : > { %1972 = vrot.lane.b32.xlu0 %v8990_v32, %s7745_s10  ;;  %v2454_v33 = vpop.permute.xlu1 %2453  ;;  %v9090_v12 = vrot.slane %v1704_v53, 4 }
 0x192   : > { %2535 = vst.msk [vmem:[#allocation4 + $0x3c] sm:$0xf] %vm10613_vm7, %v2454_v33  ;;  %vm10620_vm7 = vmmov %vm10619_vm4 }
 0x193   : > { %v2452_v31 = vpop.permute.xlu0 %2451  ;;  %2099 = vrot.lane.b32.xlu1 %v8981_v55, %s7746_s11 }
 0x194   : > { %2534 = vst.msk [vmem:[#allocation4 + $0x38] sm:$0xf] %vm10614_vm8, %v2452_v31  ;;  %vm10621_vm8 = vmmov %vm10619_vm4  ;;  %v3726_v31 = vld [vmem:[#allocation3] sm:$0xf] }
 0x195   : > { %2097 = vrot.lane.b32.xlu0 %v8990_v32, %s7746_s11  ;;  %v2579_v29 = vpop.permute.xlu1 %2578  ;;  %v3937_v39 = vshrl.u32 %v3726_v31, 16 }
 0x196   : > { %2662 = vst.msk [vmem:[#allocation4 + $0x34] sm:$0xf] %vm10615_vm13, %v2579_v29  ;;  %vm10622_vm13 = vmmov %vm10619_vm4 }
 0x197   : > { %v2577_v54 = vpop.permute.xlu0 %2576  ;;  %2103 = vrot.lane.b32.xlu1 %v9003_v6, %s7746_s11  ;;  %v9112_v61 = vrot.slane %v3937_v39, 4 }
 0x198   : > { %2661 = vst.msk [vmem:[#allocation4 + $0x30] sm:$0xf] %vm10616_vm6, %v2577_v54  ;;  %vm10623_vm6 = vcmask 60448  }
 0x199   : > { %2101 = vrot.lane.b32.xlu0 %v9010_v13, %s7746_s11  ;;  %v2583_v25 = vpop.permute.xlu1 %2582 }
 0x19a   : > { %2664 = vst.msk [vmem:[#allocation4 + $0x3c] sm:$0xf] %vm10617_vm1, %v2583_v25  ;;  %vm10624_vm1 = vmmov %vm10623_vm6  ;;  %v9080_v25 = vrot.slane %v1713_v60, 5 }
 0x19b   : > { %v2581_v51 = vpop.permute.xlu0 %2580  ;;  %2465 = vrot.lane.b32.xlu1 %v8876_v22, %s7747_s12 }
 0x19c   : > { %2663 = vst.msk [vmem:[#allocation4 + $0x38] sm:$0xf] %vm10618_vm0, %v2581_v51  ;;  %vm10625_vm0 = vcmask 293888   ;;  %v3727_v51 = vld [vmem:[#allocation3 + $0x4] sm:$0xf]  ;;  %v1720_v35 = vor.u32 %v9082_v20, %v9080_v25 }
 0x19d   : > { %2463 = vrot.lane.b32.xlu0 %v8883_v28, %s7747_s12  ;;  %v2708_v11 = vpop.permute.xlu1 %2707  ;;  %v6541_v28 = vrot.slane %v2222_v49, 9  ;;  %v3946_v48 = vshll.u32 %v3727_v51, 16  ;;  %v3950_v18 = vshrl.u32 %v3727_v51, 16  ;;  %v442_v51 = vld [vmem:[#allocation3 + $0x44] sm:$0x1] }
 0x19e   : > { %2791 = vst.msk [vmem:[#allocation4 + $0x34] sm:$0xf] %vm10619_vm4, %v2708_v11  ;;  %vm10626_vm4 = vmmov %vm10624_vm1 }
 0x19f   : > { %v2706_v21 = vpop.permute.xlu0 %2705  ;;  %2469 = vrot.lane.b32.xlu1 %v8900_v36, %s7747_s12  ;;  %v9042_v37 = vsel %vm8053_vm14, %v6541_v28, %v2383_v9  ;;  %v3940_v28 = vshll.u32 %v3726_v31, 16 }
 0x1a0   : > { %2790 = vst.msk [vmem:[#allocation4 + $0x30] sm:$0xf] %vm10620_vm7, %v2706_v21  ;;  %vm10627_vm7 = vmmov %vm10624_vm1 }
 0x1a1   : > { %2467 = vrot.lane.b32.xlu0 %v8909_v41, %s7747_s12  ;;  %v2712_v22 = vpop.permute.xlu1 %2711  ;;  %v3942_v31 = vrot.slane %v3940_v28, 5  ;;  %v3918_v28 = vld [vmem:[#allocation3 + $0x8] sm:$0x1] }
 0x1a2   : > { %2793 = vst.msk [vmem:[#allocation4 + $0x3c] sm:$0xf] %vm10621_vm8, %v2712_v22  ;;  %vm10628_vm8 = vmmov %vm10625_vm0  ;;  %v9092_v22 = vrot.slane %v1707_v27, 5  ;;  %v1356_v27 = vld [vmem:[#allocation2 + $0xb8] sm:$0xf] }
 0x1a3   : > { %v2710_v5 = vpop.permute.xlu0 %2709  ;;  %2594 = vrot.lane.b32.xlu1 %v8900_v36, %s7748_s13 }
 0x1a4   : > { %2792 = vst.msk [vmem:[#allocation4 + $0x38] sm:$0xf] %vm10622_vm13, %v2710_v5  ;;  %vm3612_vm13 = vcmask 1043456  }
 0x1a5   : > { %2592 = vrot.lane.b32.xlu0 %v8909_v41, %s7748_s13  ;;  %v1085_v10 = vpop.permute.xlu1 %1084 }
 0x1a6   : > { %1164 = vst.msk [vmem:[#allocation4 + $0x44] sm:$0xf] %vm10623_vm6, %v1085_v10  ;;  %vm10629_vm6 = vsmask.f32 7938 }
 0x1a7   : > { %v1083_v15 = vpop.permute.xlu0 %1082  ;;  %2598 = vrot.lane.b32.xlu1 %v9035_v7, %s7748_s13  ;;  %v7604_v36 = vld [vmem:[#allocation4 + $0x30] sm:$0xff]  }
 0x1a8   : > { %1163 = vst.msk [vmem:[#allocation4 + $0x40] sm:$0xf] %vm10624_vm1, %v1083_v15  ;;  %7400 = vmatprep.mubr.msk.bf16.mxu0 %vm10625_vm0, %v7604_v36  ;;  %v387_v15 = vld [vmem:[#allocation3 + $0x3c] sm:$0x1]  ;;  %v3621_v36 = vld [vmem:[#allocation3 + $0x18] sm:$0xf]  ;;  %vm9105_vm1 = vmand %vm3612_vm13, %vm10629_vm6 }
 0x1a9   : > { %2596 = vrot.lane.b32.xlu0 %v9042_v37, %s7748_s13  ;;  %v1089_v41 = vpop.permute.xlu1 %1088  ;;  %vm10632_vm0 = vcmask 224448   ;;  %vm10638_vm13 = vcmask 257248  }
 0x1aa   : > { %1166 = vst.msk [vmem:[#allocation4 + $0x4c] sm:$0xf] %vm10626_vm4, %v1089_v41  ;;  %v388_v41 = vsel %vm8705_vm15, 0, %v387_v15  ;;  %vm10633_vm4 = vmmov %vm10632_vm0 }
 0x1ab   : > { %v1087_v3 = vpop.permute.xlu0 %1086  ;;  %2723 = vrot.lane.b32.xlu1 %v9035_v7, %s7749_s20  ;;  %v7605_v1 = vld [vmem:[#allocation4 + $0x38] sm:$0xff]   ;;  %389 = vst [vmem:[#allocation3 + $0x3c] sm:$0x1] %v388_v41  ;;  %v3943_v41 = vor.u32 %v3942_v31, %v9112_v61  ;;  %v1710_v61 = vor.u32 %v9092_v22, %v9090_v12  ;;  %vm10639_vm6 = vmmov %vm10638_vm13 }
 0x1ac   : > { %1165 = vst.msk [vmem:[#allocation4 + $0x48] sm:$0xf] %vm10627_vm7, %v1087_v3  ;;  %v7390_v58 = vpop.f32.mrf.mxu0  ;;  %7401 = vmatmul.mubr.msk.bf16.gmra.mxu0 %vm10628_vm8, %v7605_v1  ;;  %vm10635_vm7 = vmmov %vm10632_vm0 }
 0x1ad   : > { %2721 = vrot.lane.b32.xlu0 %v9042_v37, %s7749_s20  ;;  %v1216_v44 = vpop.permute.xlu1 %1215  ;;  %v3045_v8 = vadd.f32 %v7390_v58, %v9056_v62  ;;  %v3614_v58 = vld [vmem:[#allocation3 + $0xc] sm:$0xf]  ;;  %v3944_v20 = vrot.slane %v3943_v41, 4  ;;  %vm10637_vm8 = vmmov %vm10632_vm0 }
 0x1ae   : > { %1295 = vst.msk [vmem:[#allocation4 + $0x44] sm:$0xf] %vm1277_vm3, %v1216_v44  ;;  %v3036_v63 = vpop.f32.mrf.mxu0 }
 0x1af   : > { %v1214_v43 = vpop.permute.xlu0 %1213  ;;  %2727 = vrot.lane.b32.xlu1 %v9061_v14, %s7749_s20  ;;  %v3165_v33 = vmax.f32 %v3045_v8, 0.0  ;;  %v3037_v47 = vadd.f32 %v9056_v62, %v3036_v63  ;;  %v446_v8 = vsel %vm8733_vm2, 0, %v445_v52  ;;  %v3956_v52 = vshll.u32 %v3918_v28, 16 }
 0x1b0   : > { %1294 = vst.msk [vmem:[#allocation4 + $0x40] sm:$0xf] %vm1277_vm3, %v1214_v43  ;;  %v7391_v29 = vpop.f32.mrf.mxu0  ;;  %447 = vst [vmem:[#allocation3 + $0x50] sm:$0x1] %v446_v8 }
 0x1b1   : > { %2725 = vrot.lane.b32.xlu0 %v9070_v46, %s7749_s20  ;;  %v1220_v54 = vpop.permute.xlu1 %1219  ;;  %v6798_v9 = vpack.c.bf16 %v3165_v33, %v3165_v33  ;;  %v3163_v11 = vmax.f32 %v3037_v47, 0.0  ;;  %v3048_v24 = vadd.f32 %v7391_v29, %v9056_v62  ;;  %v9119_v29 = vrot.slane %v3946_v48, 5 }
 0x1b2   : > { %1297 = vst.msk [vmem:[#allocation4 + $0x4c] sm:$0xf] %vm1277_vm3, %v1220_v54  ;;  %v3039_v49 = vpop.f32.mrf.mxu0  ;;  %v3952_v54 = vrot.slane %v3950_v18, 4 }
 0x1b3   : > { %v1218_v21 = vpop.permute.xlu0 %1217  ;;  %1100 = vrot.lane.b32.xlu1 %v8581_v0, %s7742_s7  ;;  %v3309_v5 = vshrl.u32 %v6798_v9, 16  ;;  %v6796_v56 = vpack.c.bf16 %v3163_v11, %v3163_v11  ;;  %v3166_v10 = vmax.f32 %v3048_v24, 0.0  ;;  %v3040_v40 = vadd.f32 %v9056_v62, %v3039_v49  ;;  %v3625_v49 = vld [vmem:[#allocation3 + $0x20] sm:$0x1] }
 0x1b4   : > { %1296 = vst.msk [vmem:[#allocation4 + $0x48] sm:$0xf] %vm1277_vm3, %v1218_v21  ;;  %v3312_v38 = vshll.u32 %v6798_v9, 16 }
 0x1b5   : > { %1098 = vrot.lane.b32.xlu0 %v8583_v59, %s7742_s7  ;;  %v1834_v0 = vpop.permute.xlu1 %1833  ;;  %v3311_v19 = vrot.slane %v3309_v5, 7  ;;  %v3292_v3 = vshrl.u32 %v6796_v56, 16  ;;  %v6799_v1 = vpack.c.bf16 %v3166_v10, %v3166_v10  ;;  %v3164_v44 = vmax.f32 %v3040_v40, 0.0 }
 0x1b6   : > { %1913 = vst.msk [vmem:[#allocation4 + $0x44] sm:$0xf] %vm1895_vm9, %v1834_v0  ;;  %v3295_v63 = vshll.u32 %v6796_v56, 16  ;;  %v1737_v5 = vshll.u32 %v1356_v27, 16  ;;  %v1741_v56 = vshrl.u32 %v1356_v27, 16  ;;  %v443_v10 = vsel %vm8733_vm2, 0, %v442_v51 }
 0x1b7   : > { %v1832_v60 = vpop.permute.xlu0 %1831  ;;  %1104 = vrot.lane.b32.xlu1 %v8770_v2, %s7742_s7  ;;  %v3314_v42 = vor.u32 %v3312_v38, %v3311_v19  ;;  %v3294_v43 = vrot.slane %v3292_v3, 7  ;;  %v3317_v53 = vshrl.u32 %v6799_v1, 16  ;;  %v6797_v33 = vpack.c.bf16 %v3164_v44, %v3164_v44  ;;  %444 = vst [vmem:[#allocation3 + $0x44] sm:$0x1] %v443_v10  ;;  %v3618_v3 = vld [vmem:[#allocation3 + $0x14] sm:$0x1] }
 0x1b8   : > { %1912 = vst.msk [vmem:[#allocation4 + $0x40] sm:$0xf] %vm1895_vm9, %v1832_v60  ;;  %v3320_v21 = vshll.u32 %v6799_v1, 16  ;;  %v3315_v48 = vrot.slane %v3311_v19, 4  ;;  %v3953_v1 = vor.u32 %v3952_v54, %v9119_v29  ;;  %v3949_v10 = vsel %vm7913_vm11, %v3944_v20, %v9119_v29 }
 0x1b9   : > { %1102 = vrot.lane.b32.xlu0 %v8756_v4, %s7742_s7  ;;  %v1838_v47 = vpop.permute.xlu1 %1837  ;;  %v3622_v9 = vsel %vm9105_vm1, %v3314_v42, %v3621_v36  ;;  %v3297_v11 = vor.u32 %v3295_v63, %v3294_v43  ;;  %v3319_v24 = vrot.slane %v3317_v53, 7  ;;  %v3300_v16 = vshrl.u32 %v6797_v33, 16 }
 0x1ba   : > { %1915 = vst.msk [vmem:[#allocation4 + $0x4c] sm:$0xf] %vm1895_vm9, %v1838_v47  ;;  %3623 = vst [vmem:[#allocation3 + $0x18] sm:$0xf] %v3622_v9  ;;  %v3303_v18 = vshll.u32 %v6797_v33, 16  ;;  %v3298_v44 = vrot.slane %v3294_v43, 4 }
 0x1bb   : > { %v1836_v39 = vpop.permute.xlu0 %1835  ;;  %1231 = vrot.lane.b32.xlu1 %v8770_v2, %s7743_s8  ;;  %v3615_v15 = vsel %vm9105_vm1, %v3297_v11, %v3614_v58  ;;  %v3322_v36 = vor.u32 %v3320_v21, %v3319_v24  ;;  %v3324_v40 = vrot.slane %v3319_v24, 4  ;;  %v3302_v0 = vrot.slane %v3300_v16, 7  ;;  %v1355_v58 = vld [vmem:[#allocation2 + $0xb4] sm:$0xf]  ;;  %v1357_v11 = vld [vmem:[#allocation2 + $0xbc] sm:$0x1] }
 0x1bc   : > { %1914 = vst.msk [vmem:[#allocation4 + $0x48] sm:$0xf] %vm1895_vm9, %v1836_v39  ;;  %3616 = vst [vmem:[#allocation3 + $0xc] sm:$0xf] %v3615_v15  ;;  %v1721_v42 = vrot.slane %v1720_v35, 4  ;;  %v1725_v63 = vrot.slane %v1723_v50, 5 }
 0x1bd   : > { %1229 = vrot.lane.b32.xlu0 %v8756_v4, %s7743_s8  ;;  %v1963_v2 = vpop.permute.xlu1 %1962  ;;  %v3323_v19 = vsel %vm7838_vm5, %v3315_v48, %v3322_v36  ;;  %v3626_v38 = vsel %vm8705_vm15, %v3324_v40, %v3625_v49  ;;  %v3305_v4 = vor.u32 %v3303_v18, %v3302_v0  ;;  %v3307_v60 = vrot.slane %v3302_v0, 4 }
 0x1be   : > { %2042 = vst.msk [vmem:[#allocation4 + $0x44] sm:$0xf] %vm2024_vm10, %v1963_v2  ;;  %3624 = vst [vmem:[#allocation3 + $0x1c] sm:$0xf] %v3323_v19  ;;  %v9148_v53 = vrot.slane %v1737_v5, 5  ;;  %v1743_v43 = vrot.slane %v1741_v56, 4  ;;  %v9162_v24 = vsel %vm7913_vm11, %v1721_v42, %v1725_v63 }
 0x1bf   : > { %3627 = vst [vmem:[#allocation3 + $0x20] sm:$0x1] %v3626_v38  ;;  %v1961_v8 = vpop.permute.xlu0 %1960  ;;  %1235 = vrot.lane.b32.xlu1 %v8786_v26, %s7743_s8  ;;  %v3306_v27 = vsel %vm7838_vm5, %v3298_v44, %v3305_v4  ;;  %v3619_v33 = vsel %vm8705_vm15, %v3307_v60, %v3618_v3  ;;  %v1728_v22 = vshrl.u32 %v1355_v58, 16  ;;  %v1731_v47 = vshll.u32 %v1355_v58, 16 }
 0x1c0   : > { %2041 = vst.msk [vmem:[#allocation4 + $0x40] sm:$0xf] %vm2024_vm10, %v1961_v8  ;;  %3617 = vst [vmem:[#allocation3 + $0x10] sm:$0xf] %v3306_v27  ;;  %v3954_v35 = vrot.slane %v3953_v1, 4  ;;  %v3958_v50 = vrot.slane %v3956_v52, 5  ;;  %v1744_v16 = vor.u32 %v1743_v43, %v9148_v53 }
 0x1c1   : > { %1233 = vrot.lane.b32.xlu0 %v8788_v34, %s7743_s8  ;;  %v1967_v12 = vpop.permute.xlu1 %1966  ;;  %3620 = vst [vmem:[#allocation3 + $0x14] sm:$0x1] %v3619_v33  ;;  %v3730_v31 = vld [vmem:[#allocation3 + $0x18] sm:$0xf]  ;;  %v1711_v21 = vrot.slane %v1710_v61, 4  ;;  %v9169_v56 = vrot.slane %v1731_v47, 5 }
 0x1c2   : > { %2044 = vst.msk [vmem:[#allocation4 + $0x4c] sm:$0xf] %vm2024_vm10, %v1967_v12  ;;  %v3985_v51 = vshrl.u32 %v3730_v31, 16  ;;  %v3988_v9 = vshll.u32 %v3730_v31, 16  ;;  %v3959_v48 = vsel %vm7913_vm11, %v3954_v35, %v3958_v50  ;;  %v9189_v3 = vrot.slane %v1744_v16, 4 }
 0x1c3   : > { %v1965_v54 = vpop.permute.xlu0 %1964  ;;  %1849 = vrot.lane.b32.xlu1 %v8981_v55, %s7744_s9  ;;  %v3728_v49 = vld [vmem:[#allocation3 + $0xc] sm:$0xf]  ;;  %v9167_v55 = vrot.slane %v1728_v22, 4  ;;  %v9186_v29 = vsel %vm7913_vm11, %v1711_v21, %v9080_v25  ;;  %v5423_v52 = vld [vmem:[#allocation3 + $0x18] sm:$0xe]  ;;  %v9196_v60 = vcombine.low %v3949_v10, %v3959_v48 }
 0x1c4   : > { %2043 = vst.msk [vmem:[#allocation4 + $0x48] sm:$0xf] %vm2024_vm10, %v1965_v54  ;;  %v3961_v28 = vshrl.u32 %v3728_v49, 16  ;;  %v3964_v5 = vshll.u32 %v3728_v49, 16  ;;  %v3987_v36 = vrot.slane %v3985_v51, 4  ;;  %v3990_v2 = vrot.slane %v3988_v9, 5 }
 0x1c5   : > { %1847 = vrot.lane.b32.xlu0 %v8990_v32, %s7744_s9  ;;  %v2092_v39 = vpop.permute.xlu1 %2091  ;;  %v9177_v15 = vld [vmem:[#allocation3 + $0x1c] sm:$0xf]  ;;  %v1747_v32 = vshll.u32 %v1357_v11, 16  ;;  %v1734_v25 = vor.u32 %v9169_v56, %v9167_v55  ;;  %v5422_v33 = vld [vmem:[#allocation3 + $0xc] sm:$0xe]  ;;  %v6701_v16 = vrot.slane %v5423_v52, 9 }
 0x1c6   : > { %2171 = vst.msk [vmem:[#allocation4 + $0x44] sm:$0xf] %vm10568_vm12, %v2092_v39  ;;  %v3963_v0 = vrot.slane %v3961_v28, 4  ;;  %v3966_v18 = vrot.slane %v3964_v5, 5  ;;  %v3994_v41 = vshll.u32 %v9177_v15, 16  ;;  %v3998_v38 = vshrl.u32 %v9177_v15, 16 }
 0x1c7   : > { %v2090_v40 = vpop.permute.xlu0 %2089  ;;  %1853 = vrot.lane.b32.xlu1 %v9003_v6, %s7744_s9  ;;  %v3920_v19 = vld [vmem:[#allocation3 + $0x20] sm:$0x1]  ;;  %v9192_v1 = vcombine.low %v3730_v31, %v9177_v15  ;;  %v3729_v44 = vld [vmem:[#allocation3 + $0x10] sm:$0xf]  ;;  %v5491_v61 = vrot.slane %v9177_v15, 5  ;;  %v3991_v22 = vor.u32 %v3990_v2, %v3987_v36  ;;  %v1749_v20 = vrot.slane %v1747_v32, 5 }
 0x1c8   : > { %2170 = vst.msk [vmem:[#allocation4 + $0x40] sm:$0xf] %vm10568_vm12, %v2090_v40  ;;  %v3919_v4 = vld [vmem:[#allocation3 + $0x14] sm:$0x1]  ;;  %v9198_v8 = vrot.slane %v3994_v41, 5  ;;  %v3967_v42 = vor.u32 %v3966_v18, %v3963_v0  ;;  %v3970_v63 = vshll.u32 %v3729_v44, 16  ;;  %v9206_v35 = vcombine.low %v3728_v49, %v3729_v44 }
 0x1c9   : > { %1851 = vrot.lane.b32.xlu0 %v9010_v13, %s7744_s9  ;;  %v2096_v58 = vpop.permute.xlu1 %2095  ;;  %v3974_v43 = vshrl.u32 %v3729_v44, 16  ;;  %v4000_v27 = vrot.slane %v3998_v38, 4  ;;  %v4004_v47 = vshll.u32 %v3920_v19, 16  ;;  %v3980_v54 = vshll.u32 %v3919_v4, 16 }
 0x1ca   : > { %2173 = vst.msk [vmem:[#allocation4 + $0x4c] sm:$0xf] %vm10568_vm12, %v2096_v58  ;;  %v3972_v50 = vrot.slane %v3970_v63, 5  ;;  %v6700_v11 = vrot.slane %v5422_v33, 9  ;;  %v5484_v21 = vrot.slane %v3729_v44, 5  ;;  %v3968_v39 = vrot.slane %v3967_v42, 4 }
 0x1cb   : > { %v2094_v12 = vpop.permute.xlu0 %2093  ;;  %1978 = vrot.lane.b32.xlu1 %v9003_v6, %s7745_s10  ;;  %v3976_v31 = vrot.slane %v3974_v43, 4  ;;  %v4001_v51 = vor.u32 %v4000_v27, %v9198_v8  ;;  %v5493_v6 = vrot.slane %v5491_v61, 4  ;;  %v5494_v5 = vrot.slane %v3920_v19, 5 }
 0x1cc   : > { %2172 = vst.msk [vmem:[#allocation4 + $0x48] sm:$0xf] %vm10568_vm12, %v2094_v12  ;;  %v3992_v56 = vrot.slane %v3991_v22, 4  ;;  %v4006_v10 = vrot.slane %v4004_v47, 5  ;;  %v5486_v48 = vrot.slane %v5484_v21, 4  ;;  %v5487_v15 = vrot.slane %v3919_v4, 5 }
 0x1cd   : > { %1976 = vrot.lane.b32.xlu0 %v9010_v13, %s7745_s10  ;;  %v2458_v9 = vpop.permute.xlu1 %2457  ;;  %v3977_v49 = vor.u32 %v3976_v31, %v3972_v50  ;;  %v4002_v28 = vrot.slane %v4001_v51, 4  ;;  %v3982_v36 = vrot.slane %v3980_v54, 5  ;;  %v5492_v32 = vsel %vm8053_vm14, %v6701_v16, %v5491_v61  ;;  %v2230_v22 = vld [vmem:[#allocation2 + $0xb0] sm:$0x1]  ;;  %v2232_v54 = vld [vmem:[#allocation2 + $0xb8] sm:$0xf] }
 0x1ce   : > { %2537 = vst.msk [vmem:[#allocation4 + $0x44] sm:$0xf] %vm10632_vm0, %v2458_v9  ;;  %v5495_v40 = vsel %vm8053_vm14, %v5493_v6, %v5494_v5  ;;  %v1735_v18 = vrot.slane %v1734_v25, 4  ;;  %v5485_v2 = vsel %vm8053_vm14, %v6700_v11, %v5484_v21  ;;  %v5488_v41 = vsel %vm8053_vm14, %v5486_v48, %v5487_v15  ;;  %vm10640_vm0 = vmmov %vm10639_vm6  ;;  %v2233_v16 = vld [vmem:[#allocation2 + $0xbc] sm:$0x1] }
 0x1cf   : > { %v2456_v55 = vpop.permute.xlu0 %2455  ;;  %1982 = vrot.lane.b32.xlu1 %v9162_v24, %s7745_s10  ;;  %v3978_v13 = vrot.slane %v3977_v49, 4  ;;  %v9226_v19 = vcombine.low %v5492_v32, %v5495_v40  ;;  %v3973_v38 = vsel %vm7913_vm11, %v3968_v39, %v3972_v50  ;;  %v4007_v58 = vsel %vm7913_vm11, %v4002_v28, %v4006_v10  ;;  %v2231_v49 = vld [vmem:[#allocation2 + $0xb4] sm:$0xe]  ;;  %v396_v15 = vld [vmem:[#allocation3 + $0x60] sm:$0x1] }
 0x1d0   : > { %2536 = vst.msk [vmem:[#allocation4 + $0x40] sm:$0xf] %vm10633_vm4, %v2456_v55  ;;  %v9235_v44 = vcombine.low %v5485_v2, %v5488_v41  ;;  %v3997_v61 = vsel %vm7913_vm11, %v3992_v56, %v9198_v8  ;;  %v9246_v42 = vsel %vm7913_vm11, %v9189_v3, %v1749_v20  ;;  %v9257_v8 = vsel %vm7913_vm11, %v1735_v18, %v9148_v53  ;;  %vm10641_vm4 = vmmov %vm10640_vm0  ;;  %v2228_v20 = vld [vmem:[#allocation2 + $0xa8] sm:$0xe] }
 0x1d1   : > { %1980 = vrot.lane.b32.xlu0 %v9186_v29, %s7745_s10  ;;  %v2462_v0 = vpop.permute.xlu1 %2461  ;;  %10634 = vst [vmem:[#allocation8_spill] sm:$0xff] %v9226_v19  ;;  %v3983_v52 = vsel %vm7913_vm11, %v3978_v13, %v3982_v36  ;;  %v9250_v43 = vcombine.low %v3997_v61, %v4007_v58  ;;  %v2404_v11 = vrot.slane %v2232_v54, 5  ;;  %v2407_v5 = vrot.slane %v2233_v16, 5 }
 0x1d2   : > { %2539 = vst.msk [vmem:[#allocation4 + $0x4c] sm:$0xf] %vm10635_vm7, %v2462_v0  ;;  %10636 = vst [vmem:[#allocation9_spill] sm:$0xff] %v9235_v44  ;;  %v6634_v25 = vcombine.low %v3973_v38, %v3983_v52  ;;  %vm10642_vm7 = vcmask 290048   ;;  %v6544_v55 = vrot.slane %v2231_v49, 9  ;;  %v397_v32 = vsel %vm8705_vm15, 0, %v396_v15 }
 0x1d3   : > { %v2460_v4 = vpop.permute.xlu0 %2459  ;;  %2107 = vrot.lane.b32.xlu1 %v9162_v24, %s7746_s11  ;;  %v2406_v28 = vrot.slane %v2404_v11, 4  ;;  %398 = vst [vmem:[#allocation3 + $0x60] sm:$0x1] %v397_v32  ;;  %v1359_v52 = vld [vmem:[#allocation2 + $0xc4] sm:$0xf] }
 0x1d4   : > { %2538 = vst.msk [vmem:[#allocation4 + $0x48] sm:$0xf] %vm10637_vm8, %v2460_v4  ;;  %4665 = vmatprep.mubr.bf16.mxu1 %v6634_v25  ;;  %vm10643_vm8 = vmmov %vm10642_vm7  ;;  %v9315_v0 = vsel %vm8053_vm14, %v6544_v55, %v2404_v11  ;;  %v451_v49 = vld [vmem:[#allocation3 + $0x68] sm:$0x1] }
 0x1d5   : > { %2105 = vrot.lane.b32.xlu0 %v9186_v29, %s7746_s11  ;;  %v2587_v63 = vpop.permute.xlu1 %2586  ;;  %4666 = vmatmul.mubr.bf16.vlgmr.msra.gmra.mxu1 %v9196_v60  ;;  %v2229_v60 = vld [vmem:[#allocation2 + $0xac] sm:$0xf]  ;;  %v9304_v48 = vsel %vm8053_vm14, %v2406_v28, %v2407_v5  ;;  %v3628_v28 = vld [vmem:[#allocation3 + $0x24] sm:$0xf] }
 0x1d6   : > { %2666 = vst.msk [vmem:[#allocation4 + $0x44] sm:$0xf] %vm10638_vm13, %v2587_v63  ;;  %4673 = vmatprep.mubr.bf16.mxu1 %v9250_v43  ;;  %v2397_v53 = vrot.slane %v2229_v60, 5  ;;  %vm10644_vm13 = vmmov %vm10642_vm7 }
 0x1d7   : > { %v2585_v27 = vpop.permute.xlu0 %2584  ;;  %2111 = vrot.lane.b32.xlu1 %v9246_v42, %s7746_s11 }
 0x1d8   : > { %2665 = vst.msk [vmem:[#allocation4 + $0x40] sm:$0xf] %vm10639_vm6, %v2585_v27  ;;  %v2399_v50 = vrot.slane %v2397_v53, 4  ;;  %vm10645_vm6 = vmmov %vm10642_vm7  ;;  %v1358_v27 = vld [vmem:[#allocation2 + $0xc0] sm:$0xf] }
 0x1d9   : > { %2109 = vrot.lane.b32.xlu0 %v9257_v8, %s7746_s11  ;;  %v2591_v3 = vpop.permute.xlu1 %2590  ;;  %v1755_v11 = vshll.u32 %v1358_v27, 16 }
 0x1da   : > { %2668 = vst.msk [vmem:[#allocation4 + $0x4c] sm:$0xf] %vm10640_vm0, %v2591_v3  ;;  %vm10646_vm0 = vcmask 60448  }
 0x1db   : > { %v2589_v33 = vpop.permute.xlu0 %2588  ;;  %2473 = vrot.lane.b32.xlu1 %v9035_v7, %s7747_s12  ;;  %v2400_v7 = vrot.slane %v2230_v22, 5 }
 0x1dc   : > { %2667 = vst.msk [vmem:[#allocation4 + $0x48] sm:$0xf] %vm10641_vm4, %v2589_v33  ;;  %vm10647_vm4 = vmmov %vm10646_vm0  ;;  %v983_v33 = vld [vmem:[#allocation2 + $0xc4] sm:$0xf] }
 0x1dd   : > { %2471 = vrot.lane.b32.xlu0 %v9042_v37, %s7747_s12  ;;  %v2716_v12 = vpop.permute.xlu1 %2715  ;;  %4674 = vmatmul.mubr.bf16.gmra.mxu1 %v6634_v25  ;;  %v6543_v37 = vrot.slane %v2228_v20, 9  ;;  %v9283_v9 = vsel %vm8053_vm14, %v2399_v50, %v2400_v7  ;;  %v1765_v20 = vshrl.u32 %v1359_v52, 16  ;;  %v393_v50 = vld [vmem:[#allocation3 + $0x54] sm:$0x1]  ;;  %v3635_v7 = vld [vmem:[#allocation3 + $0x30] sm:$0xf] }
 0x1de   : > { %2795 = vst.msk [vmem:[#allocation4 + $0x44] sm:$0xf] %vm10642_vm7, %v2716_v12  ;;  %vm10648_vm7 = vcmask 293888  }
 0x1df   : > { %v2714_v47 = vpop.permute.xlu0 %2713  ;;  %2477 = vrot.lane.b32.xlu1 %v9061_v14, %s7747_s12  ;;  %v9290_v6 = vsel %vm8053_vm14, %v6543_v37, %v2397_v53  ;;  %v1761_v53 = vshll.u32 %v1359_v52, 16  ;;  %v982_v37 = vld [vmem:[#allocation2 + $0xc0] sm:$0xf] }
 0x1e0   : > { %2794 = vst.msk [vmem:[#allocation4 + $0x40] sm:$0xf] %vm10643_vm8, %v2714_v47  ;;  %vm10649_vm8 = vmmov %vm10646_vm0 }
 0x1e1   : > { %2475 = vrot.lane.b32.xlu0 %v9070_v46, %s7747_s12  ;;  %v2720_v31 = vpop.permute.xlu1 %2719 }
 0x1e2   : > { %2797 = vst.msk [vmem:[#allocation4 + $0x4c] sm:$0xf] %vm10644_vm13, %v2720_v31  ;;  %vm10650_vm13 = vmmov %vm10646_vm0 }
 0x1e3   : > { %v2718_v51 = vpop.permute.xlu0 %2717  ;;  %2602 = vrot.lane.b32.xlu1 %v9061_v14, %s7748_s13 }
 0x1e4   : > { %2796 = vst.msk [vmem:[#allocation4 + $0x48] sm:$0xf] %vm10645_vm6, %v2718_v51  ;;  %vm10651_vm6 = vmmov %vm10648_vm7  ;;  %v1752_v51 = vshrl.u32 %v1358_v27, 16 }
 0x1e5   : > { %2600 = vrot.lane.b32.xlu0 %v9070_v46, %s7748_s13  ;;  %v1093_v21 = vpop.permute.xlu1 %1092 }
 0x1e6   : > { %1168 = vst.msk [vmem:[#allocation4 + $0x54] sm:$0xf] %vm10646_vm0, %v1093_v21  ;;  %vm10652_vm0 = vcmask 224448  }
 0x1e7   : > { %v1091_v39 = vpop.permute.xlu0 %1090  ;;  %2606 = vrot.lane.b32.xlu1 %v9283_v9, %s7748_s13  ;;  %v7622_v14 = vld [vmem:[#allocation4 + $0x40] sm:$0xff]  }
 0x1e8   : > { %1167 = vst.msk [vmem:[#allocation4 + $0x50] sm:$0xf] %vm10647_vm4, %v1091_v39  ;;  %7404 = vmatprep.mubr.msk.bf16.mxu0 %vm10648_vm7, %v7622_v14  ;;  %vm10653_vm4 = vmmov %vm10652_vm0 }
 0x1e9   : > { %2604 = vrot.lane.b32.xlu0 %v9290_v6, %s7748_s13  ;;  %v1097_v46 = vpop.permute.xlu1 %1096  ;;  %vm10655_vm7 = vmmov %vm10652_vm0 }
 0x1ea   : > { %1170 = vst.msk [vmem:[#allocation4 + $0x5c] sm:$0xf] %vm10649_vm8, %v1097_v46  ;;  %v452_v46 = vsel %vm8733_vm2, 0, %v451_v49  ;;  %vm10657_vm8 = vmmov %vm10652_vm0 }
 0x1eb   : > { %v1095_v56 = vpop.permute.xlu0 %1094  ;;  %2731 = vrot.lane.b32.xlu1 %v9283_v9, %s7749_s20  ;;  %v7623_v10 = vld [vmem:[#allocation4 + $0x48] sm:$0xff]   ;;  %453 = vst [vmem:[#allocation3 + $0x68] sm:$0x1] %v452_v46 }
 0x1ec   : > { %1169 = vst.msk [vmem:[#allocation4 + $0x58] sm:$0xf] %vm10650_vm13, %v1095_v56  ;;  %v7394_v13 = vpop.f32.mrf.mxu0  ;;  %7405 = vmatmul.mubr.msk.bf16.gmra.mxu0 %vm10651_vm6, %v7623_v10  ;;  %vm10658_vm13 = vcmask 257248  }
 0x1ed   : > { %2729 = vrot.lane.b32.xlu0 %v9290_v6, %s7749_s20  ;;  %v1224_v36 = vpop.permute.xlu1 %1223  ;;  %v3061_v40 = vadd.f32 %v7394_v13, %v9056_v62  ;;  %v1362_v13 = vld [vmem:[#allocation2 + $0xd0] sm:$0xf]  ;;  %vm10659_vm6 = vmmov %vm10658_vm13 }
 0x1ee   : > { %1299 = vst.msk [vmem:[#allocation4 + $0x54] sm:$0xf] %vm1277_vm3, %v1224_v36  ;;  %v3052_v2 = vpop.f32.mrf.mxu0  ;;  %v1785_v27 = vshll.u32 %v1362_v13, 16 }
 0x1ef   : > { %v1222_v18 = vpop.permute.xlu0 %1221  ;;  %2735 = vrot.lane.b32.xlu1 %v9304_v48, %s7749_s20  ;;  %v3169_v41 = vmax.f32 %v3061_v40, 0.0  ;;  %v3053_v38 = vadd.f32 %v9056_v62, %v3052_v2  ;;  %v9341_v40 = vrot.slane %v1765_v20, 4  ;;  %v9345_v2 = vrot.slane %v1755_v11, 5  ;;  %v985_v20 = vld [vmem:[#allocation2 + $0xd0] sm:$0xf] }
 0x1f0   : > { %1298 = vst.msk [vmem:[#allocation4 + $0x50] sm:$0xf] %vm1277_vm3, %v1222_v18  ;;  %v7395_v58 = vpop.f32.mrf.mxu0  ;;  %v9343_v18 = vrot.slane %v1752_v51, 4  ;;  %v3632_v11 = vld [vmem:[#allocation3 + $0x2c] sm:$0x1] }
 0x1f1   : > { %2733 = vrot.lane.b32.xlu0 %v9315_v0, %s7749_s20  ;;  %v1228_v4 = vpop.permute.xlu1 %1227  ;;  %v6802_v25 = vpack.c.bf16 %v3169_v41, %v3169_v41  ;;  %v3167_v61 = vmax.f32 %v3053_v38, 0.0  ;;  %v3064_v63 = vadd.f32 %v7395_v58, %v9056_v62  ;;  %v448_v41 = vld [vmem:[#allocation3 + $0x5c] sm:$0x1] }
 0x1f2   : > { %1301 = vst.msk [vmem:[#allocation4 + $0x5c] sm:$0xf] %vm1277_vm3, %v1228_v4  ;;  %v3055_v60 = vpop.f32.mrf.mxu0 }
 0x1f3   : > { %v1226_v3 = vpop.permute.xlu0 %1225  ;;  %1108 = vrot.lane.b32.xlu1 %v8786_v26, %s7742_s7  ;;  %v3343_v12 = vshrl.u32 %v6802_v25, 16  ;;  %v6800_v22 = vpack.c.bf16 %v3167_v61, %v3167_v61  ;;  %v3170_v47 = vmax.f32 %v3064_v63, 0.0  ;;  %v3056_v31 = vadd.f32 %v9056_v62, %v3055_v60 }
 0x1f4   : > { %1300 = vst.msk [vmem:[#allocation4 + $0x58] sm:$0xf] %vm1277_vm3, %v1226_v3  ;;  %v394_v26 = vsel %vm8705_vm15, 0, %v393_v50  ;;  %v3346_v16 = vshll.u32 %v6802_v25, 16  ;;  %v3639_v25 = vld [vmem:[#allocation3 + $0x38] sm:$0x1] }
 0x1f5   : > { %1106 = vrot.lane.b32.xlu0 %v8788_v34, %s7742_s7  ;;  %v1842_v54 = vpop.permute.xlu1 %1841  ;;  %v3345_v21 = vrot.slane %v3343_v12, 7  ;;  %v3326_v39 = vshrl.u32 %v6800_v22, 16  ;;  %v6803_v14 = vpack.c.bf16 %v3170_v47, %v3170_v47  ;;  %395 = vst [vmem:[#allocation3 + $0x54] sm:$0x1] %v394_v26  ;;  %v3168_v62 = vmax.f32 %v3056_v31, 0.0 }
 0x1f6   : > { %1917 = vst.msk [vmem:[#allocation4 + $0x54] sm:$0xf] %vm1895_vm9, %v1842_v54  ;;  %v9335_v34 = vrot.slane %v1761_v53, 5  ;;  %v3329_v10 = vshll.u32 %v6800_v22, 16  ;;  %v1789_v3 = vshrl.u32 %v1362_v13, 16  ;;  %v449_v60 = vsel %vm8733_vm2, 0, %v448_v41 }
 0x1f7   : > { %v1840_v5 = vpop.permute.xlu0 %1839  ;;  %1112 = vrot.lane.b32.xlu1 %v983_v33, %s7742_s7  ;;  %v3348_v55 = vor.u32 %v3346_v16, %v3345_v21  ;;  %v3328_v56 = vrot.slane %v3326_v39, 7  ;;  %v3351_v15 = vshrl.u32 %v6803_v14, 16  ;;  %v6801_v36 = vpack.c.bf16 %v3168_v62, %v3168_v62  ;;  %450 = vst [vmem:[#allocation3 + $0x5c] sm:$0x1] %v449_v60  ;;  %v1360_v31 = vld [vmem:[#allocation2 + $0xc8] sm:$0x1] }
 0x1f8   : > { %1916 = vst.msk [vmem:[#allocation4 + $0x50] sm:$0xf] %vm1895_vm9, %v1840_v5  ;;  %v3354_v4 = vshll.u32 %v6803_v14, 16  ;;  %v3349_v53 = vrot.slane %v3345_v21, 4  ;;  %v984_v26 = vld [vmem:[#allocation2 + $0xcc] sm:$0xf]  ;;  %v1758_v62 = vor.u32 %v9345_v2, %v9343_v18 }
 0x1f9   : > { %1110 = vrot.lane.b32.xlu0 %v982_v37, %s7742_s7  ;;  %v1846_v32 = vpop.permute.xlu1 %1845  ;;  %v3636_v38 = vsel %vm9105_vm1, %v3348_v55, %v3635_v7  ;;  %v3331_v52 = vor.u32 %v3329_v10, %v3328_v56  ;;  %v3353_v58 = vrot.slane %v3351_v15, 7  ;;  %v3334_v61 = vshrl.u32 %v6801_v36, 16  ;;  %v1361_v21 = vld [vmem:[#allocation2 + $0xcc] sm:$0xf]  ;;  %v1363_v2 = vld [vmem:[#allocation2 + $0xd4] sm:$0x1] }
 0x1fa   : > { %1919 = vst.msk [vmem:[#allocation4 + $0x5c] sm:$0xf] %vm1895_vm9, %v1846_v32  ;;  %3637 = vst [vmem:[#allocation3 + $0x30] sm:$0xf] %v3636_v38  ;;  %v3337_v7 = vshll.u32 %v6801_v36, 16  ;;  %v3332_v16 = vrot.slane %v3328_v56, 4 }
 0x1fb   : > { %v1844_v63 = vpop.permute.xlu0 %1843  ;;  %1239 = vrot.lane.b32.xlu1 %v983_v33, %s7743_s8  ;;  %v3629_v12 = vsel %vm9105_vm1, %v3331_v52, %v3628_v28  ;;  %v3356_v22 = vor.u32 %v3354_v4, %v3353_v58  ;;  %v3358_v47 = vrot.slane %v3353_v58, 4  ;;  %v3336_v50 = vrot.slane %v3334_v61, 7 }
 0x1fc   : > { %1918 = vst.msk [vmem:[#allocation4 + $0x58] sm:$0xf] %vm1895_vm9, %v1844_v63  ;;  %3630 = vst [vmem:[#allocation3 + $0x24] sm:$0xf] %v3629_v12  ;;  %v1771_v28 = vshll.u32 %v1360_v31, 16  ;;  %v9368_v5 = vrot.slane %v1785_v27, 5 }
 0x1fd   : > { %1237 = vrot.lane.b32.xlu0 %v982_v37, %s7743_s8  ;;  %v1971_v33 = vpop.permute.xlu1 %1970  ;;  %v3357_v54 = vsel %vm7838_vm5, %v3349_v53, %v3356_v22  ;;  %v3640_v51 = vsel %vm8705_vm15, %v3358_v47, %v3639_v25  ;;  %v3339_v39 = vor.u32 %v3337_v7, %v3336_v50  ;;  %v3341_v14 = vrot.slane %v3336_v50, 4 }
 0x1fe   : > { %2046 = vst.msk [vmem:[#allocation4 + $0x54] sm:$0xf] %vm2024_vm10, %v1971_v33  ;;  %3638 = vst [vmem:[#allocation3 + $0x34] sm:$0xf] %v3357_v54  ;;  %v1768_v37 = vor.u32 %v9341_v40, %v9335_v34  ;;  %v1791_v46 = vrot.slane %v1789_v3, 4  ;;  %v1776_v15 = vshrl.u32 %v1361_v21, 16 }
 0x1ff   : > { %3641 = vst [vmem:[#allocation3 + $0x38] sm:$0x1] %v3640_v51  ;;  %v1969_v49 = vpop.permute.xlu0 %1968  ;;  %1243 = vrot.lane.b32.xlu1 %v985_v20, %s7743_s8  ;;  %v3340_v55 = vsel %vm7838_vm5, %v3332_v16, %v3339_v39  ;;  %v3633_v56 = vsel %vm8705_vm15, %v3341_v14, %v3632_v11  ;;  %v1779_v13 = vshll.u32 %v1361_v21, 16  ;;  %v1773_v38 = vrot.slane %v1771_v28, 5 }
 0x200   : > { %2045 = vst.msk [vmem:[#allocation4 + $0x50] sm:$0xf] %vm2024_vm10, %v1969_v49  ;;  %3631 = vst [vmem:[#allocation3 + $0x28] sm:$0xf] %v3340_v55  ;;  %v1769_v41 = vrot.slane %v1768_v37, 4  ;;  %v1759_v52 = vrot.slane %v1758_v62, 4  ;;  %v1792_v4 = vor.u32 %v1791_v46, %v9368_v5 }
 0x201   : > { %1241 = vrot.lane.b32.xlu0 %v984_v26, %s7743_s8  ;;  %v1975_v10 = vpop.permute.xlu1 %1974  ;;  %3634 = vst [vmem:[#allocation3 + $0x2c] sm:$0x1] %v3633_v56  ;;  %v3734_v36 = vld [vmem:[#allocation3 + $0x30] sm:$0xf]  ;;  %v9382_v27 = vrot.slane %v1776_v15, 4  ;;  %v1795_v53 = vshll.u32 %v1363_v2, 16 }
 0x202   : > { %2048 = vst.msk [vmem:[#allocation4 + $0x5c] sm:$0xf] %vm2024_vm10, %v1975_v10  ;;  %v4033_v40 = vshrl.u32 %v3734_v36, 16  ;;  %v4036_v18 = vshll.u32 %v3734_v36, 16  ;;  %v9395_v50 = vsel %vm7913_vm11, %v1769_v41, %v1773_v38  ;;  %v9398_v31 = vrot.slane %v1792_v4, 4 }
 0x203   : > { %v1973_v32 = vpop.permute.xlu0 %1972  ;;  %1857 = vrot.lane.b32.xlu1 %v9162_v24, %s7744_s9  ;;  %v3732_v58 = vld [vmem:[#allocation3 + $0x24] sm:$0xf]  ;;  %v9384_v24 = vrot.slane %v1779_v13, 5  ;;  %v5425_v51 = vld [vmem:[#allocation3 + $0x30] sm:$0xe]  ;;  %v9408_v26 = vsel %vm7913_vm11, %v1759_v52, %v9335_v34  ;;  %v1797_v15 = vrot.slane %v1795_v53, 5 }
 0x204   : > { %2047 = vst.msk [vmem:[#allocation4 + $0x58] sm:$0xf] %vm2024_vm10, %v1973_v32  ;;  %v4009_v61 = vshrl.u32 %v3732_v58, 16  ;;  %v4012_v63 = vshll.u32 %v3732_v58, 16  ;;  %v4035_v60 = vrot.slane %v4033_v40, 4  ;;  %v6703_v52 = vrot.slane %v5425_v51, 9 }
 0x205   : > { %1855 = vrot.lane.b32.xlu0 %v9186_v29, %s7744_s9  ;;  %v2100_v25 = vpop.permute.xlu1 %2099  ;;  %v9387_v3 = vld [vmem:[#allocation3 + $0x34] sm:$0xf]  ;;  %v4038_v29 = vrot.slane %v4036_v18, 5  ;;  %v1782_v14 = vor.u32 %v9384_v24, %v9382_v27  ;;  %v5424_v55 = vld [vmem:[#allocation3 + $0x24] sm:$0xe] }
 0x206   : > { %2175 = vst.msk [vmem:[#allocation4 + $0x54] sm:$0xf] %vm10568_vm12, %v2100_v25  ;;  %v4011_v22 = vrot.slane %v4009_v61, 4  ;;  %v4014_v47 = vrot.slane %v4012_v63, 5  ;;  %v4042_v20 = vshll.u32 %v9387_v3, 16  ;;  %v4046_v33 = vshrl.u32 %v9387_v3, 16 }
 0x207   : > { %v2098_v12 = vpop.permute.xlu0 %2097  ;;  %1861 = vrot.lane.b32.xlu1 %v9246_v42, %s7744_s9  ;;  %v3922_v7 = vld [vmem:[#allocation3 + $0x38] sm:$0x1]  ;;  %v9401_v54 = vcombine.low %v3734_v36, %v9387_v3  ;;  %v3733_v21 = vld [vmem:[#allocation3 + $0x28] sm:$0xf]  ;;  %v5505_v49 = vrot.slane %v9387_v3, 5  ;;  %v4039_v34 = vor.u32 %v4038_v29, %v4035_v60  ;;  %v6702_v41 = vrot.slane %v5424_v55, 9 }
 0x208   : > { %2174 = vst.msk [vmem:[#allocation4 + $0x50] sm:$0xf] %vm10568_vm12, %v2098_v12  ;;  %v3921_v16 = vld [vmem:[#allocation3 + $0x2c] sm:$0x1]  ;;  %v9410_v39 = vrot.slane %v4042_v20, 5  ;;  %v4015_v37 = vor.u32 %v4014_v47, %v4011_v22  ;;  %v4018_v28 = vshll.u32 %v3733_v21, 16  ;;  %v9418_v13 = vcombine.low %v3732_v58, %v3733_v21 }
 0x209   : > { %1859 = vrot.lane.b32.xlu0 %v9257_v8, %s7744_s9  ;;  %v2104_v11 = vpop.permute.xlu1 %2103  ;;  %v4022_v62 = vshrl.u32 %v3733_v21, 16  ;;  %v4048_v46 = vrot.slane %v4046_v33, 4  ;;  %v4052_v10 = vshll.u32 %v3922_v7, 16  ;;  %v4028_v40 = vshll.u32 %v3921_v16, 16  ;;  %s10436_s9 = scalar_lea.vmem %s10560_s5, %s6794_s28 }
 0x20a   : > { %2177 = vst.msk [vmem:[#allocation4 + $0x5c] sm:$0xf] %vm10568_vm12, %v2104_v11  ;;  %v4020_v36 = vrot.slane %v4018_v28, 5  ;;  %v5498_v38 = vrot.slane %v3733_v21, 5  ;;  %v4016_v4 = vrot.slane %v4015_v37, 4  ;;  %v5508_v61 = vrot.slane %v3922_v7, 5 }
 0x20b   : > { %v2102_v56 = vpop.permute.xlu0 %2101  ;;  %1986 = vrot.lane.b32.xlu1 %v9246_v42, %s7745_s10  ;;  %v4024_v32 = vrot.slane %v4022_v62, 4  ;;  %v4049_v18 = vor.u32 %v4048_v46, %v9410_v39  ;;  %v5507_v42 = vrot.slane %v5505_v49, 4  ;;  %v4040_v27 = vrot.slane %v4039_v34, 4 }
 0x20c   : > { %2176 = vst.msk [vmem:[#allocation4 + $0x58] sm:$0xf] %vm10568_vm12, %v2102_v56  ;;  %v4054_v24 = vrot.slane %v4052_v10, 5  ;;  %v5500_v3 = vrot.slane %v5498_v38, 4  ;;  %v5501_v60 = vrot.slane %v3921_v16, 5  ;;  %v4030_v53 = vrot.slane %v4028_v40, 5 }
 0x20d   : > { %1984 = vrot.lane.b32.xlu0 %v9257_v8, %s7745_s10  ;;  %v2466_v2 = vpop.permute.xlu1 %2465  ;;  %v4025_v58 = vor.u32 %v4024_v32, %v4020_v36  ;;  %v4050_v25 = vrot.slane %v4049_v18, 4  ;;  %v5506_v12 = vsel %vm8053_vm14, %v6703_v52, %v5505_v49  ;;  %v5509_v22 = vsel %vm8053_vm14, %v5507_v42, %v5508_v61  ;;  %v7629_v56 = vld [vmem:[#allocation5 + $0x170] sm:$0xff]   ;;  %v7632_v61 = vld [vmem:[#allocation5 + $0x158] sm:$0xff]  }
 0x20e   : > { %2541 = vst.msk [vmem:[#allocation4 + $0x54] sm:$0xf] %vm10652_vm0, %v2466_v2  ;;  %v1783_v29 = vrot.slane %v1782_v14, 4  ;;  %v5499_v20 = vsel %vm8053_vm14, %v6702_v41, %v5498_v38  ;;  %v5502_v7 = vsel %vm8053_vm14, %v5500_v3, %v5501_v60  ;;  %v9438_v33 = vcombine.low %v5506_v12, %v5509_v22  ;;  %vm10660_vm0 = vmmov %vm10659_vm6  ;;  %v2238_v2 = vld [vmem:[#allocation2 + $0xd0] sm:$0xf] }
 0x20f   : > { %v2464_v63 = vpop.permute.xlu0 %2463  ;;  %1990 = vrot.lane.b32.xlu1 %v9395_v50, %s7745_s10  ;;  %v4026_v8 = vrot.slane %v4025_v58, 4  ;;  %v4021_v51 = vsel %vm7913_vm11, %v4016_v4, %v4020_v36  ;;  %v4055_v21 = vsel %vm7913_vm11, %v4050_v25, %v4054_v24  ;;  %v9447_v16 = vcombine.low %v5499_v20, %v5502_v7  ;;  %v7630_v36 = vld [vmem:[#allocation5 + $0x168] sm:$0xff]   ;;  %v7631_v41 = vld [vmem:[#allocation5 + $0x160] sm:$0xff]   ;;  %v2237_v24 = vld [vmem:[#allocation2 + $0xcc] sm:$0xe] }
 0x210   : > { %2540 = vst.msk [vmem:[#allocation4 + $0x50] sm:$0xf] %vm10653_vm4, %v2464_v63  ;;  %10654 = vst [vmem:[#allocation10_spill] sm:$0xff] %v9438_v33  ;;  %v4045_v37 = vsel %vm7913_vm11, %v4040_v27, %v9410_v39  ;;  %v1798_v28 = vsel %vm7913_vm11, %v9398_v31, %v1797_v15  ;;  %v1788_v39 = vsel %vm7913_vm11, %v1783_v29, %v9368_v5  ;;  %v2236_v15 = vld [vmem:[#allocation2 + $0xc8] sm:$0x1]  ;;  %v2418_v4 = vrot.slane %v2238_v2, 5 }
 0x211   : > { %1988 = vrot.lane.b32.xlu0 %v9408_v26, %s7745_s10  ;;  %v2470_v47 = vpop.permute.xlu1 %2469  ;;  %v4031_v11 = vsel %vm7913_vm11, %v4026_v8, %v4030_v53  ;;  %10656 = vst [vmem:[#allocation11_spill] sm:$0xff] %v9447_v16  ;;  %v9463_v46 = vcombine.low %v4045_v37, %v4055_v21  ;;  %vm10661_vm4 = vmmov %vm10660_vm0  ;;  %v2414_v18 = vrot.slane %v2236_v15, 5  ;;  %v2239_v25 = vld [vmem:[#allocation2 + $0xd4] sm:$0x1]  ;;  %v7634_v8 = vld [vmem:[#allocation5 + $0x150] sm:$0xff]   ;;  %v6546_v12 = vrot.slane %v2237_v24, 9 }
 0x212   : > { %2543 = vst.msk [vmem:[#allocation4 + $0x5c] sm:$0xf] %vm10655_vm7, %v2470_v47  ;;  %v9451_v49 = vcombine.low %v4021_v51, %v4031_v11  ;;  %vm10662_vm7 = vcmask 290048   ;;  %v2420_v3 = vrot.slane %v2418_v4, 4  ;;  %v2421_v60 = vrot.slane %v2239_v25, 5  ;;  %v7636_v11 = vld [vmem:[#allocation5 + $0x148] sm:$0xff]  }
 0x213   : > { %v2468_v14 = vpop.permute.xlu0 %2467  ;;  %2115 = vrot.lane.b32.xlu1 %v9395_v50, %s7746_s11  ;;  %v7628_v50 = vld [vmem:[#allocation5 + $0x178] sm:$0xff]   ;;  %v402_v53 = vld [vmem:[#allocation3 + $0x78] sm:$0x1]  ;;  %v9514_v21 = vld [vmem:[%s10557_s2] ss:$0 sm:$0xff]  ;;  %v2419_v37 = vsel %vm8053_vm14, %v6546_v12, %v2418_v4 }
 0x214   : > { %2542 = vst.msk [vmem:[#allocation4 + $0x58] sm:$0xf] %vm10657_vm8, %v2468_v14  ;;  %4681 = vmatprep.mubr.bf16.mxu1 %v9451_v49  ;;  %7420 = vmatprep.subr.bf16.mxu0 %v7628_v50  ;;  %vm10663_vm8 = vmmov %vm10662_vm7  ;;  %v403_v22 = vsel %vm8705_vm15, 0, %v402_v53  ;;  %v2422_v20 = vsel %vm8053_vm14, %v2420_v3, %v2421_v60  ;;  %v457_v4 = vld [vmem:[#allocation3 + $0x80] sm:$0x1] }
 0x215   : > { %2113 = vrot.lane.b32.xlu0 %v9408_v26, %s7746_s11  ;;  %v2595_v62 = vpop.permute.xlu1 %2594  ;;  %4682 = vmatmul.mubr.bf16.gmra.mxu1 %v9250_v43  ;;  %v2235_v26 = vld [vmem:[#allocation2 + $0xc4] sm:$0xf]  ;;  %404 = vst [vmem:[#allocation3 + $0x78] sm:$0x1] %v403_v22  ;;  %v3642_v60 = vld [vmem:[#allocation3 + $0x3c] sm:$0xf] }
 0x216   : > { %2670 = vst.msk [vmem:[#allocation4 + $0x54] sm:$0xf] %vm10658_vm13, %v2595_v62  ;;  %4689 = vmatprep.mubr.bf16.mxu1 %v9463_v46  ;;  %7421 = vmatpush3.bf16.msra.mxu0 %v7628_v50  ;;  %v2411_v5 = vrot.slane %v2235_v26, 5  ;;  %vm10664_vm13 = vmmov %vm10662_vm7  ;;  %v7637_v26 = vld [vmem:[#allocation5 + $0x140] sm:$0xff]   ;;  %v454_v53 = vld [vmem:[#allocation3 + $0x74] sm:$0x1] }
 0x217   : > { %v2593_v55 = vpop.permute.xlu0 %2592  ;;  %2119 = vrot.lane.b32.xlu1 %v1798_v28, %s7746_s11  ;;  %7422 = vmatprep.subr.bf16.mxu0 %v7629_v56 }
 0x218   : > { %2669 = vst.msk [vmem:[#allocation4 + $0x50] sm:$0xf] %vm10659_vm6, %v2593_v55  ;;  %v2413_v40 = vrot.slane %v2411_v5, 4  ;;  %vm10665_vm6 = vmmov %vm10662_vm7 }
 0x219   : > { %2117 = vrot.lane.b32.xlu0 %v1788_v39, %s7746_s11  ;;  %v2599_v31 = vpop.permute.xlu1 %2598 }
 0x21a   : > { %2672 = vst.msk [vmem:[#allocation4 + $0x5c] sm:$0xf] %vm10660_vm0, %v2599_v31  ;;  %7423 = vmatpush3.bf16.msra.mxu0 %v7629_v56  ;;  %v2415_v42 = vsel %vm8053_vm14, %v2413_v40, %v2414_v18  ;;  %vm10666_vm0 = vcmask 60448   ;;  %v399_v40 = vld [vmem:[#allocation3 + $0x6c] sm:$0x1] }
 0x21b   : > { %v2597_v34 = vpop.permute.xlu0 %2596  ;;  %2481 = vrot.lane.b32.xlu1 %v9283_v9, %s7747_s12  ;;  %v2234_v9 = vld [vmem:[#allocation2 + $0xc0] sm:$0xe]  ;;  %7424 = vmatprep.subr.bf16.mxu0 %v7630_v36  ;;  %v400_v2 = vsel %vm8705_vm15, 0, %v399_v40 }
 0x21c   : > { %2671 = vst.msk [vmem:[#allocation4 + $0x58] sm:$0xf] %vm10661_vm4, %v2597_v34  ;;  %v6545_v38 = vrot.slane %v2234_v9, 9  ;;  %vm10667_vm4 = vmmov %vm10666_vm0 }
 0x21d   : > { %2479 = vrot.lane.b32.xlu0 %v9290_v6, %s7747_s12  ;;  %v2724_v10 = vpop.permute.xlu1 %2723  ;;  %4690 = vmatmul.mubr.bf16.gmra.mxu1 %v9451_v49  ;;  %401 = vst [vmem:[#allocation3 + $0x6c] sm:$0x1] %v400_v2 }
 0x21e   : > { %2799 = vst.msk [vmem:[#allocation4 + $0x54] sm:$0xf] %vm10662_vm7, %v2724_v10  ;;  %7425 = vmatpush3.bf16.msra.mxu0 %v7630_v36  ;;  %v2412_v63 = vsel %vm8053_vm14, %v6545_v38, %v2411_v5  ;;  %vm10668_vm7 = vcmask 293888  }
 0x21f   : > { %v2722_v32 = vpop.permute.xlu0 %2721  ;;  %2485 = vrot.lane.b32.xlu1 %v9304_v48, %s7747_s12  ;;  %7426 = vmatprep.subr.bf16.mxu0 %v7631_v41 }
 0x220   : > { %2798 = vst.msk [vmem:[#allocation4 + $0x50] sm:$0xf] %vm10663_vm8, %v2722_v32  ;;  %vm10669_vm8 = vmmov %vm10666_vm0 }
 0x221   : > { %2483 = vrot.lane.b32.xlu0 %v9315_v0, %s7747_s12  ;;  %v2728_v6 = vpop.permute.xlu1 %2727 }
 0x222   : > { %2801 = vst.msk [vmem:[#allocation4 + $0x5c] sm:$0xf] %vm10664_vm13, %v2728_v6  ;;  %7427 = vmatpush3.bf16.msra.mxu0 %v7631_v41  ;;  %vm10670_vm13 = vmmov %vm10666_vm0 }
 0x223   : > { %v2726_v52 = vpop.permute.xlu0 %2725  ;;  %2610 = vrot.lane.b32.xlu1 %v9304_v48, %s7748_s13  ;;  %7428 = vmatprep.subr.bf16.mxu0 %v7632_v61 }
 0x224   : > { %2800 = vst.msk [vmem:[#allocation4 + $0x58] sm:$0xf] %vm10665_vm6, %v2726_v52  ;;  %vm10671_vm6 = vmmov %vm10668_vm7 }
 0x225   : > { %2608 = vrot.lane.b32.xlu0 %v9315_v0, %s7748_s13  ;;  %v1101_v58 = vpop.permute.xlu1 %1100 }
 0x226   : > { %1172 = vst.msk [vmem:[#allocation4 + $0x64] sm:$0xf] %vm10666_vm0, %v1101_v58  ;;  %7429 = vmatpush3.bf16.msra.mxu0 %v7632_v61  ;;  %v3649_v58 = vld [vmem:[#allocation3 + $0x48] sm:$0xf]  ;;  %vm10672_vm0 = vcmask 224448  }
 0x227   : > { %v1099_v48 = vpop.permute.xlu0 %1098  ;;  %2614 = vrot.lane.b32.xlu1 %v2415_v42, %s7748_s13  ;;  %v7624_v27 = vld [vmem:[#allocation4 + $0x50] sm:$0xff]   ;;  %7430 = vmatprep.subr.bf16.mxu0 %v7634_v8 }
 0x228   : > { %1171 = vst.msk [vmem:[#allocation4 + $0x60] sm:$0xf] %vm10667_vm4, %v1099_v48  ;;  %7408 = vmatprep.mubr.msk.bf16.mxu0 %vm10668_vm7, %v7624_v27  ;;  %vm10673_vm4 = vmmov %vm10672_vm0 }
 0x229   : > { %2612 = vrot.lane.b32.xlu0 %v2412_v63, %s7748_s13  ;;  %v1105_v0 = vpop.permute.xlu1 %1104  ;;  %vm10675_vm7 = vmmov %vm10672_vm0 }
 0x22a   : > { %1174 = vst.msk [vmem:[#allocation4 + $0x6c] sm:$0xf] %vm10669_vm8, %v1105_v0  ;;  %7431 = vmatpush3.bf16.msra.mxu0 %v7634_v8  ;;  %vm10677_vm8 = vmmov %vm10672_vm0 }
 0x22b   : > { %v1103_v47 = vpop.permute.xlu0 %1102  ;;  %2739 = vrot.lane.b32.xlu1 %v2415_v42, %s7749_s20  ;;  %v7625_v29 = vld [vmem:[#allocation4 + $0x58] sm:$0xff]   ;;  %7432 = vmatprep.subr.bf16.mxu0 %v7636_v11 }
 0x22c   : > { %1173 = vst.msk [vmem:[#allocation4 + $0x68] sm:$0xf] %vm10670_vm13, %v1103_v47  ;;  %v7398_v7 = vpop.f32.mrf.mxu0  ;;  %7409 = vmatmul.mubr.msk.bf16.gmra.mxu0 %vm10671_vm6, %v7625_v29  ;;  %vm10678_vm13 = vcmask 257248  }
 0x22d   : > { %2737 = vrot.lane.b32.xlu0 %v2412_v63, %s7749_s20  ;;  %v1232_v51 = vpop.permute.xlu1 %1231  ;;  %v3077_v14 = vadd.f32 %v9514_v21, %v7398_v7  ;;  %v458_v63 = vsel %vm8733_vm2, 0, %v457_v4  ;;  %vm10679_vm6 = vmmov %vm10678_vm13 }
 0x22e   : > { %1303 = vst.msk [vmem:[#allocation4 + $0x64] sm:$0xf] %vm1277_vm3, %v1232_v51  ;;  %v3068_v62 = vpop.f32.mrf.mxu0  ;;  %7433 = vmatpush3.bf16.msra.mxu0 %v7636_v11  ;;  %459 = vst [vmem:[#allocation3 + $0x80] sm:$0x1] %v458_v63  ;;  %v455_v11 = vsel %vm8733_vm2, 0, %v454_v53 }
 0x22f   : > { %v1230_v28 = vpop.permute.xlu0 %1229  ;;  %2743 = vrot.lane.b32.xlu1 %v2422_v20, %s7749_s20  ;;  %v3173_v50 = vmax.f32 %v3077_v14, 0.0  ;;  %v3069_v39 = vadd.f32 %v9514_v21, %v3068_v62  ;;  %7434 = vmatprep.subr.bf16.mxu0 %v7637_v26  ;;  %v3653_v20 = vld [vmem:[#allocation3 + $0x50] sm:$0x1]  ;;  %456 = vst [vmem:[#allocation3 + $0x74] sm:$0x1] %v455_v11 }
 0x230   : > { %1302 = vst.msk [vmem:[#allocation4 + $0x60] sm:$0xf] %vm1277_vm3, %v1230_v28  ;;  %v7399_v55 = vpop.f32.mrf.mxu0 }
 0x231   : > { %2741 = vrot.lane.b32.xlu0 %v2419_v37, %s7749_s20  ;;  %v1236_v31 = vpop.permute.xlu1 %1235  ;;  %v6806_v56 = vpack.c.bf16 %v3173_v50, %v3173_v50  ;;  %v3171_v34 = vmax.f32 %v3069_v39, 0.0  ;;  %v3080_v5 = vadd.f32 %v9514_v21, %v7399_v55 }
 0x232   : > { %1305 = vst.msk [vmem:[#allocation4 + $0x6c] sm:$0xf] %vm1277_vm3, %v1236_v31  ;;  %v3071_v15 = vpop.f32.mrf.mxu0  ;;  %7435 = vmatpush3.bf16.msra.mxu0 %v7637_v26 }
 0x233   : > { %v1234_v10 = vpop.permute.xlu0 %1233  ;;  %v3377_v36 = vshrl.u32 %v6806_v56, 16  ;;  %v6804_v32 = vpack.c.bf16 %v3171_v34, %v3171_v34  ;;  %v3174_v9 = vmax.f32 %v3080_v5, 0.0  ;;  %v3072_v18 = vadd.f32 %v9514_v21, %v3071_v15 }
 0x234   : > { %1304 = vst.msk [vmem:[#allocation4 + $0x68] sm:$0xf] %vm1277_vm3, %v1234_v10  ;;  %v3380_v38 = vshll.u32 %v6806_v56, 16  ;;  %v3646_v56 = vld [vmem:[#allocation3 + $0x44] sm:$0x1] }
 0x235   : > { %v1850_v6 = vpop.permute.xlu1 %1849  ;;  %v3379_v41 = vrot.slane %v3377_v36, 7  ;;  %v3360_v52 = vshrl.u32 %v6804_v32, 16  ;;  %v6807_v42 = vpack.c.bf16 %v3174_v9, %v3174_v9  ;;  %v3172_v25 = vmax.f32 %v3072_v18, 0.0 }
 0x236   : > { %1921 = vst.msk [vmem:[#allocation4 + $0x64] sm:$0xf] %vm1895_vm9, %v1850_v6  ;;  %v3363_v24 = vshll.u32 %v6804_v32, 16 }
 0x237   : > { %v1848_v61 = vpop.permute.xlu0 %1847  ;;  %v3382_v48 = vor.u32 %v3380_v38, %v3379_v41  ;;  %v3362_v27 = vrot.slane %v3360_v52, 7  ;;  %v3385_v3 = vshrl.u32 %v6807_v42, 16  ;;  %v6805_v0 = vpack.c.bf16 %v3172_v25, %v3172_v25 }
 0x238   : > { %1920 = vst.msk [vmem:[#allocation4 + $0x60] sm:$0xf] %vm1895_vm9, %v1848_v61  ;;  %v3388_v29 = vshll.u32 %v6807_v42, 16  ;;  %v3383_v14 = vrot.slane %v3379_v41, 4 }
 0x239   : > { %v1854_v8 = vpop.permute.xlu1 %1853  ;;  %v3650_v12 = vsel %vm9105_vm1, %v3382_v48, %v3649_v58  ;;  %v3365_v22 = vor.u32 %v3363_v24, %v3362_v27  ;;  %v3387_v47 = vrot.slane %v3385_v3, 7  ;;  %v3368_v7 = vshrl.u32 %v6805_v0, 16 }
 0x23a   : > { %1923 = vst.msk [vmem:[#allocation4 + $0x6c] sm:$0xf] %vm1895_vm9, %v1854_v8  ;;  %3651 = vst [vmem:[#allocation3 + $0x48] sm:$0xf] %v3650_v12  ;;  %v3371_v39 = vshll.u32 %v6805_v0, 16  ;;  %v3366_v34 = vrot.slane %v3362_v27, 4 }
 0x23b   : > { %v1852_v51 = vpop.permute.xlu0 %1851  ;;  %v3643_v37 = vsel %vm9105_vm1, %v3365_v22, %v3642_v60  ;;  %v3390_v28 = vor.u32 %v3388_v29, %v3387_v47  ;;  %v3392_v62 = vrot.slane %v3387_v47, 4  ;;  %v3370_v50 = vrot.slane %v3368_v7, 7 }
 0x23c   : > { %1922 = vst.msk [vmem:[#allocation4 + $0x68] sm:$0xf] %vm1895_vm9, %v1852_v51  ;;  %3644 = vst [vmem:[#allocation3 + $0x3c] sm:$0xf] %v3643_v37 }
 0x23d   : > { %v1979_v55 = vpop.permute.xlu1 %1978  ;;  %v3391_v31 = vsel %vm7838_vm5, %v3383_v14, %v3390_v28  ;;  %v3654_v26 = vsel %vm8705_vm15, %v3392_v62, %v3653_v20  ;;  %v3373_v5 = vor.u32 %v3371_v39, %v3370_v50  ;;  %v3375_v10 = vrot.slane %v3370_v50, 4 }
 0x23e   : > { %2050 = vst.msk [vmem:[#allocation4 + $0x64] sm:$0xf] %vm2024_vm10, %v1979_v55  ;;  %3652 = vst [vmem:[#allocation3 + $0x4c] sm:$0xf] %v3391_v31 }
 0x23f   : > { %3655 = vst [vmem:[#allocation3 + $0x50] sm:$0x1] %v3654_v26  ;;  %v1977_v15 = vpop.permute.xlu0 %1976  ;;  %v3374_v36 = vsel %vm7838_vm5, %v3366_v34, %v3373_v5  ;;  %v3647_v32 = vsel %vm8705_vm15, %v3375_v10, %v3646_v56 }
 0x240   : > { %2049 = vst.msk [vmem:[#allocation4 + $0x60] sm:$0xf] %vm2024_vm10, %v1977_v15  ;;  %3645 = vst [vmem:[#allocation3 + $0x40] sm:$0xf] %v3374_v36 }
 0x241   : > { %v1983_v9 = vpop.permute.xlu1 %1982  ;;  %3648 = vst [vmem:[#allocation3 + $0x44] sm:$0x1] %v3647_v32  ;;  %v3738_v40 = vld [vmem:[#allocation3 + $0x48] sm:$0xf] }
 0x242   : > { %2052 = vst.msk [vmem:[#allocation4 + $0x6c] sm:$0xf] %vm2024_vm10, %v1983_v9  ;;  %v4081_v6 = vshrl.u32 %v3738_v40, 16  ;;  %v4084_v2 = vshll.u32 %v3738_v40, 16  ;;  %v5427_v0 = vld [vmem:[#allocation3 + $0x48] sm:$0xe] }
 0x243   : > { %v1981_v18 = vpop.permute.xlu0 %1980  ;;  %v3736_v41 = vld [vmem:[#allocation3 + $0x3c] sm:$0xf]  ;;  %v6705_v5 = vrot.slane %v5427_v0, 9 }
 0x244   : > { %2051 = vst.msk [vmem:[#allocation4 + $0x68] sm:$0xf] %vm2024_vm10, %v1981_v18  ;;  %v4057_v52 = vshrl.u32 %v3736_v41, 16  ;;  %v4060_v42 = vshll.u32 %v3736_v41, 16  ;;  %v4083_v58 = vrot.slane %v4081_v6, 4  ;;  %v4086_v48 = vrot.slane %v4084_v2, 5 }
 0x245   : > { %v2108_v38 = vpop.permute.xlu1 %2107  ;;  %v3739_v4 = vld [vmem:[#allocation3 + $0x4c] sm:$0xf]  ;;  %v5426_v11 = vld [vmem:[#allocation3 + $0x3c] sm:$0xe] }
 0x246   : > { %2179 = vst.msk [vmem:[#allocation4 + $0x64] sm:$0xf] %vm10568_vm12, %v2108_v38  ;;  %v4059_v61 = vrot.slane %v4057_v52, 4  ;;  %v4062_v63 = vrot.slane %v4060_v42, 5  ;;  %v4090_v27 = vshll.u32 %v3739_v4, 16  ;;  %v4094_v3 = vshrl.u32 %v3739_v4, 16 }
 0x247   : > { %v2106_v25 = vpop.permute.xlu0 %2105  ;;  %v3924_v24 = vld [vmem:[#allocation3 + $0x50] sm:$0x1]  ;;  %v9556_v60 = vcombine.low %v3738_v40, %v3739_v4  ;;  %v3737_v53 = vld [vmem:[#allocation3 + $0x40] sm:$0xf]  ;;  %v5519_v47 = vrot.slane %v3739_v4, 5  ;;  %v4087_v37 = vor.u32 %v4086_v48, %v4083_v58  ;;  %v6704_v56 = vrot.slane %v5426_v11, 9 }
 0x248   : > { %2178 = vst.msk [vmem:[#allocation4 + $0x60] sm:$0xf] %vm10568_vm12, %v2106_v25  ;;  %v3923_v12 = vld [vmem:[#allocation3 + $0x44] sm:$0x1]  ;;  %v4092_v22 = vrot.slane %v4090_v27, 5  ;;  %v4063_v29 = vor.u32 %v4062_v63, %v4059_v61  ;;  %v4066_v20 = vshll.u32 %v3737_v53, 16  ;;  %v9559_v62 = vcombine.low %v3736_v41, %v3737_v53 }
 0x249   : > { %v2112_v8 = vpop.permute.xlu1 %2111  ;;  %v4070_v7 = vshrl.u32 %v3737_v53, 16  ;;  %v4096_v51 = vrot.slane %v4094_v3, 4  ;;  %v4100_v28 = vshll.u32 %v3924_v24, 16  ;;  %v4076_v55 = vshll.u32 %v3923_v12, 16 }
 0x24a   : > { %2181 = vst.msk [vmem:[#allocation4 + $0x6c] sm:$0xf] %vm10568_vm12, %v2112_v8  ;;  %v4068_v50 = vrot.slane %v4066_v20, 5  ;;  %v5512_v34 = vrot.slane %v3737_v53, 5  ;;  %v5521_v10 = vrot.slane %v5519_v47, 4  ;;  %v4064_v15 = vrot.slane %v4063_v29, 4 }
 0x24b   : > { %v2110_v14 = vpop.permute.xlu0 %2109  ;;  %v4072_v39 = vrot.slane %v4070_v7, 4  ;;  %v4097_v31 = vor.u32 %v4096_v51, %v4092_v22  ;;  %v5522_v9 = vrot.slane %v3924_v24, 5  ;;  %v4088_v18 = vrot.slane %v4087_v37, 4 }
 0x24c   : > { %2180 = vst.msk [vmem:[#allocation4 + $0x68] sm:$0xf] %vm10568_vm12, %v2110_v14  ;;  %v4102_v6 = vrot.slane %v4100_v28, 5  ;;  %v5514_v2 = vrot.slane %v5512_v34, 4  ;;  %v5515_v41 = vrot.slane %v3923_v12, 5  ;;  %v4078_v52 = vrot.slane %v4076_v55, 5 }
 0x24d   : > { %v2474_v26 = vpop.permute.xlu1 %2473  ;;  %v4073_v36 = vor.u32 %v4072_v39, %v4068_v50  ;;  %v4098_v32 = vrot.slane %v4097_v31, 4  ;;  %v5520_v42 = vsel %vm8053_vm14, %v6705_v5, %v5519_v47  ;;  %v5523_v4 = vsel %vm8053_vm14, %v5521_v10, %v5522_v9  ;;  %v408_v28 = vld [vmem:[#allocation3 + $0x90] sm:$0x1] }
 0x24e   : > { %2545 = vst.msk [vmem:[#allocation4 + $0x64] sm:$0xf] %vm10672_vm0, %v2474_v26  ;;  %v5513_v25 = vsel %vm8053_vm14, %v6704_v56, %v5512_v34  ;;  %v5516_v61 = vsel %vm8053_vm14, %v5514_v2, %v5515_v41  ;;  %v9572_v63 = vcombine.low %v5520_v42, %v5523_v4  ;;  %v4069_v48 = vsel %vm7913_vm11, %v4064_v15, %v4068_v50  ;;  %vm10680_vm0 = vmmov %vm10679_vm6 }
 0x24f   : > { %v2472_v40 = vpop.permute.xlu0 %2471  ;;  %v4074_v38 = vrot.slane %v4073_v36, 4  ;;  %v4103_v24 = vsel %vm7913_vm11, %v4098_v32, %v4102_v6  ;;  %v9581_v3 = vcombine.low %v5513_v25, %v5516_v61  ;;  %v4093_v53 = vsel %vm7913_vm11, %v4088_v18, %v4092_v22  ;;  %v405_v25 = vld [vmem:[#allocation3 + $0x84] sm:$0x1] }
 0x250   : > { %2544 = vst.msk [vmem:[#allocation4 + $0x60] sm:$0xf] %vm10673_vm4, %v2472_v40  ;;  %10674 = vst [vmem:[#allocation12_spill] sm:$0xff] %v9572_v63  ;;  %v9589_v47 = vcombine.low %v4093_v53, %v4103_v24  ;;  %v409_v50 = vsel %vm8705_vm15, 0, %v408_v28 }
 0x251   : > { %v2478_v58 = vpop.permute.xlu1 %2477  ;;  %v4079_v27 = vsel %vm7913_vm11, %v4074_v38, %v4078_v52  ;;  %10676 = vst [vmem:[#allocation13_spill] sm:$0xff] %v9581_v3  ;;  %vm10681_vm4 = vmmov %vm10680_vm0 }
 0x252   : > { %2547 = vst.msk [vmem:[#allocation4 + $0x6c] sm:$0xf] %vm10675_vm7, %v2478_v58  ;;  %v9583_v8 = vcombine.low %v4069_v48, %v4079_v27  ;;  %vm10682_vm7 = vcmask 290048   ;;  %410 = vst [vmem:[#allocation3 + $0x90] sm:$0x1] %v409_v50  ;;  %v406_v27 = vsel %vm8705_vm15, 0, %v405_v25 }
 0x253   : > { %v2476_v0 = vpop.permute.xlu0 %2475  ;;  %vm10685_vm12 = vmmov %vm10682_vm7  ;;  %407 = vst [vmem:[#allocation3 + $0x84] sm:$0x1] %v406_v27  ;;  %v3656_v50 = vld [vmem:[#allocation3 + $0x54] sm:$0xf] }
 0x254   : > { %2546 = vst.msk [vmem:[#allocation4 + $0x68] sm:$0xf] %vm10677_vm8, %v2476_v0  ;;  %4697 = vmatprep.mubr.bf16.mxu1 %v9583_v8  ;;  %vm10683_vm8 = vmmov %vm10682_vm7 }
 0x255   : > { %v2603_v12 = vpop.permute.xlu1 %2602  ;;  %4698 = vmatmul.mubr.bf16.gmra.mxu1 %v9463_v46 }
 0x256   : > { %2674 = vst.msk [vmem:[#allocation4 + $0x64] sm:$0xf] %vm10678_vm13, %v2603_v12  ;;  %4705 = vmatprep.mubr.bf16.mxu1 %v9589_v47  ;;  %vm10684_vm13 = vmmov %vm10682_vm7 }
 0x257   : > { %v2601_v29 = vpop.permute.xlu0 %2600 }
 0x258   : > { %2673 = vst.msk [vmem:[#allocation4 + $0x60] sm:$0xf] %vm10679_vm6, %v2601_v29  ;;  %vm10686_vm6 = vcmask 60448   ;;  %v463_v29 = vld [vmem:[#allocation3 + $0x98] sm:$0x1] }
 0x259   : > { %v2607_v20 = vpop.permute.xlu1 %2606 }
 0x25a   : > { %2676 = vst.msk [vmem:[#allocation4 + $0x6c] sm:$0xf] %vm10680_vm0, %v2607_v20  ;;  %vm10687_vm0 = vmmov %vm10686_vm6  ;;  %v3663_v20 = vld [vmem:[#allocation3 + $0x60] sm:$0xf] }
 0x25b   : > { %v2605_v7 = vpop.permute.xlu0 %2604 }
 0x25c   : > { %2675 = vst.msk [vmem:[#allocation4 + $0x68] sm:$0xf] %vm10681_vm4, %v2605_v7  ;;  %vm10688_vm4 = vcmask 293888  }
 0x25d   : > { %v2732_v22 = vpop.permute.xlu1 %2731  ;;  %4706 = vmatmul.mubr.bf16.gmra.mxu1 %v9583_v8 }
 0x25e   : > { %2803 = vst.msk [vmem:[#allocation4 + $0x64] sm:$0xf] %vm10682_vm7, %v2732_v22  ;;  %vm10689_vm7 = vmmov %vm10687_vm0 }
 0x25f   : > { %v2730_v51 = vpop.permute.xlu0 %2729 }
 0x260   : > { %2802 = vst.msk [vmem:[#allocation4 + $0x60] sm:$0xf] %vm10683_vm8, %v2730_v51  ;;  %vm10691_vm8 = vmmov %vm10688_vm4  ;;  %v464_v51 = vsel %vm8733_vm2, 0, %v463_v29 }
 0x261   : > { %v2736_v11 = vpop.permute.xlu1 %2735  ;;  %465 = vst [vmem:[#allocation3 + $0x98] sm:$0x1] %v464_v51 }
 0x262   : > { %2805 = vst.msk [vmem:[#allocation4 + $0x6c] sm:$0xf] %vm10684_vm13, %v2736_v11 }
 0x263   : > { %v2734_v14 = vpop.permute.xlu0 %2733 }
 0x264   : > { %2804 = vst.msk [vmem:[#allocation4 + $0x68] sm:$0xf] %vm10685_vm12, %v2734_v14  ;;  %vm10690_vm12 = vmmov %vm10687_vm0 }
 0x265   : > { %v1109_v37 = vpop.permute.xlu1 %1108 }
 0x266   : > { %1176 = vst.msk [vmem:[#allocation4 + $0x74] sm:$0xf] %vm10686_vm6, %v1109_v37  ;;  %vm10696_vm6 = vcmask 224448  }
 0x267   : > { %v1107_v39 = vpop.permute.xlu0 %1106  ;;  %v7626_v55 = vld [vmem:[#allocation4 + $0x60] sm:$0xff]  }
 0x268   : > { %1175 = vst.msk [vmem:[#allocation4 + $0x70] sm:$0xf] %vm10687_vm0, %v1107_v39  ;;  %7412 = vmatprep.mubr.msk.bf16.mxu0 %vm10688_vm4, %v7626_v55  ;;  %vm10697_vm0 = vmmov %vm10696_vm6 }
 0x269   : > { %v1113_v31 = vpop.permute.xlu1 %1112  ;;  %vm10699_vm4 = vmmov %vm10697_vm0 }
 0x26a   : > { %1178 = vst.msk [vmem:[#allocation4 + $0x7c] sm:$0xf] %vm10689_vm7, %v1113_v31  ;;  %v460_v31 = vld [vmem:[#allocation3 + $0x8c] sm:$0x1]  ;;  %vm10701_vm7 = vmmov %vm10697_vm0 }
 0x26b   : > { %v1111_v26 = vpop.permute.xlu0 %1110  ;;  %v7627_v56 = vld [vmem:[#allocation4 + $0x68] sm:$0xff]  }
 0x26c   : > { %1177 = vst.msk [vmem:[#allocation4 + $0x78] sm:$0xf] %vm10690_vm12, %v1111_v26  ;;  %v7402_v34 = vpop.f32.mrf.mxu0  ;;  %7413 = vmatmul.mubr.msk.bf16.gmra.mxu0 %vm10691_vm8, %v7627_v56  ;;  %vm10702_vm12 = vcmask 257248  }
 0x26d   : > { %v1240_v5 = vpop.permute.xlu1 %1239  ;;  %v3093_v10 = vadd.f32 %v9514_v21, %v7402_v34  ;;  %vm10703_vm8 = vmmov %vm10702_vm12 }
 0x26e   : > { %1307 = vst.msk [vmem:[#allocation4 + $0x74] sm:$0xf] %vm1277_vm3, %v1240_v5  ;;  %v3084_v36 = vpop.f32.mrf.mxu0 }
 0x26f   : > { %v1238_v15 = vpop.permute.xlu0 %1237  ;;  %v3177_v32 = vmax.f32 %v3093_v10, 0.0  ;;  %v3085_v9 = vadd.f32 %v9514_v21, %v3084_v36  ;;  %v3667_v10 = vld [vmem:[#allocation3 + $0x68] sm:$0x1] }
 0x270   : > { %1306 = vst.msk [vmem:[#allocation4 + $0x70] sm:$0xf] %vm1277_vm3, %v1238_v15  ;;  %v7403_v40 = vpop.f32.mrf.mxu0 }
 0x271   : > { %v1244_v18 = vpop.permute.xlu1 %1243  ;;  %v6810_v6 = vpack.c.bf16 %v3177_v32, %v3177_v32  ;;  %v3175_v2 = vmax.f32 %v3085_v9, 0.0  ;;  %v3096_v41 = vadd.f32 %v9514_v21, %v7403_v40  ;;  %v461_v32 = vsel %vm8733_vm2, 0, %v460_v31 }
 0x272   : > { %1309 = vst.msk [vmem:[#allocation4 + $0x7c] sm:$0xf] %vm1277_vm3, %v1244_v18  ;;  %v3087_v52 = vpop.f32.mrf.mxu0  ;;  %462 = vst [vmem:[#allocation3 + $0x8c] sm:$0x1] %v461_v32 }
 0x273   : > { %v1242_v38 = vpop.permute.xlu0 %1241  ;;  %v3411_v42 = vshrl.u32 %v6810_v6, 16  ;;  %v6808_v4 = vpack.c.bf16 %v3175_v2, %v3175_v2  ;;  %v3178_v58 = vmax.f32 %v3096_v41, 0.0  ;;  %v3088_v61 = vadd.f32 %v9514_v21, %v3087_v52 }
 0x274   : > { %1308 = vst.msk [vmem:[#allocation4 + $0x78] sm:$0xf] %vm1277_vm3, %v1242_v38  ;;  %v3414_v0 = vshll.u32 %v6810_v6, 16  ;;  %vm10692_vm3 = vcmask 191648  }
 0x275   : > { %v1858_v48 = vpop.permute.xlu1 %1857  ;;  %v3413_v24 = vrot.slane %v3411_v42, 7  ;;  %v3394_v53 = vshrl.u32 %v6808_v4, 16  ;;  %v6811_v12 = vpack.c.bf16 %v3178_v58, %v3178_v58  ;;  %v3176_v7 = vmax.f32 %v3088_v61, 0.0  ;;  %vm10695_vm13 = vmmov %vm10692_vm3 }
 0x276   : > { %1925 = vst.msk [vmem:[#allocation4 + $0x74] sm:$0xf] %vm1895_vm9, %v1858_v48  ;;  %v3397_v37 = vshll.u32 %v6808_v4, 16  ;;  %v3660_v4 = vld [vmem:[#allocation3 + $0x5c] sm:$0x1] }
 0x277   : > { %v1856_v22 = vpop.permute.xlu0 %1855  ;;  %v3416_v11 = vor.u32 %v3414_v0, %v3413_v24  ;;  %v3396_v14 = vrot.slane %v3394_v53, 7  ;;  %v3419_v28 = vshrl.u32 %v6811_v12, 16  ;;  %v6809_v39 = vpack.c.bf16 %v3176_v7, %v3176_v7 }
 0x278   : > { %1924 = vst.msk [vmem:[#allocation4 + $0x70] sm:$0xf] %vm1895_vm9, %v1856_v22  ;;  %v3422_v5 = vshll.u32 %v6811_v12, 16  ;;  %v3417_v9 = vrot.slane %v3413_v24, 4 }
 0x279   : > { %v1862_v55 = vpop.permute.xlu1 %1861  ;;  %v3664_v26 = vsel %vm9105_vm1, %v3416_v11, %v3663_v20  ;;  %v3399_v56 = vor.u32 %v3397_v37, %v3396_v14  ;;  %v3421_v34 = vrot.slane %v3419_v28, 7  ;;  %v3402_v15 = vshrl.u32 %v6809_v39, 16 }
 0x27a   : > { %1927 = vst.msk [vmem:[#allocation4 + $0x7c] sm:$0xf] %vm1895_vm9, %v1862_v55  ;;  %3665 = vst [vmem:[#allocation3 + $0x60] sm:$0xf] %v3664_v26  ;;  %v3405_v41 = vshll.u32 %v6809_v39, 16  ;;  %v3400_v58 = vrot.slane %v3396_v14, 4 }
 0x27b   : > { %v1860_v36 = vpop.permute.xlu0 %1859  ;;  %v3657_v40 = vsel %vm9105_vm1, %v3399_v56, %v3656_v50  ;;  %v3424_v18 = vor.u32 %v3422_v5, %v3421_v34  ;;  %v3426_v6 = vrot.slane %v3421_v34, 4  ;;  %v3404_v2 = vrot.slane %v3402_v15, 7 }
 0x27c   : > { %1926 = vst.msk [vmem:[#allocation4 + $0x78] sm:$0xf] %vm1895_vm9, %v1860_v36  ;;  %3658 = vst [vmem:[#allocation3 + $0x54] sm:$0xf] %v3657_v40 }
 0x27d   : > { %v1987_v38 = vpop.permute.xlu1 %1986  ;;  %v3425_v52 = vsel %vm7838_vm5, %v3417_v9, %v3424_v18  ;;  %v3668_v42 = vsel %vm8705_vm15, %v3426_v6, %v3667_v10  ;;  %v3407_v25 = vor.u32 %v3405_v41, %v3404_v2  ;;  %v3409_v61 = vrot.slane %v3404_v2, 4  ;;  %vm10693_vm9 = vmmov %vm10692_vm3 }
 0x27e   : > { %2054 = vst.msk [vmem:[#allocation4 + $0x74] sm:$0xf] %vm2024_vm10, %v1987_v38  ;;  %3666 = vst [vmem:[#allocation3 + $0x64] sm:$0xf] %v3425_v52 }
 0x27f   : > { %3669 = vst [vmem:[#allocation3 + $0x68] sm:$0x1] %v3668_v42  ;;  %v1985_v48 = vpop.permute.xlu0 %1984  ;;  %v3408_v27 = vsel %vm7838_vm5, %v3400_v58, %v3407_v25  ;;  %v3661_v24 = vsel %vm8705_vm15, %v3409_v61, %v3660_v4 }
 0x280   : > { %2053 = vst.msk [vmem:[#allocation4 + $0x70] sm:$0xf] %vm2024_vm10, %v1985_v48  ;;  %3659 = vst [vmem:[#allocation3 + $0x58] sm:$0xf] %v3408_v27 }
 0x281   : > { %v1991_v0 = vpop.permute.xlu1 %1990  ;;  %3662 = vst [vmem:[#allocation3 + $0x5c] sm:$0x1] %v3661_v24  ;;  %v3742_v53 = vld [vmem:[#allocation3 + $0x60] sm:$0xf] }
 0x282   : > { %2056 = vst.msk [vmem:[#allocation4 + $0x7c] sm:$0xf] %vm2024_vm10, %v1991_v0  ;;  %v4129_v29 = vshrl.u32 %v3742_v53, 16  ;;  %v4132_v20 = vshll.u32 %v3742_v53, 16  ;;  %v5429_v5 = vld [vmem:[#allocation3 + $0x60] sm:$0xe] }
 0x283   : > { %v1989_v12 = vpop.permute.xlu0 %1988  ;;  %v3740_v7 = vld [vmem:[#allocation3 + $0x54] sm:$0xf] }
 0x284   : > { %2055 = vst.msk [vmem:[#allocation4 + $0x78] sm:$0xf] %vm2024_vm10, %v1989_v12  ;;  %v4105_v51 = vshrl.u32 %v3740_v7, 16  ;;  %v4108_v11 = vshll.u32 %v3740_v7, 16  ;;  %v4131_v37 = vrot.slane %v4129_v29, 4  ;;  %v4134_v55 = vrot.slane %v4132_v20, 5  ;;  %vm10694_vm10 = vmmov %vm10692_vm3 }
 0x285   : > { %v2116_v22 = vpop.permute.xlu1 %2115  ;;  %v3743_v14 = vld [vmem:[#allocation3 + $0x64] sm:$0xf]  ;;  %v5428_v41 = vld [vmem:[#allocation3 + $0x54] sm:$0xe] }
 0x286   : > { %2183 = vst.msk [vmem:[#allocation4 + $0x74] sm:$0xf] %vm10692_vm3, %v2116_v22  ;;  %v4107_v50 = vrot.slane %v4105_v51, 4  ;;  %v4110_v39 = vrot.slane %v4108_v11, 5  ;;  %v4138_v31 = vshll.u32 %v3743_v14, 16  ;;  %v4142_v56 = vshrl.u32 %v3743_v14, 16  ;;  %vm10705_vm3 = vmmov %vm10703_vm8 }
 0x287   : > { %v2114_v28 = vpop.permute.xlu0 %2113  ;;  %v3926_v26 = vld [vmem:[#allocation3 + $0x68] sm:$0x1]  ;;  %v9646_v34 = vcombine.low %v3742_v53, %v3743_v14  ;;  %v3741_v15 = vld [vmem:[#allocation3 + $0x58] sm:$0xf]  ;;  %v5533_v9 = vrot.slane %v3743_v14, 5  ;;  %v4135_v52 = vor.u32 %v4134_v55, %v4131_v37  ;;  %v6706_v24 = vrot.slane %v5428_v41, 9 }
 0x288   : > { %2182 = vst.msk [vmem:[#allocation4 + $0x70] sm:$0xf] %vm10693_vm9, %v2114_v28  ;;  %v3925_v36 = vld [vmem:[#allocation3 + $0x5c] sm:$0x1]  ;;  %v4140_v32 = vrot.slane %v4138_v31, 5  ;;  %v4111_v40 = vor.u32 %v4110_v39, %v4107_v50  ;;  %v4114_v18 = vshll.u32 %v3741_v15, 16  ;;  %v9649_v4 = vcombine.low %v3740_v7, %v3741_v15  ;;  %vm10706_vm9 = vmmov %vm10705_vm3 }
 0x289   : > { %v2120_v10 = vpop.permute.xlu1 %2119  ;;  %v4118_v6 = vshrl.u32 %v3741_v15, 16  ;;  %v4144_v2 = vrot.slane %v4142_v56, 4  ;;  %v4148_v42 = vshll.u32 %v3926_v26, 16  ;;  %v4124_v61 = vshll.u32 %v3925_v36, 16 }
 0x28a   : > { %2185 = vst.msk [vmem:[#allocation4 + $0x7c] sm:$0xf] %vm10694_vm10, %v2120_v10  ;;  %v4116_v58 = vrot.slane %v4114_v18, 5  ;;  %v5526_v0 = vrot.slane %v3741_v15, 5  ;;  %v6707_v53 = vrot.slane %v5429_v5, 9  ;;  %v5535_v12 = vrot.slane %v5533_v9, 4 }
 0x28b   : > { %v2118_v38 = vpop.permute.xlu0 %2117  ;;  %v4120_v25 = vrot.slane %v4118_v6, 4  ;;  %v4145_v48 = vor.u32 %v4144_v2, %v4140_v32  ;;  %v4112_v29 = vrot.slane %v4111_v40, 4  ;;  %v5536_v51 = vrot.slane %v3926_v26, 5 }
 0x28c   : > { %2184 = vst.msk [vmem:[#allocation4 + $0x78] sm:$0xf] %vm10695_vm13, %v2118_v38  ;;  %v4136_v7 = vrot.slane %v4135_v52, 4  ;;  %v4150_v14 = vrot.slane %v4148_v42, 5  ;;  %v5528_v37 = vrot.slane %v5526_v0, 4  ;;  %v5529_v28 = vrot.slane %v3925_v36, 5 }
 0x28d   : > { %v2482_v27 = vpop.permute.xlu1 %2481  ;;  %v4121_v20 = vor.u32 %v4120_v25, %v4116_v58  ;;  %v4146_v22 = vrot.slane %v4145_v48, 4  ;;  %v4126_v39 = vrot.slane %v4124_v61, 5  ;;  %v5534_v55 = vsel %vm8053_vm14, %v6707_v53, %v5533_v9 }
 0x28e   : > { %2549 = vst.msk [vmem:[#allocation4 + $0x74] sm:$0xf] %vm10696_vm6, %v2482_v27  ;;  %v5537_v31 = vsel %vm8053_vm14, %v5535_v12, %v5536_v51  ;;  %v5527_v5 = vsel %vm8053_vm14, %v6706_v24, %v5526_v0  ;;  %v5530_v26 = vsel %vm8053_vm14, %v5528_v37, %v5529_v28  ;;  %v4117_v15 = vsel %vm7913_vm11, %v4112_v29, %v4116_v58  ;;  %v7638_v51 = vld [vmem:[#allocation5 + $0xb8] sm:$0xff]  }
 0x28f   : > { %v2480_v11 = vpop.permute.xlu0 %2479  ;;  %v4122_v50 = vrot.slane %v4121_v20, 4  ;;  %v9662_v10 = vcombine.low %v5534_v55, %v5537_v31  ;;  %v4151_v9 = vsel %vm7913_vm11, %v4146_v22, %v4150_v14  ;;  %v9671_v40 = vcombine.low %v5527_v5, %v5530_v26  ;;  %7468 = vmatprep.subr.bf16.mxu1 %v7638_v51 }
 0x290   : > { %2548 = vst.msk [vmem:[#allocation4 + $0x70] sm:$0xf] %vm10697_vm0, %v2480_v11  ;;  %v4141_v2 = vsel %vm7913_vm11, %v4136_v7, %v4140_v32  ;;  %vm10708_vm10 = vcmask 290048   ;;  %v414_v11 = vld [vmem:[#allocation3 + $0xa8] sm:$0x1]  ;;  %7469 = vmatpush3.bf16.msra.mxu1 %v7638_v51 }
 0x291   : > { %v2486_v56 = vpop.permute.xlu1 %2485  ;;  %10698 = vst [vmem:[#allocation14_spill] sm:$0xff] %v9662_v10  ;;  %v4127_v36 = vsel %vm7913_vm11, %v4122_v50, %v4126_v39  ;;  %10700 = vst [vmem:[#allocation15_spill] sm:$0xff] %v9671_v40  ;;  %v9679_v38 = vcombine.low %v4141_v2, %v4151_v9  ;;  %v415_v7 = vsel %vm8705_vm15, 0, %v414_v11  ;;  %v3670_v51 = vld [vmem:[#allocation3 + $0x6c] sm:$0xf] }
 0x292   : > { %2551 = vst.msk [vmem:[#allocation4 + $0x7c] sm:$0xf] %vm10699_vm4, %v2486_v56  ;;  %v9673_v6 = vcombine.low %v4117_v15, %v4127_v36  ;;  %vm10709_vm13 = vmmov %vm10708_vm10  ;;  %vm10712_vm4 = vcmask 293888  }
 0x293   : > { %v2484_v18 = vpop.permute.xlu0 %2483  ;;  %vm10710_vm6 = vmmov %vm10708_vm10  ;;  %416 = vst [vmem:[#allocation3 + $0xa8] sm:$0x1] %v415_v7  ;;  %v466_v7 = vld [vmem:[#allocation3 + $0xa4] sm:$0x1] }
 0x294   : > { %2550 = vst.msk [vmem:[#allocation4 + $0x78] sm:$0xf] %vm10701_vm7, %v2484_v18  ;;  %4713 = vmatprep.mubr.bf16.mxu1 %v9673_v6  ;;  %vm10711_vm0 = vmmov %vm10710_vm6 }
 0x295   : > { %v2611_v41 = vpop.permute.xlu1 %2610  ;;  %v6990_v52 = vpop.f32.mrf.mxu1  ;;  %4714 = vmatmul.mubr.bf16.gmra.mxu1 %v9589_v47  ;;  %vm10713_vm7 = vmmov %vm10712_vm4 }
 0x296   : > { %2678 = vst.msk [vmem:[#allocation4 + $0x74] sm:$0xf] %vm10702_vm12, %v2611_v41  ;;  %4721 = vmatprep.mubr.bf16.mxu1 %v9679_v38  ;;  %v411_v41 = vld [vmem:[#allocation3 + $0x9c] sm:$0x1] }
 0x297   : > { %v2609_v42 = vpop.permute.xlu0 %2608  ;;  %v6991_v58 = vpop.f32.mrf.mxu1 }
 0x298   : > { %2677 = vst.msk [vmem:[#allocation4 + $0x70] sm:$0xf] %vm10703_vm8, %v2609_v42  ;;  %v9685_v25 = vadd.f32 %v6991_v58, %v6990_v52 }
 0x299   : > { %v2615_v61 = vpop.permute.xlu1 %2614  ;;  %v9687_v32 = vpop.f32.mrf.mxu1 }
 0x29a   : > { %10704 = vst [vmem:[#allocation16_spill] sm:$0xff] %v9687_v32  ;;  %2680 = vst.msk [vmem:[#allocation4 + $0x7c] sm:$0xf] %vm10705_vm3, %v2615_v61 }
 0x29b   : > { %v2613_v48 = vpop.permute.xlu0 %2612  ;;  %v9691_v27 = vpop.f32.mrf.mxu1 }
 0x29c   : > { %2679 = vst.msk [vmem:[#allocation4 + $0x78] sm:$0xf] %vm10706_vm9, %v2613_v48  ;;  %10707 = vst [vmem:[#allocation17_spill] sm:$0xff] %v9691_v27 }
 0x29d   : > { %v2740_v24 = vpop.permute.xlu1 %2739  ;;  %v6996_v0 = vpop.f32.mrf.mxu1  ;;  %4722 = vmatmul.mubr.bf16.gmra.mxu1 %v9673_v6 }
 0x29e   : > { %2807 = vst.msk [vmem:[#allocation4 + $0x74] sm:$0xf] %vm10708_vm10, %v2740_v24  ;;  %v469_v24 = vld [vmem:[#allocation3 + $0xb0] sm:$0x1] }
 0x29f   : > { %v2738_v53 = vpop.permute.xlu0 %2737  ;;  %v6997_v12 = vpop.f32.mrf.mxu1 }
 0x2a0   : > { %2806 = vst.msk [vmem:[#allocation4 + $0x70] sm:$0xf] %vm10709_vm13, %v2738_v53  ;;  %v9696_v29 = vadd.f32 %v6997_v12, %v6996_v0  ;;  %v3677_v0 = vld [vmem:[#allocation3 + $0x78] sm:$0xf]  ;;  %v470_v12 = vsel %vm8733_vm2, 0, %v469_v24 }
 0x2a1   : > { %v2744_v20 = vpop.permute.xlu1 %2743  ;;  %471 = vst [vmem:[#allocation3 + $0xb0] sm:$0x1] %v470_v12 }
 0x2a2   : > { %2809 = vst.msk [vmem:[#allocation4 + $0x7c] sm:$0xf] %vm10710_vm6, %v2744_v20 }
 0x2a3   : > { %v2742_v22 = vpop.permute.xlu0 %2741 }
 0x2a4   : > { %2808 = vst.msk [vmem:[#allocation4 + $0x78] sm:$0xf] %vm10711_vm0, %v2742_v22 }
 0x2a7   : > { %v7633_v14 = vld [vmem:[#allocation4 + $0x70] sm:$0xff]  }
 0x2a8   : > { %7416 = vmatprep.mubr.msk.bf16.mxu0 %vm10712_vm4, %v7633_v14 }
 0x2ab   : > { %v7635_v37 = vld [vmem:[#allocation4 + $0x78] sm:$0xff]  }
 0x2ac   : > { %v7406_v28 = vpop.f32.mrf.mxu0  ;;  %7417 = vmatmul.mubr.msk.bf16.gmra.mxu0 %vm10713_vm7, %v7635_v37 }
 0x2ad   : > { %v3109_v50 = vadd.f32 %v9514_v21, %v7406_v28  ;;  %7436 = vmatprep.mubr.bf16.mxu0 %v9250_v43  ;;  %v412_v43 = vsel %vm8705_vm15, 0, %v411_v41 }
 0x2ae   : > { %v3100_v39 = vpop.f32.mrf.mxu0  ;;  %413 = vst [vmem:[#allocation3 + $0x9c] sm:$0x1] %v412_v43 }
 0x2af   : > { %v3181_v55 = vmax.f32 %v3109_v50, 0.0  ;;  %v3101_v31 = vadd.f32 %v9514_v21, %v3100_v39  ;;  %v3681_v50 = vld [vmem:[#allocation3 + $0x80] sm:$0x1] }
 0x2b0   : > { %v7407_v56 = vpop.f32.mrf.mxu0 }
 0x2b1   : > { %v6814_v5 = vpack.c.bf16 %v3181_v55, %v3181_v55  ;;  %v3179_v26 = vmax.f32 %v3101_v31, 0.0  ;;  %v3112_v15 = vadd.f32 %v9514_v21, %v7407_v56  ;;  %v467_v55 = vsel %vm8733_vm2, 0, %v466_v7 }
 0x2b2   : > { %v3103_v36 = vpop.f32.mrf.mxu0  ;;  %468 = vst [vmem:[#allocation3 + $0xa4] sm:$0x1] %v467_v55 }
 0x2b3   : > { %v3445_v9 = vshrl.u32 %v6814_v5, 16  ;;  %v6812_v18 = vpack.c.bf16 %v3179_v26, %v3179_v26  ;;  %v3182_v2 = vmax.f32 %v3112_v15, 0.0  ;;  %v3104_v52 = vadd.f32 %v9514_v21, %v3103_v36 }
 0x2b4   : > { %7437 = vmatmul.mubr.bf16.vlgmr.msra.gmra.mxu0 %v9451_v49  ;;  %v3448_v58 = vshll.u32 %v6814_v5, 16 }
 0x2b5   : > { %v3447_v42 = vrot.slane %v3445_v9, 7  ;;  %v3428_v61 = vshrl.u32 %v6812_v18, 16  ;;  %v6815_v48 = vpack.c.bf16 %v3182_v2, %v3182_v2  ;;  %7440 = vmatprep.mubr.bf16.mxu0 %v9463_v46  ;;  %v3180_v53 = vmax.f32 %v3104_v52, 0.0  ;;  %v3674_v2 = vld [vmem:[#allocation3 + $0x74] sm:$0x1] }
 0x2b6   : > { %v3431_v22 = vshll.u32 %v6812_v18, 16 }
 0x2b7   : > { %v3450_v20 = vor.u32 %v3448_v58, %v3447_v42  ;;  %v3430_v21 = vrot.slane %v3428_v61, 7  ;;  %v3453_v49 = vshrl.u32 %v6815_v48, 16  ;;  %v6813_v11 = vpack.c.bf16 %v3180_v53, %v3180_v53  ;;  %v7639_v61 = vld [vmem:[#allocation5 + $0xb0] sm:$0xff]  }
 0x2b8   : > { %v3456_v28 = vshll.u32 %v6815_v48, 16  ;;  %v3451_v31 = vrot.slane %v3447_v42, 4  ;;  %v7640_v48 = vld [vmem:[#allocation5 + $0xa8] sm:$0xff]   ;;  %7470 = vmatprep.subr.bf16.mxu1 %v7639_v61 }
 0x2b9   : > { %v3678_v14 = vsel %vm9105_vm1, %v3450_v20, %v3677_v0  ;;  %v3433_v37 = vor.u32 %v3431_v22, %v3430_v21  ;;  %v3455_v46 = vrot.slane %v3453_v49, 7  ;;  %v3436_v39 = vshrl.u32 %v6813_v11, 16  ;;  %7471 = vmatpush3.bf16.msra.mxu1 %v7639_v61 }
 0x2ba   : > { %3679 = vst [vmem:[#allocation3 + $0x78] sm:$0xf] %v3678_v14  ;;  %v3439_v36 = vshll.u32 %v6813_v11, 16  ;;  %v3434_v41 = vrot.slane %v3430_v21, 4  ;;  %7472 = vmatprep.subr.bf16.mxu1 %v7640_v48 }
 0x2bb   : > { %v3671_v56 = vsel %vm9105_vm1, %v3433_v37, %v3670_v51  ;;  %v3458_v5 = vor.u32 %v3456_v28, %v3455_v46  ;;  %v3460_v26 = vrot.slane %v3455_v46, 4  ;;  %v3438_v15 = vrot.slane %v3436_v39, 7 }
 0x2bc   : > { %3672 = vst [vmem:[#allocation3 + $0x6c] sm:$0xf] %v3671_v56  ;;  %7441 = vmatmul.mubr.bf16.gmra.mxu0 %v9583_v8 }
 0x2bd   : > { %v3459_v9 = vsel %vm7838_vm5, %v3451_v31, %v3458_v5  ;;  %v3682_v18 = vsel %vm8705_vm15, %v3460_v26, %v3681_v50  ;;  %7444 = vmatprep.mubr.bf16.mxu0 %v9589_v47  ;;  %v3441_v52 = vor.u32 %v3439_v36, %v3438_v15  ;;  %v3443_v43 = vrot.slane %v3438_v15, 4  ;;  %7473 = vmatpush3.bf16.msra.mxu1 %v7640_v48 }
 0x2be   : > { %3680 = vst [vmem:[#allocation3 + $0x7c] sm:$0xf] %v3459_v9  ;;  %3683 = vst [vmem:[#allocation3 + $0x80] sm:$0x1] %v3682_v18 }
 0x2bf   : > { %v3442_v42 = vsel %vm7838_vm5, %v3434_v41, %v3441_v52  ;;  %v3675_v8 = vsel %vm8705_vm15, %v3443_v43, %v3674_v2 }
 0x2c0   : > { %3673 = vst [vmem:[#allocation3 + $0x70] sm:$0xf] %v3442_v42  ;;  %3676 = vst [vmem:[#allocation3 + $0x74] sm:$0x1] %v3675_v8 }
 0x2c1   : > { %v3746_v58 = vld [vmem:[#allocation3 + $0x78] sm:$0xf] }
 0x2c2   : > { %v4177_v24 = vshrl.u32 %v3746_v58, 16  ;;  %v4180_v0 = vshll.u32 %v3746_v58, 16  ;;  %v5431_v46 = vld [vmem:[#allocation3 + $0x78] sm:$0xe] }
 0x2c3   : > { %v3744_v53 = vld [vmem:[#allocation3 + $0x6c] sm:$0xf]  ;;  %v6709_v8 = vrot.slane %v5431_v46, 9 }
 0x2c4   : > { %7445 = vmatmul.mubr.bf16.gmra.mxu0 %v9673_v6  ;;  %v4153_v47 = vshrl.u32 %v3744_v53, 16  ;;  %v4156_v12 = vshll.u32 %v3744_v53, 16  ;;  %v4179_v21 = vrot.slane %v4177_v24, 4  ;;  %v4182_v51 = vrot.slane %v4180_v0, 5  ;;  %v5430_v26 = vld [vmem:[#allocation3 + $0x6c] sm:$0xe] }
 0x2c5   : > { %7448 = vmatprep.mubr.bf16.mxu0 %v9679_v38  ;;  %v3747_v20 = vld [vmem:[#allocation3 + $0x7c] sm:$0xf]  ;;  %v3928_v7 = vld [vmem:[#allocation3 + $0x80] sm:$0x1]  ;;  %v6708_v43 = vrot.slane %v5430_v26, 9 }
 0x2c6   : > { %v4155_v22 = vrot.slane %v4153_v47, 4  ;;  %v4158_v49 = vrot.slane %v4156_v12, 5  ;;  %v4186_v11 = vshll.u32 %v3747_v20, 16  ;;  %v4190_v14 = vshrl.u32 %v3747_v20, 16 }
 0x2c7   : > { %v9733_v37 = vcombine.low %v3746_v58, %v3747_v20  ;;  %v3745_v28 = vld [vmem:[#allocation3 + $0x70] sm:$0xf]  ;;  %v3927_v50 = vld [vmem:[#allocation3 + $0x74] sm:$0x1]  ;;  %v5547_v39 = vrot.slane %v3747_v20, 5  ;;  %v4183_v15 = vor.u32 %v4182_v51, %v4179_v21  ;;  %v4196_v36 = vshll.u32 %v3928_v7, 16  ;;  %v9737_v21 = vpop.f32.mrf.mxu1 }
 0x2c8   : > { %v4188_v6 = vrot.slane %v4186_v11, 5  ;;  %v4159_v55 = vor.u32 %v4158_v49, %v4155_v22  ;;  %v4162_v31 = vshll.u32 %v3745_v28, 16  ;;  %v4166_v56 = vshrl.u32 %v3745_v28, 16 }
 0x2c9   : > { %v4192_v5 = vrot.slane %v4190_v14, 4  ;;  %v9735_v9 = vcombine.low %v3744_v53, %v3745_v28  ;;  %v4172_v41 = vshll.u32 %v3927_v50, 16  ;;  %v5540_v42 = vrot.slane %v3745_v28, 5 }
 0x2ca   : > { %v4164_v18 = vrot.slane %v4162_v31, 5  ;;  %v4168_v2 = vrot.slane %v4166_v56, 4  ;;  %v5549_v58 = vrot.slane %v5547_v39, 4  ;;  %v4160_v61 = vrot.slane %v4159_v55, 4 }
 0x2cb   : > { %v4193_v52 = vor.u32 %v4192_v5, %v4188_v6  ;;  %v5550_v0 = vrot.slane %v3928_v7, 5  ;;  %v4184_v47 = vrot.slane %v4183_v15, 4  ;;  %v4198_v12 = vrot.slane %v4196_v36, 5  ;;  %v9759_v5 = vpop.f32.mrf.mxu1  ;;  %v7641_v15 = vld [vmem:[#allocation5 + $0xa0] sm:$0xff]  }
 0x2cc   : > { %v4169_v48 = vor.u32 %v4168_v2, %v4164_v18  ;;  %v5542_v20 = vrot.slane %v5540_v42, 4  ;;  %v5543_v22 = vrot.slane %v3927_v50, 5  ;;  %v4174_v49 = vrot.slane %v4172_v41, 5  ;;  %7474 = vmatprep.subr.bf16.mxu1 %v7641_v15 }
 0x2cd   : > { %v4194_v24 = vrot.slane %v4193_v52, 4  ;;  %v5548_v51 = vsel %vm8053_vm14, %v6709_v8, %v5547_v39  ;;  %v5551_v11 = vsel %vm8053_vm14, %v5549_v58, %v5550_v0  ;;  %v5541_v7 = vsel %vm8053_vm14, %v6708_v43, %v5540_v42  ;;  %7475 = vmatpush3.bf16.msra.mxu1 %v7641_v15  ;;  %v7642_v8 = vld [vmem:[#allocation5 + $0x98] sm:$0xff]   ;;  %v9779_v0 = vld [vmem:[%s10557_s2] ss:$0 sm:$0xff] }
 0x2ce   : > { %v4170_v53 = vrot.slane %v4169_v48, 4  ;;  %v5544_v46 = vsel %vm8053_vm14, %v5542_v20, %v5543_v22  ;;  %v9749_v28 = vcombine.low %v5548_v51, %v5551_v11  ;;  %v4165_v50 = vsel %vm7913_vm11, %v4160_v61, %v4164_v18  ;;  %v7644_v58 = vld [vmem:[#allocation5 + $0x38] sm:$0xff]   ;;  %v420_v61 = vld [vmem:[#allocation3 + $0xc0] sm:$0x1]  ;;  %7476 = vmatprep.subr.bf16.mxu1 %v7642_v8 }
 0x2cf   : > { %v4199_v14 = vsel %vm7913_vm11, %v4194_v24, %v4198_v12  ;;  %v9755_v55 = vcombine.low %v5541_v7, %v5544_v46  ;;  %v4189_v56 = vsel %vm7913_vm11, %v4184_v47, %v4188_v6  ;;  %v421_v48 = vsel %vm8705_vm15, 0, %v420_v61 }
 0x2d0   : > { %10714 = vst [vmem:[#allocation18_spill] sm:$0xff] %v9749_v28  ;;  %v4175_v39 = vsel %vm7913_vm11, %v4170_v53, %v4174_v49  ;;  %v9761_v26 = vcombine.low %v4189_v56, %v4199_v14  ;;  %422 = vst [vmem:[#allocation3 + $0xc0] sm:$0x1] %v421_v48 }
 0x2d1   : > { %10715 = vst [vmem:[#allocation19_spill] sm:$0xff] %v9755_v55  ;;  %v6642_v31 = vcombine.low %v4165_v50, %v4175_v39  ;;  %7477 = vmatpush3.bf16.msra.mxu1 %v7642_v8  ;;  %v417_v39 = vld [vmem:[#allocation3 + $0xb4] sm:$0x1]  ;;  %v3691_v8 = vld [vmem:[#allocation3 + $0x90] sm:$0xf] }
 0x2d2   : > { %v418_v56 = vsel %vm8705_vm15, 0, %v417_v39 }
 0x2d3   : > { %4729 = vmatprep.mubr.bf16.mxu1 %v6642_v31  ;;  %7449 = vmatmul.mubr.bf16.gmra.mxu0 %v6642_v31  ;;  %419 = vst [vmem:[#allocation3 + $0xb4] sm:$0x1] %v418_v56 }
 0x2d4   : > { %4730 = vmatmul.mubr.bf16.gmra.mxu1 %v9679_v38  ;;  %7452 = vmatprep.mubr.bf16.mxu0 %v9761_v26  ;;  %v7643_v38 = vld [vmem:[#allocation5 + $0x78] sm:$0xff]  }
 0x2d5   : > { %v7002_v36 = vpop.f32.mrf.mxu1  ;;  %4737 = vmatprep.mubr.bf16.mxu1 %v9761_v26  ;;  %7110 = vmatprep.subr.bf16.mxu0 %v7643_v38 }
 0x2d6   : > { %7111 = vmatpush3.bf16.msra.mxu0 %v7644_v58 }
 0x2d7   : > { %v7003_v18 = vpop.f32.mrf.mxu1 }
 0x2d8   : > { %v9766_v2 = vadd.f32 %v7003_v18, %v7002_v36 }
 0x2d9   : > { %v9768_v6 = vpop.f32.mrf.mxu1 }
 0x2da   : > { %10716 = vst [vmem:[#allocation20_spill] sm:$0xff] %v9768_v6 }
 0x2db   : > { %v9770_v41 = vpop.f32.mrf.mxu1 }
 0x2dc   : > { %10717 = vst [vmem:[#allocation21_spill] sm:$0xff] %v9770_v41  ;;  %4738 = vmatmul.mubr.bf16.gmra.mxu1 %v6642_v31 }
 0x2dd   : > { %v7008_v52 = vpop.f32.mrf.mxu1 }
 0x2df   : > { %v7009_v43 = vpop.f32.mrf.mxu1 }
 0x2e0   : > { %v9772_v42 = vadd.f32 %v7009_v43, %v7008_v52  ;;  %v475_v43 = vld [vmem:[#allocation3 + $0xc8] sm:$0x1] }
 0x2e1   : > { %v476_v58 = vsel %vm8733_vm2, 0, %v475_v43 }
 0x2e2   : > { %477 = vst [vmem:[#allocation3 + $0xc8] sm:$0x1] %v476_v58  ;;  %v3688_v58 = vld [vmem:[#allocation3 + $0x8c] sm:$0x1] }
 0x2ec   : > { %v7410_v24 = vpop.f32.mrf.mxu0 }
 0x2ed   : > { %v3125_v47 = vadd.f32 %v9779_v0, %v7410_v24 }
 0x2ee   : > { %v3116_v12 = vpop.f32.mrf.mxu0 }
 0x2ef   : > { %v3185_v20 = vmax.f32 %v3125_v47, 0.0  ;;  %v3117_v22 = vadd.f32 %v9779_v0, %v3116_v12  ;;  %v3684_v12 = vld [vmem:[#allocation3 + $0x84] sm:$0xf] }
 0x2f0   : > { %v7411_v53 = vpop.f32.mrf.mxu0 }
 0x2f1   : > { %v6818_v49 = vpack.c.bf16 %v3185_v20, %v3185_v20  ;;  %v3183_v51 = vmax.f32 %v3117_v22, 0.0  ;;  %v3128_v11 = vadd.f32 %v9779_v0, %v7411_v53  ;;  %v472_v22 = vld [vmem:[#allocation3 + $0xbc] sm:$0x1] }
 0x2f2   : > { %v3119_v14 = vpop.f32.mrf.mxu0  ;;  %v473_v39 = vsel %vm8733_vm2, 0, %v472_v22  ;;  %v7647_v22 = vld [vmem:[#allocation5 + $0x90] sm:$0xff]  }
 0x2f3   : > { %v3479_v7 = vshrl.u32 %v6818_v49, 16  ;;  %v6816_v46 = vpack.c.bf16 %v3183_v51, %v3183_v51  ;;  %v3186_v50 = vmax.f32 %v3128_v11, 0.0  ;;  %v3120_v31 = vadd.f32 %v9779_v0, %v3119_v14  ;;  %v3695_v14 = vld [vmem:[#allocation3 + $0x98] sm:$0x1]  ;;  %474 = vst [vmem:[#allocation3 + $0xbc] sm:$0x1] %v473_v39  ;;  %7478 = vmatprep.subr.bf16.mxu1 %v7647_v22 }
 0x2f4   : > { %v3482_v36 = vshll.u32 %v6818_v49, 16  ;;  %7479 = vmatpush3.bf16.msra.mxu1 %v7647_v22 }
 0x2f5   : > { %v3481_v15 = vrot.slane %v3479_v7, 7  ;;  %v3462_v18 = vshrl.u32 %v6816_v46, 16  ;;  %v6819_v52 = vpack.c.bf16 %v3186_v50, %v3186_v50  ;;  %v3184_v38 = vmax.f32 %v3120_v31, 0.0  ;;  %v7645_v50 = vld [vmem:[#allocation5 + $0x70] sm:$0xff]  }
 0x2f6   : > { %v3465_v24 = vshll.u32 %v6816_v46, 16  ;;  %7112 = vmatprep.subr.bf16.mxu0 %v7645_v50 }
 0x2f7   : > { %v3484_v61 = vor.u32 %v3482_v36, %v3481_v15  ;;  %v3464_v48 = vrot.slane %v3462_v18, 7  ;;  %v3487_v47 = vshrl.u32 %v6819_v52, 16  ;;  %v6817_v20 = vpack.c.bf16 %v3184_v38, %v3184_v38 }
 0x2f8   : > { %v3490_v11 = vshll.u32 %v6819_v52, 16  ;;  %v3485_v31 = vrot.slane %v3481_v15, 4 }
 0x2f9   : > { %v3692_v53 = vsel %vm9105_vm1, %v3484_v61, %v3691_v8  ;;  %v3467_v49 = vor.u32 %v3465_v24, %v3464_v48  ;;  %v3489_v51 = vrot.slane %v3487_v47, 7  ;;  %v3470_v7 = vshrl.u32 %v6817_v20, 16  ;;  %v7646_v8 = vld [vmem:[#allocation5 + $0x30] sm:$0xff]  }
 0x2fa   : > { %3693 = vst [vmem:[#allocation3 + $0x90] sm:$0xf] %v3692_v53  ;;  %v3473_v43 = vshll.u32 %v6817_v20, 16  ;;  %v3468_v61 = vrot.slane %v3464_v48, 4  ;;  %7113 = vmatpush3.bf16.msra.mxu0 %v7646_v8  ;;  %v7648_v53 = vld [vmem:[#allocation5 + $0x68] sm:$0xff]   ;;  %v7650_v48 = vld [vmem:[#allocation5 + $0x60] sm:$0xff]  }
 0x2fb   : > { %v3685_v46 = vsel %vm9105_vm1, %v3467_v49, %v3684_v12  ;;  %v3492_v56 = vor.u32 %v3490_v11, %v3489_v51  ;;  %v3494_v36 = vrot.slane %v3489_v51, 4  ;;  %v3472_v18 = vrot.slane %v3470_v7, 7  ;;  %v7649_v11 = vld [vmem:[#allocation5 + $0x28] sm:$0xff]   ;;  %7114 = vmatprep.subr.bf16.mxu0 %v7648_v53  ;;  %v7654_v53 = vld [vmem:[#allocation5 + $0x18] sm:$0xff]  }
 0x2fc   : > { %3686 = vst [vmem:[#allocation3 + $0x84] sm:$0xf] %v3685_v46  ;;  %v7652_v7 = vld [vmem:[#allocation5 + $0x88] sm:$0xff]  }
 0x2fd   : > { %v3493_v52 = vsel %vm7838_vm5, %v3485_v31, %v3492_v56  ;;  %v3696_v38 = vsel %vm8705_vm15, %v3494_v36, %v3695_v14  ;;  %v3475_v15 = vor.u32 %v3473_v43, %v3472_v18  ;;  %v3477_v24 = vrot.slane %v3472_v18, 4  ;;  %v7651_v31 = vld [vmem:[#allocation5 + $0x20] sm:$0xff]   ;;  %7480 = vmatprep.subr.bf16.mxu1 %v7652_v7  ;;  %v7653_v18 = vld [vmem:[#allocation5 + $0x58] sm:$0xff]  }
 0x2fe   : > { %3694 = vst [vmem:[#allocation3 + $0x94] sm:$0xf] %v3493_v52  ;;  %3697 = vst [vmem:[#allocation3 + $0x98] sm:$0x1] %v3696_v38  ;;  %7115 = vmatpush3.bf16.msra.mxu0 %v7649_v11  ;;  %7481 = vmatpush3.bf16.msra.mxu1 %v7652_v7 }
 0x2ff   : > { %v3476_v47 = vsel %vm7838_vm5, %v3468_v61, %v3475_v15  ;;  %v3689_v12 = vsel %vm8705_vm15, %v3477_v24, %v3688_v58  ;;  %7116 = vmatprep.subr.bf16.mxu0 %v7650_v48 }
 0x300   : > { %3687 = vst [vmem:[#allocation3 + $0x88] sm:$0xf] %v3476_v47  ;;  %3690 = vst [vmem:[#allocation3 + $0x8c] sm:$0x1] %v3689_v12 }
 0x301   : > { %v3750_v20 = vld [vmem:[#allocation3 + $0x90] sm:$0xf] }
 0x302   : > { %v4225_v49 = vshrl.u32 %v3750_v20, 16  ;;  %v4228_v51 = vshll.u32 %v3750_v20, 16  ;;  %7117 = vmatpush3.bf16.msra.mxu0 %v7651_v31  ;;  %v5433_v31 = vld [vmem:[#allocation3 + $0x90] sm:$0xe] }
 0x303   : > { %v3748_v14 = vld [vmem:[#allocation3 + $0x84] sm:$0xf]  ;;  %7118 = vmatprep.subr.bf16.mxu0 %v7653_v18  ;;  %v6711_v10 = vrot.slane %v5433_v31, 9 }
 0x304   : > { %v4201_v50 = vshrl.u32 %v3748_v14, 16  ;;  %v4204_v39 = vshll.u32 %v3748_v14, 16  ;;  %v4227_v56 = vrot.slane %v4225_v49, 4  ;;  %v4230_v36 = vrot.slane %v4228_v51, 5  ;;  %v5432_v15 = vld [vmem:[#allocation3 + $0x84] sm:$0xe] }
 0x305   : > { %v9803_v46 = vld [vmem:[#allocation3 + $0x94] sm:$0xf]  ;;  %v3930_v38 = vld [vmem:[#allocation3 + $0x98] sm:$0x1] }
 0x306   : > { %v4203_v43 = vrot.slane %v4201_v50, 4  ;;  %v4206_v8 = vrot.slane %v4204_v39, 5  ;;  %v4234_v52 = vshll.u32 %v9803_v46, 16  ;;  %v4238_v58 = vshrl.u32 %v9803_v46, 16  ;;  %v423_v50 = vld [vmem:[#allocation3 + $0xcc] sm:$0x1]  ;;  %7119 = vmatpush3.bf16.msra.mxu0 %v7654_v53  ;;  %v9817_v53 = vpop.f32.mrf.mxu1 }
 0x307   : > { %v9808_v61 = vcombine.low %v3750_v20, %v9803_v46  ;;  %v3749_v24 = vld [vmem:[#allocation3 + $0x88] sm:$0xf]  ;;  %v3929_v47 = vld [vmem:[#allocation3 + $0x8c] sm:$0x1]  ;;  %v4231_v11 = vor.u32 %v4230_v36, %v4227_v56  ;;  %v4244_v39 = vshll.u32 %v3930_v38, 16  ;;  %v424_v41 = vsel %vm8705_vm15, 0, %v423_v50 }
 0x308   : > { %v4207_v12 = vor.u32 %v4206_v8, %v4203_v43  ;;  %v4236_v22 = vrot.slane %v4234_v52, 5  ;;  %v4210_v49 = vshll.u32 %v3749_v24, 16  ;;  %v4214_v51 = vshrl.u32 %v3749_v24, 16  ;;  %v7655_v43 = vld [vmem:[#allocation5 + $0x50] sm:$0xff]   ;;  %425 = vst [vmem:[#allocation3 + $0xcc] sm:$0x1] %v424_v41 }
 0x309   : > { %v4240_v48 = vrot.slane %v4238_v58, 4  ;;  %v6710_v20 = vrot.slane %v5432_v15, 9  ;;  %v4220_v32 = vshll.u32 %v3929_v47, 16  ;;  %v7656_v8 = vld [vmem:[#allocation5 + $0x10] sm:$0xff]   ;;  %v478_v52 = vld [vmem:[#allocation3 + $0xd4] sm:$0x1]  ;;  %v9812_v56 = vcombine.low %v3748_v14, %v3749_v24  ;;  %7120 = vmatprep.subr.bf16.mxu0 %v7655_v43 }
 0x30a   : > { %v4212_v6 = vrot.slane %v4210_v49, 5  ;;  %v4216_v27 = vrot.slane %v4214_v51, 4  ;;  %v4208_v7 = vrot.slane %v4207_v12, 4  ;;  %v5554_v36 = vrot.slane %v3749_v24, 5  ;;  %7121 = vmatpush3.bf16.msra.mxu0 %v7656_v8 }
 0x30b   : > { %v4241_v28 = vor.u32 %v4240_v48, %v4236_v22  ;;  %v5561_v18 = vrot.slane %v9803_v46, 5  ;;  %v4232_v55 = vrot.slane %v4231_v11, 4  ;;  %v479_v15 = vsel %vm8733_vm2, 0, %v478_v52  ;;  %v7658_v52 = vld [vmem:[#allocation5 + $0x48] sm:$0xff]  }
 0x30c   : > { %v4217_v58 = vor.u32 %v4216_v27, %v4212_v6  ;;  %v4246_v49 = vrot.slane %v4244_v39, 5  ;;  %480 = vst [vmem:[#allocation3 + $0xd4] sm:$0x1] %v479_v15  ;;  %v5556_v41 = vrot.slane %v5554_v36, 4  ;;  %v5557_v51 = vrot.slane %v3929_v47, 5  ;;  %7122 = vmatprep.subr.bf16.mxu0 %v7658_v52 }
 0x30d   : > { %v4242_v50 = vrot.slane %v4241_v28, 4  ;;  %v5563_v12 = vrot.slane %v5561_v18, 4  ;;  %v4222_v14 = vrot.slane %v4220_v32, 5  ;;  %v5564_v24 = vrot.slane %v3930_v38, 5 }
 0x30e   : > { %v4218_v48 = vrot.slane %v4217_v58, 4  ;;  %v4213_v27 = vsel %vm7913_vm11, %v4208_v7, %v4212_v6  ;;  %v5555_v23 = vsel %vm8053_vm14, %v6710_v20, %v5554_v36  ;;  %v5558_v46 = vsel %vm8053_vm14, %v5556_v41, %v5557_v51  ;;  %v9839_v20 = vpop.f32.mrf.mxu1  ;;  %v7662_v41 = vld [vmem:[#allocation5 + $0x1f8] sm:$0xff]  }
 0x30f   : > { %v4247_v28 = vsel %vm7913_vm11, %v4242_v50, %v4246_v49  ;;  %v9829_v11 = vcombine.low %v5555_v23, %v5558_v46  ;;  %v5562_v32 = vsel %vm8053_vm14, %v6711_v10, %v5561_v18  ;;  %v5565_v6 = vsel %vm8053_vm14, %v5563_v12, %v5564_v24  ;;  %v7657_v10 = vld [vmem:[#allocation5 + $0x80] sm:$0xff]   ;;  %v9854_v51 = vld [vmem:[#allocation5 + $0x238] sm:$0xff]  }
 0x310   : > { %v4223_v47 = vsel %vm7913_vm11, %v4218_v48, %v4222_v14  ;;  %v4237_v39 = vsel %vm7913_vm11, %v4232_v55, %v4236_v22  ;;  %v9837_v43 = vcombine.low %v5562_v32, %v5565_v6  ;;  %7482 = vmatprep.subr.bf16.mxu1 %v7657_v10  ;;  %v7659_v22 = vld [vmem:[#allocation5 + $0x8] sm:$0xff]   ;;  %v7661_v49 = vld [vmem:[#allocation5] sm:$0xff]  }
 0x311   : > { %10718 = vst [vmem:[#allocation22_spill] sm:$0xff] %v9829_v11  ;;  %v6644_v38 = vcombine.low %v4213_v27, %v4223_v47  ;;  %v9841_v31 = vcombine.low %v4237_v39, %v4247_v28  ;;  %7483 = vmatpush3.bf16.msra.mxu1 %v7657_v10  ;;  %7123 = vmatpush3.bf16.msra.mxu0 %v7659_v22 }
 0x312   : > { %10719 = vst [vmem:[#allocation23_spill] sm:$0xff] %v9837_v43  ;;  %7246 = vmatprep.subr.bf16.mxu1 %v7662_v41 }
 0x313   : > { %4745 = vmatprep.mubr.bf16.mxu1 %v6644_v38  ;;  %7453 = vmatmul.mubr.bf16.gmra.mxu0 %v6644_v38 }
 0x314   : > { %4746 = vmatmul.mubr.bf16.gmra.mxu1 %v9761_v26  ;;  %7456 = vmatprep.mubr.bf16.mxu0 %v9841_v31  ;;  %v7660_v26 = vld [vmem:[#allocation5 + $0x40] sm:$0xff]  }
 0x315   : > { %v7014_v7 = vpop.f32.mrf.mxu1  ;;  %4753 = vmatprep.mubr.bf16.mxu1 %v9841_v31  ;;  %7124 = vmatprep.subr.bf16.mxu0 %v7660_v26 }
 0x316   : > { %7125 = vmatpush3.bf16.msra.mxu0 %v7661_v49 }
 0x317   : > { %v7015_v8 = vpop.f32.mrf.mxu1  ;;  %7516 = vmatprep.subr.bf16.mxu0 %v9854_v51 }
 0x318   : > { %v9846_v55 = vadd.f32 %v7015_v8, %v7014_v7 }
 0x319   : > { %v9848_v36 = vpop.f32.mrf.mxu1 }
 0x31a   : > { %10720 = vst [vmem:[#allocation24_spill] sm:$0xff] %v9848_v36 }
 0x31b   : > { %v9850_v18 = vpop.f32.mrf.mxu1 }
 0x31c   : > { %10721 = vst [vmem:[#allocation25_spill] sm:$0xff] %v9850_v18  ;;  %4754 = vmatmul.mubr.bf16.gmra.mxu1 %v6644_v38 }
 0x31d   : > { %v7020_v58 = vpop.f32.mrf.mxu1 }
 0x31f   : > { %v7021_v50 = vpop.f32.mrf.mxu1 }
 0x320   : > { %v9852_v15 = vadd.f32 %v7021_v50, %v7020_v58  ;;  %v3705_v58 = vld [vmem:[#allocation3 + $0xa8] sm:$0xf] }
 0x32c   : > { %v7414_v12 = vpop.f32.mrf.mxu0 }
 0x32d   : > { %v3141_v48 = vadd.f32 %v9779_v0, %v7414_v12 }
 0x32e   : > { %v3132_v14 = vpop.f32.mrf.mxu0 }
 0x32f   : > { %v3189_v24 = vmax.f32 %v3141_v48, 0.0  ;;  %v3133_v27 = vadd.f32 %v9779_v0, %v3132_v14  ;;  %v3698_v48 = vld [vmem:[#allocation3 + $0x9c] sm:$0xf] }
 0x330   : > { %v7415_v28 = vpop.f32.mrf.mxu0 }
 0x331   : > { %v6822_v23 = vpack.c.bf16 %v3189_v24, %v3189_v24  ;;  %v3187_v46 = vmax.f32 %v3133_v27, 0.0  ;;  %v3144_v47 = vadd.f32 %v9779_v0, %v7415_v28 }
 0x332   : > { %v3135_v32 = vpop.f32.mrf.mxu0 }
 0x333   : > { %v3513_v6 = vshrl.u32 %v6822_v23, 16  ;;  %v6820_v38 = vpack.c.bf16 %v3187_v46, %v3187_v46  ;;  %v3190_v39 = vmax.f32 %v3144_v47, 0.0  ;;  %v3136_v7 = vadd.f32 %v9779_v0, %v3135_v32  ;;  %v3709_v47 = vld [vmem:[#allocation3 + $0xb0] sm:$0x1] }
 0x334   : > { %v3516_v8 = vshll.u32 %v6822_v23, 16 }
 0x335   : > { %v3515_v10 = vrot.slane %v3513_v6, 7  ;;  %v3496_v52 = vshrl.u32 %v6820_v38, 16  ;;  %v6823_v22 = vpack.c.bf16 %v3190_v39, %v3190_v39  ;;  %v3188_v26 = vmax.f32 %v3136_v7, 0.0 }
 0x336   : > { %v3499_v41 = vshll.u32 %v6820_v38, 16 }
 0x337   : > { %v3518_v50 = vor.u32 %v3516_v8, %v3515_v10  ;;  %v3498_v49 = vrot.slane %v3496_v52, 7  ;;  %v3521_v12 = vshrl.u32 %v6823_v22, 16  ;;  %v6821_v14 = vpack.c.bf16 %v3188_v26, %v3188_v26  ;;  %v3702_v26 = vld [vmem:[#allocation3 + $0xa4] sm:$0x1] }
 0x338   : > { %v3524_v46 = vshll.u32 %v6823_v22, 16  ;;  %v3519_v23 = vrot.slane %v3515_v10, 4 }
 0x339   : > { %v3706_v24 = vsel %vm9105_vm1, %v3518_v50, %v3705_v58  ;;  %v3501_v27 = vor.u32 %v3499_v41, %v3498_v49  ;;  %v3523_v28 = vrot.slane %v3521_v12, 7  ;;  %v3504_v32 = vshrl.u32 %v6821_v14, 16 }
 0x33a   : > { %3707 = vst [vmem:[#allocation3 + $0xa8] sm:$0xf] %v3706_v24  ;;  %v3507_v8 = vshll.u32 %v6821_v14, 16  ;;  %v3502_v22 = vrot.slane %v3498_v49, 4 }
 0x33b   : > { %v3699_v6 = vsel %vm9105_vm1, %v3501_v27, %v3698_v48  ;;  %v3526_v39 = vor.u32 %v3524_v46, %v3523_v28  ;;  %v3528_v7 = vrot.slane %v3523_v28, 4  ;;  %v3506_v38 = vrot.slane %v3504_v32, 7 }
 0x33c   : > { %3700 = vst [vmem:[#allocation3 + $0x9c] sm:$0xf] %v3699_v6 }
 0x33d   : > { %v3527_v52 = vsel %vm7838_vm5, %v3519_v23, %v3526_v39  ;;  %v3710_v58 = vsel %vm8705_vm15, %v3528_v7, %v3709_v47  ;;  %v3509_v50 = vor.u32 %v3507_v8, %v3506_v38  ;;  %v3511_v10 = vrot.slane %v3506_v38, 4 }
 0x33e   : > { %3708 = vst [vmem:[#allocation3 + $0xac] sm:$0xf] %v3527_v52  ;;  %3711 = vst [vmem:[#allocation3 + $0xb0] sm:$0x1] %v3710_v58 }
 0x33f   : > { %v3510_v41 = vsel %vm7838_vm5, %v3502_v22, %v3509_v50  ;;  %v3703_v12 = vsel %vm8705_vm15, %v3511_v10, %v3702_v26 }
 0x340   : > { %3701 = vst [vmem:[#allocation3 + $0xa0] sm:$0xf] %v3510_v41  ;;  %3704 = vst [vmem:[#allocation3 + $0xa4] sm:$0x1] %v3703_v12 }
 0x341   : > { %v3754_v48 = vld [vmem:[#allocation3 + $0xa8] sm:$0xf] }
 0x342   : > { %v4273_v14 = vshrl.u32 %v3754_v48, 16  ;;  %v4276_v24 = vshll.u32 %v3754_v48, 16  ;;  %v5435_v52 = vld [vmem:[#allocation3 + $0xa8] sm:$0xe] }
 0x343   : > { %v3752_v27 = vld [vmem:[#allocation3 + $0x9c] sm:$0xf]  ;;  %v6713_v3 = vrot.slane %v5435_v52, 9 }
 0x344   : > { %v4249_v28 = vshrl.u32 %v3752_v27, 16  ;;  %v4252_v46 = vshll.u32 %v3752_v27, 16  ;;  %v4275_v49 = vrot.slane %v4273_v14, 4  ;;  %v4278_v6 = vrot.slane %v4276_v24, 5  ;;  %v5434_v36 = vld [vmem:[#allocation3 + $0x9c] sm:$0xe] }
 0x345   : > { %v3755_v47 = vld [vmem:[#allocation3 + $0xac] sm:$0xf]  ;;  %v3932_v7 = vld [vmem:[#allocation3 + $0xb0] sm:$0x1] }
 0x346   : > { %v4251_v32 = vrot.slane %v4249_v28, 4  ;;  %v4254_v23 = vrot.slane %v4252_v46, 5  ;;  %v4282_v39 = vshll.u32 %v3755_v47, 16  ;;  %v4286_v38 = vshrl.u32 %v3755_v47, 16 }
 0x347   : > { %v9873_v8 = vcombine.low %v3754_v48, %v3755_v47  ;;  %v3753_v58 = vld [vmem:[#allocation3 + $0xa0] sm:$0xf]  ;;  %v3931_v26 = vld [vmem:[#allocation3 + $0xa4] sm:$0x1]  ;;  %v5575_v50 = vrot.slane %v3755_v47, 5  ;;  %v4279_v43 = vor.u32 %v4278_v6, %v4275_v49  ;;  %v4292_v14 = vshll.u32 %v3932_v7, 16  ;;  %v9877_v49 = vpop.f32.mrf.mxu1 }
 0x348   : > { %v4284_v22 = vrot.slane %v4282_v39, 5  ;;  %v4255_v10 = vor.u32 %v4254_v23, %v4251_v32  ;;  %v4258_v41 = vshll.u32 %v3753_v58, 16  ;;  %v4262_v12 = vshrl.u32 %v3753_v58, 16 }
 0x349   : > { %v4288_v18 = vrot.slane %v4286_v38, 4  ;;  %v9875_v28 = vcombine.low %v3752_v27, %v3753_v58  ;;  %v4268_v11 = vshll.u32 %v3931_v26, 16  ;;  %v6712_v48 = vrot.slane %v5434_v36, 9 }
 0x34a   : > { %v4260_v24 = vrot.slane %v4258_v41, 5  ;;  %v4264_v46 = vrot.slane %v4262_v12, 4  ;;  %v5568_v63 = vrot.slane %v3753_v58, 5  ;;  %v5577_v33 = vrot.slane %v5575_v50, 4  ;;  %v9899_v58 = vpop.f32.mrf.mxu1 }
 0x34b   : > { %v4289_v40 = vor.u32 %v4288_v18, %v4284_v22  ;;  %v4256_v16 = vrot.slane %v4255_v10, 4  ;;  %v5578_v32 = vrot.slane %v3932_v7, 5  ;;  %v4280_v23 = vrot.slane %v4279_v43, 4 }
 0x34c   : > { %v4265_v39 = vor.u32 %v4264_v46, %v4260_v24  ;;  %v4294_v19 = vrot.slane %v4292_v14, 5  ;;  %v5570_v38 = vrot.slane %v5568_v63, 4  ;;  %v5571_v44 = vrot.slane %v3931_v26, 5 }
 0x34d   : > { %v4290_v47 = vrot.slane %v4289_v40, 4  ;;  %v4270_v6 = vrot.slane %v4268_v11, 5  ;;  %v5576_v41 = vsel %vm8053_vm14, %v6713_v3, %v5575_v50  ;;  %v5579_v36 = vsel %vm8053_vm14, %v5577_v33, %v5578_v32 }
 0x34e   : > { %v4266_v27 = vrot.slane %v4265_v39, 4  ;;  %v5569_v40 = vsel %vm8053_vm14, %v6712_v48, %v5568_v63  ;;  %v5572_v43 = vsel %vm8053_vm14, %v5570_v38, %v5571_v44  ;;  %v9889_v7 = vcombine.low %v5576_v41, %v5579_v36 }
 0x34f   : > { %v4295_v18 = vsel %vm7913_vm11, %v4290_v47, %v4294_v19  ;;  %v4261_v11 = vsel %vm7913_vm11, %v4256_v16, %v4260_v24  ;;  %v9895_v52 = vcombine.low %v5569_v40, %v5572_v43  ;;  %v4285_v19 = vsel %vm7913_vm11, %v4280_v23, %v4284_v22 }
 0x350   : > { %v4271_v3 = vsel %vm7913_vm11, %v4266_v27, %v4270_v6  ;;  %v9901_v63 = vcombine.low %v4285_v19, %v4295_v18  ;;  %v3719_v19 = vld [vmem:[#allocation3 + $0xc0] sm:$0xf] }
 0x351   : > { %v6646_v33 = vcombine.low %v4261_v11, %v4271_v3 }
 0x353   : > { %4761 = vmatprep.mubr.bf16.mxu1 %v6646_v33  ;;  %7457 = vmatmul.mubr.bf16.gmra.mxu0 %v6646_v33 }
 0x354   : > { %4762 = vmatmul.mubr.bf16.gmra.mxu1 %v9841_v31  ;;  %7460 = vmatprep.mubr.bf16.mxu0 %v9901_v63 }
 0x355   : > { %v7026_v44 = vpop.f32.mrf.mxu1  ;;  %4769 = vmatprep.mubr.bf16.mxu1 %v9901_v63 }
 0x357   : > { %v7027_v16 = vpop.f32.mrf.mxu1 }
 0x358   : > { %v9906_v26 = vadd.f32 %v7027_v16, %v7026_v44 }
 0x359   : > { %v9908_v50 = vpop.f32.mrf.mxu1 }
 0x35a   : > { %10722 = vst [vmem:[#allocation26_spill] sm:$0xff] %v9908_v50 }
 0x35b   : > { %v9910_v10 = vpop.f32.mrf.mxu1 }
 0x35c   : > { %10723 = vst [vmem:[#allocation27_spill] sm:$0xff] %v9910_v10  ;;  %4770 = vmatmul.mubr.bf16.gmra.mxu1 %v6646_v33 }
 0x35d   : > { %v7032_v22 = vpop.f32.mrf.mxu1 }
 0x35f   : > { %v7033_v12 = vpop.f32.mrf.mxu1 }
 0x360   : > { %v9912_v14 = vadd.f32 %v7033_v12, %v7032_v22 }
 0x36c   : > { %v7418_v24 = vpop.f32.mrf.mxu0 }
 0x36d   : > { %v3157_v46 = vadd.f32 %v9779_v0, %v7418_v24 }
 0x36e   : > { %v3148_v31 = vpop.f32.mrf.mxu0 }
 0x36f   : > { %v3193_v48 = vmax.f32 %v3157_v46, 0.0  ;;  %v3149_v39 = vadd.f32 %v9779_v0, %v3148_v31 }
 0x370   : > { %v7419_v47 = vpop.f32.mrf.mxu0 }
 0x371   : > { %v6826_v32 = vpack.c.bf16 %v3193_v48, %v3193_v48  ;;  %v3191_v23 = vmax.f32 %v3149_v39, 0.0  ;;  %v3160_v38 = vadd.f32 %v9779_v0, %v7419_v47  ;;  %v7001_v48 = vadd.f32 %v9759_v5, %v9737_v21  ;;  %v3712_v39 = vld [vmem:[#allocation3 + $0xb4] sm:$0xf]  ;;  %v9934_v5 = vld [vmem:[#allocation3 + $0xcc] sm:$0xf] }
 0x372   : > { %v3151_v27 = vpop.f32.mrf.mxu0 }
 0x373   : > { %v3547_v6 = vshrl.u32 %v6826_v32, 16  ;;  %v6824_v41 = vpack.c.bf16 %v3191_v23, %v3191_v23  ;;  %v3194_v36 = vmax.f32 %v3160_v38, 0.0  ;;  %v3152_v18 = vadd.f32 %v9779_v0, %v3151_v27 }
 0x374   : > { %v7438_v40 = vpop.f32.mrf.mxu0  ;;  %v3550_v11 = vshll.u32 %v6826_v32, 16 }
 0x375   : > { %v3549_v43 = vrot.slane %v3547_v6, 7  ;;  %v3530_v3 = vshrl.u32 %v6824_v41, 16  ;;  %v6827_v33 = vpack.c.bf16 %v3194_v36, %v3194_v36  ;;  %v3192_v44 = vmax.f32 %v3152_v18, 0.0  ;;  %v9928_v6 = vld [vmem:[#allocation3 + $0xd0] sm:$0xf] }
 0x376   : > { %v9919_v16 = vadd.f32 %v7438_v40, %v9696_v29  ;;  %v4828_v22 = vpop.f32.mrf.mxu0  ;;  %v3533_v46 = vshll.u32 %v6824_v41, 16  ;;  %v3723_v41 = vld [vmem:[#allocation3 + $0xc8] sm:$0x1] }
 0x377   : > { %v3552_v12 = vor.u32 %v3550_v11, %v3549_v43  ;;  %v3532_v24 = vrot.slane %v3530_v3, 7  ;;  %v3555_v31 = vshrl.u32 %v6827_v33, 16  ;;  %v6825_v0 = vpack.c.bf16 %v3192_v44, %v3192_v44 }
 0x378   : > { %10724 = vst [vmem:[#allocation28_spill] sm:$0xff] %v9919_v16  ;;  %v9924_v47 = vadd.f32 %v9685_v25, %v4828_v22  ;;  %v7439_v32 = vpop.f32.mrf.mxu0  ;;  %v3558_v27 = vshll.u32 %v6827_v33, 16  ;;  %v3553_v25 = vrot.slane %v3549_v43, 4  ;;  %v4354_v22 = vshll.u32 %v9928_v6, 16  ;;  %v3716_v43 = vld [vmem:[#allocation3 + $0xbc] sm:$0x1] }
 0x379   : > { %v3720_v23 = vsel %vm9105_vm1, %v3552_v12, %v3719_v19  ;;  %v3535_v38 = vor.u32 %v3533_v46, %v3532_v24  ;;  %v3557_v29 = vrot.slane %v3555_v31, 7  ;;  %v3538_v36 = vshrl.u32 %v6825_v0, 16 }
 0x37a   : > { %3721 = vst [vmem:[#allocation3 + $0xc0] sm:$0xf] %v3720_v23  ;;  %v9930_v18 = vadd.f32 %v7439_v32, %v7001_v48  ;;  %v9932_v21 = vpop.f32.mrf.mxu0  ;;  %v3541_v33 = vshll.u32 %v6825_v0, 16  ;;  %v4358_v12 = vshrl.u32 %v9928_v6, 16  ;;  %v4345_v48 = vshrl.u32 %v9934_v5, 16 }
 0x37b   : > { %10726 = vst [vmem:[#allocation30_spill] sm:$0xff] %v9932_v21  ;;  %v3713_v40 = vsel %vm9105_vm1, %v3535_v38, %v3712_v39  ;;  %v3560_v11 = vor.u32 %v3558_v27, %v3557_v29  ;;  %v3562_v3 = vrot.slane %v3557_v29, 4  ;;  %v3540_v19 = vrot.slane %v3538_v36, 7 }
 0x37c   : > { %10725 = vst [vmem:[#allocation29_spill] sm:$0xff] %v9930_v18  ;;  %3714 = vst [vmem:[#allocation3 + $0xb4] sm:$0xf] %v3713_v40  ;;  %v7442_v44 = vpop.f32.mrf.mxu0  ;;  %v3536_v39 = vrot.slane %v3532_v24, 4  ;;  %v4348_v38 = vshll.u32 %v9934_v5, 16  ;;  %v7013_v29 = vadd.f32 %v9839_v20, %v9817_v53  ;;  %v9958_v36 = vrot.slane %v4354_v22, 5 }
 0x37d   : > { %v3561_v46 = vsel %vm7838_vm5, %v3553_v25, %v3560_v11  ;;  %v3724_v31 = vsel %vm8705_vm15, %v3562_v3, %v3723_v41  ;;  %v9945_v59 = vadd.f32 %v7442_v44, %v9772_v42  ;;  %v3543_v0 = vor.u32 %v3541_v33, %v3540_v19  ;;  %v9964_v20 = vld [vmem:[#allocation3 + $0xd4] sm:$0x1] }
 0x37e   : > { %3722 = vst [vmem:[#allocation3 + $0xc4] sm:$0xf] %v3561_v46  ;;  %3725 = vst [vmem:[#allocation3 + $0xc8] sm:$0x1] %v3724_v31  ;;  %v3545_v32 = vrot.slane %v3540_v19, 4  ;;  %v4844_v23 = vpop.f32.mrf.mxu0  ;;  %v4360_v25 = vrot.slane %v4358_v12, 4 }
 0x37f   : > { %10727 = vst [vmem:[#allocation31_spill] sm:$0xff] %v9945_v59  ;;  %v9952_v27 = vadd.f32 %v9766_v2, %v4844_v23  ;;  %v3544_v42 = vsel %vm7838_vm5, %v3536_v39, %v3543_v0  ;;  %v4347_v17 = vrot.slane %v4345_v48, 4  ;;  %v4350_v19 = vrot.slane %v4348_v38, 5 }
 0x380   : > { %v3717_v41 = vsel %vm8705_vm15, %v3545_v32, %v3716_v43  ;;  %v7443_v24 = vpop.f32.mrf.mxu0  ;;  %3715 = vst [vmem:[#allocation3 + $0xb8] sm:$0xf] %v3544_v42  ;;  %v4361_v22 = vor.u32 %v4360_v25, %v9958_v36  ;;  %v4364_v0 = vshll.u32 %v9964_v20, 16  ;;  %v7025_v38 = vadd.f32 %v9899_v58, %v9877_v49 }
 0x381   : > { %10728 = vst [vmem:[#allocation32_spill] sm:$0xff] %v9952_v27  ;;  %3718 = vst [vmem:[#allocation3 + $0xbc] sm:$0x1] %v3717_v41  ;;  %v9960_v40 = vadd.f32 %v7443_v24, %v7013_v29  ;;  %v3758_v11 = vld [vmem:[#allocation3 + $0xc0] sm:$0xf]  ;;  %v4351_v48 = vor.u32 %v4350_v19, %v4347_v17 }
 0x382   : > { %v9962_v3 = vpop.f32.mrf.mxu0  ;;  %v4321_v53 = vshrl.u32 %v3758_v11, 16  ;;  %v4324_v2 = vshll.u32 %v3758_v11, 16 }
 0x383   : > { %10729 = vst [vmem:[#allocation33_spill] sm:$0xff] %v9960_v40  ;;  %10730 = vst [vmem:[#allocation34_spill] sm:$0xff] %v9962_v3  ;;  %v3756_v33 = vld [vmem:[#allocation3 + $0xb4] sm:$0xf] }
 0x384   : > { %v7446_v45 = vpop.f32.mrf.mxu0  ;;  %v4297_v44 = vshrl.u32 %v3756_v33, 16  ;;  %v4300_v46 = vshll.u32 %v3756_v33, 16  ;;  %v4323_v43 = vrot.slane %v4321_v53, 4  ;;  %v4326_v39 = vrot.slane %v4324_v2, 5 }
 0x385   : > { %v9968_v12 = vadd.f32 %v7446_v45, %v9852_v15  ;;  %v3759_v31 = vld [vmem:[#allocation3 + $0xc4] sm:$0xf]  ;;  %v3934_v24 = vld [vmem:[#allocation3 + $0xc8] sm:$0x1]  ;;  %v5437_v45 = vld [vmem:[#allocation3 + $0xc0] sm:$0xe] }
 0x386   : > { %v4860_v32 = vpop.f32.mrf.mxu0  ;;  %v4299_v23 = vrot.slane %v4297_v44, 4  ;;  %v4302_v29 = vrot.slane %v4300_v46, 5  ;;  %v4330_v42 = vshll.u32 %v3759_v31, 16  ;;  %v4334_v25 = vshrl.u32 %v3759_v31, 16 }
 0x387   : > { %10731 = vst [vmem:[#allocation35_spill] sm:$0xff] %v9968_v12  ;;  %v9974_v41 = vadd.f32 %v9846_v55, %v4860_v32  ;;  %v9976_v15 = vcombine.low %v3758_v11, %v3759_v31  ;;  %v3757_v2 = vld [vmem:[#allocation3 + $0xb8] sm:$0xf]  ;;  %v4362_v44 = vrot.slane %v4361_v22, 4  ;;  %v4327_v40 = vor.u32 %v4326_v39, %v4323_v43 }
 0x388   : > { %v7447_v53 = vpop.f32.mrf.mxu0  ;;  %v3933_v10 = vld [vmem:[#allocation3 + $0xbc] sm:$0x1]  ;;  %v4303_v50 = vor.u32 %v4302_v29, %v4299_v23  ;;  %v4332_v12 = vrot.slane %v4330_v42, 5  ;;  %v4306_v17 = vshll.u32 %v3757_v2, 16  ;;  %v4310_v19 = vshrl.u32 %v3757_v2, 16 }
 0x389   : > { %10732 = vst [vmem:[#allocation36_spill] sm:$0xff] %v9974_v41  ;;  %v9978_v46 = vadd.f32 %v7447_v53, %v7025_v38  ;;  %v4336_v49 = vrot.slane %v4334_v25, 4  ;;  %v4340_v58 = vshll.u32 %v3934_v24, 16  ;;  %v4352_v55 = vrot.slane %v4351_v48, 4  ;;  %v5436_v41 = vld [vmem:[#allocation3 + $0xb4] sm:$0xe]  ;;  %v7035_v48 = vpop.f32.mrf.mxu1 }
 0x38a   : > { %v4366_v32 = vrot.slane %v4364_v0, 5  ;;  %v4308_v59 = vrot.slane %v4306_v17, 5  ;;  %v4312_v11 = vrot.slane %v4310_v19, 4  ;;  %v4316_v3 = vshll.u32 %v3933_v10, 16 }
 0x38b   : > { %10733 = vst [vmem:[#allocation37_spill] sm:$0xff] %v9978_v46  ;;  %v6715_v27 = vrot.slane %v5437_v45, 9  ;;  %v4304_v18 = vrot.slane %v4303_v50, 4  ;;  %v4337_v16 = vor.u32 %v4336_v49, %v4332_v12  ;;  %v9980_v21 = vcombine.low %v3756_v33, %v3757_v2 }
 0x38c   : > { %v5582_v23 = vrot.slane %v3757_v2, 5  ;;  %v4313_v22 = vor.u32 %v4312_v11, %v4308_v59  ;;  %v4328_v29 = vrot.slane %v4327_v40, 4  ;;  %v6714_v42 = vrot.slane %v5436_v41, 9  ;;  %v7036_v2 = vpop.f32.mrf.mxu1 }
 0x38d   : > { %v5589_v38 = vrot.slane %v3759_v31, 5  ;;  %v4338_v53 = vrot.slane %v4337_v16, 4  ;;  %v4342_v43 = vrot.slane %v4340_v58, 5  ;;  %v5585_v25 = vrot.slane %v3933_v10, 5 }
 0x38e   : > { %v5584_v39 = vrot.slane %v5582_v23, 4  ;;  %v4314_v0 = vrot.slane %v4313_v22, 4  ;;  %v4318_v46 = vrot.slane %v4316_v3, 5  ;;  %v5592_v19 = vrot.slane %v3934_v24, 5 }
 0x38f   : > { %v5591_v17 = vrot.slane %v5589_v38, 4  ;;  %v4309_v50 = vsel %vm7913_vm11, %v4304_v18, %v4308_v59  ;;  %v4343_v33 = vsel %vm7913_vm11, %v4338_v53, %v4342_v43  ;;  %v5583_v40 = vsel %vm8053_vm14, %v6714_v42, %v5582_v23  ;;  %v9998_v59 = vpop.f32.mrf.mxu0 }
 0x390   : > { %v5586_v16 = vsel %vm8053_vm14, %v5584_v39, %v5585_v25  ;;  %v4319_v10 = vsel %vm7913_vm11, %v4314_v0, %v4318_v46  ;;  %v5590_v3 = vsel %vm8053_vm14, %v6715_v27, %v5589_v38  ;;  %v4333_v24 = vsel %vm7913_vm11, %v4328_v29, %v4332_v12  ;;  %v7663_v25 = vld [vmem:[#allocation5 + $0x1b8] sm:$0xff]   ;;  %v7669_v0 = vld [vmem:[#allocation5 + $0x230] sm:$0xff]  }
 0x391   : > { %v9992_v31 = vcombine.low %v5583_v40, %v5586_v16  ;;  %v5593_v18 = vsel %vm8053_vm14, %v5591_v17, %v5592_v19  ;;  %v6648_v41 = vcombine.low %v4309_v50, %v4319_v10  ;;  %v6649_v49 = vcombine.low %v4333_v24, %v4343_v33  ;;  %v7666_v17 = vld [vmem:[#allocation5 + $0x1b0] sm:$0xff]   ;;  %v7667_v19 = vld [vmem:[#allocation5 + $0x1e8] sm:$0xff]   ;;  %v7670_v40 = vld [vmem:[#allocation5 + $0x1e0] sm:$0xff]  }
 0x392   : > { %v10002_v45 = vcombine.low %v5590_v3, %v5593_v18  ;;  %v4357_v11 = vsel %vm7913_vm11, %v4352_v55, %v9958_v36  ;;  %v4367_v12 = vsel %vm7913_vm11, %v4362_v44, %v4366_v32  ;;  %v7037_v22 = vadd.f32 %v7036_v2, %v7035_v48  ;;  %v7697_v44 = vld [vmem:[#allocation3] sm:$0xf]  ;;  %v10028_v55 = vld [vmem:[#allocation3 + $0x4] sm:$0xf]  ;;  %v7665_v48 = vld [vmem:[#allocation5 + $0x1f0] sm:$0xff]  }
 0x393   : > { %4777 = vmatprep.mubr.bf16.mxu1 %v6648_v41  ;;  %v7450_v46 = vpop.f32.mrf.mxu0  ;;  %7461 = vmatmul.mubr.bf16.gmra.mxu0 %v6648_v41  ;;  %v6650_v53 = vcombine.low %v4357_v11, %v4367_v12  ;;  %v6615_v32 = vcombine.low %v7697_v44, %v10028_v55  ;;  %v7678_v50 = vld [vmem:[#allocation5 + $0x228] sm:$0xff]   ;;  %v7687_v16 = vld [vmem:[#allocation5 + $0x220] sm:$0xff]   ;;  %v7674_v10 = vld [vmem:[#allocation5 + $0x1d8] sm:$0xff]  }
 0x394   : > { %v10005_v58 = vadd.f32 %v7450_v46, %v9912_v14  ;;  %v7038_v27 = vpop.f32.mrf.mxu1  ;;  %4778 = vmatmul.mubr.bf16.gmra.mxu1 %v9901_v63  ;;  %7464 = vmatprep.mubr.bf16.mxu0 %v6649_v49  ;;  %v7668_v33 = vld [vmem:[#allocation5 + $0x1a8] sm:$0xff]   ;;  %v7691_v3 = vld [vmem:[#allocation5 + $0x218] sm:$0xff]   ;;  %v7681_v24 = vld [vmem:[#allocation5 + $0x190] sm:$0xff]  }
 0x395   : > { %4785 = vmatprep.mubr.bf16.mxu1 %v6649_v49  ;;  %v4876_v23 = vpop.f32.mrf.mxu0  ;;  %v7676_v18 = vld [vmem:[#allocation5 + $0x198] sm:$0xff]   ;;  %v7683_v2 = vld [vmem:[#allocation5 + $0x1c8] sm:$0xff]   ;;  %v7690_v11 = vld [vmem:[#allocation5 + $0x180] sm:$0xff]  }
 0x396   : > { %v10014_v29 = vadd.f32 %v9906_v26, %v4876_v23  ;;  %v7039_v42 = vpop.f32.mrf.mxu1  ;;  %v7693_v49 = vld [vmem:[#allocation5 + $0x208] sm:$0xff]  }
 0x397   : > { %v10016_v14 = vadd.f32 %v7039_v42, %v7038_v27  ;;  %v7451_v38 = vpop.f32.mrf.mxu0  ;;  %v7685_v46 = vld [vmem:[#allocation5 + $0x188] sm:$0xff]   ;;  %v7688_v27 = vld [vmem:[#allocation5 + $0x1c0] sm:$0xff]  }
 0x398   : > { %v10018_v63 = vadd.f32 %v7451_v38, %v7037_v22  ;;  %v10020_v43 = vpop.f32.mrf.mxu1  ;;  %v5477_v38 = vrot.slane %v10028_v55, 5  ;;  %v5421_v44 = vld [vmem:[#allocation3] sm:$0xe] }
 0x399   : > { %v10055_v12 = vpop.f32.mrf.mxu0 }
 0x39a   : > { %v10022_v39 = vpop.f32.mrf.mxu1 }
 0x39b   : > { %7465 = vmatmul.mubr.bf16.gmra.mxu0 %v6650_v53 }
 0x39c   : > { %v7044_v30 = vpop.f32.mrf.mxu1  ;;  %4786 = vmatmul.mubr.bf16.gmra.mxu1 %v6648_v41  ;;  %5131 = vmatprep.mubr.bf16.mxu0 %v9206_v35  ;;  %v7679_v41 = vld [vmem:[#allocation5 + $0x1d0] sm:$0xff]  }
 0x39d   : > { %7484 = vmatprep.mubr.bf16.mxu1 %v9192_v1 }
 0x39e   : > { %v7045_v26 = vpop.f32.mrf.mxu1 }
 0x39f   : > { %v10026_v36 = vadd.f32 %v7045_v26, %v7044_v30 }
 0x3a3   : > { %5132 = vmatmul.mubr.bf16.vlgmr.msra.gmra.mxu0 %v6615_v32 }
 0x3a4   : > { %5139 = vmatprep.mubr.bf16.mxu0 %v9192_v1  ;;  %7485 = vmatmul.mubr.bf16.vlgmr.msra.gmra.mxu1 %v9418_v13 }
 0x3a5   : > { %7247 = vmatpush3.bf16.msra.mxu1 %v7663_v25  ;;  %7488 = vmatprep.mubr.bf16.mxu1 %v9401_v54 }
 0x3a6   : > { %7517 = vmatpush3.bf16.msra.mxu0 %v9854_v51  ;;  %7248 = vmatprep.subr.bf16.mxu1 %v7665_v48  ;;  %v7672_v51 = vld [vmem:[#allocation5 + $0x1a0] sm:$0xff]  }
 0x3a7   : > { %7518 = vmatprep.subr.bf16.mxu0 %v7669_v0 }
 0x3a9   : > { %7249 = vmatpush3.bf16.msra.mxu1 %v7666_v17  ;;  %v7699_v17 = vld [vmem:[#allocation3 + $0x8] sm:$0x1] }
 0x3aa   : > { %7250 = vmatprep.subr.bf16.mxu1 %v7667_v19  ;;  %7519 = vmatpush3.bf16.msra.mxu0 %v7669_v0  ;;  %v6632_v0 = vcombine.low %v9934_v5, %v9928_v6  ;;  %v5480_v19 = vrot.slane %v7699_v17, 5  ;;  %v10745_v17 = vld [vmem:[#allocation23_spill] sm:$0xff] }
 0x3ab   : > { %5140 = vmatmul.mubr.bf16.gmra.mxu0 %v9206_v35  ;;  %7520 = vmatprep.subr.bf16.mxu0 %v7678_v50  ;;  %v7692_v35 = vld [vmem:[#allocation5 + $0x210] sm:$0xff]  }
 0x3ac   : > { %5147 = vmatprep.mubr.bf16.mxu0 %v9418_v13  ;;  %7489 = vmatmul.mubr.bf16.gmra.mxu1 %v9559_v62 }
 0x3ad   : > { %7492 = vmatprep.mubr.bf16.mxu1 %v9556_v60  ;;  %7251 = vmatpush3.bf16.msra.mxu1 %v7668_v33  ;;  %v5479_v33 = vrot.slane %v5477_v38, 4 }
 0x3ae   : > { %7252 = vmatprep.subr.bf16.mxu1 %v7670_v40  ;;  %7521 = vmatpush3.bf16.msra.mxu0 %v7678_v50  ;;  %v6699_v50 = vrot.slane %v5421_v44, 9 }
 0x3af   : > { %7522 = vmatprep.subr.bf16.mxu0 %v7687_v16  ;;  %v5481_v5 = vsel %vm8053_vm14, %v5479_v33, %v5480_v19  ;;  %v5596_v19 = vrot.slane %v9928_v6, 5 }
 0x3b1   : > { %7253 = vmatpush3.bf16.msra.mxu1 %v7672_v51 }
 0x3b2   : > { %7254 = vmatprep.subr.bf16.mxu1 %v7674_v10  ;;  %7523 = vmatpush3.bf16.msra.mxu0 %v7687_v16 }
 0x3b3   : > { %5148 = vmatmul.mubr.bf16.gmra.mxu0 %v9192_v1  ;;  %7524 = vmatprep.subr.bf16.mxu0 %v7691_v3  ;;  %v7694_v1 = vld [vmem:[#allocation5 + $0x200] sm:$0xff]  }
 0x3b4   : > { %5155 = vmatprep.mubr.bf16.mxu0 %v9401_v54  ;;  %7493 = vmatmul.mubr.bf16.gmra.mxu1 %v9649_v4 }
 0x3b5   : > { %7496 = vmatprep.mubr.bf16.mxu1 %v9646_v34  ;;  %7255 = vmatpush3.bf16.msra.mxu1 %v7676_v18  ;;  %v10736_v18 = vld [vmem:[#allocation11_spill] sm:$0xff] }
 0x3b6   : > { %7256 = vmatprep.subr.bf16.mxu1 %v7679_v41  ;;  %7525 = vmatpush3.bf16.msra.mxu0 %v7691_v3 }
 0x3b7   : > { %7526 = vmatprep.subr.bf16.mxu0 %v7692_v35 }
 0x3b9   : > { %7257 = vmatpush3.bf16.msra.mxu1 %v7681_v24 }
 0x3ba   : > { %7258 = vmatprep.subr.bf16.mxu1 %v7683_v2  ;;  %7527 = vmatpush3.bf16.msra.mxu0 %v7692_v35 }
 0x3bb   : > { %5156 = vmatmul.mubr.bf16.gmra.mxu0 %v9418_v13  ;;  %7528 = vmatprep.subr.bf16.mxu0 %v7693_v49  ;;  %v7047_v13 = vpop.f32.mrf.mxu1 }
 0x3bc   : > { %5163 = vmatprep.mubr.bf16.mxu0 %v9559_v62  ;;  %7497 = vmatmul.mubr.bf16.gmra.mxu1 %v9735_v9 }
 0x3bd   : > { %7500 = vmatprep.mubr.bf16.mxu1 %v9733_v37  ;;  %7259 = vmatpush3.bf16.msra.mxu1 %v7685_v46  ;;  %v7048_v23 = vpop.f32.mrf.mxu1 }
 0x3be   : > { %7260 = vmatprep.subr.bf16.mxu1 %v7688_v27  ;;  %7529 = vmatpush3.bf16.msra.mxu0 %v7693_v49  ;;  %v7049_v53 = vadd.f32 %v7048_v23, %v7047_v13 }
 0x3bf   : > { %7530 = vmatprep.subr.bf16.mxu0 %v7694_v1 }
 0x3c1   : > { %7261 = vmatpush3.bf16.msra.mxu1 %v7690_v11 }
 0x3c2   : > { %7531 = vmatpush3.bf16.msra.mxu0 %v7694_v1 }
 0x3c3   : > { %5164 = vmatmul.mubr.bf16.gmra.mxu0 %v9401_v54 }
 0x3c4   : > { %5171 = vmatprep.mubr.bf16.mxu0 %v9556_v60  ;;  %7501 = vmatmul.mubr.bf16.gmra.mxu1 %v9812_v56 }
 0x3c5   : > { %7504 = vmatprep.mubr.bf16.mxu1 %v9808_v61 }
 0x3cb   : > { %5172 = vmatmul.mubr.bf16.gmra.mxu0 %v9559_v62 }
 0x3cc   : > { %5179 = vmatprep.mubr.bf16.mxu0 %v9649_v4  ;;  %7505 = vmatmul.mubr.bf16.gmra.mxu1 %v9875_v28 }
 0x3cd   : > { %7508 = vmatprep.mubr.bf16.mxu1 %v9873_v8 }
 0x3d3   : > { %v7454_v22 = vpop.f32.mrf.mxu0  ;;  %5180 = vmatmul.mubr.bf16.gmra.mxu0 %v9556_v60 }
 0x3d4   : > { %v10059_v54 = vadd.f32 %v7454_v22, %v10026_v36  ;;  %v7050_v42 = vpop.f32.mrf.mxu1  ;;  %5187 = vmatprep.mubr.bf16.mxu0 %v9646_v34  ;;  %7509 = vmatmul.mubr.bf16.gmra.mxu1 %v9980_v21  ;;  %v7043_v36 = vadd.f32 %v10022_v39, %v10020_v43  ;;  %v10734_v43 = vld [vmem:[#allocation9_spill] sm:$0xff]  ;;  %v5478_v39 = vsel %vm8053_vm14, %v6699_v50, %v5477_v38  ;;  %v5599_v50 = vrot.slane %v9964_v20, 5 }
 0x3d5   : > { %v4892_v62 = vpop.f32.mrf.mxu0  ;;  %7512 = vmatprep.mubr.bf16.mxu1 %v9976_v15  ;;  %v6717_v3 = vcombine.low %v5478_v39, %v5481_v5 }
 0x3d6   : > { %v10066_v30 = vadd.f32 %v10016_v14, %v4892_v62  ;;  %v7051_v26 = vpop.f32.mrf.mxu1 }
 0x3d7   : > { %v7052_v60 = vadd.f32 %v7051_v26, %v7050_v42  ;;  %v7455_v32 = vpop.f32.mrf.mxu0  ;;  %v10742_v26 = vld [vmem:[#allocation19_spill] sm:$0xff] }
 0x3d8   : > { %v10070_v25 = vadd.f32 %v7455_v32, %v7049_v53  ;;  %v7053_v48 = vpop.f32.mrf.mxu1 }
 0x3d9   : > { %v4895_v55 = vpop.f32.mrf.mxu0 }
 0x3da   : > { %v10074_v14 = vadd.f32 %v7043_v36, %v4895_v55  ;;  %v7054_v40 = vpop.f32.mrf.mxu1  ;;  %v5438_v55 = vld [vmem:[#allocation3 + $0xcc] sm:$0xe] }
 0x3db   : > { %5188 = vmatmul.mubr.bf16.gmra.mxu0 %v9649_v4  ;;  %v10735_v4 = vld [vmem:[#allocation8_spill] sm:$0xff]  ;;  %v7055_v23 = vadd.f32 %v7054_v40, %v7053_v48  ;;  %v6716_v33 = vrot.slane %v5438_v55, 9  ;;  %v5598_v40 = vrot.slane %v5596_v19, 4 }
 0x3dc   : > { %v7056_v16 = vpop.f32.mrf.mxu1  ;;  %5195 = vmatprep.mubr.bf16.mxu0 %v9735_v9  ;;  %7513 = vmatmul.mubr.bf16.gmra.mxu1 %v6632_v0  ;;  %v10743_v0 = vld [vmem:[#allocation18_spill] sm:$0xff] }
 0x3dd   : > { %5898 = vmatprep.mubr.bf16.mxu1 %v10734_v43  ;;  %v5600_v6 = vsel %vm8053_vm14, %v5598_v40, %v5599_v50 }
 0x3de   : > { %v7057_v51 = vpop.f32.mrf.mxu1 }
 0x3df   : > { %v7058_v10 = vadd.f32 %v7057_v51, %v7056_v16 }
 0x3e0   : > { %v7059_v41 = vpop.f32.mrf.mxu1 }
 0x3e2   : > { %v7060_v35 = vpop.f32.mrf.mxu1 }
 0x3e3   : > { %5196 = vmatmul.mubr.bf16.gmra.mxu0 %v9646_v34  ;;  %v10737_v34 = vld [vmem:[#allocation10_spill] sm:$0xff]  ;;  %v7061_v46 = vadd.f32 %v7060_v35, %v7059_v41 }
 0x3e4   : > { %5203 = vmatprep.mubr.bf16.mxu0 %v9733_v37  ;;  %5899 = vmatmul.mubr.bf16.vlgmr.msra.gmra.mxu1 %v6717_v3 }
 0x3e5   : > { %5906 = vmatprep.mubr.bf16.mxu1 %v10735_v4 }
 0x3eb   : > { %5204 = vmatmul.mubr.bf16.gmra.mxu0 %v9735_v9  ;;  %v10738_v9 = vld [vmem:[#allocation13_spill] sm:$0xff] }
 0x3ec   : > { %5211 = vmatprep.mubr.bf16.mxu0 %v9812_v56  ;;  %5907 = vmatmul.mubr.bf16.gmra.mxu1 %v10734_v43 }
 0x3ed   : > { %5914 = vmatprep.mubr.bf16.mxu1 %v10736_v18 }
 0x3f3   : > { %5212 = vmatmul.mubr.bf16.gmra.mxu0 %v9733_v37  ;;  %v10739_v37 = vld [vmem:[#allocation12_spill] sm:$0xff] }
 0x3f4   : > { %5219 = vmatprep.mubr.bf16.mxu0 %v9808_v61  ;;  %5915 = vmatmul.mubr.bf16.gmra.mxu1 %v10735_v4 }
 0x3f5   : > { %5922 = vmatprep.mubr.bf16.mxu1 %v10737_v34 }
 0x3fb   : > { %5220 = vmatmul.mubr.bf16.gmra.mxu0 %v9812_v56  ;;  %v10740_v56 = vld [vmem:[#allocation15_spill] sm:$0xff] }
 0x3fc   : > { %5227 = vmatprep.mubr.bf16.mxu0 %v9875_v28  ;;  %5923 = vmatmul.mubr.bf16.gmra.mxu1 %v10736_v18 }
 0x3fd   : > { %5930 = vmatprep.mubr.bf16.mxu1 %v10738_v9 }
 0x403   : > { %5228 = vmatmul.mubr.bf16.gmra.mxu0 %v9808_v61 }
 0x404   : > { %5235 = vmatprep.mubr.bf16.mxu0 %v9873_v8  ;;  %5931 = vmatmul.mubr.bf16.gmra.mxu1 %v10737_v34 }
 0x405   : > { %5938 = vmatprep.mubr.bf16.mxu1 %v10739_v37 }
 0x40b   : > { %5236 = vmatmul.mubr.bf16.gmra.mxu0 %v9875_v28  ;;  %v10741_v28 = vld [vmem:[#allocation14_spill] sm:$0xff] }
 0x40c   : > { %5243 = vmatprep.mubr.bf16.mxu0 %v9980_v21  ;;  %5939 = vmatmul.mubr.bf16.gmra.mxu1 %v10738_v9 }
 0x40d   : > { %5946 = vmatprep.mubr.bf16.mxu1 %v10740_v56 }
 0x413   : > { %v7458_v24 = vpop.f32.mrf.mxu0  ;;  %5244 = vmatmul.mubr.bf16.gmra.mxu0 %v9873_v8 }
 0x414   : > { %v10107_v61 = vadd.f32 %v7458_v24, %v7058_v10  ;;  %v7062_v2 = vpop.f32.mrf.mxu1  ;;  %5251 = vmatprep.mubr.bf16.mxu0 %v9976_v15  ;;  %5947 = vmatmul.mubr.bf16.gmra.mxu1 %v10739_v37 }
 0x415   : > { %v4908_v49 = vpop.f32.mrf.mxu0  ;;  %5954 = vmatprep.mubr.bf16.mxu1 %v10741_v28 }
 0x416   : > { %v10112_v27 = vadd.f32 %v7052_v60, %v4908_v49  ;;  %v7063_v1 = vpop.f32.mrf.mxu1 }
 0x417   : > { %v7064_v11 = vadd.f32 %v7063_v1, %v7062_v2  ;;  %v7459_v13 = vpop.f32.mrf.mxu0 }
 0x418   : > { %v10114_v22 = vadd.f32 %v7459_v13, %v7061_v46  ;;  %v7065_v8 = vpop.f32.mrf.mxu1 }
 0x419   : > { %v4911_v42 = vpop.f32.mrf.mxu0 }
 0x41a   : > { %v10116_v62 = vadd.f32 %v7055_v23, %v4911_v42  ;;  %v7066_v38 = vpop.f32.mrf.mxu1 }
 0x41b   : > { %v7067_v15 = vadd.f32 %v7066_v38, %v7065_v8  ;;  %5252 = vmatmul.mubr.bf16.gmra.mxu0 %v9980_v21  ;;  %v10744_v21 = vld [vmem:[#allocation22_spill] sm:$0xff] }
 0x41c   : > { %v7068_v53 = vpop.f32.mrf.mxu1  ;;  %5955 = vmatmul.mubr.bf16.gmra.mxu1 %v10740_v56  ;;  %7532 = vmatprep.mubr.bf16.mxu0 %v10735_v4 }
 0x41d   : > { %5962 = vmatprep.mubr.bf16.mxu1 %v10742_v26 }
 0x41e   : > { %v7069_v44 = vpop.f32.mrf.mxu1 }
 0x41f   : > { %v7070_v60 = vadd.f32 %v7069_v44, %v7068_v53  ;;  %v10747_v53 = vld [vmem:[#allocation17_spill] sm:$0xff] }
 0x420   : > { %v7071_v32 = vpop.f32.mrf.mxu1 }
 0x422   : > { %v7072_v36 = vpop.f32.mrf.mxu1 }
 0x423   : > { %v7073_v48 = vadd.f32 %v7072_v36, %v7071_v32  ;;  %7533 = vmatmul.mubr.bf16.vlgmr.msra.gmra.mxu0 %v10736_v18 }
 0x424   : > { %5963 = vmatmul.mubr.bf16.gmra.mxu1 %v10741_v28  ;;  %7536 = vmatprep.mubr.bf16.mxu0 %v10737_v34 }
 0x425   : > { %5970 = vmatprep.mubr.bf16.mxu1 %v10743_v0 }
 0x42b   : > { %7537 = vmatmul.mubr.bf16.gmra.mxu0 %v10738_v9 }
 0x42c   : > { %5971 = vmatmul.mubr.bf16.gmra.mxu1 %v10742_v26  ;;  %7540 = vmatprep.mubr.bf16.mxu0 %v10739_v37 }
 0x42d   : > { %5978 = vmatprep.mubr.bf16.mxu1 %v10744_v21 }
 0x433   : > { %7541 = vmatmul.mubr.bf16.gmra.mxu0 %v10740_v56 }
 0x434   : > { %5979 = vmatmul.mubr.bf16.gmra.mxu1 %v10743_v0  ;;  %7544 = vmatprep.mubr.bf16.mxu0 %v10741_v28 }
 0x435   : > { %5986 = vmatprep.mubr.bf16.mxu1 %v10745_v17 }
 0x43b   : > { %7545 = vmatmul.mubr.bf16.gmra.mxu0 %v10742_v26 }
 0x43c   : > { %5987 = vmatmul.mubr.bf16.gmra.mxu1 %v10744_v21  ;;  %7548 = vmatprep.mubr.bf16.mxu0 %v10743_v0 }
 0x43d   : > { %5994 = vmatprep.mubr.bf16.mxu1 %v9895_v52 }
 0x443   : > { %7549 = vmatmul.mubr.bf16.gmra.mxu0 %v10744_v21  ;;  %v10748_v21 = vld [vmem:[#allocation30_spill] sm:$0xff] }
 0x444   : > { %5995 = vmatmul.mubr.bf16.gmra.mxu1 %v10745_v17  ;;  %7552 = vmatprep.mubr.bf16.mxu0 %v10745_v17 }
 0x445   : > { %6002 = vmatprep.mubr.bf16.mxu1 %v9889_v7 }
 0x44b   : > { %7553 = vmatmul.mubr.bf16.gmra.mxu0 %v9895_v52 }
 0x44c   : > { %6003 = vmatmul.mubr.bf16.gmra.mxu1 %v9895_v52  ;;  %7556 = vmatprep.mubr.bf16.mxu0 %v9889_v7  ;;  %v5597_v52 = vsel %vm8053_vm14, %v6716_v33, %v5596_v19 }
 0x44d   : > { %6010 = vmatprep.mubr.bf16.mxu1 %v9992_v31  ;;  %v6734_v4 = vcombine.low %v5597_v52, %v5600_v6 }
 0x453   : > { %v7462_v16 = vpop.f32.mrf.mxu0  ;;  %7557 = vmatmul.mubr.bf16.gmra.mxu0 %v9992_v31 }
 0x454   : > { %v10149_v43 = vadd.f32 %v7462_v16, %v7070_v60  ;;  %v7074_v39 = vpop.f32.mrf.mxu1  ;;  %6011 = vmatmul.mubr.bf16.gmra.mxu1 %v9889_v7  ;;  %7560 = vmatprep.mubr.bf16.mxu0 %v10002_v45 }
 0x455   : > { %v4924_v5 = vpop.f32.mrf.mxu0  ;;  %6018 = vmatprep.mubr.bf16.mxu1 %v10002_v45 }
 0x456   : > { %v10158_v20 = vadd.f32 %v7064_v11, %v4924_v5  ;;  %v7075_v51 = vpop.f32.mrf.mxu1 }
 0x457   : > { %v7076_v10 = vadd.f32 %v7075_v51, %v7074_v39  ;;  %v7463_v3 = vpop.f32.mrf.mxu0 }
 0x458   : > { %v10160_v18 = vadd.f32 %v7463_v3, %v7073_v48  ;;  %v7077_v7 = vpop.f32.mrf.mxu1 }
 0x459   : > { %v4927_v34 = vpop.f32.mrf.mxu0 }
 0x45a   : > { %v10162_v9 = vadd.f32 %v7067_v15, %v4927_v34  ;;  %v7078_v37 = vpop.f32.mrf.mxu1 }
 0x45b   : > { %v7079_v56 = vadd.f32 %v7078_v37, %v7077_v7  ;;  %v7466_v41 = vpop.f32.mrf.mxu0  ;;  %7561 = vmatmul.mubr.bf16.gmra.mxu0 %v6734_v4 }
 0x45c   : > { %v7080_v57 = vpop.f32.mrf.mxu1  ;;  %6019 = vmatmul.mubr.bf16.gmra.mxu1 %v9992_v31  ;;  %v10746_v31 = vld [vmem:[#allocation16_spill] sm:$0xff] }
 0x45d   : > { %v4940_v45 = vpop.f32.mrf.mxu0  ;;  %v6995_v26 = vadd.f32 %v10747_v53, %v10746_v31 }
 0x45e   : > { %v10165_v35 = vadd.f32 %v7076_v10, %v4940_v45  ;;  %v7081_v24 = vpop.f32.mrf.mxu1  ;;  %v10749_v10 = vld [vmem:[#allocation28_spill] sm:$0xff] }
 0x45f   : > { %v7082_v2 = vadd.f32 %v7081_v24, %v7080_v57  ;;  %v7467_v49 = vpop.f32.mrf.mxu0  ;;  %v4832_v17 = vadd.f32 %v6995_v26, %v10748_v21 }
 0x460   : > { %v7083_v28 = vpop.f32.mrf.mxu1 }
 0x461   : > { %v10167_v46 = vadd.f32 %v7466_v41, %v7082_v2  ;;  %v4943_v1 = vpop.f32.mrf.mxu0  ;;  %v10750_v41 = vld [vmem:[#allocation29_spill] sm:$0xff] }
 0x462   : > { %v10169_v11 = vadd.f32 %v7079_v56, %v4943_v1  ;;  %v7084_v13 = vpop.f32.mrf.mxu1 }
 0x463   : > { %v7085_v23 = vadd.f32 %v7084_v13, %v7083_v28  ;;  %v7126_v8 = vpop.f32.mrf.mxu0  ;;  %v10751_v13 = vld [vmem:[#allocation20_spill] sm:$0xff] }
 0x464   : > { %v7486_v42 = vpop.f32.mrf.mxu1 }
 0x465   : > { %v10171_v38 = vadd.f32 %v7467_v49, %v7085_v23  ;;  %v7127_v15 = vpop.f32.mrf.mxu0  ;;  %v10752_v23 = vld [vmem:[#allocation21_spill] sm:$0xff] }
 0x466   : > { %v7128_v44 = vadd.f32 %v7127_v15, %v7126_v8  ;;  %v5294_v60 = vpop.f32.mrf.mxu1  ;;  %v7007_v8 = vadd.f32 %v10752_v23, %v10751_v13  ;;  %v10753_v15 = vld [vmem:[#allocation32_spill] sm:$0xff] }
 0x467   : > { %v7129_v32 = vpop.f32.mrf.mxu0  ;;  %v10757_v23 = vld [vmem:[#allocation24_spill] sm:$0xff] }
 0x468   : > { %v5134_v36 = vadd.f32 %v7128_v44, %v9924_v47  ;;  %v7487_v48 = vpop.f32.mrf.mxu1  ;;  %v10754_v44 = vld [vmem:[#allocation34_spill] sm:$0xff] }
 0x469   : > { %v7130_v0 = vpop.f32.mrf.mxu0 }
 0x46a   : > { %v10177_v19 = vadd.f32 %v5294_v60, %v5134_v36  ;;  %v7131_v55 = vadd.f32 %v7130_v0, %v7129_v32  ;;  %v5297_v50 = vpop.f32.mrf.mxu1 }
 0x46b   : > { %v7132_v33 = vpop.f32.mrf.mxu0 }
 0x46c   : > { %v5137_v40 = vadd.f32 %v7131_v55, %v4832_v17  ;;  %v7490_v16 = vpop.f32.mrf.mxu1 }
 0x46d   : > { %v7133_v39 = vpop.f32.mrf.mxu0 }
 0x46e   : > { %v10179_v52 = vadd.f32 %v5297_v50, %v5137_v40  ;;  %v7134_v6 = vadd.f32 %v7133_v39, %v7132_v33  ;;  %v5310_v5 = vpop.f32.mrf.mxu1  ;;  %v10755_v39 = vld [vmem:[#allocation31_spill] sm:$0xff] }
 0x46f   : > { %v7135_v51 = vpop.f32.mrf.mxu0 }
 0x470   : > { %v5142_v3 = vadd.f32 %v7134_v6, %v10749_v10  ;;  %v7491_v47 = vpop.f32.mrf.mxu1 }
 0x471   : > { %v7136_v4 = vpop.f32.mrf.mxu0 }
 0x472   : > { %v7137_v7 = vadd.f32 %v7136_v4, %v7135_v51  ;;  %v5313_v34 = vpop.f32.mrf.mxu1  ;;  %v10182_v37 = vadd.f32 %v7486_v42, %v5142_v3  ;;  %v4848_v42 = vadd.f32 %v7007_v8, %v10754_v44  ;;  %v10758_v8 = vld [vmem:[#allocation25_spill] sm:$0xff] }
 0x473   : > { %v7138_v56 = vpop.f32.mrf.mxu0 }
 0x474   : > { %v5145_v57 = vadd.f32 %v7137_v7, %v10750_v41  ;;  %v7494_v45 = vpop.f32.mrf.mxu1 }
 0x475   : > { %v7139_v24 = vpop.f32.mrf.mxu0 }
 0x476   : > { %v7140_v2 = vadd.f32 %v7139_v24, %v7138_v56  ;;  %v5326_v49 = vpop.f32.mrf.mxu1  ;;  %v10185_v28 = vadd.f32 %v7487_v48, %v5145_v57  ;;  %v10756_v56 = vld [vmem:[#allocation33_spill] sm:$0xff] }
 0x477   : > { %v7141_v1 = vpop.f32.mrf.mxu0 }
 0x478   : > { %v5150_v31 = vadd.f32 %v7140_v2, %v10753_v15  ;;  %v7495_v53 = vpop.f32.mrf.mxu1  ;;  %v7019_v15 = vadd.f32 %v10758_v8, %v10757_v23  ;;  %v10761_v23 = vld [vmem:[#allocation37_spill] sm:$0xff] }
 0x479   : > { %v7142_v26 = vpop.f32.mrf.mxu0 }
 0x47a   : > { %v7143_v60 = vadd.f32 %v7142_v26, %v7141_v1  ;;  %v5329_v32 = vpop.f32.mrf.mxu1  ;;  %v10191_v36 = vadd.f32 %v5310_v5, %v5150_v31  ;;  %v10759_v31 = vld [vmem:[#allocation36_spill] sm:$0xff] }
 0x47b   : > { %v7144_v0 = vpop.f32.mrf.mxu0 }
 0x47c   : > { %v5153_v21 = vadd.f32 %v7143_v60, %v4848_v42  ;;  %v10193_v17 = vpop.f32.mrf.mxu1  ;;  %v4864_v42 = vadd.f32 %v7019_v15, %v9998_v59 }
 0x47d   : > { %v7145_v48 = vpop.f32.mrf.mxu0 }
 0x47e   : > { %v7146_v55 = vadd.f32 %v7145_v48, %v7144_v0  ;;  %v5342_v50 = vpop.f32.mrf.mxu1  ;;  %v10195_v33 = vadd.f32 %v5313_v34, %v5153_v21 }
 0x47f   : > { %v7147_v40 = vpop.f32.mrf.mxu0 }
 0x480   : > { %v5158_v6 = vadd.f32 %v7146_v55, %v10755_v39  ;;  %v10198_v51 = vpop.f32.mrf.mxu1 }
 0x481   : > { %v7148_v10 = vpop.f32.mrf.mxu0 }
 0x482   : > { %v7149_v3 = vadd.f32 %v7148_v10, %v7147_v40  ;;  %v5345_v4 = vpop.f32.mrf.mxu1  ;;  %v10200_v7 = vadd.f32 %v7490_v16, %v5158_v6 }
 0x483   : > { %v7150_v5 = vpop.f32.mrf.mxu0 }
 0x484   : > { %v5161_v41 = vadd.f32 %v7149_v3, %v10756_v56  ;;  %v10203_v57 = vpop.f32.mrf.mxu1 }
 0x485   : > { %v7151_v24 = vpop.f32.mrf.mxu0 }
 0x486   : > { %v7152_v2 = vadd.f32 %v7151_v24, %v7150_v5  ;;  %v10205_v1 = vpop.f32.mrf.mxu1  ;;  %v10207_v34 = vadd.f32 %v7491_v47, %v5161_v41  ;;  %v10760_v5 = vld [vmem:[#allocation35_spill] sm:$0xff] }
 0x487   : > { %v7153_v13 = vpop.f32.mrf.mxu0 }
 0x488   : > { %v5166_v26 = vadd.f32 %v7152_v2, %v10759_v31  ;;  %v10212_v44 = vpop.f32.mrf.mxu1 }
 0x489   : > { %v7154_v16 = vpop.f32.mrf.mxu0 }
 0x48a   : > { %v7155_v60 = vadd.f32 %v7154_v16, %v7153_v13  ;;  %v10215_v0 = vpop.f32.mrf.mxu1  ;;  %v10217_v21 = vadd.f32 %v5326_v49, %v5166_v26 }
 0x48b   : > { %v7156_v48 = vpop.f32.mrf.mxu0 }
 0x48c   : > { %v5169_v55 = vadd.f32 %v7155_v60, %v4864_v42  ;;  %v10219_v47 = vpop.f32.mrf.mxu1  ;;  %v10762_v60 = vld [vmem:[#allocation26_spill] sm:$0xff] }
 0x48d   : > { %v7157_v40 = vpop.f32.mrf.mxu0 }
 0x48e   : > { %v7158_v39 = vadd.f32 %v7157_v40, %v7156_v48  ;;  %v10221_v6 = vpop.f32.mrf.mxu1  ;;  %v10223_v10 = vadd.f32 %v5329_v32, %v5169_v55  ;;  %v10763_v48 = vld [vmem:[#allocation27_spill] sm:$0xff] }
 0x48f   : > { %v7159_v3 = vpop.f32.mrf.mxu0  ;;  %v7031_v55 = vadd.f32 %v10763_v48, %v10762_v60 }
 0x490   : > { %v5174_v56 = vadd.f32 %v7158_v39, %v10760_v5  ;;  %v10226_v41 = vpop.f32.mrf.mxu1 }
 0x491   : > { %v7160_v59 = vpop.f32.mrf.mxu0 }
 0x492   : > { %v7161_v24 = vadd.f32 %v7160_v59, %v7159_v3  ;;  %v10228_v2 = vpop.f32.mrf.mxu1  ;;  %v10230_v49 = vadd.f32 %v7494_v45, %v5174_v56  ;;  %v4880_v3 = vadd.f32 %v7031_v55, %v10055_v12 }
 0x493   : > { %v7162_v13 = vpop.f32.mrf.mxu0 }
 0x494   : > { %v5177_v8 = vadd.f32 %v7161_v24, %v10761_v23  ;;  %v10233_v15 = vpop.f32.mrf.mxu1 }
 0x495   : > { %v7163_v31 = vpop.f32.mrf.mxu0 }
 0x496   : > { %v7164_v26 = vadd.f32 %v7163_v31, %v7162_v13  ;;  %v10235_v32 = vpop.f32.mrf.mxu1  ;;  %v10237_v16 = vadd.f32 %v7495_v53, %v5177_v8 }
 0x497   : > { %v7165_v42 = vpop.f32.mrf.mxu0 }
 0x498   : > { %v5182_v40 = vadd.f32 %v7164_v26, %v10014_v29  ;;  %v10242_v39 = vpop.f32.mrf.mxu1 }
 0x499   : > { %v7166_v45 = vpop.f32.mrf.mxu0 }
 0x49a   : > { %v7167_v5 = vadd.f32 %v7166_v45, %v7165_v42  ;;  %v10245_v56 = vpop.f32.mrf.mxu1  ;;  %v10247_v59 = vadd.f32 %v5342_v50, %v5182_v40 }
 0x49b   : > { %v7168_v24 = vpop.f32.mrf.mxu0 }
 0x49c   : > { %v5185_v13 = vadd.f32 %v7167_v5, %v4880_v3  ;;  %v10249_v53 = vpop.f32.mrf.mxu1 }
 0x49d   : > { %10764 = vst [vmem:[#allocation9_spill] sm:$0xff] %v10249_v53  ;;  %v7169_v23 = vpop.f32.mrf.mxu0 }
 0x49e   : > { %v7170_v8 = vadd.f32 %v7169_v23, %v7168_v24  ;;  %v10251_v31 = vpop.f32.mrf.mxu1  ;;  %v10253_v60 = vadd.f32 %v5345_v4, %v5185_v13 }
 0x49f   : > { %v7171_v29 = vpop.f32.mrf.mxu0 }
 0x4a0   : > { %v5190_v26 = vadd.f32 %v7170_v8, %v10005_v58  ;;  %v10256_v48 = vpop.f32.mrf.mxu1 }
 0x4a1   : > { %10765 = vst [vmem:[#allocation8_spill] sm:$0xff] %v10256_v48  ;;  %v7172_v12 = vpop.f32.mrf.mxu0 }
 0x4a2   : > { %v7173_v42 = vadd.f32 %v7172_v12, %v7171_v29  ;;  %v10258_v55 = vpop.f32.mrf.mxu1  ;;  %v10261_v50 = vadd.f32 %v10193_v17, %v5190_v26 }
 0x4a3   : > { %v7174_v40 = vpop.f32.mrf.mxu0 }
 0x4a4   : > { %v5193_v45 = vadd.f32 %v7173_v42, %v10018_v63  ;;  %v7262_v3 = vpop.f32.mrf.mxu1 }
 0x4a5   : > { %v7175_v5 = vpop.f32.mrf.mxu0 }
 0x4a6   : > { %v7176_v24 = vadd.f32 %v7175_v5, %v7174_v40  ;;  %v7263_v4 = vpop.f32.mrf.mxu1  ;;  %v10265_v13 = vadd.f32 %v10198_v51, %v5193_v45 }
 0x4a7   : > { %v10267_v58 = vadd.f32 %v7263_v4, %v7262_v3  ;;  %v7177_v23 = vpop.f32.mrf.mxu0 }
 0x4a8   : > { %v5198_v8 = vadd.f32 %v7176_v24, %v10066_v30  ;;  %v10270_v29 = vpop.f32.mrf.mxu1 }
 0x4a9   : > { %v7178_v12 = vpop.f32.mrf.mxu0 }
 0x4aa   : > { %v7179_v17 = vadd.f32 %v7178_v12, %v7177_v23  ;;  %v10272_v26 = vpop.f32.mrf.mxu1  ;;  %v10275_v63 = vadd.f32 %v10205_v1, %v5198_v8 }
 0x4ab   : > { %v7180_v42 = vpop.f32.mrf.mxu0 }
 0x4ac   : > { %v5201_v40 = vadd.f32 %v7179_v17, %v10074_v14  ;;  %v10278_v5 = vpop.f32.mrf.mxu1 }
 0x4ad   : > { %v7181_v51 = vpop.f32.mrf.mxu0 }
 0x4ae   : > { %v7182_v45 = vadd.f32 %v7181_v51, %v7180_v42  ;;  %v10280_v3 = vpop.f32.mrf.mxu1  ;;  %v10283_v30 = vadd.f32 %v10215_v0, %v5201_v40 }
 0x4af   : > { %v7183_v24 = vpop.f32.mrf.mxu0 }
 0x4b0   : > { %10766 = vst [vmem:[#allocation11_spill] sm:$0xff] %v10283_v30  ;;  %v5206_v4 = vadd.f32 %v7182_v45, %v10059_v54  ;;  %v10286_v23 = vpop.f32.mrf.mxu1 }
 0x4b1   : > { %v7184_v12 = vpop.f32.mrf.mxu0 }
 0x4b2   : > { %v7185_v1 = vadd.f32 %v7184_v12, %v7183_v24  ;;  %v10288_v8 = vpop.f32.mrf.mxu1  ;;  %v10291_v14 = vadd.f32 %v10203_v57, %v5206_v4 }
 0x4b3   : > { %v7186_v17 = vpop.f32.mrf.mxu0 }
 0x4b4   : > { %v5209_v42 = vadd.f32 %v7185_v1, %v10070_v25  ;;  %v10294_v51 = vpop.f32.mrf.mxu1 }
 0x4b5   : > { %v7187_v48 = vpop.f32.mrf.mxu0 }
 0x4b6   : > { %v7188_v0 = vadd.f32 %v7187_v48, %v7186_v17  ;;  %v10296_v40 = vpop.f32.mrf.mxu1  ;;  %v10299_v54 = vadd.f32 %v10212_v44, %v5209_v42 }
 0x4b7   : > { %v7189_v45 = vpop.f32.mrf.mxu0 }
 0x4b8   : > { %10767 = vst [vmem:[#allocation10_spill] sm:$0xff] %v10299_v54  ;;  %v5214_v24 = vadd.f32 %v7188_v0, %v10112_v27  ;;  %v10302_v12 = vpop.f32.mrf.mxu1 }
 0x4b9   : > { %v7190_v53 = vpop.f32.mrf.mxu0 }
 0x4ba   : > { %v7191_v57 = vadd.f32 %v7190_v53, %v7189_v45  ;;  %v10304_v4 = vpop.f32.mrf.mxu1  ;;  %v10307_v25 = vadd.f32 %v10221_v6, %v5214_v24 }
 0x4bb   : > { %v7192_v1 = vpop.f32.mrf.mxu0 }
 0x4bc   : > { %10768 = vst [vmem:[#allocation13_spill] sm:$0xff] %v10307_v25  ;;  %v5217_v48 = vadd.f32 %v7191_v57, %v10116_v62  ;;  %v10310_v17 = vpop.f32.mrf.mxu1 }
 0x4bd   : > { %v7193_v30 = vpop.f32.mrf.mxu0 }
 0x4be   : > { %v7194_v44 = vadd.f32 %v7193_v30, %v7192_v1  ;;  %v10312_v42 = vpop.f32.mrf.mxu1  ;;  %v10315_v27 = vadd.f32 %v10228_v2, %v5217_v48 }
 0x4bf   : > { %v7195_v0 = vpop.f32.mrf.mxu0 }
 0x4c0   : > { %10769 = vst [vmem:[#allocation12_spill] sm:$0xff] %v10315_v27  ;;  %v5222_v53 = vadd.f32 %v7194_v44, %v10107_v61  ;;  %v10318_v45 = vpop.f32.mrf.mxu1 }
 0x4c1   : > { %v7196_v54 = vpop.f32.mrf.mxu0 }
 0x4c2   : > { %v7197_v6 = vadd.f32 %v7196_v54, %v7195_v0  ;;  %v10320_v24 = vpop.f32.mrf.mxu1  ;;  %v10323_v62 = vadd.f32 %v10219_v47, %v5222_v53 }
 0x4c3   : > { %v7198_v57 = vpop.f32.mrf.mxu0 }
 0x4c4   : > { %10770 = vst [vmem:[#allocation15_spill] sm:$0xff] %v10323_v62  ;;  %v5225_v30 = vadd.f32 %v7197_v6, %v10114_v22  ;;  %v10326_v1 = vpop.f32.mrf.mxu1 }
 0x4c5   : > { %v7199_v25 = vpop.f32.mrf.mxu0 }
 0x4c6   : > { %v7200_v2 = vadd.f32 %v7199_v25, %v7198_v57  ;;  %v10328_v48 = vpop.f32.mrf.mxu1  ;;  %v10331_v61 = vadd.f32 %v10226_v41, %v5225_v30 }
 0x4c7   : > { %v7201_v44 = vpop.f32.mrf.mxu0 }
 0x4c8   : > { %10771 = vst [vmem:[#allocation14_spill] sm:$0xff] %v10331_v61  ;;  %v5230_v54 = vadd.f32 %v7200_v2, %v10158_v20  ;;  %v10334_v0 = vpop.f32.mrf.mxu1 }
 0x4c9   : > { %v7202_v27 = vpop.f32.mrf.mxu0 }
 0x4ca   : > { %v7203_v47 = vadd.f32 %v7202_v27, %v7201_v44  ;;  %v10336_v53 = vpop.f32.mrf.mxu1  ;;  %v10339_v22 = vadd.f32 %v10235_v32, %v5230_v54 }
 0x4cb   : > { %v7204_v6 = vpop.f32.mrf.mxu0 }
 0x4cc   : > { %10772 = vst [vmem:[#allocation19_spill] sm:$0xff] %v10339_v22  ;;  %v5233_v25 = vadd.f32 %v7203_v47, %v10162_v9  ;;  %v10342_v57 = vpop.f32.mrf.mxu1 }
 0x4cd   : > { %v7205_v62 = vpop.f32.mrf.mxu0 }
 0x4ce   : > { %v7206_v41 = vadd.f32 %v7205_v62, %v7204_v6  ;;  %v10344_v30 = vpop.f32.mrf.mxu1  ;;  %v10347_v20 = vadd.f32 %v10245_v56, %v5233_v25 }
 0x4cf   : > { %v7207_v2 = vpop.f32.mrf.mxu0 }
 0x4d0   : > { %10773 = vst [vmem:[#allocation18_spill] sm:$0xff] %v10347_v20  ;;  %v5238_v27 = vadd.f32 %v7206_v41, %v10149_v43  ;;  %v10350_v44 = vpop.f32.mrf.mxu1 }
 0x4d1   : > { %v7208_v61 = vpop.f32.mrf.mxu0 }
 0x4d2   : > { %v7209_v32 = vadd.f32 %v7208_v61, %v7207_v2  ;;  %v10352_v54 = vpop.f32.mrf.mxu1  ;;  %v10355_v9 = vadd.f32 %v10233_v15, %v5238_v27 }
 0x4d3   : > { %v7210_v47 = vpop.f32.mrf.mxu0 }
 0x4d4   : > { %10774 = vst [vmem:[#allocation22_spill] sm:$0xff] %v10355_v9  ;;  %v5241_v62 = vadd.f32 %v7209_v32, %v10160_v18  ;;  %v10358_v6 = vpop.f32.mrf.mxu1 }
 0x4d5   : > { %v7211_v22 = vpop.f32.mrf.mxu0 }
 0x4d6   : > { %v7212_v56 = vadd.f32 %v7211_v22, %v7210_v47  ;;  %v10360_v25 = vpop.f32.mrf.mxu1  ;;  %v10363_v43 = vadd.f32 %v10242_v39, %v5241_v62 }
 0x4d7   : > { %v7213_v41 = vpop.f32.mrf.mxu0 }
 0x4d8   : > { %v5246_v61 = vadd.f32 %v7212_v56, %v10165_v35  ;;  %v10366_v2 = vpop.f32.mrf.mxu1 }
 0x4d9   : > { %v7214_v20 = vpop.f32.mrf.mxu0 }
 0x4da   : > { %v7215_v15 = vadd.f32 %v7214_v20, %v7213_v41  ;;  %v10368_v27 = vpop.f32.mrf.mxu1  ;;  %v10371_v18 = vadd.f32 %v10251_v31, %v5246_v61  ;;  %v7270_v61 = vadd.f32 %v10280_v3, %v10278_v5  ;;  %v10404_v5 = vld [vmem:[%s10559_s4] ss:$0 sm:$0xff]  ;;  %v7267_v3 = vadd.f32 %v10272_v26, %v10270_v29 }
 0x4db   : > { %v7216_v32 = vpop.f32.mrf.mxu0  ;;  %v7276_v29 = vadd.f32 %v10296_v40, %v10294_v51  ;;  %v7279_v51 = vadd.f32 %v10304_v4, %v10302_v12  ;;  %v7285_v40 = vadd.f32 %v10320_v24, %v10318_v45  ;;  %v7294_v24 = vadd.f32 %v10344_v30, %v10342_v57 }
 0x4dc   : > { %10775 = vst [vmem:[#allocation23_spill] sm:$0xff] %v10371_v18  ;;  %v5249_v22 = vadd.f32 %v7215_v15, %v10169_v11  ;;  %v10374_v47 = vpop.f32.mrf.mxu1 }
 0x4dd   : > { %v7217_v9 = vpop.f32.mrf.mxu0 }
 0x4de   : > { %v7218_v39 = vadd.f32 %v7217_v9, %v7216_v32  ;;  %v10376_v62 = vpop.f32.mrf.mxu1  ;;  %v10379_v35 = vadd.f32 %v10258_v55, %v5249_v22 }
 0x4df   : > { %v7219_v56 = vpop.f32.mrf.mxu0 }
 0x4e0   : > { %10776 = vst [vmem:[#allocation16_spill] sm:$0xff] %v10379_v35  ;;  %v10382_v20 = vadd.f32 %v7218_v39, %v10167_v46  ;;  %v10384_v41 = vpop.f32.mrf.mxu1  ;;  %v7273_v46 = vadd.f32 %v10288_v8, %v10286_v23 }
 0x4e1   : > { %v7220_v31 = vpop.f32.mrf.mxu0 }
 0x4e2   : > { %10777 = vst [vmem:[#allocation17_spill] sm:$0xff] %v10382_v20  ;;  %v7221_v11 = vadd.f32 %v7220_v31, %v7219_v56  ;;  %v10388_v15 = vpop.f32.mrf.mxu1 }
 0x4e3   : > { %v7534_v18 = vpop.f32.mrf.mxu0 }
 0x4e4   : > { %v10391_v9 = vadd.f32 %v7221_v11, %v10171_v38  ;;  %v6070_v32 = vadd.f32 %v7534_v18, %v7270_v61  ;;  %v10393_v55 = vpop.f32.mrf.mxu1 }
 0x4e5   : > { %v6061_v22 = vpop.f32.mrf.mxu0 }
 0x4e6   : > { %v6190_v39 = vadd.f32 %v6070_v32, %v10182_v37  ;;  %v6062_v35 = vadd.f32 %v10267_v58, %v6061_v22  ;;  %v10399_v20 = vpop.f32.mrf.mxu1  ;;  %v7282_v37 = vadd.f32 %v10312_v42, %v10310_v17 }
 0x4e7   : > { %v7535_v38 = vpop.f32.mrf.mxu0 }
 0x4e8   : > { %v6188_v18 = vadd.f32 %v6062_v35, %v10177_v19  ;;  %v6073_v56 = vadd.f32 %v7535_v38, %v7273_v46  ;;  %v10409_v31 = vpop.f32.mrf.mxu1  ;;  %v6229_v58 = vadd.f32 %v10404_v5, %v6190_v39 }
 0x4e9   : > { %v6064_v23 = vpop.f32.mrf.mxu0 }
 0x4ea   : > { %v6191_v8 = vadd.f32 %v6073_v56, %v10185_v28  ;;  %v6065_v61 = vadd.f32 %v7267_v3, %v6064_v23  ;;  %v10415_v11 = vpop.f32.mrf.mxu1  ;;  %v6227_v19 = vadd.f32 %v10404_v5, %v6188_v18  ;;  %v6261_v46 = vmax.f32 %v6229_v58, 0.0 }
 0x4eb   : > { %v7538_v26 = vpop.f32.mrf.mxu0 }
 0x4ec   : > { %v6230_v35 = vadd.f32 %v10404_v5, %v6191_v8  ;;  %v6189_v32 = vadd.f32 %v6065_v61, %v10179_v52  ;;  %v6086_v22 = vadd.f32 %v7538_v26, %v7282_v37  ;;  %v10422_v17 = vpop.f32.mrf.mxu1  ;;  %v6259_v56 = vmax.f32 %v6227_v19, 0.0 }
 0x4ed   : > { %v6077_v42 = vpop.f32.mrf.mxu0 }
 0x4ee   : > { %v6262_v28 = vmax.f32 %v6230_v35, 0.0  ;;  %v6228_v39 = vadd.f32 %v10404_v5, %v6189_v32  ;;  %v6078_v38 = vadd.f32 %v7276_v29, %v6077_v42  ;;  %v10425_v3 = vpop.f32.mrf.mxu1  ;;  %v6194_v52 = vadd.f32 %v6086_v22, %v10200_v7 }
 0x4ef   : > { %v7539_v18 = vpop.f32.mrf.mxu0 }
 0x4f0   : > { %v6868_v23 = vpack.c.bf16 %v6262_v28, %v6261_v46  ;;  %v6260_v37 = vmax.f32 %v6228_v39, 0.0  ;;  %v6192_v58 = vadd.f32 %v6078_v38, %v10191_v36  ;;  %v10440_v12 = vpop.f32.mrf.mxu1  ;;  %v6089_v4 = vadd.f32 %v7539_v18, %v7285_v40 }
 0x4f1   : > { %v6080_v45 = vpop.f32.mrf.mxu0  ;;  %v6233_v7 = vadd.f32 %v10404_v5, %v6194_v52  ;;  %v7288_v36 = vadd.f32 %v10328_v48, %v10326_v1  ;;  %v7297_v46 = vadd.f32 %v10352_v54, %v10350_v44  ;;  %v7291_v44 = vadd.f32 %v10336_v53, %v10334_v0 }
 0x4f2   : > { %6940 = vst [vmem:[%s10436_s9 + $0x8] sm:$0xff] %v6868_v23   ;;  %v6863_v8 = vpack.c.bf16 %v6260_v37, %v6259_v56  ;;  %v6081_v61 = vadd.f32 %v7279_v51, %v6080_v45  ;;  %v10445_v29 = vpop.f32.mrf.mxu1  ;;  %v6195_v26 = vadd.f32 %v6089_v4, %v10207_v34  ;;  %v6231_v35 = vadd.f32 %v10404_v5, %v6192_v58 }
 0x4f3   : > { %v7542_v19 = vpop.f32.mrf.mxu0  ;;  %v6265_v48 = vmax.f32 %v6233_v7, 0.0  ;;  %v7306_v23 = vadd.f32 %v10376_v62, %v10374_v47  ;;  %v7300_v0 = vadd.f32 %v10360_v25, %v10358_v6  ;;  %v7309_v47 = vadd.f32 %v10388_v15, %v10384_v41 }
 0x4f4   : > { %6864 = vst [vmem:[%s10436_s9] sm:$0xff] %v6863_v8   ;;  %v6193_v32 = vadd.f32 %v6081_v61, %v10195_v33  ;;  %v6102_v22 = vadd.f32 %v7542_v19, %v7294_v24  ;;  %v10454_v57 = vpop.f32.mrf.mxu1  ;;  %v6234_v30 = vadd.f32 %v10404_v5, %v6195_v26  ;;  %v6263_v51 = vmax.f32 %v6231_v35, 0.0 }
 0x4f5   : > { %v6093_v42 = vpop.f32.mrf.mxu0 }
 0x4f6   : > { %v6232_v34 = vadd.f32 %v10404_v5, %v6193_v32  ;;  %v6198_v28 = vadd.f32 %v6102_v22, %v10230_v49  ;;  %v6094_v39 = vadd.f32 %v7288_v36, %v6093_v42  ;;  %v10461_v1 = vpop.f32.mrf.mxu1  ;;  %v6266_v38 = vmax.f32 %v6234_v30, 0.0 }
 0x4f7   : > { %v7543_v33 = vpop.f32.mrf.mxu0  ;;  %v7303_v22 = vadd.f32 %v10368_v27, %v10366_v2  ;;  %v7312_v2 = vadd.f32 %v10399_v20, %v10393_v55  ;;  %v7315_v20 = vadd.f32 %v10415_v11, %v10409_v31  ;;  %v7321_v55 = vadd.f32 %v10445_v29, %v10440_v12  ;;  %v10778_v12 = vld [vmem:[#allocation10_spill] sm:$0xff] }
 0x4f8   : > { %v6264_v40 = vmax.f32 %v6232_v34, 0.0  ;;  %v6105_v52 = vadd.f32 %v7543_v33, %v7297_v46  ;;  %v10463_v18 = vpop.f32.mrf.mxu1  ;;  %v6878_v54 = vpack.c.bf16 %v6266_v38, %v6265_v48  ;;  %v6196_v56 = vadd.f32 %v6094_v39, %v10217_v21 }
 0x4f9   : > { %v6096_v49 = vpop.f32.mrf.mxu0  ;;  %v6237_v58 = vadd.f32 %v10404_v5, %v6198_v28 }
 0x4fa   : > { %v6873_v37 = vpack.c.bf16 %v6264_v40, %v6263_v51  ;;  %v6199_v4 = vadd.f32 %v6105_v52, %v10237_v16  ;;  %v10472_v45 = vpop.f32.mrf.mxu1  ;;  %6942 = vst [vmem:[%s10436_s9 + $0x18] sm:$0xff] %v6878_v54   ;;  %v6097_v24 = vadd.f32 %v7291_v44, %v6096_v49  ;;  %v6235_v62 = vadd.f32 %v10404_v5, %v6196_v56 }
 0x4fb   : > { %v7546_v8 = vpop.f32.mrf.mxu0  ;;  %v6269_v26 = vmax.f32 %v6237_v58, 0.0 }
 0x4fc   : > { %6941 = vst [vmem:[%s10436_s9 + $0x10] sm:$0xff] %v6873_v37   ;;  %v6238_v21 = vadd.f32 %v10404_v5, %v6199_v4  ;;  %v6118_v53 = vadd.f32 %v7546_v8, %v7306_v23  ;;  %v7328_v61 = vpop.f32.mrf.mxu1  ;;  %v6197_v16 = vadd.f32 %v6097_v24, %v10223_v10  ;;  %v6267_v10 = vmax.f32 %v6235_v62, 0.0 }
 0x4fd   : > { %v6109_v7 = vpop.f32.mrf.mxu0 }
 0x4fe   : > { %v6270_v19 = vmax.f32 %v6238_v21, 0.0  ;;  %v6202_v36 = vadd.f32 %v6118_v53, %v10261_v50  ;;  %v6110_v35 = vadd.f32 %v7300_v0, %v6109_v7  ;;  %v7329_v6 = vpop.f32.mrf.mxu1  ;;  %v6236_v25 = vadd.f32 %v10404_v5, %v6197_v16 }
 0x4ff   : > { %v7547_v32 = vpop.f32.mrf.mxu0  ;;  %v7318_v50 = vadd.f32 %v10425_v3, %v10422_v17  ;;  %v7330_v53 = vadd.f32 %v7329_v6, %v7328_v61  ;;  %v7324_v16 = vadd.f32 %v10461_v1, %v10454_v57 }
 0x500   : > { %v6888_v30 = vpack.c.bf16 %v6270_v19, %v6269_v26  ;;  %v6200_v41 = vadd.f32 %v6110_v35, %v10247_v59  ;;  %v6121_v15 = vadd.f32 %v7547_v32, %v7309_v47  ;;  %v7331_v42 = vpop.f32.mrf.mxu1  ;;  %v6268_v46 = vmax.f32 %v6236_v25, 0.0  ;;  %v10780_v32 = vld [vmem:[#allocation15_spill] sm:$0xff] }
 0x501   : > { %v6112_v34 = vpop.f32.mrf.mxu0  ;;  %v6241_v28 = vadd.f32 %v10404_v5, %v6202_v36 }
 0x502   : > { %6944 = vst [vmem:[%s10436_s9 + $0x28] sm:$0xff] %v6888_v30   ;;  %v6203_v39 = vadd.f32 %v6121_v15, %v10265_v13  ;;  %v6113_v48 = vadd.f32 %v7303_v22, %v6112_v34  ;;  %v7332_v38 = vpop.f32.mrf.mxu1  ;;  %v6883_v59 = vpack.c.bf16 %v6268_v46, %v6267_v10  ;;  %v6239_v33 = vadd.f32 %v10404_v5, %v6200_v41 }
 0x503   : > { %v7550_v27 = vpop.f32.mrf.mxu0  ;;  %v6273_v44 = vmax.f32 %v6241_v28, 0.0  ;;  %v7333_v6 = vadd.f32 %v7332_v38, %v7331_v42  ;;  %v7327_v28 = vadd.f32 %v10472_v45, %v10463_v18 }
 0x504   : > { %v6242_v51 = vadd.f32 %v10404_v5, %v6203_v39  ;;  %v6201_v40 = vadd.f32 %v6113_v48, %v10253_v60  ;;  %v6134_v52 = vadd.f32 %v7550_v27, %v7318_v50  ;;  %v7334_v17 = vpop.f32.mrf.mxu1  ;;  %6943 = vst [vmem:[%s10436_s9 + $0x20] sm:$0xff] %v6883_v59   ;;  %v6271_v37 = vmax.f32 %v6239_v33, 0.0  ;;  %v10781_v48 = vld [vmem:[#allocation13_spill] sm:$0xff]  ;;  %v10782_v33 = vld [vmem:[#allocation14_spill] sm:$0xff] }
 0x505   : > { %v6125_v3 = vpop.f32.mrf.mxu0 }
 0x506   : > { %v6274_v54 = vmax.f32 %v6242_v51, 0.0  ;;  %v6240_v13 = vadd.f32 %v10404_v5, %v6201_v40  ;;  %v6126_v56 = vadd.f32 %v7312_v2, %v6125_v3  ;;  %v7335_v49 = vpop.f32.mrf.mxu1  ;;  %v6206_v23 = vadd.f32 %v6134_v52, %v10291_v14 }
 0x507   : > { %v7551_v60 = vpop.f32.mrf.mxu0 }
 0x508   : > { %v6898_v58 = vpack.c.bf16 %v6274_v54, %v6273_v44  ;;  %v6272_v4 = vmax.f32 %v6240_v13, 0.0  ;;  %v6204_v24 = vadd.f32 %v6126_v56, %v10275_v63  ;;  %v7337_v8 = vpop.f32.mrf.mxu1  ;;  %v6137_v0 = vadd.f32 %v7551_v60, %v7321_v55  ;;  %v10779_v63 = vld [vmem:[#allocation11_spill] sm:$0xff] }
 0x509   : > { %v6128_v21 = vpop.f32.mrf.mxu0  ;;  %v6245_v11 = vadd.f32 %v10404_v5, %v6206_v23  ;;  %v7336_v44 = vadd.f32 %v7335_v49, %v7334_v17 }
 0x50a   : > { %6946 = vst [vmem:[%s10436_s9 + $0x38] sm:$0xff] %v6898_v58   ;;  %v6893_v47 = vpack.c.bf16 %v6272_v4, %v6271_v37  ;;  %v6129_v62 = vadd.f32 %v7315_v20, %v6128_v21  ;;  %v7338_v31 = vpop.f32.mrf.mxu1  ;;  %v6207_v29 = vadd.f32 %v6137_v0, %v10778_v12  ;;  %v6243_v7 = vadd.f32 %v10404_v5, %v6204_v24  ;;  %v10783_v20 = vld [vmem:[#allocation12_spill] sm:$0xff]  ;;  %v10784_v58 = vld [vmem:[#allocation22_spill] sm:$0xff] }
 0x50b   : > { %v7554_v14 = vpop.f32.mrf.mxu0  ;;  %v6277_v15 = vmax.f32 %v6245_v11, 0.0  ;;  %v7339_v21 = vadd.f32 %v7338_v31, %v7337_v8 }
 0x50c   : > { %6945 = vst [vmem:[%s10436_s9 + $0x30] sm:$0xff] %v6893_v47   ;;  %v6205_v26 = vadd.f32 %v6129_v62, %v10779_v63  ;;  %v6150_v19 = vadd.f32 %v7554_v14, %v7330_v53  ;;  %v7340_v36 = vpop.f32.mrf.mxu1  ;;  %v6246_v61 = vadd.f32 %v10404_v5, %v6207_v29  ;;  %v6275_v10 = vmax.f32 %v6243_v7, 0.0  ;;  %v10785_v47 = vld [vmem:[#allocation19_spill] sm:$0xff] }
 0x50d   : > { %v6141_v35 = vpop.f32.mrf.mxu0 }
 0x50e   : > { %v6244_v25 = vadd.f32 %v10404_v5, %v6205_v26  ;;  %v6210_v22 = vadd.f32 %v6150_v19, %v10780_v32  ;;  %v6142_v30 = vadd.f32 %v7324_v16, %v6141_v35  ;;  %v7341_v41 = vpop.f32.mrf.mxu1  ;;  %v6278_v57 = vmax.f32 %v6246_v61, 0.0 }
 0x50f   : > { %v7555_v1 = vpop.f32.mrf.mxu0  ;;  %v7342_v27 = vadd.f32 %v7341_v41, %v7340_v36 }
 0x510   : > { %v6276_v46 = vmax.f32 %v6244_v25, 0.0  ;;  %v6153_v34 = vadd.f32 %v7555_v1, %v7333_v6  ;;  %v7343_v50 = vpop.f32.mrf.mxu1  ;;  %v6908_v39 = vpack.c.bf16 %v6278_v57, %v6277_v15  ;;  %v6249_v42 = vadd.f32 %v10404_v5, %v6210_v22  ;;  %v10786_v6 = vld [vmem:[#allocation18_spill] sm:$0xff] }
 0x511   : > { %v6208_v38 = vadd.f32 %v6142_v30, %v10781_v48  ;;  %v6144_v2 = vpop.f32.mrf.mxu0 }
 0x512   : > { %v6903_v59 = vpack.c.bf16 %v6276_v46, %v6275_v10  ;;  %v6211_v51 = vadd.f32 %v6153_v34, %v10782_v33  ;;  %v7344_v40 = vpop.f32.mrf.mxu1  ;;  %6948 = vst [vmem:[%s10436_s9 + $0x48] sm:$0xff] %v6908_v39   ;;  %v6145_v52 = vadd.f32 %v7327_v28, %v6144_v2  ;;  %v6281_v45 = vmax.f32 %v6249_v42, 0.0  ;;  %v10787_v39 = vld [vmem:[#allocation23_spill] sm:$0xff]  ;;  %v10789_v2 = vld [vmem:[#allocation9_spill] sm:$0xff] }
 0x513   : > { %v7558_v3 = vpop.f32.mrf.mxu0  ;;  %v6247_v56 = vadd.f32 %v10404_v5, %v6208_v38  ;;  %v7345_v37 = vadd.f32 %v7344_v40, %v7343_v50  ;;  %v10788_v38 = vld [vmem:[#allocation17_spill] sm:$0xff] }
 0x514   : > { %6947 = vst [vmem:[%s10436_s9 + $0x40] sm:$0xff] %v6903_v59   ;;  %v6250_v54 = vadd.f32 %v10404_v5, %v6211_v51  ;;  %v6166_v13 = vadd.f32 %v7558_v3, %v7342_v27  ;;  %v7346_v18 = vpop.f32.mrf.mxu1  ;;  %v6209_v55 = vadd.f32 %v6145_v52, %v10783_v20  ;;  %v5415_v59 = vadd.f32 %v10789_v2, %v10788_v38 }
 0x515   : > { %v6157_v23 = vpop.f32.mrf.mxu0  ;;  %v6279_v29 = vmax.f32 %v6247_v56, 0.0 }
 0x516   : > { %v6282_v60 = vmax.f32 %v6250_v54, 0.0  ;;  %v6214_v4 = vadd.f32 %v6166_v13, %v10784_v58  ;;  %v6158_v24 = vadd.f32 %v7336_v44, %v6157_v23  ;;  %v7347_v0 = vpop.f32.mrf.mxu1  ;;  %v6248_v17 = vadd.f32 %v10404_v5, %v6209_v55  ;;  %v10790_v13 = vld [vmem:[#allocation16_spill] sm:$0xff] }
 0x517   : > { %v7559_v49 = vpop.f32.mrf.mxu0  ;;  %v7348_v31 = vadd.f32 %v7347_v0, %v7346_v18 }
 0x518   : > { %v6918_v53 = vpack.c.bf16 %v6282_v60, %v6281_v45  ;;  %v6212_v62 = vadd.f32 %v6158_v24, %v10785_v47  ;;  %v6169_v11 = vadd.f32 %v7559_v49, %v7345_v37  ;;  %v7349_v12 = vpop.f32.mrf.mxu1  ;;  %v6280_v14 = vmax.f32 %v6248_v17, 0.0  ;;  %v10791_v45 = vld [vmem:[#allocation8_spill] sm:$0xff] }
 0x519   : > { %v6160_v16 = vpop.f32.mrf.mxu0  ;;  %v6253_v7 = vadd.f32 %v10404_v5, %v6214_v4  ;;  %v5418_v56 = vadd.f32 %v10791_v45, %v10391_v9 }
 0x51a   : > { %6950 = vst [vmem:[%s10436_s9 + $0x58] sm:$0xff] %v6918_v53   ;;  %v6215_v63 = vadd.f32 %v6169_v11, %v10363_v43  ;;  %v6161_v26 = vadd.f32 %v7339_v21, %v6160_v16  ;;  %v7350_v19 = vpop.f32.mrf.mxu1  ;;  %v6913_v36 = vpack.c.bf16 %v6280_v14, %v6279_v29  ;;  %v6251_v8 = vadd.f32 %v10404_v5, %v6212_v62 }
 0x51b   : > { %v7562_v61 = vpop.f32.mrf.mxu0  ;;  %v6285_v30 = vmax.f32 %v6253_v7, 0.0  ;;  %v7351_v1 = vadd.f32 %v7350_v19, %v7349_v12 }
 0x51c   : > { %v6254_v35 = vadd.f32 %v10404_v5, %v6215_v63  ;;  %v6213_v25 = vadd.f32 %v6161_v26, %v10786_v6  ;;  %v7352_v32 = vpop.f32.mrf.mxu1  ;;  %6949 = vst [vmem:[%s10436_s9 + $0x50] sm:$0xff] %v6913_v36   ;;  %v6283_v34 = vmax.f32 %v6251_v8, 0.0 }
 0x51d   : > { %v6173_v22 = vpop.f32.mrf.mxu0 }
 0x51e   : > { %v6286_v41 = vmax.f32 %v6254_v35, 0.0  ;;  %v6252_v15 = vadd.f32 %v10404_v5, %v6213_v25  ;;  %v6174_v43 = vadd.f32 %v7348_v31, %v6173_v22  ;;  %v7353_v57 = vpop.f32.mrf.mxu1 }
 0x51f   : > { %v7354_v10 = vadd.f32 %v7353_v57, %v7352_v32  ;;  %v7563_v46 = vpop.f32.mrf.mxu0 }
 0x520   : > { %v6928_v50 = vpack.c.bf16 %v6286_v41, %v6285_v30  ;;  %v6284_v28 = vmax.f32 %v6252_v15, 0.0  ;;  %v6216_v42 = vadd.f32 %v6174_v43, %v10787_v39  ;;  %v7355_v48 = vpop.f32.mrf.mxu1 }
 0x521   : > { %v6182_v27 = vadd.f32 %v7562_v61, %v7354_v10  ;;  %v6176_v33 = vpop.f32.mrf.mxu0 }
 0x522   : > { %6952 = vst [vmem:[%s10436_s9 + $0x68] sm:$0xff] %v6928_v50   ;;  %v6923_v51 = vpack.c.bf16 %v6284_v28, %v6283_v34  ;;  %v6177_v40 = vadd.f32 %v7351_v1, %v6176_v33  ;;  %v7356_v52 = vpop.f32.mrf.mxu1  ;;  %v6255_v54 = vadd.f32 %v10404_v5, %v6216_v42 }
 0x523   : > { %v6218_v3 = vadd.f32 %v6182_v27, %v5415_v59  ;;  %v7357_v44 = vadd.f32 %v7356_v52, %v7355_v48 }
 0x524   : > { %6951 = vst [vmem:[%s10436_s9 + $0x60] sm:$0xff] %v6923_v51   ;;  %v6217_v18 = vadd.f32 %v6177_v40, %v10790_v13  ;;  %v6287_v37 = vmax.f32 %v6255_v54, 0.0 }
 0x525   : > { %v6185_v20 = vadd.f32 %v7563_v46, %v7357_v44  ;;  %v6257_v23 = vadd.f32 %v10404_v5, %v6218_v3 }
 0x526   : > { %v6256_v55 = vadd.f32 %v10404_v5, %v6217_v18 }
 0x527   : > { %v6219_v60 = vadd.f32 %v6185_v20, %v5418_v56  ;;  %v6289_v0 = vmax.f32 %v6257_v23, 0.0 }
 0x528   : > { %v6288_v58 = vmax.f32 %v6256_v55, 0.0 }
 0x529   : > { %v6258_v4 = vadd.f32 %v10404_v5, %v6219_v60 }
 0x52a   : > { %v6933_v24 = vpack.c.bf16 %v6288_v58, %v6287_v37 }
 0x52b   : > { %v6290_v17 = vmax.f32 %v6258_v4, 0.0 }
 0x52c   : > { %6953 = vst [vmem:[%s10436_s9 + $0x70] sm:$0xff] %v6933_v24  }
 0x52d   : > { %v6938_v49 = vpack.c.bf16 %v6290_v17, %v6289_v0 }
 0x52f   : > { %6954 = vst [vmem:[%s10436_s9 + $0x78] sm:$0xff] %v6938_v49  }
 0x530 PF: > { %s16_s18 = sadd.s32 1, %s7736_s18  }
 0x531   : > { %p13_p1 = scmp.ge.s32.totalorder %s16_s18, 4  }
 0x533   :  { %15 = sbr.rel (!%p13_p1) target bundleno = 1 (0x1), region = 81 }
 0x538   :  { %6472 = vsyncpa [#allocation6], 1 }
 0x539   :  { %6474 = vsyncpa [#allocation6 + $0x1], 1 }

</bundles_post_ra>
